<compile_context>
chip_gen: v5e
topology: v5e:2x2
jax: 0.10.0
libtpu: 0.0.40
codegen_flags: <defaults>
</compile_context>

<pallas_src>
from functools import partial

import jax
import jax.numpy as jnp
from jax.experimental import pallas as pl
from jax.experimental.pallas import tpu as pltpu

_SUBLANE = 8          # sublane granularity for batch tiles
_MAX_TB = 1024        # batch-tile cap (narrow output -> per-step bytes tiny)
_FAST_PATH_ROWS = 256  # below this, fused XLA is as fast as a pallas launch
_MIN_SPLIT_ROWS = 1024  # keep grid >= 2 above this so v7x's 2 TCs both work


def _round_up(x, m):
    return (x + m - 1) // m * m


def _linear_policy_kernel(x_ref, w1_ref, b1_ref, w2_ref, b2_ref, o_ref):
    hp = jax.lax.Precision.HIGHEST
    # Hidden layer: Linear -> Tanh (MXU matmul, f32 accumulate; tanh on EUP).
    h = jnp.dot(x_ref[...], w1_ref[...],
                preferred_element_type=jnp.float32, precision=hp)
    h = jnp.tanh(h + b1_ref[...])                     # (TB, D) + (1, D)
    # Output layer: Linear -> Sigmoid, narrow (TB, A) store.
    z = jnp.dot(h, w2_ref[...],
                preferred_element_type=jnp.float32, precision=hp)
    o_ref[...] = jax.nn.sigmoid(z + b2_ref[...]).astype(o_ref.dtype)


def prepare_linear_policy_params(w1, b1, w2, b2):
    """One-time parameter prep (do NOT call per forward).

    w1: (D, D) PyTorch (out, in);  b1: (D,)
    w2: (A, D) PyTorch (out, in);  b2: (A,)
    Returns weights in (in, out) layout and biases as (1, out) rows.
    """
    return (jnp.transpose(w1), b1.reshape(1, -1),
            jnp.transpose(w2), b2.reshape(1, -1))


@partial(jax.jit, static_argnames=("action_num",))
def linear_policy_forward(x, w1_t, b1_r, w2_t, b2_r, *, action_num):
    """x: (B, D) f32. Params from prepare_linear_policy_params. Returns (B, A)."""
    B, D = x.shape
    A = w2_t.shape[1]
    assert A == action_num
    hp = jax.lax.Precision.HIGHEST

    # Small-batch fast path: pallas launch + pad/slice is pure overhead here.
    if B < _FAST_PATH_ROWS:
        h = jnp.tanh(jnp.dot(x, w1_t, precision=hp) + b1_r)
        return jax.nn.sigmoid(jnp.dot(h, w2_t, precision=hp) + b2_r)

    # Balanced batch tiling: TB multiple of 8, padding bounded to a few rows,
    # grid kept >= 2 for large batches (v7x megacore; no-op on v5e/v6e).
    B8 = _round_up(B, _SUBLANE)
    n_tiles = pl.cdiv(B8, _MAX_TB)
    if B8 >= _MIN_SPLIT_ROWS:
        n_tiles = max(n_tiles, 2)
    TB = _round_up(pl.cdiv(B8, n_tiles), _SUBLANE)
    B_pad = n_tiles * TB

    x_p = jnp.pad(x, ((0, B_pad - B), (0, 0))) if B_pad != B else x

    cost = pl.CostEstimate(
        flops=2 * B_pad * (D * D + D * A),
        transcendentals=B_pad * (D + A),
        bytes_accessed=4 * (B_pad * (D + A) + D * D + D * A + D + A),
    )

    out = pl.pallas_call(
        _linear_policy_kernel,
        out_shape=jax.ShapeDtypeStruct((B_pad, A), x.dtype),
        grid=(n_tiles,),
        in_specs=[
            # x tiles stream over the batch grid ...
            pl.BlockSpec((TB, D), lambda i: (i, 0)),
            # ... while weights/biases stay resident (constant block index).
            pl.BlockSpec((D, D), lambda i: (0, 0)),
            pl.BlockSpec((1, D), lambda i: (0, 0)),
            pl.BlockSpec((D, A), lambda i: (0, 0)),
            pl.BlockSpec((1, A), lambda i: (0, 0)),
        ],
        out_specs=pl.BlockSpec((TB, A), lambda i: (i, 0)),
        compiler_params=pltpu.CompilerParams(
            dimension_semantics=("parallel",),  # v7x: 2 TCs share the batch grid
        ),
        cost_estimate=cost,
    )(x_p, w1_t, b1_r, w2_t, b2_r)

    # Padded batch rows hold garbage (sigmoid of 0-row) -> slice them off.
    return out[:B] if B_pad != B else out


def init_linear_policy_params(key, input_dim, action_num, dtype=jnp.float32):
    """Deterministic init matching nn.Linear's default U(-1/sqrt(fan_in), .)."""
    k1, k2, k3, k4 = jax.random.split(key, 4)
    bound = 1.0 / (input_dim ** 0.5)
    w1 = jax.random.uniform(k1, (input_dim, input_dim), dtype, -bound, bound)
    b1 = jax.random.uniform(k2, (input_dim,), dtype, -bound, bound)
    w2 = jax.random.uniform(k3, (action_num, input_dim), dtype, -bound, bound)
    b2 = jax.random.uniform(k4, (action_num,), dtype, -bound, bound)
    return w1, b1, w2, b2


def _reference_forward(x, w1, b1, w2, b2):
    hp = jax.lax.Precision.HIGHEST
    h = jnp.tanh(jnp.dot(x, w1.T, precision=hp) + b1)
    return jax.nn.sigmoid(jnp.dot(h, w2.T, precision=hp) + b2)


if __name__ == "__main__":
    key = jax.random.PRNGKey(0)
    kx1, kx2, kp = jax.random.split(key, 3)

    input_dim = 32
    action_num = 4

    w1, b1, w2, b2 = init_linear_policy_params(kp, input_dim, action_num)
    # One-time prep (hoisted out of the forward path).
    w1_t, b1_r, w2_t, b2_r = prepare_linear_policy_params(w1, b1, w2, b2)

    # Case 1: larger batch -> Pallas path (balanced 2-step grid + ragged tail).
    batch_big = 1500
    x_big = jax.random.normal(kx1, (batch_big, input_dim), dtype=jnp.float32)
    out_big = jax.block_until_ready(
        linear_policy_forward(x_big, w1_t, b1_r, w2_t, b2_r,
                              action_num=action_num))
    ref_big = _reference_forward(x_big, w1, b1, w2, b2)
    assert out_big.shape == (batch_big, action_num)
    assert jnp.allclose(out_big, ref_big, atol=1e-5, rtol=1e-5), "pallas mismatch"

    # Case 2: tiny batch -> fused-XLA fast path.
    batch_small = 16
    x_small = jax.random.normal(kx2, (batch_small, input_dim), dtype=jnp.float32)
    out_small = jax.block_until_ready(
        linear_policy_forward(x_small, w1_t, b1_r, w2_t, b2_r,
                              action_num=action_num))
    ref_small = _reference_forward(x_small, w1, b1, w2, b2)
    assert out_small.shape == (batch_small, action_num)
    assert jnp.allclose(out_small, ref_small, atol=1e-5, rtol=1e-5), "fast-path mismatch"

    print("KERNEL_OK")
</pallas_src>

<mosaic_0001>
module attributes {stable_mosaic.version = 11 : i64} {
  func.func @_linear_policy_kernel(%arg0: i32, %arg1: memref<752x32xf32, #tpu.memory_space<vmem>>, %arg2: memref<32x32xf32, #tpu.memory_space<vmem>>, %arg3: memref<1x32xf32, #tpu.memory_space<vmem>>, %arg4: memref<32x4xf32, #tpu.memory_space<vmem>>, %arg5: memref<1x4xf32, #tpu.memory_space<vmem>>, %arg6: memref<752x4xf32, #tpu.memory_space<vmem>>) attributes {dimension_semantics = [#tpu.dimension_semantics<parallel>], iteration_bounds = array<i64: 2>, scalar_prefetch = 0 : i64, scratch_operands = 0 : i64, tpu.core_type = #tpu.core_type<tc>, window_params = [{transform_indices = @transform_0, window_bounds = array<i64: 752, 32>}, {pipeline_mode = #tpu.pipeline_mode<synchronous>, transform_indices = @transform_1, window_bounds = array<i64: 32, 32>}, {pipeline_mode = #tpu.pipeline_mode<synchronous>, transform_indices = @transform_2, window_bounds = array<i64: 1, 32>}, {pipeline_mode = #tpu.pipeline_mode<synchronous>, transform_indices = @transform_3, window_bounds = array<i64: 32, 4>}, {pipeline_mode = #tpu.pipeline_mode<synchronous>, transform_indices = @transform_4, window_bounds = array<i64: 1, 4>}, {transform_indices = @transform_5, window_bounds = array<i64: 752, 4>}]} {
    %c0 = arith.constant 0 : index
    %c0_0 = arith.constant 0 : index
    %0 = vector.load %arg1[%c0, %c0_0] : memref<752x32xf32, #tpu.memory_space<vmem>>, vector<752x32xf32>
    %c0_1 = arith.constant 0 : index
    %c0_2 = arith.constant 0 : index
    %1 = vector.load %arg2[%c0_1, %c0_2] : memref<32x32xf32, #tpu.memory_space<vmem>>, vector<32x32xf32>
    %cst = arith.constant dense<0.000000e+00> : vector<752x32xf32>
    %2 = tpu.matmul %0, %1, %cst {dimension_numbers = #tpu.dot_dimension_numbers<[1], [0], [0], [1], [0, 0, 1, 1], [], []>, precision = #tpu.contract_precision<fp32>} : vector<752x32xf32>, vector<32x32xf32>, vector<752x32xf32> -> vector<752x32xf32>
    %c0_3 = arith.constant 0 : index
    %c0_4 = arith.constant 0 : index
    %3 = vector.load %arg3[%c0_3, %c0_4] : memref<1x32xf32, #tpu.memory_space<vmem>>, vector<1x32xf32>
    %4 = vector.broadcast %3 : vector<1x32xf32> to vector<752x32xf32>
    %5 = arith.addf %2, %4 : vector<752x32xf32>
    %6 = math.tanh %5 : vector<752x32xf32>
    %c0_5 = arith.constant 0 : index
    %c0_6 = arith.constant 0 : index
    %7 = vector.load %arg4[%c0_5, %c0_6] : memref<32x4xf32, #tpu.memory_space<vmem>>, vector<32x4xf32>
    %cst_7 = arith.constant dense<0.000000e+00> : vector<752x4xf32>
    %8 = tpu.matmul %6, %7, %cst_7 {dimension_numbers = #tpu.dot_dimension_numbers<[1], [0], [0], [1], [0, 0, 1, 1], [], []>, precision = #tpu.contract_precision<fp32>} : vector<752x32xf32>, vector<32x4xf32>, vector<752x4xf32> -> vector<752x4xf32>
    %c0_8 = arith.constant 0 : index
    %c0_9 = arith.constant 0 : index
    %9 = vector.load %arg5[%c0_8, %c0_9] : memref<1x4xf32, #tpu.memory_space<vmem>>, vector<1x4xf32>
    %10 = vector.broadcast %9 : vector<1x4xf32> to vector<752x4xf32>
    %11 = arith.addf %8, %10 : vector<752x4xf32>
    %12 = arith.negf %11 : vector<752x4xf32>
    %13 = math.exp %12 : vector<752x4xf32>
    %cst_10 = arith.constant 1.000000e+00 : f32
    %14 = vector.broadcast %cst_10 : f32 to vector<752x4xf32>
    %15 = arith.addf %14, %13 : vector<752x4xf32>
    %16 = arith.divf %14, %15 : vector<752x4xf32>
    %c0_11 = arith.constant 0 : index
    %c0_12 = arith.constant 0 : index
    %17 = vector.load %arg6[%c0_11, %c0_12] : memref<752x4xf32, #tpu.memory_space<vmem>>, vector<752x4xf32>
    tpu.vector_store %arg6[%c0_11, %c0_12], %16 {strides = array<i32>} : memref<752x4xf32, #tpu.memory_space<vmem>>, vector<752x4xf32>,
    return
  }
  func.func @transform_0(%arg0: i32) -> (i32, i32) {
    %c0_i32 = arith.constant 0 : i32
    %c0_i32_0 = arith.constant 0 : i32
    return %arg0, %c0_i32 : i32, i32
  }
  func.func @transform_1(%arg0: i32) -> (i32, i32) {
    %c0_i32 = arith.constant 0 : i32
    %c0_i32_0 = arith.constant 0 : i32
    %c0_i32_1 = arith.constant 0 : i32
    return %c0_i32, %c0_i32_0 : i32, i32
  }
  func.func @transform_2(%arg0: i32) -> (i32, i32) {
    %c0_i32 = arith.constant 0 : i32
    %c0_i32_0 = arith.constant 0 : i32
    %c0_i32_1 = arith.constant 0 : i32
    return %c0_i32, %c0_i32_0 : i32, i32
  }
  func.func @transform_3(%arg0: i32) -> (i32, i32) {
    %c0_i32 = arith.constant 0 : i32
    %c0_i32_0 = arith.constant 0 : i32
    %c0_i32_1 = arith.constant 0 : i32
    return %c0_i32, %c0_i32_0 : i32, i32
  }
  func.func @transform_4(%arg0: i32) -> (i32, i32) {
    %c0_i32 = arith.constant 0 : i32
    %c0_i32_0 = arith.constant 0 : i32
    %c0_i32_1 = arith.constant 0 : i32
    return %c0_i32, %c0_i32_0 : i32, i32
  }
  func.func @transform_5(%arg0: i32) -> (i32, i32) {
    %c0_i32 = arith.constant 0 : i32
    %c0_i32_0 = arith.constant 0 : i32
    return %arg0, %c0_i32 : i32, i32
  }
}

</mosaic_0001>

<bundles_post_ra>
// kernel: linear_policy_forward.1
= control target key start
LH: loop header
LB: loop body
LE: loop exit
PB: predicated region body
PF: predicated region fallthrough
CT: control target
= control target key end

     0   :  { %s9792_s18 = smov 0   ;;  %s14057_s0 = inlined_call_operand.vmem [shape: f32[1504,32], index: 0, kind: input, shape index: {}]   ;;  %s14058_s1 = inlined_call_operand.vmem [shape: f32[32,32], index: 1, kind: input, shape index: {}]   ;;  %s14059_s2 = inlined_call_operand.vmem [shape: f32[1,32], index: 2, kind: input, shape index: {}]   ;;  %s14060_s3 = inlined_call_operand.vmem [shape: f32[32,4], index: 3, kind: input, shape index: {}]   ;;  %s14061_s4 = inlined_call_operand.vmem [shape: f32[1,4], index: 4, kind: input, shape index: {}]   ;;  %s14062_s5 = inlined_call_operand.vmem [shape: f32[1504,4], index: 5, kind: output, shape index: {}]  }
   0x1 LB: > { %s9070_s19 = sadd.s32 4294967295, %s9760_s18   ;;  %p9074_p0 = scmp.ge.s32.totalorder %s9760_s18, 1  ;;  %s9760_s18 = sphi %s9792_s18, %s15_s18  }
   0x2   : > { %p188_p1 = scmp.lt.s32.totalorder %s9760_s18, 3 }
   0x4   : > { %p189_p2 = pnand %p9074_p0, %p188_p1 }
   0x6   : > { %192 = sbr.rel (%p189_p2) target bundleno = 2591 (0xa1f), region = 40 }
   0xb   : > { %v325_v0 = vld [vmem:[%s14058_s1 + $0x18] sm:$0xff]  ;;  %v324_v1 = vld [vmem:[%s14058_s1 + $0x10] sm:$0xff]  ;;  %v323_v2 = vld [vmem:[%s14058_s1 + $0x8] sm:$0xff]  ;;  %s216_s26 = smul.u32 94, %s9070_s19  ;;  %vm330_vm0 = vcmask 261120   ;;  %vm8919_vm4 = vcmask 31744  }
   0xc   : > { %v9809_v3 = vand.u32 4294901760, %v325_v0  ;;  %v9811_v4 = vand.u32 4294901760, %v324_v1  ;;  %v9813_v5 = vand.u32 4294901760, %v323_v2  ;;  %v322_v6 = vld [vmem:[%s14058_s1] sm:$0xff] }
   0xd   : > { %v9818_v7 = vand.u32 4294901760, %v322_v6  ;;  %p217_p3 = scmp.lt.s32.totalorder %s216_s26, 187 }
   0xe   : > { %v1399_v8 = vsub.f32 %v325_v0, %v9809_v3  ;;  %626 = vmatpush.msra.mxu0 %v9809_v3  ;;  %v1405_v9 = vsub.f32 %v324_v1, %v9811_v4  ;;  %2307 = vmatpush.msra.mxu3 %v9809_v3  ;;  %v1411_v10 = vsub.f32 %v323_v2, %v9813_v5 }
   0xf   : > { %v1417_v11 = vsub.f32 %v322_v6, %v9818_v7  ;;  %s15622_s26 = smov (!%p217_p3, %s216_s26), 187 }
  0x10   : > { %v1400_v12 = vand.u32 4294901760, %v1399_v8  ;;  %1813 = vmatpush.msra.mxu2 %v1399_v8  ;;  %v1406_v13 = vand.u32 4294901760, %v1405_v9  ;;  %628 = vmatpush.msra.mxu0 %v9811_v4  ;;  %v1412_v14 = vand.u32 4294901760, %v1411_v10  ;;  %s9075_s29 = sshll.u32 %s15622_s26, 3 }
  0x11   : > { %2309 = vmatpush.msra.mxu3 %v9811_v4  ;;  %v1418_v15 = vand.u32 4294901760, %v1417_v11  ;;  %s9837_s7 = scalar_lea.vmem %s14057_s0, %s9075_s29  ;;  %s12845_s14 = scalar_lea.vmem %s14062_s5, %s9075_s29 }
  0x12   : > { %v1401_v16 = vsub.f32 %v1399_v8, %v1400_v12  ;;  %v1407_v17 = vsub.f32 %v1405_v9, %v1406_v13  ;;  %1816 = vmatpush.msra.mxu2 %v1405_v9  ;;  %v1413_v18 = vsub.f32 %v1411_v10, %v1412_v14  ;;  %630 = vmatpush.msra.mxu0 %v9813_v5  ;;  %v228_v19 = vld [vmem:[%s9837_s7] sm:$0xff]  ;;  %v229_v20 = vld [vmem:[%s9837_s7 + $0x8] sm:$0xff]  ;;  %v230_v27 = vld [vmem:[%s9837_s7 + $0x10] sm:$0xff] }
  0x13   : > { %2311 = vmatpush.msra.mxu3 %v9813_v5  ;;  %v1419_v23 = vsub.f32 %v1417_v11, %v1418_v15  ;;  %v332_v24 = vsel %vm330_vm0, %v228_v19, 0  ;;  %v335_v26 = vsel %vm330_vm0, %v229_v20, 0  ;;  %v338_v33 = vsel %vm330_vm0, %v230_v27, 0  ;;  %v231_v39 = vld [vmem:[%s9837_s7 + $0x18] sm:$0xff]  ;;  %v232_v46 = vld [vmem:[%s9837_s7 + $0x20] sm:$0xff]  ;;  %v233_v53 = vld [vmem:[%s9837_s7 + $0x28] sm:$0xff] }
  0x14   : > { %v1402_v21 = vand.u32 4294901760, %v1401_v16  ;;  %v1408_v22 = vand.u32 4294901760, %v1407_v17  ;;  %1819 = vmatpush.msra.mxu2 %v1411_v10  ;;  %632 = vmatpush.msra.mxu0 %v9818_v7  ;;  %v9844_v25 = vand.u32 4294901760, %v332_v24  ;;  %v1414_v28 = vand.u32 4294901760, %v1413_v18  ;;  %v234_v60 = vld [vmem:[%s9837_s7 + $0x30] sm:$0xff]  ;;  %v236_v10 = vld [vmem:[%s9837_s7 + $0x40] sm:$0xff] }
  0x15   : > { %2313 = vmatpush.msra.mxu3 %v9818_v7  ;;  %v9849_v29 = vand.u32 4294901760, %v335_v26  ;;  %v1420_v31 = vand.u32 4294901760, %v1419_v23  ;;  %v9854_v37 = vand.u32 4294901760, %v338_v33  ;;  %v341_v42 = vsel %vm330_vm0, %v231_v39, 0  ;;  %v237_v17 = vld [vmem:[%s9837_s7 + $0x48] sm:$0xff] }
  0x16   : > { %2894 = vmatpush.msrb.mxu0 %v1400_v12  ;;  %1403 = vmatpush.msra.mxu1 %v1402_v21  ;;  %v634_v30 = vsub.f32 %v332_v24, %v9844_v25  ;;  %v9863_v45 = vand.u32 4294901760, %v341_v42  ;;  %v344_v49 = vsel %vm330_vm0, %v232_v46, 0  ;;  %v347_v56 = vsel %vm330_vm0, %v233_v53, 0  ;;  %v238_v24 = vld [vmem:[%s9837_s7 + $0x50] sm:$0xff] }
  0x17   : > { %1822 = vmatpush.msra.mxu2 %v1417_v11  ;;  %v642_v32 = vsub.f32 %v335_v26, %v9849_v29  ;;  %v650_v41 = vsub.f32 %v338_v33, %v9854_v37  ;;  %v9870_v52 = vand.u32 4294901760, %v344_v49  ;;  %v9876_v59 = vand.u32 4294901760, %v347_v56  ;;  %v239_v33 = vld [vmem:[%s9837_s7 + $0x58] sm:$0xff] }
  0x18   : > { %2898 = vmatpush.msrb.mxu0 %v1406_v13  ;;  %1409 = vmatpush.msra.mxu1 %v1408_v22  ;;  %v635_v34 = vand.u32 4294901760, %v634_v30  ;;  %v658_v48 = vsub.f32 %v341_v42, %v9863_v45  ;;  %v350_v63 = vsel %vm330_vm0, %v234_v60, 0  ;;  %v356_v13 = vsel %vm330_vm0, %v236_v10, 0  ;;  %v244_v10 = vld [vmem:[%s9837_s7 + $0x80] sm:$0xff] }
  0x19   : > { %1825 = vmatmul.f32.vlgmr.msra.gmra.mxu2 %v634_v30  ;;  %v643_v36 = vand.u32 4294901760, %v642_v32  ;;  %v651_v44 = vand.u32 4294901760, %v650_v41  ;;  %v666_v55 = vsub.f32 %v344_v49, %v9870_v52  ;;  %v674_v62 = vsub.f32 %v347_v56, %v9876_v59  ;;  %v241_v49 = vld [vmem:[%s9837_s7 + $0x68] sm:$0xff] }
  0x1a   : > { %2902 = vmatpush.msrb.mxu0 %v1412_v14  ;;  %1415 = vmatpush.msra.mxu1 %v1414_v28  ;;  %v636_v35 = vsub.f32 %v634_v30, %v635_v34  ;;  %v659_v51 = vand.u32 4294901760, %v658_v48  ;;  %v9882_v2 = vand.u32 4294901760, %v350_v63  ;;  %v9894_v16 = vand.u32 4294901760, %v356_v13 }
  0x1b   : > { %2317 = vmatmul.f32.vlgmr.msra.gmra.mxu3 %v635_v34  ;;  %v644_v40 = vsub.f32 %v642_v32, %v643_v36  ;;  %v652_v47 = vsub.f32 %v650_v41, %v651_v44  ;;  %v667_v58 = vand.u32 4294901760, %v666_v55  ;;  %v675_v1 = vand.u32 4294901760, %v674_v62 }
  0x1c   : > { %2906 = vmatpush.msrb.mxu0 %v1418_v15  ;;  %1421 = vmatpush.msra.mxu1 %v1420_v31  ;;  %v637_v38 = vand.u32 4294901760, %v636_v35  ;;  %v660_v54 = vsub.f32 %v658_v48, %v659_v51  ;;  %v698_v19 = vsub.f32 %v356_v13, %v9894_v16  ;;  %v359_v20 = vsel %vm330_vm0, %v237_v17, 0 }
  0x1d   : > { %1423 = vmatmul.f32.vlgmr.msra.gmra.mxu1 %v9844_v25  ;;  %v645_v43 = vand.u32 4294901760, %v644_v40  ;;  %v653_v50 = vand.u32 4294901760, %v652_v47  ;;  %v668_v61 = vsub.f32 %v666_v55, %v667_v58  ;;  %v9900_v23 = vand.u32 4294901760, %v359_v20 }
  0x1e   : > { %3297 = vmatpush.msrb.mxu1 %v9809_v3  ;;  %638 = vmatmul.f32.vlgmr.msra.gmra.mxu0 %v637_v38  ;;  %v661_v57 = vand.u32 4294901760, %v660_v54  ;;  %v235_v3 = vld [vmem:[%s9837_s7 + $0x38] sm:$0xff]  ;;  %v699_v22 = vand.u32 4294901760, %v698_v19  ;;  %v362_v28 = vsel %vm330_vm0, %v238_v24, 0  ;;  %v371_v53 = vsel %vm330_vm0, %v241_v49, 0 }
  0x1f   : > { %v669_v0 = vand.u32 4294901760, %v668_v61  ;;  %v353_v6 = vsel %vm330_vm0, %v235_v3, 0  ;;  %v706_v27 = vsub.f32 %v359_v20, %v9900_v23  ;;  %v9924_v56 = vand.u32 4294901760, %v371_v53 }
  0x20   : > { %3299 = vmatpush.msrb.mxu1 %v9811_v4  ;;  %v676_v4 = vsub.f32 %v674_v62, %v675_v1  ;;  %v9888_v9 = vand.u32 4294901760, %v353_v6  ;;  %v700_v26 = vsub.f32 %v698_v19, %v699_v22  ;;  %v380_v13 = vsel %vm330_vm0, %v244_v10, 0 }
  0x21   : > { %1830 = vmatmul.f32.gmra.mxu2 %v642_v32  ;;  %v707_v31 = vand.u32 4294901760, %v706_v27  ;;  %v9906_v32 = vand.u32 4294901760, %v362_v28  ;;  %v738_v60 = vsub.f32 %v371_v53, %v9924_v56  ;;  %v9942_v17 = vand.u32 4294901760, %v380_v13 }
  0x22   : > { %3301 = vmatpush.msrb.mxu1 %v9813_v5  ;;  %v682_v5 = vsub.f32 %v350_v63, %v9882_v2  ;;  %v690_v12 = vsub.f32 %v353_v6, %v9888_v9  ;;  %v701_v30 = vand.u32 4294901760, %v700_v26 }
  0x23   : > { %2323 = vmatmul.f32.gmra.mxu3 %v643_v36  ;;  %v708_v34 = vsub.f32 %v706_v27, %v707_v31  ;;  %v714_v35 = vsub.f32 %v362_v28, %v9906_v32  ;;  %v365_v36 = vsel %vm330_vm0, %v239_v33, 0  ;;  %v739_v63 = vand.u32 4294901760, %v738_v60 }
  0x24   : > { %3303 = vmatpush.msrb.mxu1 %v9818_v7  ;;  %v677_v7 = vand.u32 4294901760, %v676_v4  ;;  %v683_v8 = vand.u32 4294901760, %v682_v5  ;;  %v691_v15 = vand.u32 4294901760, %v690_v12  ;;  %v9912_v40 = vand.u32 4294901760, %v365_v36 }
  0x25   : > { %1427 = vmatmul.f32.gmra.mxu1 %v9849_v29  ;;  %v709_v38 = vand.u32 4294901760, %v708_v34  ;;  %v715_v39 = vand.u32 4294901760, %v714_v35  ;;  %v740_v3 = vsub.f32 %v738_v60, %v739_v63  ;;  %v762_v20 = vsub.f32 %v380_v13, %v9942_v17 }
  0x26   : > { %646 = vmatmul.f32.gmra.mxu0 %v645_v43  ;;  %v684_v11 = vsub.f32 %v682_v5, %v683_v8  ;;  %v692_v18 = vsub.f32 %v690_v12, %v691_v15  ;;  %v722_v43 = vsub.f32 %v365_v36, %v9912_v40 }
  0x27   : > { %v716_v42 = vsub.f32 %v714_v35, %v715_v39  ;;  %v741_v6 = vand.u32 4294901760, %v740_v3  ;;  %v763_v24 = vand.u32 4294901760, %v762_v20 }
  0x28   : > { %v685_v14 = vand.u32 4294901760, %v684_v11  ;;  %v693_v21 = vand.u32 4294901760, %v692_v18  ;;  %v723_v47 = vand.u32 4294901760, %v722_v43  ;;  %v245_v18 = vld [vmem:[%s9837_s7 + $0x88] sm:$0xff] }
  0x29   : > { %1835 = vmatmul.f32.gmra.mxu2 %v650_v41  ;;  %v240_v41 = vld [vmem:[%s9837_s7 + $0x60] sm:$0xff]  ;;  %v717_v46 = vand.u32 4294901760, %v716_v42  ;;  %v764_v33 = vsub.f32 %v762_v20, %v763_v24 }
  0x2b   : > { %2329 = vmatmul.f32.gmra.mxu3 %v651_v44  ;;  %v368_v44 = vsel %vm330_vm0, %v240_v41, 0  ;;  %v765_v42 = vand.u32 4294901760, %v764_v33  ;;  %v249_v33 = vld [vmem:[%s9837_s7 + $0xa8] sm:$0xff] }
  0x2d   : > { %1431 = vmatmul.f32.gmra.mxu1 %v9854_v37 }
  0x2e   : > { %654 = vmatmul.f32.gmra.mxu0 %v653_v50  ;;  %v724_v50 = vsub.f32 %v722_v43, %v723_v47 }
  0x30   : > { %v725_v54 = vand.u32 4294901760, %v724_v50 }
  0x31   : > { %1840 = vmatmul.f32.gmra.mxu2 %v658_v48  ;;  %v9918_v48 = vand.u32 4294901760, %v368_v44 }
  0x33   : > { %2335 = vmatmul.f32.gmra.mxu3 %v659_v51  ;;  %v730_v51 = vsub.f32 %v368_v44, %v9918_v48 }
  0x35   : > { %1435 = vmatmul.f32.gmra.mxu1 %v9863_v45 }
  0x36   : > { %662 = vmatmul.f32.gmra.mxu0 %v661_v57  ;;  %v242_v57 = vld [vmem:[%s9837_s7 + $0x70] sm:$0xff] }
  0x37   : > { %v374_v61 = vsel %vm330_vm0, %v242_v57, 0 }
  0x39   : > { %1845 = vmatmul.f32.gmra.mxu2 %v666_v55  ;;  %v731_v55 = vand.u32 4294901760, %v730_v51 }
  0x3b   : > { %2341 = vmatmul.f32.gmra.mxu3 %v667_v58  ;;  %v732_v58 = vsub.f32 %v730_v51, %v731_v55 }
  0x3d   : > { %1439 = vmatmul.f32.gmra.mxu1 %v9870_v52 }
  0x3e   : > { %670 = vmatmul.f32.gmra.mxu0 %v669_v0  ;;  %v9930_v0 = vand.u32 4294901760, %v374_v61 }
  0x40   : > { %v746_v4 = vsub.f32 %v374_v61, %v9930_v0 }
  0x41   : > { %1850 = vmatmul.f32.gmra.mxu2 %v674_v62  ;;  %v733_v62 = vand.u32 4294901760, %v732_v58 }
  0x43   : > { %2347 = vmatmul.f32.gmra.mxu3 %v675_v1  ;;  %v243_v1 = vld [vmem:[%s9837_s7 + $0x78] sm:$0xff] }
  0x45   : > { %1443 = vmatmul.f32.gmra.mxu1 %v9876_v59 }
  0x46   : > { %678 = vmatmul.f32.gmra.mxu0 %v677_v7  ;;  %v747_v7 = vand.u32 4294901760, %v746_v4 }
  0x48   : > { %v748_v11 = vsub.f32 %v746_v4, %v747_v7 }
  0x49   : > { %1855 = vmatmul.f32.gmra.mxu2 %v682_v5  ;;  %v377_v5 = vsel %vm330_vm0, %v243_v1, 0 }
  0x4b   : > { %2353 = vmatmul.f32.gmra.mxu3 %v683_v8  ;;  %v9936_v8 = vand.u32 4294901760, %v377_v5 }
  0x4d   : > { %1447 = vmatmul.f32.gmra.mxu1 %v9882_v2 }
  0x4e   : > { %686 = vmatmul.f32.gmra.mxu0 %v685_v14  ;;  %v749_v14 = vand.u32 4294901760, %v748_v11 }
  0x51   : > { %1860 = vmatmul.f32.gmra.mxu2 %v690_v12  ;;  %v754_v12 = vsub.f32 %v377_v5, %v9936_v8 }
  0x53   : > { %2359 = vmatmul.f32.gmra.mxu3 %v691_v15  ;;  %v755_v15 = vand.u32 4294901760, %v754_v12 }
  0x55   : > { %1451 = vmatmul.f32.gmra.mxu1 %v9888_v9 }
  0x56   : > { %694 = vmatmul.f32.gmra.mxu0 %v693_v21  ;;  %v383_v21 = vsel %vm330_vm0, %v245_v18, 0 }
  0x57   : > { %v9948_v26 = vand.u32 4294901760, %v383_v21 }
  0x59   : > { %1865 = vmatmul.f32.gmra.mxu2 %v698_v19  ;;  %v756_v19 = vsub.f32 %v754_v12, %v755_v15  ;;  %v770_v34 = vsub.f32 %v383_v21, %v9948_v26 }
  0x5b   : > { %2365 = vmatmul.f32.gmra.mxu3 %v699_v22  ;;  %v757_v22 = vand.u32 4294901760, %v756_v19 }
  0x5d   : > { %1455 = vmatmul.f32.gmra.mxu1 %v9894_v16 }
  0x5e   : > { %702 = vmatmul.f32.gmra.mxu0 %v701_v30  ;;  %v246_v30 = vld [vmem:[%s9837_s7 + $0x90] sm:$0xff] }
  0x61   : > { %1870 = vmatmul.f32.gmra.mxu2 %v706_v27  ;;  %v3778_v27 = vld [vmem:[%s14060_s3 + $0x18] sm:$0xff] }
  0x62   : > { %v9953_v28 = vand.u32 4294901760, %v3778_v27 }
  0x63   : > { %2371 = vmatmul.f32.gmra.mxu3 %v707_v31 }
  0x64   : > { %4078 = vmatpush.msrb.mxu2 %v9953_v28  ;;  %v9959_v31 = vsub.f32 %v3778_v27, %v9953_v28  ;;  %5759 = vmatpush.msra.mxu1 %v9953_v28 }
  0x65   : > { %1459 = vmatmul.f32.gmra.mxu1 %v9900_v23 }
  0x66   : > { %710 = vmatmul.f32.gmra.mxu0 %v709_v38  ;;  %v14063_v36 = vand.u32 4294901760, %v9959_v31  ;;  %v9969_v38 = vld [vmem:[%s14059_s2] ss:$0 sm:$0xff] }
  0x67   : > { %5265 = vmatpush.msra.mxu0 %v9959_v31 }
  0x68   : > { %v4853_v41 = vsub.f32 %v9959_v31, %v14063_v36 }
  0x69   : > { %1875 = vmatmul.f32.gmra.mxu2 %v714_v35  ;;  %v386_v35 = vsel %vm330_vm0, %v246_v30, 0 }
  0x6a   : > { %v9974_v44 = vand.u32 4294901760, %v386_v35  ;;  %v4854_v49 = vand.u32 4294901760, %v4853_v41 }
  0x6b   : > { %2377 = vmatmul.f32.gmra.mxu3 %v715_v39 }
  0x6c   : > { %4855 = vmatpush.msrb.mxu3 %v4854_v49  ;;  %v778_v57 = vsub.f32 %v386_v35, %v9974_v44 }
  0x6d   : > { %1463 = vmatmul.f32.gmra.mxu1 %v9906_v32 }
  0x6e   : > { %718 = vmatmul.f32.gmra.mxu0 %v717_v46  ;;  %v779_v1 = vand.u32 4294901760, %v778_v57 }
  0x71   : > { %1880 = vmatmul.f32.gmra.mxu2 %v722_v43  ;;  %v771_v43 = vand.u32 4294901760, %v770_v34 }
  0x73   : > { %2383 = vmatmul.f32.gmra.mxu3 %v723_v47 }
  0x75   : > { %1467 = vmatmul.f32.gmra.mxu1 %v9912_v40 }
  0x76   : > { %726 = vmatmul.f32.gmra.mxu0 %v725_v54 }
  0x79   : > { %1885 = vmatmul.f32.gmra.mxu2 %v730_v51  ;;  %v247_v51 = vld [vmem:[%s9837_s7 + $0x98] sm:$0xff] }
  0x7a   : > { %v389_v58 = vsel %vm330_vm0, %v247_v51, 0 }
  0x7b   : > { %2389 = vmatmul.f32.gmra.mxu3 %v731_v55  ;;  %v772_v55 = vsub.f32 %v770_v34, %v771_v43  ;;  %v9983_v3 = vand.u32 4294901760, %v389_v58 }
  0x7d   : > { %1471 = vmatmul.f32.gmra.mxu1 %v9918_v48  ;;  %v786_v13 = vsub.f32 %v389_v58, %v9983_v3 }
  0x7e   : > { %734 = vmatmul.f32.gmra.mxu0 %v733_v62 }
  0x7f   : > { %v787_v21 = vand.u32 4294901760, %v786_v13 }
  0x81   : > { %1890 = vmatmul.f32.gmra.mxu2 %v738_v60 }
  0x83   : > { %2395 = vmatmul.f32.gmra.mxu3 %v739_v63  ;;  %v773_v63 = vand.u32 4294901760, %v772_v55 }
  0x85   : > { %1475 = vmatmul.f32.gmra.mxu1 %v9924_v56 }
  0x86   : > { %742 = vmatmul.f32.gmra.mxu0 %v741_v6 }
  0x89   : > { %1895 = vmatmul.f32.gmra.mxu2 %v746_v4 }
  0x8b   : > { %2401 = vmatmul.f32.gmra.mxu3 %v747_v7  ;;  %v248_v7 = vld [vmem:[%s9837_s7 + $0xa0] sm:$0xff] }
  0x8d   : > { %1479 = vmatmul.f32.gmra.mxu1 %v9930_v0 }
  0x8e   : > { %750 = vmatmul.f32.gmra.mxu0 %v749_v14  ;;  %v392_v14 = vsel %vm330_vm0, %v248_v7, 0 }
  0x91   : > { %1900 = vmatmul.f32.gmra.mxu2 %v754_v12  ;;  %v780_v12 = vsub.f32 %v778_v57, %v779_v1 }
  0x93   : > { %2407 = vmatmul.f32.gmra.mxu3 %v755_v15 }
  0x95   : > { %1483 = vmatmul.f32.gmra.mxu1 %v9936_v8 }
  0x96   : > { %758 = vmatmul.f32.gmra.mxu0 %v757_v22  ;;  %v9992_v22 = vand.u32 4294901760, %v392_v14 }
  0x98   : > { %v794_v41 = vsub.f32 %v392_v14, %v9992_v22 }
  0x99   : > { %1905 = vmatmul.f32.gmra.mxu2 %v762_v20  ;;  %v781_v20 = vand.u32 4294901760, %v780_v12 }
  0x9a   : > { %v1424_v39 = vpop.f32.mrf.mxu1 }
  0x9b   : > { %2413 = vmatmul.f32.gmra.mxu3 %v763_v24  ;;  %v639_v46 = vpop.f32.mrf.mxu0 }
  0x9c   : > { %v1826_v47 = vpop.f32.mrf.mxu2  ;;  %v640_v50 = vadd.f32 %v9969_v38, %v639_v46 }
  0x9d   : > { %1487 = vmatmul.f32.gmra.mxu1 %v9942_v17 }
  0x9e   : > { %v2318_v53 = vpop.f32.mrf.mxu3  ;;  %766 = vmatmul.f32.gmra.mxu0 %v765_v42  ;;  %v1425_v54 = vadd.f32 %v1424_v39, %v640_v50  ;;  %v788_v39 = vsub.f32 %v786_v13, %v787_v21  ;;  %v395_v42 = vsel %vm330_vm0, %v249_v33, 0  ;;  %v795_v50 = vand.u32 4294901760, %v794_v41 }
  0x9f   : > { %v10001_v51 = vand.u32 4294901760, %v395_v42 }
  0xa0   : > { %v1827_v60 = vadd.f32 %v1826_v47, %v1425_v54  ;;  %v789_v49 = vand.u32 4294901760, %v788_v39 }
  0xa1   : > { %1910 = vmatmul.f32.gmra.mxu2 %v770_v34 }
  0xa2   : > { %v1428_v61 = vpop.f32.mrf.mxu1  ;;  %v9981_v62 = vadd.f32 %v2318_v53, %v1827_v60 }
  0xa3   : > { %2419 = vmatmul.f32.gmra.mxu3 %v771_v43  ;;  %v647_v4 = vpop.f32.mrf.mxu0 }
  0xa4   : > { %v1831_v5 = vpop.f32.mrf.mxu2  ;;  %v648_v6 = vadd.f32 %v9969_v38, %v647_v4 }
  0xa5   : > { %1491 = vmatmul.f32.gmra.mxu1 %v9948_v26 }
  0xa6   : > { %v2324_v10 = vpop.f32.mrf.mxu3  ;;  %774 = vmatmul.f32.gmra.mxu0 %v773_v63  ;;  %v1429_v11 = vadd.f32 %v1428_v61, %v648_v6  ;;  %v796_v61 = vsub.f32 %v794_v41, %v795_v50  ;;  %v802_v63 = vsub.f32 %v395_v42, %v10001_v51 }
  0xa8   : > { %v1832_v15 = vadd.f32 %v1831_v5, %v1429_v11  ;;  %v797_v7 = vand.u32 4294901760, %v796_v61 }
  0xa9   : > { %1915 = vmatmul.f32.gmra.mxu2 %v778_v57  ;;  %v250_v57 = vld [vmem:[%s9837_s7 + $0xb0] sm:$0xff] }
  0xaa   : > { %v1432_v18 = vpop.f32.mrf.mxu1  ;;  %v9990_v19 = vadd.f32 %v2324_v10, %v1832_v15  ;;  %v803_v10 = vand.u32 4294901760, %v802_v63  ;;  %v251_v15 = vld [vmem:[%s9837_s7 + $0xb8] sm:$0xff] }
  0xab   : > { %2425 = vmatmul.f32.gmra.mxu3 %v779_v1  ;;  %v655_v24 = vpop.f32.mrf.mxu0  ;;  %v398_v1 = vsel %vm330_vm0, %v250_v57, 0 }
  0xac   : > { %v1836_v27 = vpop.f32.mrf.mxu2  ;;  %v656_v30 = vadd.f32 %v9969_v38, %v655_v24  ;;  %v10010_v11 = vand.u32 4294901760, %v398_v1 }
  0xad   : > { %1495 = vmatmul.f32.gmra.mxu1 %v9974_v44 }
  0xae   : > { %v2330_v34 = vpop.f32.mrf.mxu3  ;;  %782 = vmatmul.f32.gmra.mxu0 %v781_v20  ;;  %v1433_v35 = vadd.f32 %v1432_v18, %v656_v30  ;;  %v810_v24 = vsub.f32 %v398_v1, %v10010_v11 }
  0xb0   : > { %v1837_v43 = vadd.f32 %v1836_v27, %v1433_v35  ;;  %v401_v27 = vsel %vm330_vm0, %v251_v15, 0  ;;  %v811_v39 = vand.u32 4294901760, %v810_v24 }
  0xb1   : > { %1920 = vmatmul.f32.gmra.mxu2 %v786_v13 }
  0xb2   : > { %v1436_v46 = vpop.f32.mrf.mxu1  ;;  %v9999_v47 = vadd.f32 %v2330_v34, %v1837_v43 }
  0xb3   : > { %2431 = vmatmul.f32.gmra.mxu3 %v787_v21  ;;  %v663_v53 = vpop.f32.mrf.mxu0  ;;  %v804_v21 = vsub.f32 %v802_v63, %v803_v10 }
  0xb4   : > { %v1841_v54 = vpop.f32.mrf.mxu2  ;;  %v664_v55 = vadd.f32 %v9969_v38, %v663_v53 }
  0xb5   : > { %1499 = vmatmul.f32.gmra.mxu1 %v9983_v3  ;;  %v805_v35 = vand.u32 4294901760, %v804_v21 }
  0xb6   : > { %v2336_v58 = vpop.f32.mrf.mxu3  ;;  %790 = vmatmul.f32.gmra.mxu0 %v789_v49  ;;  %v1437_v60 = vadd.f32 %v1436_v46, %v664_v55  ;;  %v252_v49 = vld [vmem:[%s9837_s7 + $0xc0] sm:$0xff] }
  0xb7   : > { %v404_v57 = vsel %vm330_vm0, %v252_v49, 0 }
  0xb8   : > { %v1842_v4 = vadd.f32 %v1841_v54, %v1437_v60  ;;  %v812_v54 = vsub.f32 %v810_v24, %v811_v39 }
  0xb9   : > { %1925 = vmatmul.f32.gmra.mxu2 %v794_v41  ;;  %v10019_v41 = vand.u32 4294901760, %v401_v27 }
  0xba   : > { %v1440_v5 = vpop.f32.mrf.mxu1  ;;  %v10008_v6 = vadd.f32 %v2336_v58, %v1842_v4  ;;  %v10028_v4 = vand.u32 4294901760, %v404_v57 }
  0xbb   : > { %2437 = vmatmul.f32.gmra.mxu3 %v795_v50  ;;  %v671_v12 = vpop.f32.mrf.mxu0  ;;  %v818_v55 = vsub.f32 %v401_v27, %v10019_v41 }
  0xbc   : > { %v1846_v13 = vpop.f32.mrf.mxu2  ;;  %v672_v14 = vadd.f32 %v9969_v38, %v671_v12  ;;  %v253_v12 = vld [vmem:[%s9837_s7 + $0xc8] sm:$0xff] }
  0xbd   : > { %1503 = vmatmul.f32.gmra.mxu1 %v9992_v22  ;;  %v819_v1 = vand.u32 4294901760, %v818_v55 }
  0xbe   : > { %v2342_v18 = vpop.f32.mrf.mxu3  ;;  %798 = vmatmul.f32.gmra.mxu0 %v797_v7  ;;  %v1441_v20 = vadd.f32 %v1440_v5, %v672_v14 }
  0xbf   : > { %v820_v15 = vsub.f32 %v818_v55, %v819_v1 }
  0xc0   : > { %v1847_v30 = vadd.f32 %v1846_v13, %v1441_v20  ;;  %v407_v20 = vsel %vm330_vm0, %v253_v12, 0 }
  0xc1   : > { %1930 = vmatmul.f32.gmra.mxu2 %v802_v63  ;;  %v813_v63 = vand.u32 4294901760, %v812_v54 }
  0xc2   : > { %v1444_v33 = vpop.f32.mrf.mxu1  ;;  %v10017_v34 = vadd.f32 %v2342_v18, %v1847_v30  ;;  %v826_v18 = vsub.f32 %v404_v57, %v10028_v4  ;;  %v821_v30 = vand.u32 4294901760, %v820_v15 }
  0xc3   : > { %2443 = vmatmul.f32.gmra.mxu3 %v803_v10  ;;  %v679_v42 = vpop.f32.mrf.mxu0 }
  0xc4   : > { %v1851_v43 = vpop.f32.mrf.mxu2  ;;  %v680_v46 = vadd.f32 %v9969_v38, %v679_v42 }
  0xc5   : > { %1507 = vmatmul.f32.gmra.mxu1 %v10001_v51 }
  0xc6   : > { %v2348_v50 = vpop.f32.mrf.mxu3  ;;  %806 = vmatmul.f32.gmra.mxu0 %v805_v35  ;;  %v1445_v53 = vadd.f32 %v1444_v33, %v680_v46  ;;  %v827_v33 = vand.u32 4294901760, %v826_v18  ;;  %v10037_v35 = vand.u32 4294901760, %v407_v20  ;;  %v254_v46 = vld [vmem:[%s9837_s7 + $0xd0] sm:$0xff] }
  0xc8   : > { %v1852_v58 = vadd.f32 %v1851_v43, %v1445_v53  ;;  %14640 = vst [vmem:[#allocation2_spill] sm:$0xff] %v10037_v35  ;;  %v828_v53 = vsub.f32 %v826_v18, %v827_v33  ;;  %v834_v54 = vsub.f32 %v407_v20, %v10037_v35 }
  0xc9   : > { %1935 = vmatmul.f32.gmra.mxu2 %v810_v24 }
  0xca   : > { %v1448_v60 = vpop.f32.mrf.mxu1  ;;  %v10026_v61 = vadd.f32 %v2348_v50, %v1852_v58 }
  0xcb   : > { %2449 = vmatmul.f32.gmra.mxu3 %v811_v39  ;;  %v687_v5 = vpop.f32.mrf.mxu0 }
  0xcc   : > { %v1856_v7 = vpop.f32.mrf.mxu2  ;;  %v688_v10 = vadd.f32 %v9969_v38, %v687_v5 }
  0xcd   : > { %1511 = vmatmul.f32.gmra.mxu1 %v10010_v11 }
  0xce   : > { %v2354_v13 = vpop.f32.mrf.mxu3  ;;  %814 = vmatmul.f32.gmra.mxu0 %v813_v63  ;;  %v1449_v14 = vadd.f32 %v1448_v60, %v688_v10  ;;  %v829_v63 = vand.u32 4294901760, %v828_v53  ;;  %v256_v53 = vld [vmem:[%s9837_s7 + $0xe0] sm:$0xff] }
  0xd0   : > { %v1857_v21 = vadd.f32 %v1856_v7, %v1449_v14 }
  0xd1   : > { %1940 = vmatmul.f32.gmra.mxu2 %v818_v55  ;;  %v410_v55 = vsel %vm330_vm0, %v254_v46, 0 }
  0xd2   : > { %v1452_v24 = vpop.f32.mrf.mxu1  ;;  %v10035_v27 = vadd.f32 %v2354_v13, %v1857_v21  ;;  %v10046_v5 = vand.u32 4294901760, %v410_v55  ;;  %v255_v13 = vld [vmem:[%s9837_s7 + $0xd8] sm:$0xff] }
  0xd3   : > { %2455 = vmatmul.f32.gmra.mxu3 %v819_v1  ;;  %v695_v39 = vpop.f32.mrf.mxu0  ;;  %v835_v1 = vand.u32 4294901760, %v834_v54  ;;  %v413_v21 = vsel %vm330_vm0, %v255_v13, 0 }
  0xd4   : > { %v1861_v42 = vpop.f32.mrf.mxu2  ;;  %v696_v43 = vadd.f32 %v9969_v38, %v695_v39  ;;  %14641 = vst [vmem:[#allocation3_spill] sm:$0xff] %v10046_v5  ;;  %v842_v20 = vsub.f32 %v410_v55, %v10046_v5 }
  0xd5   : > { %1515 = vmatmul.f32.gmra.mxu1 %v10019_v41 }
  0xd6   : > { %v2360_v49 = vpop.f32.mrf.mxu3  ;;  %822 = vmatmul.f32.gmra.mxu0 %v821_v30  ;;  %v1453_v50 = vadd.f32 %v1452_v24, %v696_v43  ;;  %v10055_v43 = vand.u32 4294901760, %v413_v21 }
  0xd8   : > { %v1862_v57 = vadd.f32 %v1861_v42, %v1453_v50  ;;  %v843_v42 = vand.u32 4294901760, %v842_v20  ;;  %14642 = vst [vmem:[#allocation4_spill] sm:$0xff] %v10055_v43 }
  0xd9   : > { %1945 = vmatmul.f32.gmra.mxu2 %v826_v18  ;;  %v836_v18 = vsub.f32 %v834_v54, %v835_v1 }
  0xda   : > { %v1456_v58 = vpop.f32.mrf.mxu1  ;;  %v10044_v60 = vadd.f32 %v2360_v49, %v1862_v57 }
  0xdb   : > { %2461 = vmatmul.f32.gmra.mxu3 %v827_v33  ;;  %v703_v7 = vpop.f32.mrf.mxu0  ;;  %v837_v39 = vand.u32 4294901760, %v836_v18 }
  0xdc   : > { %v1866_v10 = vpop.f32.mrf.mxu2  ;;  %v704_v12 = vadd.f32 %v9969_v38, %v703_v7 }
  0xdd   : > { %1519 = vmatmul.f32.gmra.mxu1 %v10028_v4 }
  0xde   : > { %v2366_v14 = vpop.f32.mrf.mxu3  ;;  %830 = vmatmul.f32.gmra.mxu0 %v829_v63  ;;  %v1457_v15 = vadd.f32 %v1456_v58, %v704_v12  ;;  %v850_v58 = vsub.f32 %v413_v21, %v10055_v43  ;;  %v416_v63 = vsel %vm330_vm0, %v256_v53, 0 }
  0xe0   : > { %v1867_v24 = vadd.f32 %v1866_v10, %v1457_v15  ;;  %v851_v13 = vand.u32 4294901760, %v850_v58 }
  0xe1   : > { %1950 = vmatmul.f32.gmra.mxu2 %v834_v54  ;;  %v844_v54 = vsub.f32 %v842_v20, %v843_v42 }
  0xe2   : > { %v1460_v30 = vpop.f32.mrf.mxu1  ;;  %v10053_v33 = vadd.f32 %v2366_v14, %v1867_v24  ;;  %v10064_v14 = vand.u32 4294901760, %v416_v63 }
  0xe3   : > { %2467 = vmatmul.f32.gmra.mxu3 %v835_v1  ;;  %v711_v46 = vpop.f32.mrf.mxu0  ;;  %v845_v12 = vand.u32 4294901760, %v844_v54 }
  0xe4   : > { %v1871_v49 = vpop.f32.mrf.mxu2  ;;  %v712_v50 = vadd.f32 %v9969_v38, %v711_v46  ;;  %14644 = vst [vmem:[#allocation6_spill] sm:$0xff] %v10064_v14  ;;  %v858_v46 = vsub.f32 %v416_v63, %v10064_v14 }
  0xe5   : > { %1523 = vmatmul.f32.gmra.mxu1 %v10037_v35 }
  0xe6   : > { %v2372_v55 = vpop.f32.mrf.mxu3  ;;  %838 = vmatmul.f32.gmra.mxu0 %v837_v39  ;;  %v1461_v57 = vadd.f32 %v1460_v30, %v712_v50  ;;  %v257_v30 = vld [vmem:[%s9837_s7 + $0xe8] sm:$0xff] }
  0xe8   : > { %v1872_v1 = vadd.f32 %v1871_v49, %v1461_v57  ;;  %v419_v49 = vsel %vm330_vm0, %v257_v30, 0  ;;  %v859_v57 = vand.u32 4294901760, %v858_v46 }
  0xe9   : > { %1955 = vmatmul.f32.gmra.mxu2 %v842_v20  ;;  %v852_v20 = vsub.f32 %v850_v58, %v851_v13  ;;  %v10073_v54 = vand.u32 4294901760, %v419_v49 }
  0xea   : > { %v1464_v7 = vpop.f32.mrf.mxu1  ;;  %v10062_v10 = vadd.f32 %v2372_v55, %v1872_v1 }
  0xeb   : > { %2473 = vmatmul.f32.gmra.mxu3 %v843_v42  ;;  %v719_v15 = vpop.f32.mrf.mxu0  ;;  %v853_v55 = vand.u32 4294901760, %v852_v20  ;;  %14646 = vst [vmem:[#allocation8_spill] sm:$0xff] %v10073_v54 }
  0xec   : > { %14643 = vst [vmem:[#allocation5_spill] sm:$0xff] %v10062_v10  ;;  %v1876_v18 = vpop.f32.mrf.mxu2  ;;  %v720_v24 = vadd.f32 %v9969_v38, %v719_v15 }
  0xed   : > { %1527 = vmatmul.f32.gmra.mxu1 %v10046_v5 }
  0xee   : > { %v2378_v21 = vpop.f32.mrf.mxu3  ;;  %846 = vmatmul.f32.gmra.mxu0 %v845_v12  ;;  %v1465_v39 = vadd.f32 %v1464_v7, %v720_v24  ;;  %v258_v12 = vld [vmem:[%s9837_s7 + $0xf0] sm:$0xff] }
  0xef   : > { %v422_v30 = vsel %vm330_vm0, %v258_v12, 0 }
  0xf0   : > { %v1877_v42 = vadd.f32 %v1876_v18, %v1465_v39  ;;  %v866_v18 = vsub.f32 %v419_v49, %v10073_v54 }
  0xf1   : > { %1960 = vmatmul.f32.gmra.mxu2 %v850_v58  ;;  %v860_v58 = vsub.f32 %v858_v46, %v859_v57 }
  0xf2   : > { %v1468_v50 = vpop.f32.mrf.mxu1  ;;  %v10071_v53 = vadd.f32 %v2378_v21, %v1877_v42  ;;  %v867_v42 = vand.u32 4294901760, %v866_v18 }
  0xf3   : > { %2479 = vmatmul.f32.gmra.mxu3 %v851_v13  ;;  %v727_v1 = vpop.f32.mrf.mxu0  ;;  %v861_v20 = vand.u32 4294901760, %v860_v58 }
  0xf4   : > { %14645 = vst [vmem:[#allocation7_spill] sm:$0xff] %v10071_v53  ;;  %v1881_v15 = vpop.f32.mrf.mxu2  ;;  %v728_v7 = vadd.f32 %v9969_v38, %v727_v1  ;;  %v10082_v1 = vand.u32 4294901760, %v422_v30 }
  0xf5   : > { %1531 = vmatmul.f32.gmra.mxu1 %v10055_v43 }
  0xf6   : > { %v2384_v63 = vpop.f32.mrf.mxu3  ;;  %854 = vmatmul.f32.gmra.mxu0 %v853_v55  ;;  %v1469_v24 = vadd.f32 %v1468_v50, %v728_v7  ;;  %14648 = vst [vmem:[#allocation10_spill] sm:$0xff] %v10082_v1  ;;  %v259_v55 = vld [vmem:[%s9837_s7 + $0xf8] sm:$0xff] }
  0xf7   : > { %v425_v12 = vsel %vm330_vm0, %v259_v55, 0 }
  0xf8   : > { %v1882_v13 = vadd.f32 %v1881_v15, %v1469_v24  ;;  %v874_v15 = vsub.f32 %v422_v30, %v10082_v1 }
  0xf9   : > { %1965 = vmatmul.f32.gmra.mxu2 %v858_v46  ;;  %v868_v46 = vsub.f32 %v866_v18, %v867_v42 }
  0xfa   : > { %v1472_v21 = vpop.f32.mrf.mxu1  ;;  %v10080_v39 = vadd.f32 %v2384_v63, %v1882_v13  ;;  %v10091_v13 = vand.u32 4294901760, %v425_v12 }
  0xfb   : > { %2485 = vmatmul.f32.gmra.mxu3 %v859_v57  ;;  %v735_v36 = vpop.f32.mrf.mxu0  ;;  %v869_v58 = vand.u32 4294901760, %v868_v46 }
  0xfc   : > { %14647 = vst [vmem:[#allocation9_spill] sm:$0xff] %v10080_v39  ;;  %v1886_v43 = vpop.f32.mrf.mxu2  ;;  %v736_v50 = vadd.f32 %v9969_v38, %v735_v36  ;;  %v875_v36 = vand.u32 4294901760, %v874_v15 }
  0xfd   : > { %1535 = vmatmul.f32.gmra.mxu1 %v10064_v14  ;;  %14650 = vst [vmem:[#allocation12_spill] sm:$0xff] %v10091_v13 }
  0xfe   : > { %v2390_v49 = vpop.f32.mrf.mxu3  ;;  %862 = vmatmul.f32.gmra.mxu0 %v861_v20  ;;  %v1473_v7 = vadd.f32 %v1472_v21, %v736_v50  ;;  %v260_v20 = vld [vmem:[%s9837_s7 + $0x100] sm:$0xff] }
  0xff   : > { %v428_v55 = vsel %vm330_vm0, %v260_v20, 0 }
 0x100   : > { %v1887_v57 = vadd.f32 %v1886_v43, %v1473_v7  ;;  %v876_v43 = vsub.f32 %v874_v15, %v875_v36 }
 0x101   : > { %1970 = vmatmul.f32.gmra.mxu2 %v866_v18  ;;  %v882_v18 = vsub.f32 %v425_v12, %v10091_v13 }
 0x102   : > { %v1476_v63 = vpop.f32.mrf.mxu1  ;;  %v10089_v24 = vadd.f32 %v2390_v49, %v1887_v57  ;;  %v877_v46 = vand.u32 4294901760, %v876_v43  ;;  %v10100_v57 = vand.u32 4294901760, %v428_v55 }
 0x103   : > { %2491 = vmatmul.f32.gmra.mxu3 %v867_v42  ;;  %v743_v14 = vpop.f32.mrf.mxu0 }
 0x104   : > { %14649 = vst [vmem:[#allocation11_spill] sm:$0xff] %v10089_v24  ;;  %v1891_v39 = vpop.f32.mrf.mxu2  ;;  %v744_v21 = vadd.f32 %v9969_v38, %v743_v14  ;;  %v883_v14 = vand.u32 4294901760, %v882_v18 }
 0x105   : > { %1539 = vmatmul.f32.gmra.mxu1 %v10073_v54  ;;  %14652 = vst [vmem:[#allocation14_spill] sm:$0xff] %v10100_v57 }
 0x106   : > { %v2396_v30 = vpop.f32.mrf.mxu3  ;;  %870 = vmatmul.f32.gmra.mxu0 %v869_v58  ;;  %v1477_v50 = vadd.f32 %v1476_v63, %v744_v21  ;;  %v261_v58 = vld [vmem:[%s9837_s7 + $0x108] sm:$0xff] }
 0x107   : > { %v431_v20 = vsel %vm330_vm0, %v261_v58, 0 }
 0x108   : > { %v1892_v42 = vadd.f32 %v1891_v39, %v1477_v50  ;;  %v884_v39 = vsub.f32 %v882_v18, %v883_v14 }
 0x109   : > { %1975 = vmatmul.f32.gmra.mxu2 %v874_v15  ;;  %v890_v15 = vsub.f32 %v428_v55, %v10100_v57 }
 0x10a   : > { %v1480_v49 = vpop.f32.mrf.mxu1  ;;  %v10098_v7 = vadd.f32 %v2396_v30, %v1892_v42  ;;  %v885_v43 = vand.u32 4294901760, %v884_v39  ;;  %v10109_v42 = vand.u32 4294901760, %v431_v20 }
 0x10b   : > { %2497 = vmatmul.f32.gmra.mxu3 %v875_v36  ;;  %v751_v54 = vpop.f32.mrf.mxu0 }
 0x10c   : > { %14651 = vst [vmem:[#allocation13_spill] sm:$0xff] %v10098_v7  ;;  %v1896_v24 = vpop.f32.mrf.mxu2  ;;  %v752_v63 = vadd.f32 %v9969_v38, %v751_v54  ;;  %v891_v54 = vand.u32 4294901760, %v890_v15 }
 0x10d   : > { %1543 = vmatmul.f32.gmra.mxu1 %v10082_v1  ;;  %14654 = vst [vmem:[#allocation16_spill] sm:$0xff] %v10109_v42 }
 0x10e   : > { %v2402_v12 = vpop.f32.mrf.mxu3  ;;  %878 = vmatmul.f32.gmra.mxu0 %v877_v46  ;;  %v1481_v21 = vadd.f32 %v1480_v49, %v752_v63  ;;  %v262_v46 = vld [vmem:[%s9837_s7 + $0x110] sm:$0xff] }
 0x10f   : > { %v434_v58 = vsel %vm330_vm0, %v262_v46, 0 }
 0x110   : > { %v1897_v36 = vadd.f32 %v1896_v24, %v1481_v21  ;;  %v892_v24 = vsub.f32 %v890_v15, %v891_v54 }
 0x111   : > { %1980 = vmatmul.f32.gmra.mxu2 %v882_v18  ;;  %v898_v18 = vsub.f32 %v431_v20, %v10109_v42 }
 0x112   : > { %v1484_v30 = vpop.f32.mrf.mxu1  ;;  %v10107_v50 = vadd.f32 %v2402_v12, %v1897_v36  ;;  %v893_v39 = vand.u32 4294901760, %v892_v24  ;;  %v10118_v36 = vand.u32 4294901760, %v434_v58 }
 0x113   : > { %2503 = vmatmul.f32.gmra.mxu3 %v883_v14  ;;  %v759_v1 = vpop.f32.mrf.mxu0 }
 0x114   : > { %14653 = vst [vmem:[#allocation15_spill] sm:$0xff] %v10107_v50  ;;  %v1901_v7 = vpop.f32.mrf.mxu2  ;;  %v760_v49 = vadd.f32 %v9969_v38, %v759_v1  ;;  %v899_v1 = vand.u32 4294901760, %v898_v18 }
 0x115   : > { %1547 = vmatmul.f32.gmra.mxu1 %v10091_v13  ;;  %14656 = vst [vmem:[#allocation18_spill] sm:$0xff] %v10118_v36 }
 0x116   : > { %v2408_v55 = vpop.f32.mrf.mxu3  ;;  %886 = vmatmul.f32.gmra.mxu0 %v885_v43  ;;  %v1485_v63 = vadd.f32 %v1484_v30, %v760_v49  ;;  %v263_v43 = vld [vmem:[%s9837_s7 + $0x118] sm:$0xff] }
 0x117   : > { %v437_v46 = vsel %vm330_vm0, %v263_v43, 0 }
 0x118   : > { %v1902_v14 = vadd.f32 %v1901_v7, %v1485_v63  ;;  %v900_v7 = vsub.f32 %v898_v18, %v899_v1 }
 0x119   : > { %1985 = vmatmul.f32.gmra.mxu2 %v890_v15  ;;  %v906_v15 = vsub.f32 %v434_v58, %v10118_v36 }
 0x11a   : > { %v1488_v12 = vpop.f32.mrf.mxu1  ;;  %v10116_v21 = vadd.f32 %v2408_v55, %v1902_v14  ;;  %v901_v24 = vand.u32 4294901760, %v900_v7  ;;  %v10127_v14 = vand.u32 4294901760, %v437_v46 }
 0x11b   : > { %2509 = vmatmul.f32.gmra.mxu3 %v891_v54  ;;  %v767_v13 = vpop.f32.mrf.mxu0 }
 0x11c   : > { %14655 = vst [vmem:[#allocation17_spill] sm:$0xff] %v10116_v21  ;;  %v1906_v50 = vpop.f32.mrf.mxu2  ;;  %v768_v30 = vadd.f32 %v9969_v38, %v767_v13  ;;  %v907_v13 = vand.u32 4294901760, %v906_v15 }
 0x11d   : > { %1551 = vmatmul.f32.gmra.mxu1 %v10100_v57  ;;  %14658 = vst [vmem:[#allocation20_spill] sm:$0xff] %v10127_v14 }
 0x11e   : > { %v2414_v20 = vpop.f32.mrf.mxu3  ;;  %894 = vmatmul.f32.gmra.mxu0 %v893_v39  ;;  %v1489_v49 = vadd.f32 %v1488_v12, %v768_v30  ;;  %v264_v39 = vld [vmem:[%s9837_s7 + $0x120] sm:$0xff] }
 0x11f   : > { %v440_v43 = vsel %vm330_vm0, %v264_v39, 0 }
 0x120   : > { %v1907_v54 = vadd.f32 %v1906_v50, %v1489_v49  ;;  %v908_v50 = vsub.f32 %v906_v15, %v907_v13 }
 0x121   : > { %1990 = vmatmul.f32.gmra.mxu2 %v898_v18  ;;  %v914_v18 = vsub.f32 %v437_v46, %v10127_v14 }
 0x122   : > { %v1492_v55 = vpop.f32.mrf.mxu1  ;;  %v10125_v63 = vadd.f32 %v2414_v20, %v1907_v54  ;;  %v909_v7 = vand.u32 4294901760, %v908_v50  ;;  %v10136_v54 = vand.u32 4294901760, %v440_v43 }
 0x123   : > { %2515 = vmatmul.f32.gmra.mxu3 %v899_v1  ;;  %v775_v57 = vpop.f32.mrf.mxu0 }
 0x124   : > { %14657 = vst [vmem:[#allocation19_spill] sm:$0xff] %v10125_v63  ;;  %v1911_v21 = vpop.f32.mrf.mxu2  ;;  %v776_v12 = vadd.f32 %v9969_v38, %v775_v57  ;;  %v915_v57 = vand.u32 4294901760, %v914_v18 }
 0x125   : > { %1555 = vmatmul.f32.gmra.mxu1 %v10109_v42  ;;  %14660 = vst [vmem:[#allocation22_spill] sm:$0xff] %v10136_v54 }
 0x126   : > { %v2420_v58 = vpop.f32.mrf.mxu3  ;;  %902 = vmatmul.f32.gmra.mxu0 %v901_v24  ;;  %v1493_v30 = vadd.f32 %v1492_v55, %v776_v12  ;;  %v265_v24 = vld [vmem:[%s9837_s7 + $0x128] sm:$0xff] }
 0x127   : > { %v443_v39 = vsel %vm330_vm0, %v265_v24, 0 }
 0x128   : > { %v1912_v1 = vadd.f32 %v1911_v21, %v1493_v30  ;;  %v916_v21 = vsub.f32 %v914_v18, %v915_v57 }
 0x129   : > { %1995 = vmatmul.f32.gmra.mxu2 %v906_v15  ;;  %v922_v15 = vsub.f32 %v440_v43, %v10136_v54 }
 0x12a   : > { %v1496_v20 = vpop.f32.mrf.mxu1  ;;  %v10134_v49 = vadd.f32 %v2420_v58, %v1912_v1  ;;  %v917_v50 = vand.u32 4294901760, %v916_v21  ;;  %v10145_v1 = vand.u32 4294901760, %v443_v39 }
 0x12b   : > { %2521 = vmatmul.f32.gmra.mxu3 %v907_v13  ;;  %v783_v42 = vpop.f32.mrf.mxu0 }
 0x12c   : > { %14659 = vst [vmem:[#allocation21_spill] sm:$0xff] %v10134_v49  ;;  %v1916_v63 = vpop.f32.mrf.mxu2  ;;  %v784_v55 = vadd.f32 %v9969_v38, %v783_v42  ;;  %v923_v42 = vand.u32 4294901760, %v922_v15 }
 0x12d   : > { %1559 = vmatmul.f32.gmra.mxu1 %v10118_v36  ;;  %14662 = vst [vmem:[#allocation24_spill] sm:$0xff] %v10145_v1 }
 0x12e   : > { %v2426_v46 = vpop.f32.mrf.mxu3  ;;  %910 = vmatmul.f32.gmra.mxu0 %v909_v7  ;;  %v1497_v12 = vadd.f32 %v1496_v20, %v784_v55  ;;  %v266_v7 = vld [vmem:[%s9837_s7 + $0x130] sm:$0xff] }
 0x12f   : > { %v446_v24 = vsel %vm330_vm0, %v266_v7, 0 }
 0x130   : > { %v1917_v13 = vadd.f32 %v1916_v63, %v1497_v12  ;;  %v924_v63 = vsub.f32 %v922_v15, %v923_v42 }
 0x131   : > { %2000 = vmatmul.f32.gmra.mxu2 %v914_v18  ;;  %v930_v18 = vsub.f32 %v443_v39, %v10145_v1 }
 0x132   : > { %v1500_v58 = vpop.f32.mrf.mxu1  ;;  %v10143_v30 = vadd.f32 %v2426_v46, %v1917_v13  ;;  %v925_v21 = vand.u32 4294901760, %v924_v63  ;;  %v10154_v13 = vand.u32 4294901760, %v446_v24 }
 0x133   : > { %2527 = vmatmul.f32.gmra.mxu3 %v915_v57  ;;  %v791_v36 = vpop.f32.mrf.mxu0 }
 0x134   : > { %14661 = vst [vmem:[#allocation23_spill] sm:$0xff] %v10143_v30  ;;  %v1921_v49 = vpop.f32.mrf.mxu2  ;;  %v792_v20 = vadd.f32 %v9969_v38, %v791_v36  ;;  %v931_v36 = vand.u32 4294901760, %v930_v18 }
 0x135   : > { %1563 = vmatmul.f32.gmra.mxu1 %v10127_v14  ;;  %14664 = vst [vmem:[#allocation26_spill] sm:$0xff] %v10154_v13 }
 0x136   : > { %v2432_v43 = vpop.f32.mrf.mxu3  ;;  %918 = vmatmul.f32.gmra.mxu0 %v917_v50  ;;  %v1501_v55 = vadd.f32 %v1500_v58, %v792_v20  ;;  %v267_v50 = vld [vmem:[%s9837_s7 + $0x138] sm:$0xff] }
 0x137   : > { %v449_v7 = vsel %vm330_vm0, %v267_v50, 0 }
 0x138   : > { %v1922_v57 = vadd.f32 %v1921_v49, %v1501_v55  ;;  %v932_v49 = vsub.f32 %v930_v18, %v931_v36 }
 0x139   : > { %2005 = vmatmul.f32.gmra.mxu2 %v922_v15  ;;  %v938_v15 = vsub.f32 %v446_v24, %v10154_v13 }
 0x13a   : > { %v1504_v46 = vpop.f32.mrf.mxu1  ;;  %v10152_v12 = vadd.f32 %v2432_v43, %v1922_v57  ;;  %v933_v63 = vand.u32 4294901760, %v932_v49  ;;  %v10163_v57 = vand.u32 4294901760, %v449_v7 }
 0x13b   : > { %2533 = vmatmul.f32.gmra.mxu3 %v923_v42  ;;  %v799_v14 = vpop.f32.mrf.mxu0 }
 0x13c   : > { %14663 = vst [vmem:[#allocation25_spill] sm:$0xff] %v10152_v12  ;;  %v1926_v30 = vpop.f32.mrf.mxu2  ;;  %v800_v58 = vadd.f32 %v9969_v38, %v799_v14  ;;  %v939_v14 = vand.u32 4294901760, %v938_v15 }
 0x13d   : > { %1567 = vmatmul.f32.gmra.mxu1 %v10136_v54  ;;  %14666 = vst [vmem:[#allocation28_spill] sm:$0xff] %v10163_v57 }
 0x13e   : > { %v2438_v39 = vpop.f32.mrf.mxu3  ;;  %926 = vmatmul.f32.gmra.mxu0 %v925_v21  ;;  %v1505_v20 = vadd.f32 %v1504_v46, %v800_v58  ;;  %v268_v21 = vld [vmem:[%s9837_s7 + $0x140] sm:$0xff] }
 0x13f   : > { %v452_v50 = vsel %vm330_vm0, %v268_v21, 0 }
 0x140   : > { %v1927_v42 = vadd.f32 %v1926_v30, %v1505_v20  ;;  %v940_v30 = vsub.f32 %v938_v15, %v939_v14 }
 0x141   : > { %2010 = vmatmul.f32.gmra.mxu2 %v930_v18  ;;  %v946_v18 = vsub.f32 %v449_v7, %v10163_v57 }
 0x142   : > { %v1508_v43 = vpop.f32.mrf.mxu1  ;;  %v10161_v55 = vadd.f32 %v2438_v39, %v1927_v42  ;;  %v941_v49 = vand.u32 4294901760, %v940_v30  ;;  %v10172_v42 = vand.u32 4294901760, %v452_v50 }
 0x143   : > { %2539 = vmatmul.f32.gmra.mxu3 %v931_v36  ;;  %v807_v54 = vpop.f32.mrf.mxu0 }
 0x144   : > { %14665 = vst [vmem:[#allocation27_spill] sm:$0xff] %v10161_v55  ;;  %v1931_v12 = vpop.f32.mrf.mxu2  ;;  %v808_v46 = vadd.f32 %v9969_v38, %v807_v54  ;;  %v947_v54 = vand.u32 4294901760, %v946_v18 }
 0x145   : > { %1571 = vmatmul.f32.gmra.mxu1 %v10145_v1  ;;  %14668 = vst [vmem:[#allocation30_spill] sm:$0xff] %v10172_v42 }
 0x146   : > { %v2444_v24 = vpop.f32.mrf.mxu3  ;;  %934 = vmatmul.f32.gmra.mxu0 %v933_v63  ;;  %v1509_v58 = vadd.f32 %v1508_v43, %v808_v46  ;;  %v269_v63 = vld [vmem:[%s9837_s7 + $0x148] sm:$0xff] }
 0x147   : > { %v455_v21 = vsel %vm330_vm0, %v269_v63, 0 }
 0x148   : > { %v1932_v36 = vadd.f32 %v1931_v12, %v1509_v58  ;;  %v948_v12 = vsub.f32 %v946_v18, %v947_v54 }
 0x149   : > { %2015 = vmatmul.f32.gmra.mxu2 %v938_v15  ;;  %v954_v15 = vsub.f32 %v452_v50, %v10172_v42 }
 0x14a   : > { %v1512_v39 = vpop.f32.mrf.mxu1  ;;  %v10170_v20 = vadd.f32 %v2444_v24, %v1932_v36  ;;  %v949_v36 = vand.u32 4294901760, %v948_v12 }
 0x14b   : > { %2545 = vmatmul.f32.gmra.mxu3 %v939_v14  ;;  %v815_v1 = vpop.f32.mrf.mxu0  ;;  %v3777_v14 = vld [vmem:[%s14060_s3 + $0x10] sm:$0xff] }
 0x14c   : > { %14667 = vst [vmem:[#allocation29_spill] sm:$0xff] %v10170_v20  ;;  %v1936_v55 = vpop.f32.mrf.mxu2  ;;  %v816_v43 = vadd.f32 %v9969_v38, %v815_v1  ;;  %v10182_v24 = vand.u32 4294901760, %v3777_v14 }
 0x14d   : > { %1575 = vmatmul.f32.gmra.mxu1 %v10154_v13 }
 0x14e   : > { %v2450_v7 = vpop.f32.mrf.mxu3  ;;  %942 = vmatmul.f32.gmra.mxu0 %v941_v49  ;;  %v1513_v46 = vadd.f32 %v1512_v39, %v816_v43  ;;  %4080 = vmatpush.msrb.mxu2 %v10182_v24  ;;  %v10186_v30 = vsub.f32 %v3777_v14, %v10182_v24  ;;  %v955_v39 = vand.u32 4294901760, %v954_v15  ;;  %v10191_v49 = vand.u32 4294901760, %v455_v21 }
 0x14f   : > { %5761 = vmatpush.msra.mxu1 %v10182_v24 }
 0x150   : > { %v1937_v58 = vadd.f32 %v1936_v55, %v1513_v46  ;;  %14670 = vst [vmem:[#allocation32_spill] sm:$0xff] %v10191_v49  ;;  %v14094_v55 = vand.u32 4294901760, %v10186_v30  ;;  %5268 = vmatpush.msra.mxu0 %v10186_v30  ;;  %v270_v46 = vld [vmem:[%s9837_s7 + $0x150] sm:$0xff]  ;;  %v956_v12 = vsub.f32 %v954_v15, %v955_v39 }
 0x151   : > { %2020 = vmatmul.f32.gmra.mxu2 %v946_v18  ;;  %v458_v13 = vsel %vm330_vm0, %v270_v46, 0 }
 0x152   : > { %v1516_v1 = vpop.f32.mrf.mxu1  ;;  %v10189_v50 = vadd.f32 %v2450_v7, %v1937_v58  ;;  %v4859_v7 = vsub.f32 %v10186_v30, %v14094_v55  ;;  %v962_v58 = vsub.f32 %v455_v21, %v10191_v49  ;;  %v957_v5 = vand.u32 4294901760, %v956_v12  ;;  %v271_v21 = vld [vmem:[%s9837_s7 + $0x158] sm:$0xff] }
 0x153   : > { %2551 = vmatmul.f32.gmra.mxu3 %v947_v54  ;;  %v823_v43 = vpop.f32.mrf.mxu0  ;;  %v10205_v35 = vand.u32 4294901760, %v458_v13 }
 0x154   : > { %14669 = vst [vmem:[#allocation31_spill] sm:$0xff] %v10189_v50  ;;  %v1941_v63 = vpop.f32.mrf.mxu2  ;;  %v824_v18 = vadd.f32 %v9969_v38, %v823_v43  ;;  %v4860_v50 = vand.u32 4294901760, %v4859_v7  ;;  %v963_v53 = vand.u32 4294901760, %v962_v58 }
 0x155   : > { %1579 = vmatmul.f32.gmra.mxu1 %v10163_v57  ;;  %14672 = vst [vmem:[#allocation34_spill] sm:$0xff] %v10205_v35 }
 0x156   : > { %v2456_v14 = vpop.f32.mrf.mxu3  ;;  %950 = vmatmul.f32.gmra.mxu0 %v949_v36  ;;  %v1517_v54 = vadd.f32 %v1516_v1, %v824_v18  ;;  %4861 = vmatpush.msrb.mxu3 %v4860_v50  ;;  %v461_v50 = vsel %vm330_vm0, %v271_v21, 0 }
 0x158   : > { %v1942_v20 = vadd.f32 %v1941_v63, %v1517_v54 }
 0x159   : > { %2025 = vmatmul.f32.gmra.mxu2 %v954_v15  ;;  %v964_v15 = vsub.f32 %v962_v58, %v963_v53 }
 0x15a   : > { %v1520_v43 = vpop.f32.mrf.mxu1  ;;  %v10203_v57 = vadd.f32 %v2456_v14, %v1942_v20  ;;  %v970_v20 = vsub.f32 %v458_v13, %v10205_v35 }
 0x15b   : > { %2557 = vmatmul.f32.gmra.mxu3 %v955_v39  ;;  %v831_v36 = vpop.f32.mrf.mxu0  ;;  %v965_v54 = vand.u32 4294901760, %v964_v15 }
 0x15c   : > { %14671 = vst [vmem:[#allocation33_spill] sm:$0xff] %v10203_v57  ;;  %v1946_v1 = vpop.f32.mrf.mxu2  ;;  %v832_v18 = vadd.f32 %v9969_v38, %v831_v36  ;;  %v971_v12 = vand.u32 4294901760, %v970_v20  ;;  %v10214_v36 = vand.u32 4294901760, %v461_v50 }
 0x15d   : > { %1583 = vmatmul.f32.gmra.mxu1 %v10172_v42 }
 0x15e   : > { %v2462_v46 = vpop.f32.mrf.mxu3  ;;  %958 = vmatmul.f32.gmra.mxu0 %v957_v5  ;;  %v1521_v63 = vadd.f32 %v1520_v43, %v832_v18  ;;  %14674 = vst [vmem:[#allocation36_spill] sm:$0xff] %v10214_v36  ;;  %v272_v43 = vld [vmem:[%s9837_s7 + $0x160] sm:$0xff] }
 0x15f   : > { %v464_v21 = vsel %vm330_vm0, %v272_v43, 0 }
 0x160   : > { %v1947_v39 = vadd.f32 %v1946_v1, %v1521_v63  ;;  %v972_v1 = vsub.f32 %v970_v20, %v971_v12 }
 0x161   : > { %2030 = vmatmul.f32.gmra.mxu2 %v962_v58  ;;  %v978_v58 = vsub.f32 %v461_v50, %v10214_v36 }
 0x162   : > { %v1524_v14 = vpop.f32.mrf.mxu1  ;;  %v10212_v7 = vadd.f32 %v2462_v46, %v1947_v39  ;;  %v973_v15 = vand.u32 4294901760, %v972_v1 }
 0x163   : > { %2563 = vmatmul.f32.gmra.mxu3 %v963_v53  ;;  %v839_v55 = vpop.f32.mrf.mxu0 }
 0x164   : > { %14673 = vst [vmem:[#allocation35_spill] sm:$0xff] %v10212_v7  ;;  %v1951_v42 = vpop.f32.mrf.mxu2  ;;  %v840_v5 = vadd.f32 %v9969_v38, %v839_v55  ;;  %v979_v38 = vand.u32 4294901760, %v978_v58  ;;  %v10223_v55 = vand.u32 4294901760, %v464_v21 }
 0x165   : > { %1587 = vmatmul.f32.gmra.mxu1 %v10191_v49 }
 0x166   : > { %v2468_v13 = vpop.f32.mrf.mxu3  ;;  %966 = vmatmul.f32.gmra.mxu0 %v965_v54  ;;  %v1525_v18 = vadd.f32 %v1524_v14, %v840_v5  ;;  %14676 = vst [vmem:[#allocation38_spill] sm:$0xff] %v10223_v55  ;;  %v10228_v14 = vld [vmem:[%s14059_s2] ss:$0 sm:$0xff]  ;;  %v986_v5 = vsub.f32 %v464_v21, %v10223_v55 }
 0x168   : > { %v1952_v53 = vadd.f32 %v1951_v42, %v1525_v18  ;;  %v273_v42 = vld [vmem:[%s9837_s7 + $0x168] sm:$0xff] }
 0x169   : > { %2035 = vmatmul.f32.gmra.mxu2 %v970_v20  ;;  %v467_v43 = vsel %vm330_vm0, %v273_v42, 0 }
 0x16a   : > { %v1528_v46 = vpop.f32.mrf.mxu1  ;;  %v10221_v63 = vadd.f32 %v2468_v13, %v1952_v53 }
 0x16b   : > { %2569 = vmatmul.f32.gmra.mxu3 %v971_v12  ;;  %v847_v39 = vpop.f32.mrf.mxu0  ;;  %v980_v12 = vsub.f32 %v978_v58, %v979_v38 }
 0x16c   : > { %14675 = vst [vmem:[#allocation37_spill] sm:$0xff] %v10221_v63  ;;  %v1956_v49 = vpop.f32.mrf.mxu2  ;;  %v848_v50 = vadd.f32 %v10228_v14, %v847_v39  ;;  %v987_v39 = vand.u32 4294901760, %v986_v5  ;;  %v10237_v63 = vand.u32 4294901760, %v467_v43 }
 0x16d   : > { %1591 = vmatmul.f32.gmra.mxu1 %v10205_v35  ;;  %v981_v53 = vand.u32 4294901760, %v980_v12 }
 0x16e   : > { %v2474_v20 = vpop.f32.mrf.mxu3  ;;  %974 = vmatmul.f32.gmra.mxu0 %v973_v15  ;;  %v1529_v54 = vadd.f32 %v1528_v46, %v848_v50  ;;  %14678 = vst [vmem:[#allocation40_spill] sm:$0xff] %v10237_v63  ;;  %v274_v15 = vld [vmem:[%s9837_s7 + $0x170] sm:$0xff] }
 0x16f   : > { %v470_v42 = vsel %vm330_vm0, %v274_v15, 0 }
 0x170   : > { %v1957_v13 = vadd.f32 %v1956_v49, %v1529_v54  ;;  %v988_v49 = vsub.f32 %v986_v5, %v987_v39 }
 0x171   : > { %2040 = vmatmul.f32.gmra.mxu2 %v978_v58  ;;  %v994_v58 = vsub.f32 %v467_v43, %v10237_v63 }
 0x172   : > { %v1532_v18 = vpop.f32.mrf.mxu1  ;;  %v10235_v1 = vadd.f32 %v2474_v20, %v1957_v13  ;;  %v989_v12 = vand.u32 4294901760, %v988_v49  ;;  %v10246_v13 = vand.u32 4294901760, %v470_v42 }
 0x173   : > { %2575 = vmatmul.f32.gmra.mxu3 %v979_v38  ;;  %v855_v35 = vpop.f32.mrf.mxu0 }
 0x174   : > { %14677 = vst [vmem:[#allocation39_spill] sm:$0xff] %v10235_v1  ;;  %v1961_v7 = vpop.f32.mrf.mxu2  ;;  %v856_v46 = vadd.f32 %v10228_v14, %v855_v35  ;;  %v995_v35 = vand.u32 4294901760, %v994_v58 }
 0x175   : > { %1595 = vmatmul.f32.gmra.mxu1 %v10214_v36  ;;  %14680 = vst [vmem:[#allocation42_spill] sm:$0xff] %v10246_v13 }
 0x176   : > { %v2480_v21 = vpop.f32.mrf.mxu3  ;;  %982 = vmatmul.f32.gmra.mxu0 %v981_v53  ;;  %v1533_v50 = vadd.f32 %v1532_v18, %v856_v46  ;;  %v275_v53 = vld [vmem:[%s9837_s7 + $0x178] sm:$0xff] }
 0x177   : > { %v473_v15 = vsel %vm330_vm0, %v275_v53, 0 }
 0x178   : > { %v1962_v38 = vadd.f32 %v1961_v7, %v1533_v50  ;;  %v996_v7 = vsub.f32 %v994_v58, %v995_v35 }
 0x179   : > { %2045 = vmatmul.f32.gmra.mxu2 %v986_v5  ;;  %v1002_v5 = vsub.f32 %v470_v42, %v10246_v13 }
 0x17a   : > { %v1536_v20 = vpop.f32.mrf.mxu1  ;;  %v10244_v54 = vadd.f32 %v2480_v21, %v1962_v38  ;;  %v997_v49 = vand.u32 4294901760, %v996_v7  ;;  %v10255_v38 = vand.u32 4294901760, %v473_v15 }
 0x17b   : > { %2581 = vmatmul.f32.gmra.mxu3 %v987_v39  ;;  %v863_v36 = vpop.f32.mrf.mxu0 }
 0x17c   : > { %14679 = vst [vmem:[#allocation41_spill] sm:$0xff] %v10244_v54  ;;  %v1966_v1 = vpop.f32.mrf.mxu2  ;;  %v864_v18 = vadd.f32 %v10228_v14, %v863_v36  ;;  %v1003_v36 = vand.u32 4294901760, %v1002_v5 }
 0x17d   : > { %1599 = vmatmul.f32.gmra.mxu1 %v10223_v55  ;;  %14682 = vst [vmem:[#allocation44_spill] sm:$0xff] %v10255_v38 }
 0x17e   : > { %v2486_v43 = vpop.f32.mrf.mxu3  ;;  %990 = vmatmul.f32.gmra.mxu0 %v989_v12  ;;  %v1537_v46 = vadd.f32 %v1536_v20, %v864_v18  ;;  %v276_v12 = vld [vmem:[%s9837_s7 + $0x180] sm:$0xff] }
 0x17f   : > { %v476_v53 = vsel %vm330_vm0, %v276_v12, 0 }
 0x180   : > { %v1967_v39 = vadd.f32 %v1966_v1, %v1537_v46  ;;  %v1004_v1 = vsub.f32 %v1002_v5, %v1003_v36 }
 0x181   : > { %2050 = vmatmul.f32.gmra.mxu2 %v994_v58  ;;  %v1010_v58 = vsub.f32 %v473_v15, %v10255_v38 }
 0x182   : > { %v1540_v21 = vpop.f32.mrf.mxu1  ;;  %v10253_v50 = vadd.f32 %v2486_v43, %v1967_v39  ;;  %v1005_v7 = vand.u32 4294901760, %v1004_v1  ;;  %v10264_v39 = vand.u32 4294901760, %v476_v53 }
 0x183   : > { %2587 = vmatmul.f32.gmra.mxu3 %v995_v35  ;;  %v871_v55 = vpop.f32.mrf.mxu0 }
 0x184   : > { %14681 = vst [vmem:[#allocation43_spill] sm:$0xff] %v10253_v50  ;;  %v1971_v54 = vpop.f32.mrf.mxu2  ;;  %v872_v20 = vadd.f32 %v10228_v14, %v871_v55  ;;  %v1011_v55 = vand.u32 4294901760, %v1010_v58 }
 0x185   : > { %1603 = vmatmul.f32.gmra.mxu1 %v10237_v63  ;;  %14684 = vst [vmem:[#allocation46_spill] sm:$0xff] %v10264_v39 }
 0x186   : > { %v2492_v42 = vpop.f32.mrf.mxu3  ;;  %998 = vmatmul.f32.gmra.mxu0 %v997_v49  ;;  %v1541_v18 = vadd.f32 %v1540_v21, %v872_v20  ;;  %v277_v49 = vld [vmem:[%s9837_s7 + $0x188] sm:$0xff] }
 0x187   : > { %v479_v12 = vsel %vm330_vm0, %v277_v49, 0 }
 0x188   : > { %v1972_v35 = vadd.f32 %v1971_v54, %v1541_v18  ;;  %v1012_v54 = vsub.f32 %v1010_v58, %v1011_v55 }
 0x189   : > { %2055 = vmatmul.f32.gmra.mxu2 %v1002_v5  ;;  %v1018_v5 = vsub.f32 %v476_v53, %v10264_v39 }
 0x18a   : > { %v1544_v43 = vpop.f32.mrf.mxu1  ;;  %v10262_v46 = vadd.f32 %v2492_v42, %v1972_v35  ;;  %v1013_v1 = vand.u32 4294901760, %v1012_v54  ;;  %v10273_v35 = vand.u32 4294901760, %v479_v12 }
 0x18b   : > { %2593 = vmatmul.f32.gmra.mxu3 %v1003_v36  ;;  %v879_v63 = vpop.f32.mrf.mxu0 }
 0x18c   : > { %14683 = vst [vmem:[#allocation45_spill] sm:$0xff] %v10262_v46  ;;  %v1976_v50 = vpop.f32.mrf.mxu2  ;;  %v880_v21 = vadd.f32 %v10228_v14, %v879_v63  ;;  %v1019_v63 = vand.u32 4294901760, %v1018_v5 }
 0x18d   : > { %1607 = vmatmul.f32.gmra.mxu1 %v10246_v13  ;;  %14686 = vst [vmem:[#allocation48_spill] sm:$0xff] %v10273_v35 }
 0x18e   : > { %v2498_v15 = vpop.f32.mrf.mxu3  ;;  %1006 = vmatmul.f32.gmra.mxu0 %v1005_v7  ;;  %v1545_v20 = vadd.f32 %v1544_v43, %v880_v21  ;;  %v278_v7 = vld [vmem:[%s9837_s7 + $0x190] sm:$0xff] }
 0x18f   : > { %v482_v49 = vsel %vm330_vm0, %v278_v7, 0 }
 0x190   : > { %v1977_v36 = vadd.f32 %v1976_v50, %v1545_v20  ;;  %v1020_v50 = vsub.f32 %v1018_v5, %v1019_v63 }
 0x191   : > { %2060 = vmatmul.f32.gmra.mxu2 %v1010_v58  ;;  %v1026_v58 = vsub.f32 %v479_v12, %v10273_v35 }
 0x192   : > { %v1548_v42 = vpop.f32.mrf.mxu1  ;;  %v10271_v18 = vadd.f32 %v2498_v15, %v1977_v36  ;;  %v1021_v54 = vand.u32 4294901760, %v1020_v50  ;;  %v10282_v36 = vand.u32 4294901760, %v482_v49 }
 0x193   : > { %2599 = vmatmul.f32.gmra.mxu3 %v1011_v55  ;;  %v887_v13 = vpop.f32.mrf.mxu0 }
 0x194   : > { %14685 = vst [vmem:[#allocation47_spill] sm:$0xff] %v10271_v18  ;;  %v1981_v46 = vpop.f32.mrf.mxu2  ;;  %v888_v43 = vadd.f32 %v10228_v14, %v887_v13  ;;  %v1027_v13 = vand.u32 4294901760, %v1026_v58 }
 0x195   : > { %1611 = vmatmul.f32.gmra.mxu1 %v10255_v38  ;;  %14688 = vst [vmem:[#allocation50_spill] sm:$0xff] %v10282_v36 }
 0x196   : > { %v2504_v53 = vpop.f32.mrf.mxu3  ;;  %1014 = vmatmul.f32.gmra.mxu0 %v1013_v1  ;;  %v1549_v21 = vadd.f32 %v1548_v42, %v888_v43  ;;  %v279_v1 = vld [vmem:[%s9837_s7 + $0x198] sm:$0xff] }
 0x197   : > { %v485_v7 = vsel %vm330_vm0, %v279_v1, 0 }
 0x198   : > { %v1982_v55 = vadd.f32 %v1981_v46, %v1549_v21  ;;  %v1028_v46 = vsub.f32 %v1026_v58, %v1027_v13 }
 0x199   : > { %2065 = vmatmul.f32.gmra.mxu2 %v1018_v5  ;;  %v1034_v5 = vsub.f32 %v482_v49, %v10282_v36 }
 0x19a   : > { %v1552_v15 = vpop.f32.mrf.mxu1  ;;  %v10280_v20 = vadd.f32 %v2504_v53, %v1982_v55  ;;  %v1029_v50 = vand.u32 4294901760, %v1028_v46  ;;  %v10291_v55 = vand.u32 4294901760, %v485_v7 }
 0x19b   : > { %2605 = vmatmul.f32.gmra.mxu3 %v1019_v63  ;;  %v895_v38 = vpop.f32.mrf.mxu0 }
 0x19c   : > { %14687 = vst [vmem:[#allocation49_spill] sm:$0xff] %v10280_v20  ;;  %v1986_v18 = vpop.f32.mrf.mxu2  ;;  %v896_v42 = vadd.f32 %v10228_v14, %v895_v38  ;;  %v1035_v38 = vand.u32 4294901760, %v1034_v5 }
 0x19d   : > { %1615 = vmatmul.f32.gmra.mxu1 %v10264_v39  ;;  %14690 = vst [vmem:[#allocation52_spill] sm:$0xff] %v10291_v55 }
 0x19e   : > { %v2510_v12 = vpop.f32.mrf.mxu3  ;;  %1022 = vmatmul.f32.gmra.mxu0 %v1021_v54  ;;  %v1553_v43 = vadd.f32 %v1552_v15, %v896_v42  ;;  %v280_v54 = vld [vmem:[%s9837_s7 + $0x1a0] sm:$0xff] }
 0x19f   : > { %v488_v1 = vsel %vm330_vm0, %v280_v54, 0 }
 0x1a0   : > { %v1987_v63 = vadd.f32 %v1986_v18, %v1553_v43  ;;  %v1036_v18 = vsub.f32 %v1034_v5, %v1035_v38 }
 0x1a1   : > { %2070 = vmatmul.f32.gmra.mxu2 %v1026_v58  ;;  %v1042_v58 = vsub.f32 %v485_v7, %v10291_v55 }
 0x1a2   : > { %v1556_v53 = vpop.f32.mrf.mxu1  ;;  %v10289_v21 = vadd.f32 %v2510_v12, %v1987_v63  ;;  %v1037_v46 = vand.u32 4294901760, %v1036_v18  ;;  %v10300_v63 = vand.u32 4294901760, %v488_v1 }
 0x1a3   : > { %2611 = vmatmul.f32.gmra.mxu3 %v1027_v13  ;;  %v903_v39 = vpop.f32.mrf.mxu0 }
 0x1a4   : > { %14689 = vst [vmem:[#allocation51_spill] sm:$0xff] %v10289_v21  ;;  %v1991_v20 = vpop.f32.mrf.mxu2  ;;  %v904_v15 = vadd.f32 %v10228_v14, %v903_v39  ;;  %v1043_v39 = vand.u32 4294901760, %v1042_v58 }
 0x1a5   : > { %1619 = vmatmul.f32.gmra.mxu1 %v10273_v35  ;;  %14692 = vst [vmem:[#allocation54_spill] sm:$0xff] %v10300_v63 }
 0x1a6   : > { %v2516_v49 = vpop.f32.mrf.mxu3  ;;  %1030 = vmatmul.f32.gmra.mxu0 %v1029_v50  ;;  %v1557_v42 = vadd.f32 %v1556_v53, %v904_v15  ;;  %v281_v50 = vld [vmem:[%s9837_s7 + $0x1a8] sm:$0xff] }
 0x1a7   : > { %v491_v54 = vsel %vm330_vm0, %v281_v50, 0 }
 0x1a8   : > { %v1992_v13 = vadd.f32 %v1991_v20, %v1557_v42  ;;  %v1044_v20 = vsub.f32 %v1042_v58, %v1043_v39 }
 0x1a9   : > { %2075 = vmatmul.f32.gmra.mxu2 %v1034_v5  ;;  %v1050_v5 = vsub.f32 %v488_v1, %v10300_v63 }
 0x1aa   : > { %v1560_v12 = vpop.f32.mrf.mxu1  ;;  %v10298_v43 = vadd.f32 %v2516_v49, %v1992_v13  ;;  %v1045_v18 = vand.u32 4294901760, %v1044_v20  ;;  %v10309_v13 = vand.u32 4294901760, %v491_v54 }
 0x1ab   : > { %2617 = vmatmul.f32.gmra.mxu3 %v1035_v38  ;;  %v911_v35 = vpop.f32.mrf.mxu0 }
 0x1ac   : > { %14691 = vst [vmem:[#allocation53_spill] sm:$0xff] %v10298_v43  ;;  %v1996_v21 = vpop.f32.mrf.mxu2  ;;  %v912_v53 = vadd.f32 %v10228_v14, %v911_v35  ;;  %v1051_v35 = vand.u32 4294901760, %v1050_v5 }
 0x1ad   : > { %1623 = vmatmul.f32.gmra.mxu1 %v10282_v36  ;;  %14694 = vst [vmem:[#allocation56_spill] sm:$0xff] %v10309_v13 }
 0x1ae   : > { %v2522_v7 = vpop.f32.mrf.mxu3  ;;  %1038 = vmatmul.f32.gmra.mxu0 %v1037_v46  ;;  %v1561_v15 = vadd.f32 %v1560_v12, %v912_v53  ;;  %v282_v46 = vld [vmem:[%s9837_s7 + $0x1b0] sm:$0xff] }
 0x1af   : > { %v494_v50 = vsel %vm330_vm0, %v282_v46, 0 }
 0x1b0   : > { %v1997_v38 = vadd.f32 %v1996_v21, %v1561_v15  ;;  %v1052_v21 = vsub.f32 %v1050_v5, %v1051_v35 }
 0x1b1   : > { %2080 = vmatmul.f32.gmra.mxu2 %v1042_v58  ;;  %v1058_v58 = vsub.f32 %v491_v54, %v10309_v13 }
 0x1b2   : > { %v1564_v49 = vpop.f32.mrf.mxu1  ;;  %v10307_v42 = vadd.f32 %v2522_v7, %v1997_v38  ;;  %v1053_v20 = vand.u32 4294901760, %v1052_v21  ;;  %v10318_v38 = vand.u32 4294901760, %v494_v50 }
 0x1b3   : > { %2623 = vmatmul.f32.gmra.mxu3 %v1043_v39  ;;  %v919_v36 = vpop.f32.mrf.mxu0 }
 0x1b4   : > { %14693 = vst [vmem:[#allocation55_spill] sm:$0xff] %v10307_v42  ;;  %v2001_v43 = vpop.f32.mrf.mxu2  ;;  %v920_v12 = vadd.f32 %v10228_v14, %v919_v36  ;;  %v1059_v36 = vand.u32 4294901760, %v1058_v58 }
 0x1b5   : > { %1627 = vmatmul.f32.gmra.mxu1 %v10291_v55  ;;  %14696 = vst [vmem:[#allocation58_spill] sm:$0xff] %v10318_v38 }
 0x1b6   : > { %v2528_v1 = vpop.f32.mrf.mxu3  ;;  %1046 = vmatmul.f32.gmra.mxu0 %v1045_v18  ;;  %v1565_v53 = vadd.f32 %v1564_v49, %v920_v12  ;;  %v283_v18 = vld [vmem:[%s9837_s7 + $0x1b8] sm:$0xff] }
 0x1b7   : > { %v497_v46 = vsel %vm330_vm0, %v283_v18, 0 }
 0x1b8   : > { %v2002_v39 = vadd.f32 %v2001_v43, %v1565_v53  ;;  %v1060_v43 = vsub.f32 %v1058_v58, %v1059_v36 }
 0x1b9   : > { %2085 = vmatmul.f32.gmra.mxu2 %v1050_v5  ;;  %v1066_v5 = vsub.f32 %v494_v50, %v10318_v38 }
 0x1ba   : > { %v1568_v7 = vpop.f32.mrf.mxu1  ;;  %v10316_v15 = vadd.f32 %v2528_v1, %v2002_v39  ;;  %v1061_v21 = vand.u32 4294901760, %v1060_v43  ;;  %v10327_v39 = vand.u32 4294901760, %v497_v46 }
 0x1bb   : > { %2629 = vmatmul.f32.gmra.mxu3 %v1051_v35  ;;  %v927_v55 = vpop.f32.mrf.mxu0 }
 0x1bc   : > { %14695 = vst [vmem:[#allocation57_spill] sm:$0xff] %v10316_v15  ;;  %v2006_v42 = vpop.f32.mrf.mxu2  ;;  %v928_v49 = vadd.f32 %v10228_v14, %v927_v55  ;;  %v1067_v55 = vand.u32 4294901760, %v1066_v5 }
 0x1bd   : > { %1631 = vmatmul.f32.gmra.mxu1 %v10300_v63  ;;  %14698 = vst [vmem:[#allocation60_spill] sm:$0xff] %v10327_v39 }
 0x1be   : > { %v2534_v54 = vpop.f32.mrf.mxu3  ;;  %1054 = vmatmul.f32.gmra.mxu0 %v1053_v20  ;;  %v1569_v12 = vadd.f32 %v1568_v7, %v928_v49  ;;  %v284_v20 = vld [vmem:[%s9837_s7 + $0x1c0] sm:$0xff] }
 0x1bf   : > { %v500_v18 = vsel %vm330_vm0, %v284_v20, 0 }
 0x1c0   : > { %v2007_v35 = vadd.f32 %v2006_v42, %v1569_v12  ;;  %v1068_v42 = vsub.f32 %v1066_v5, %v1067_v55 }
 0x1c1   : > { %2090 = vmatmul.f32.gmra.mxu2 %v1058_v58  ;;  %v1074_v58 = vsub.f32 %v497_v46, %v10327_v39 }
 0x1c2   : > { %v1572_v1 = vpop.f32.mrf.mxu1  ;;  %v10325_v53 = vadd.f32 %v2534_v54, %v2007_v35  ;;  %v1069_v43 = vand.u32 4294901760, %v1068_v42  ;;  %v10336_v35 = vand.u32 4294901760, %v500_v18 }
 0x1c3   : > { %2635 = vmatmul.f32.gmra.mxu3 %v1059_v36  ;;  %v935_v63 = vpop.f32.mrf.mxu0 }
 0x1c4   : > { %14697 = vst [vmem:[#allocation59_spill] sm:$0xff] %v10325_v53  ;;  %v2011_v15 = vpop.f32.mrf.mxu2  ;;  %v936_v7 = vadd.f32 %v10228_v14, %v935_v63  ;;  %v1075_v63 = vand.u32 4294901760, %v1074_v58 }
 0x1c5   : > { %1635 = vmatmul.f32.gmra.mxu1 %v10309_v13  ;;  %14700 = vst [vmem:[#allocation62_spill] sm:$0xff] %v10336_v35 }
 0x1c6   : > { %v2540_v50 = vpop.f32.mrf.mxu3  ;;  %1062 = vmatmul.f32.gmra.mxu0 %v1061_v21  ;;  %v1573_v49 = vadd.f32 %v1572_v1, %v936_v7  ;;  %v285_v21 = vld [vmem:[%s9837_s7 + $0x1c8] sm:$0xff] }
 0x1c7   : > { %v503_v20 = vsel %vm330_vm0, %v285_v21, 0 }
 0x1c8   : > { %v2012_v36 = vadd.f32 %v2011_v15, %v1573_v49  ;;  %v1076_v15 = vsub.f32 %v1074_v58, %v1075_v63 }
 0x1c9   : > { %2095 = vmatmul.f32.gmra.mxu2 %v1066_v5  ;;  %v1082_v5 = vsub.f32 %v500_v18, %v10336_v35 }
 0x1ca   : > { %v1576_v54 = vpop.f32.mrf.mxu1  ;;  %v10334_v12 = vadd.f32 %v2540_v50, %v2012_v36  ;;  %v1077_v42 = vand.u32 4294901760, %v1076_v15  ;;  %v10345_v36 = vand.u32 4294901760, %v503_v20 }
 0x1cb   : > { %2641 = vmatmul.f32.gmra.mxu3 %v1067_v55  ;;  %v943_v13 = vpop.f32.mrf.mxu0 }
 0x1cc   : > { %14699 = vst [vmem:[#allocation61_spill] sm:$0xff] %v10334_v12  ;;  %v2016_v53 = vpop.f32.mrf.mxu2  ;;  %v944_v1 = vadd.f32 %v10228_v14, %v943_v13  ;;  %v1083_v13 = vand.u32 4294901760, %v1082_v5 }
 0x1cd   : > { %1639 = vmatmul.f32.gmra.mxu1 %v10318_v38  ;;  %14702 = vst [vmem:[#allocation64_spill] sm:$0xff] %v10345_v36 }
 0x1ce   : > { %v2546_v46 = vpop.f32.mrf.mxu3  ;;  %1070 = vmatmul.f32.gmra.mxu0 %v1069_v43  ;;  %v1577_v7 = vadd.f32 %v1576_v54, %v944_v1  ;;  %v286_v43 = vld [vmem:[%s9837_s7 + $0x1d0] sm:$0xff] }
 0x1cf   : > { %v506_v21 = vsel %vm330_vm0, %v286_v43, 0 }
 0x1d0   : > { %v2017_v55 = vadd.f32 %v2016_v53, %v1577_v7  ;;  %v1084_v53 = vsub.f32 %v1082_v5, %v1083_v13 }
 0x1d1   : > { %2100 = vmatmul.f32.gmra.mxu2 %v1074_v58  ;;  %v1090_v58 = vsub.f32 %v503_v20, %v10345_v36 }
 0x1d2   : > { %v1580_v50 = vpop.f32.mrf.mxu1  ;;  %v10343_v49 = vadd.f32 %v2546_v46, %v2017_v55  ;;  %v1085_v15 = vand.u32 4294901760, %v1084_v53  ;;  %v10354_v55 = vand.u32 4294901760, %v506_v21 }
 0x1d3   : > { %2647 = vmatmul.f32.gmra.mxu3 %v1075_v63  ;;  %v951_v38 = vpop.f32.mrf.mxu0 }
 0x1d4   : > { %14701 = vst [vmem:[#allocation63_spill] sm:$0xff] %v10343_v49  ;;  %v2021_v12 = vpop.f32.mrf.mxu2  ;;  %v952_v54 = vadd.f32 %v10228_v14, %v951_v38  ;;  %v1091_v38 = vand.u32 4294901760, %v1090_v58 }
 0x1d5   : > { %1643 = vmatmul.f32.gmra.mxu1 %v10327_v39  ;;  %14704 = vst [vmem:[#allocation66_spill] sm:$0xff] %v10354_v55 }
 0x1d6   : > { %v2552_v18 = vpop.f32.mrf.mxu3  ;;  %1078 = vmatmul.f32.gmra.mxu0 %v1077_v42  ;;  %v1581_v1 = vadd.f32 %v1580_v50, %v952_v54  ;;  %v287_v42 = vld [vmem:[%s9837_s7 + $0x1d8] sm:$0xff] }
 0x1d7   : > { %v509_v43 = vsel %vm330_vm0, %v287_v42, 0 }
 0x1d8   : > { %v2022_v63 = vadd.f32 %v2021_v12, %v1581_v1  ;;  %v1092_v12 = vsub.f32 %v1090_v58, %v1091_v38 }
 0x1d9   : > { %2105 = vmatmul.f32.gmra.mxu2 %v1082_v5  ;;  %v1098_v5 = vsub.f32 %v506_v21, %v10354_v55 }
 0x1da   : > { %v1584_v46 = vpop.f32.mrf.mxu1  ;;  %v10352_v7 = vadd.f32 %v2552_v18, %v2022_v63  ;;  %v1093_v53 = vand.u32 4294901760, %v1092_v12  ;;  %v10363_v63 = vand.u32 4294901760, %v509_v43 }
 0x1db   : > { %2653 = vmatmul.f32.gmra.mxu3 %v1083_v13  ;;  %v959_v39 = vpop.f32.mrf.mxu0 }
 0x1dc   : > { %14703 = vst [vmem:[#allocation65_spill] sm:$0xff] %v10352_v7  ;;  %v2026_v49 = vpop.f32.mrf.mxu2  ;;  %v960_v50 = vadd.f32 %v10228_v14, %v959_v39  ;;  %v1099_v39 = vand.u32 4294901760, %v1098_v5 }
 0x1dd   : > { %1647 = vmatmul.f32.gmra.mxu1 %v10336_v35  ;;  %14706 = vst [vmem:[#allocation68_spill] sm:$0xff] %v10363_v63 }
 0x1de   : > { %v2558_v20 = vpop.f32.mrf.mxu3  ;;  %1086 = vmatmul.f32.gmra.mxu0 %v1085_v15  ;;  %v1585_v54 = vadd.f32 %v1584_v46, %v960_v50  ;;  %v288_v15 = vld [vmem:[%s9837_s7 + $0x1e0] sm:$0xff] }
 0x1df   : > { %v512_v42 = vsel %vm330_vm0, %v288_v15, 0 }
 0x1e0   : > { %v2027_v13 = vadd.f32 %v2026_v49, %v1585_v54  ;;  %v1100_v49 = vsub.f32 %v1098_v5, %v1099_v39 }
 0x1e1   : > { %2110 = vmatmul.f32.gmra.mxu2 %v1090_v58  ;;  %v1106_v58 = vsub.f32 %v509_v43, %v10363_v63 }
 0x1e2   : > { %v1588_v18 = vpop.f32.mrf.mxu1  ;;  %v10361_v1 = vadd.f32 %v2558_v20, %v2027_v13  ;;  %v1101_v12 = vand.u32 4294901760, %v1100_v49  ;;  %v10372_v13 = vand.u32 4294901760, %v512_v42 }
 0x1e3   : > { %2659 = vmatmul.f32.gmra.mxu3 %v1091_v38  ;;  %v967_v35 = vpop.f32.mrf.mxu0 }
 0x1e4   : > { %14705 = vst [vmem:[#allocation67_spill] sm:$0xff] %v10361_v1  ;;  %v2031_v7 = vpop.f32.mrf.mxu2  ;;  %v968_v46 = vadd.f32 %v10228_v14, %v967_v35  ;;  %v1107_v35 = vand.u32 4294901760, %v1106_v58 }
 0x1e5   : > { %1651 = vmatmul.f32.gmra.mxu1 %v10345_v36  ;;  %14708 = vst [vmem:[#allocation70_spill] sm:$0xff] %v10372_v13 }
 0x1e6   : > { %v2564_v21 = vpop.f32.mrf.mxu3  ;;  %1094 = vmatmul.f32.gmra.mxu0 %v1093_v53  ;;  %v1589_v50 = vadd.f32 %v1588_v18, %v968_v46  ;;  %v289_v53 = vld [vmem:[%s9837_s7 + $0x1e8] sm:$0xff] }
 0x1e7   : > { %v515_v15 = vsel %vm330_vm0, %v289_v53, 0 }
 0x1e8   : > { %v2032_v38 = vadd.f32 %v2031_v7, %v1589_v50  ;;  %v1108_v7 = vsub.f32 %v1106_v58, %v1107_v35 }
 0x1e9   : > { %2115 = vmatmul.f32.gmra.mxu2 %v1098_v5  ;;  %v1114_v5 = vsub.f32 %v512_v42, %v10372_v13 }
 0x1ea   : > { %v1592_v20 = vpop.f32.mrf.mxu1  ;;  %v10370_v54 = vadd.f32 %v2564_v21, %v2032_v38  ;;  %v1109_v49 = vand.u32 4294901760, %v1108_v7  ;;  %v10381_v38 = vand.u32 4294901760, %v515_v15 }
 0x1eb   : > { %2665 = vmatmul.f32.gmra.mxu3 %v1099_v39  ;;  %v975_v36 = vpop.f32.mrf.mxu0 }
 0x1ec   : > { %14707 = vst [vmem:[#allocation69_spill] sm:$0xff] %v10370_v54  ;;  %v2036_v1 = vpop.f32.mrf.mxu2  ;;  %v976_v18 = vadd.f32 %v10228_v14, %v975_v36  ;;  %v1115_v36 = vand.u32 4294901760, %v1114_v5 }
 0x1ed   : > { %1655 = vmatmul.f32.gmra.mxu1 %v10354_v55  ;;  %14710 = vst [vmem:[#allocation72_spill] sm:$0xff] %v10381_v38 }
 0x1ee   : > { %v2570_v43 = vpop.f32.mrf.mxu3  ;;  %1102 = vmatmul.f32.gmra.mxu0 %v1101_v12  ;;  %v1593_v46 = vadd.f32 %v1592_v20, %v976_v18  ;;  %v290_v12 = vld [vmem:[%s9837_s7 + $0x1f0] sm:$0xff] }
 0x1ef   : > { %v518_v53 = vsel %vm330_vm0, %v290_v12, 0 }
 0x1f0   : > { %v2037_v39 = vadd.f32 %v2036_v1, %v1593_v46  ;;  %v1116_v1 = vsub.f32 %v1114_v5, %v1115_v36 }
 0x1f1   : > { %2120 = vmatmul.f32.gmra.mxu2 %v1106_v58  ;;  %v1122_v58 = vsub.f32 %v515_v15, %v10381_v38 }
 0x1f2   : > { %v1596_v21 = vpop.f32.mrf.mxu1  ;;  %v10379_v50 = vadd.f32 %v2570_v43, %v2037_v39  ;;  %v1117_v7 = vand.u32 4294901760, %v1116_v1  ;;  %v10390_v39 = vand.u32 4294901760, %v518_v53 }
 0x1f3   : > { %2671 = vmatmul.f32.gmra.mxu3 %v1107_v35  ;;  %v983_v55 = vpop.f32.mrf.mxu0 }
 0x1f4   : > { %14709 = vst [vmem:[#allocation71_spill] sm:$0xff] %v10379_v50  ;;  %v2041_v54 = vpop.f32.mrf.mxu2  ;;  %v984_v20 = vadd.f32 %v10228_v14, %v983_v55  ;;  %v1123_v55 = vand.u32 4294901760, %v1122_v58 }
 0x1f5   : > { %1659 = vmatmul.f32.gmra.mxu1 %v10363_v63  ;;  %14712 = vst [vmem:[#allocation74_spill] sm:$0xff] %v10390_v39 }
 0x1f6   : > { %v2576_v42 = vpop.f32.mrf.mxu3  ;;  %1110 = vmatmul.f32.gmra.mxu0 %v1109_v49  ;;  %v1597_v18 = vadd.f32 %v1596_v21, %v984_v20  ;;  %v291_v49 = vld [vmem:[%s9837_s7 + $0x1f8] sm:$0xff] }
 0x1f7   : > { %v521_v12 = vsel %vm330_vm0, %v291_v49, 0 }
 0x1f8   : > { %v2042_v35 = vadd.f32 %v2041_v54, %v1597_v18  ;;  %v1124_v54 = vsub.f32 %v1122_v58, %v1123_v55 }
 0x1f9   : > { %2125 = vmatmul.f32.gmra.mxu2 %v1114_v5  ;;  %v1130_v5 = vsub.f32 %v518_v53, %v10390_v39 }
 0x1fa   : > { %v1600_v43 = vpop.f32.mrf.mxu1  ;;  %v10388_v46 = vadd.f32 %v2576_v42, %v2042_v35  ;;  %v1125_v1 = vand.u32 4294901760, %v1124_v54  ;;  %v10399_v35 = vand.u32 4294901760, %v521_v12 }
 0x1fb   : > { %2677 = vmatmul.f32.gmra.mxu3 %v1115_v36  ;;  %v991_v63 = vpop.f32.mrf.mxu0 }
 0x1fc   : > { %14711 = vst [vmem:[#allocation73_spill] sm:$0xff] %v10388_v46  ;;  %v2046_v50 = vpop.f32.mrf.mxu2  ;;  %v992_v21 = vadd.f32 %v10228_v14, %v991_v63  ;;  %v1131_v63 = vand.u32 4294901760, %v1130_v5 }
 0x1fd   : > { %1663 = vmatmul.f32.gmra.mxu1 %v10372_v13  ;;  %14714 = vst [vmem:[#allocation76_spill] sm:$0xff] %v10399_v35 }
 0x1fe   : > { %v2582_v15 = vpop.f32.mrf.mxu3  ;;  %1118 = vmatmul.f32.gmra.mxu0 %v1117_v7  ;;  %v1601_v20 = vadd.f32 %v1600_v43, %v992_v21  ;;  %v292_v7 = vld [vmem:[%s9837_s7 + $0x200] sm:$0xff] }
 0x1ff   : > { %v524_v49 = vsel %vm330_vm0, %v292_v7, 0 }
 0x200   : > { %v2047_v36 = vadd.f32 %v2046_v50, %v1601_v20  ;;  %v1132_v50 = vsub.f32 %v1130_v5, %v1131_v63 }
 0x201   : > { %2130 = vmatmul.f32.gmra.mxu2 %v1122_v58  ;;  %v1138_v58 = vsub.f32 %v521_v12, %v10399_v35 }
 0x202   : > { %v1604_v42 = vpop.f32.mrf.mxu1  ;;  %v10397_v18 = vadd.f32 %v2582_v15, %v2047_v36  ;;  %v1133_v54 = vand.u32 4294901760, %v1132_v50  ;;  %v10408_v36 = vand.u32 4294901760, %v524_v49 }
 0x203   : > { %2683 = vmatmul.f32.gmra.mxu3 %v1123_v55  ;;  %v999_v13 = vpop.f32.mrf.mxu0 }
 0x204   : > { %14713 = vst [vmem:[#allocation75_spill] sm:$0xff] %v10397_v18  ;;  %v2051_v46 = vpop.f32.mrf.mxu2  ;;  %v1000_v43 = vadd.f32 %v10228_v14, %v999_v13  ;;  %v1139_v13 = vand.u32 4294901760, %v1138_v58  ;;  %v1146_v50 = vsub.f32 %v524_v49, %v10408_v36 }
 0x205   : > { %1667 = vmatmul.f32.gmra.mxu1 %v10381_v38  ;;  %14716 = vst [vmem:[#allocation78_spill] sm:$0xff] %v10408_v36 }
 0x206   : > { %v2588_v53 = vpop.f32.mrf.mxu3  ;;  %1126 = vmatmul.f32.gmra.mxu0 %v1125_v1  ;;  %v1605_v21 = vadd.f32 %v1604_v42, %v1000_v43  ;;  %v3776_v42 = vld [vmem:[%s14060_s3 + $0x8] sm:$0xff] }
 0x207   : > { %v10413_v12 = vand.u32 4294901760, %v3776_v42 }
 0x208   : > { %v2052_v55 = vadd.f32 %v2051_v46, %v1605_v21  ;;  %v293_v46 = vld [vmem:[%s9837_s7 + $0x208] sm:$0xff]  ;;  %v1140_v21 = vsub.f32 %v1138_v58, %v1139_v13 }
 0x209   : > { %2135 = vmatmul.f32.gmra.mxu2 %v1130_v5  ;;  %5763 = vmatpush.msra.mxu1 %v10413_v12 }
 0x20a   : > { %v1608_v15 = vpop.f32.mrf.mxu1  ;;  %v10406_v20 = vadd.f32 %v2588_v53, %v2052_v55  ;;  %4082 = vmatpush.msrb.mxu2 %v10413_v12  ;;  %v527_v55 = vsel %vm330_vm0, %v293_v46, 0 }
 0x20b   : > { %2689 = vmatmul.f32.gmra.mxu3 %v1131_v63  ;;  %v1007_v1 = vpop.f32.mrf.mxu0  ;;  %v10420_v63 = vsub.f32 %v3776_v42, %v10413_v12  ;;  %v10432_v49 = vand.u32 4294901760, %v527_v55 }
 0x20c   : > { %14715 = vst [vmem:[#allocation77_spill] sm:$0xff] %v10406_v20  ;;  %v2056_v43 = vpop.f32.mrf.mxu2  ;;  %v1008_v7 = vadd.f32 %v10228_v14, %v1007_v1 }
 0x20d   : > { %1671 = vmatmul.f32.gmra.mxu1 %v10390_v39  ;;  %v14141_v1 = vand.u32 4294901760, %v10420_v63  ;;  %5271 = vmatpush.msra.mxu0 %v10420_v63  ;;  %14718 = vst [vmem:[#allocation80_spill] sm:$0xff] %v10432_v49 }
 0x20e   : > { %v2594_v5 = vpop.f32.mrf.mxu3  ;;  %1134 = vmatmul.f32.gmra.mxu0 %v1133_v54  ;;  %v1609_v53 = vadd.f32 %v1608_v15, %v1008_v7  ;;  %v1141_v15 = vand.u32 4294901760, %v1140_v21  ;;  %v1147_v54 = vand.u32 4294901760, %v1146_v50 }
 0x20f   : > { %v4865_v42 = vsub.f32 %v10420_v63, %v14141_v1 }
 0x210   : > { %v2057_v39 = vadd.f32 %v2056_v43, %v1609_v53 }
 0x211   : > { %2140 = vmatmul.f32.gmra.mxu2 %v1138_v58  ;;  %v4866_v18 = vand.u32 4294901760, %v4865_v42  ;;  %v294_v58 = vld [vmem:[%s9837_s7 + $0x210] sm:$0xff] }
 0x212   : > { %v1612_v38 = vpop.f32.mrf.mxu1  ;;  %v10430_v20 = vadd.f32 %v2594_v5, %v2057_v39  ;;  %v1148_v39 = vsub.f32 %v1146_v50, %v1147_v54  ;;  %v1154_v5 = vsub.f32 %v527_v55, %v10432_v49 }
 0x213   : > { %2695 = vmatmul.f32.gmra.mxu3 %v1139_v13  ;;  %v1015_v7 = vpop.f32.mrf.mxu0  ;;  %v530_v13 = vsel %vm330_vm0, %v294_v58, 0 }
 0x214   : > { %14717 = vst [vmem:[#allocation79_spill] sm:$0xff] %v10430_v20  ;;  %v2061_v46 = vpop.f32.mrf.mxu2  ;;  %v1016_v57 = vadd.f32 %v10228_v14, %v1015_v7  ;;  %4867 = vmatpush.msrb.mxu3 %v4866_v18  ;;  %v1149_v42 = vand.u32 4294901760, %v1148_v39  ;;  %v1155_v7 = vand.u32 4294901760, %v1154_v5 }
 0x215   : > { %1675 = vmatmul.f32.gmra.mxu1 %v10399_v35  ;;  %v10441_v35 = vand.u32 4294901760, %v530_v13 }
 0x216   : > { %v2600_v43 = vpop.f32.mrf.mxu3  ;;  %1142 = vmatmul.f32.gmra.mxu0 %v1141_v15  ;;  %v1613_v53 = vadd.f32 %v1612_v38, %v1016_v57  ;;  %v295_v38 = vld [vmem:[%s9837_s7 + $0x218] sm:$0xff] }
 0x217   : > { %14720 = vst [vmem:[#allocation82_spill] sm:$0xff] %v10441_v35  ;;  %v533_v58 = vsel %vm330_vm0, %v295_v38, 0 }
 0x218   : > { %v2062_v21 = vadd.f32 %v2061_v46, %v1613_v53  ;;  %v1162_v46 = vsub.f32 %v530_v13, %v10441_v35 }
 0x219   : > { %2145 = vmatmul.f32.gmra.mxu2 %v1146_v50  ;;  %v1156_v50 = vsub.f32 %v1154_v5, %v1155_v7 }
 0x21a   : > { %v1616_v1 = vpop.f32.mrf.mxu1  ;;  %v10439_v20 = vadd.f32 %v2600_v43, %v2062_v21  ;;  %v10450_v21 = vand.u32 4294901760, %v533_v58 }
 0x21b   : > { %2701 = vmatmul.f32.gmra.mxu3 %v1147_v54  ;;  %v1023_v10 = vpop.f32.mrf.mxu0  ;;  %v1157_v39 = vand.u32 4294901760, %v1156_v50 }
 0x21c   : > { %14719 = vst [vmem:[#allocation81_spill] sm:$0xff] %v10439_v20  ;;  %v2066_v18 = vpop.f32.mrf.mxu2  ;;  %v1024_v57 = vadd.f32 %v10228_v14, %v1023_v10  ;;  %v1163_v10 = vand.u32 4294901760, %v1162_v46 }
 0x21d   : > { %1679 = vmatmul.f32.gmra.mxu1 %v10408_v36  ;;  %14722 = vst [vmem:[#allocation84_spill] sm:$0xff] %v10450_v21 }
 0x21e   : > { %v2606_v55 = vpop.f32.mrf.mxu3  ;;  %1150 = vmatmul.f32.gmra.mxu0 %v1149_v42  ;;  %v1617_v15 = vadd.f32 %v1616_v1, %v1024_v57  ;;  %v296_v42 = vld [vmem:[%s9837_s7 + $0x220] sm:$0xff] }
 0x21f   : > { %v536_v38 = vsel %vm330_vm0, %v296_v42, 0 }
 0x220   : > { %v2067_v54 = vadd.f32 %v2066_v18, %v1617_v15  ;;  %v1170_v18 = vsub.f32 %v533_v58, %v10450_v21 }
 0x221   : > { %2150 = vmatmul.f32.gmra.mxu2 %v1154_v5  ;;  %v1164_v5 = vsub.f32 %v1162_v46, %v1163_v10 }
 0x222   : > { %v1620_v43 = vpop.f32.mrf.mxu1  ;;  %v10448_v53 = vadd.f32 %v2606_v55, %v2067_v54  ;;  %v10459_v54 = vand.u32 4294901760, %v536_v38 }
 0x223   : > { %2707 = vmatmul.f32.gmra.mxu3 %v1155_v7  ;;  %v1031_v36 = vpop.f32.mrf.mxu0  ;;  %v1165_v50 = vand.u32 4294901760, %v1164_v5 }
 0x224   : > { %14721 = vst [vmem:[#allocation83_spill] sm:$0xff] %v10448_v53  ;;  %v2071_v20 = vpop.f32.mrf.mxu2  ;;  %v1032_v1 = vadd.f32 %v10228_v14, %v1031_v36  ;;  %v1171_v36 = vand.u32 4294901760, %v1170_v18 }
 0x225   : > { %1683 = vmatmul.f32.gmra.mxu1 %v10432_v49  ;;  %14724 = vst [vmem:[#allocation86_spill] sm:$0xff] %v10459_v54 }
 0x226   : > { %v2612_v13 = vpop.f32.mrf.mxu3  ;;  %1158 = vmatmul.f32.gmra.mxu0 %v1157_v39  ;;  %v1621_v57 = vadd.f32 %v1620_v43, %v1032_v1  ;;  %v297_v39 = vld [vmem:[%s9837_s7 + $0x228] sm:$0xff] }
 0x227   : > { %v539_v42 = vsel %vm330_vm0, %v297_v39, 0 }
 0x228   : > { %v2072_v7 = vadd.f32 %v2071_v20, %v1621_v57  ;;  %v1172_v20 = vsub.f32 %v1170_v18, %v1171_v36 }
 0x229   : > { %2155 = vmatmul.f32.gmra.mxu2 %v1162_v46  ;;  %v1178_v46 = vsub.f32 %v536_v38, %v10459_v54 }
 0x22a   : > { %v1624_v55 = vpop.f32.mrf.mxu1  ;;  %v10457_v15 = vadd.f32 %v2612_v13, %v2072_v7  ;;  %v1173_v5 = vand.u32 4294901760, %v1172_v20  ;;  %v10468_v7 = vand.u32 4294901760, %v539_v42 }
 0x22b   : > { %2713 = vmatmul.f32.gmra.mxu3 %v1163_v10  ;;  %v1039_v49 = vpop.f32.mrf.mxu0 }
 0x22c   : > { %14723 = vst [vmem:[#allocation85_spill] sm:$0xff] %v10457_v15  ;;  %v2076_v53 = vpop.f32.mrf.mxu2  ;;  %v1040_v43 = vadd.f32 %v10228_v14, %v1039_v49  ;;  %v1179_v49 = vand.u32 4294901760, %v1178_v46 }
 0x22d   : > { %1687 = vmatmul.f32.gmra.mxu1 %v10441_v35  ;;  %14726 = vst [vmem:[#allocation88_spill] sm:$0xff] %v10468_v7 }
 0x22e   : > { %v2618_v58 = vpop.f32.mrf.mxu3  ;;  %1166 = vmatmul.f32.gmra.mxu0 %v1165_v50  ;;  %v1625_v1 = vadd.f32 %v1624_v55, %v1040_v43  ;;  %v298_v50 = vld [vmem:[%s9837_s7 + $0x230] sm:$0xff] }
 0x22f   : > { %v542_v39 = vsel %vm330_vm0, %v298_v50, 0 }
 0x230   : > { %v2077_v10 = vadd.f32 %v2076_v53, %v1625_v1  ;;  %v1180_v53 = vsub.f32 %v1178_v46, %v1179_v49 }
 0x231   : > { %2160 = vmatmul.f32.gmra.mxu2 %v1170_v18  ;;  %v1186_v18 = vsub.f32 %v539_v42, %v10468_v7 }
 0x232   : > { %v1628_v13 = vpop.f32.mrf.mxu1  ;;  %v10466_v57 = vadd.f32 %v2618_v58, %v2077_v10  ;;  %v1181_v20 = vand.u32 4294901760, %v1180_v53  ;;  %v10477_v10 = vand.u32 4294901760, %v542_v39 }
 0x233   : > { %2719 = vmatmul.f32.gmra.mxu3 %v1171_v36  ;;  %v1047_v35 = vpop.f32.mrf.mxu0 }
 0x234   : > { %14725 = vst [vmem:[#allocation87_spill] sm:$0xff] %v10466_v57  ;;  %v2081_v15 = vpop.f32.mrf.mxu2  ;;  %v1048_v55 = vadd.f32 %v10228_v14, %v1047_v35  ;;  %v1187_v35 = vand.u32 4294901760, %v1186_v18 }
 0x235   : > { %1691 = vmatmul.f32.gmra.mxu1 %v10450_v21  ;;  %14728 = vst [vmem:[#allocation90_spill] sm:$0xff] %v10477_v10 }
 0x236   : > { %v2624_v38 = vpop.f32.mrf.mxu3  ;;  %1174 = vmatmul.f32.gmra.mxu0 %v1173_v5  ;;  %v1629_v43 = vadd.f32 %v1628_v13, %v1048_v55  ;;  %v299_v5 = vld [vmem:[%s9837_s7 + $0x238] sm:$0xff] }
 0x237   : > { %v545_v50 = vsel %vm330_vm0, %v299_v5, 0 }
 0x238   : > { %v2082_v36 = vadd.f32 %v2081_v15, %v1629_v43  ;;  %v1188_v15 = vsub.f32 %v1186_v18, %v1187_v35 }
 0x239   : > { %2165 = vmatmul.f32.gmra.mxu2 %v1178_v46  ;;  %v1194_v46 = vsub.f32 %v542_v39, %v10477_v10 }
 0x23a   : > { %v1632_v58 = vpop.f32.mrf.mxu1  ;;  %v10475_v1 = vadd.f32 %v2624_v38, %v2082_v36  ;;  %v1189_v53 = vand.u32 4294901760, %v1188_v15 }
 0x23b   : > { %2725 = vmatmul.f32.gmra.mxu3 %v1179_v49  ;;  %v1055_v21 = vpop.f32.mrf.mxu0 }
 0x23c   : > { %14727 = vst [vmem:[#allocation89_spill] sm:$0xff] %v10475_v1  ;;  %v2086_v57 = vpop.f32.mrf.mxu2  ;;  %v1056_v13 = vadd.f32 %v10228_v14, %v1055_v21  ;;  %v1195_v14 = vand.u32 4294901760, %v1194_v46  ;;  %v10486_v21 = vand.u32 4294901760, %v545_v50 }
 0x23d   : > { %1695 = vmatmul.f32.gmra.mxu1 %v10459_v54 }
 0x23e   : > { %v2630_v42 = vpop.f32.mrf.mxu3  ;;  %1182 = vmatmul.f32.gmra.mxu0 %v1181_v20  ;;  %v1633_v55 = vadd.f32 %v1632_v58, %v1056_v13  ;;  %14730 = vst [vmem:[#allocation92_spill] sm:$0xff] %v10486_v21  ;;  %v10491_v58 = vld [vmem:[%s14059_s2] ss:$0 sm:$0xff]  ;;  %v1202_v13 = vsub.f32 %v545_v50, %v10486_v21 }
 0x240   : > { %v2087_v49 = vadd.f32 %v2086_v57, %v1633_v55  ;;  %v300_v57 = vld [vmem:[%s9837_s7 + $0x240] sm:$0xff] }
 0x241   : > { %2170 = vmatmul.f32.gmra.mxu2 %v1186_v18  ;;  %v548_v5 = vsel %vm330_vm0, %v300_v57, 0 }
 0x242   : > { %v1636_v38 = vpop.f32.mrf.mxu1  ;;  %v10484_v43 = vadd.f32 %v2630_v42, %v2087_v49 }
 0x243   : > { %2731 = vmatmul.f32.gmra.mxu3 %v1187_v35  ;;  %v1063_v36 = vpop.f32.mrf.mxu0  ;;  %v1196_v35 = vsub.f32 %v1194_v46, %v1195_v14 }
 0x244   : > { %14729 = vst [vmem:[#allocation91_spill] sm:$0xff] %v10484_v43  ;;  %v2091_v54 = vpop.f32.mrf.mxu2  ;;  %v1064_v39 = vadd.f32 %v10491_v58, %v1063_v36  ;;  %v1203_v36 = vand.u32 4294901760, %v1202_v13  ;;  %v10500_v43 = vand.u32 4294901760, %v548_v5 }
 0x245   : > { %1699 = vmatmul.f32.gmra.mxu1 %v10468_v7  ;;  %v1197_v49 = vand.u32 4294901760, %v1196_v35 }
 0x246   : > { %v2636_v18 = vpop.f32.mrf.mxu3  ;;  %1190 = vmatmul.f32.gmra.mxu0 %v1189_v53  ;;  %v1637_v20 = vadd.f32 %v1636_v38, %v1064_v39  ;;  %14732 = vst [vmem:[#allocation94_spill] sm:$0xff] %v10500_v43  ;;  %v301_v53 = vld [vmem:[%s9837_s7 + $0x248] sm:$0xff] }
 0x247   : > { %v551_v57 = vsel %vm330_vm0, %v301_v53, 0 }
 0x248   : > { %v2092_v42 = vadd.f32 %v2091_v54, %v1637_v20  ;;  %v1204_v54 = vsub.f32 %v1202_v13, %v1203_v36 }
 0x249   : > { %2175 = vmatmul.f32.gmra.mxu2 %v1194_v46  ;;  %v1210_v46 = vsub.f32 %v548_v5, %v10500_v43 }
 0x24a   : > { %v1640_v55 = vpop.f32.mrf.mxu1  ;;  %v10498_v15 = vadd.f32 %v2636_v18, %v2092_v42  ;;  %v1205_v35 = vand.u32 4294901760, %v1204_v54  ;;  %v10509_v42 = vand.u32 4294901760, %v551_v57 }
 0x24b   : > { %2737 = vmatmul.f32.gmra.mxu3 %v1195_v14  ;;  %v1071_v7 = vpop.f32.mrf.mxu0 }
 0x24c   : > { %14731 = vst [vmem:[#allocation93_spill] sm:$0xff] %v10498_v15  ;;  %v2096_v1 = vpop.f32.mrf.mxu2  ;;  %v1072_v38 = vadd.f32 %v10491_v58, %v1071_v7  ;;  %v1211_v7 = vand.u32 4294901760, %v1210_v46 }
 0x24d   : > { %1703 = vmatmul.f32.gmra.mxu1 %v10477_v10  ;;  %14734 = vst [vmem:[#allocation96_spill] sm:$0xff] %v10509_v42 }
 0x24e   : > { %v2642_v50 = vpop.f32.mrf.mxu3  ;;  %1198 = vmatmul.f32.gmra.mxu0 %v1197_v49  ;;  %v1641_v39 = vadd.f32 %v1640_v55, %v1072_v38  ;;  %v302_v49 = vld [vmem:[%s9837_s7 + $0x250] sm:$0xff] }
 0x24f   : > { %v554_v53 = vsel %vm330_vm0, %v302_v49, 0 }
 0x250   : > { %v2097_v14 = vadd.f32 %v2096_v1, %v1641_v39  ;;  %v1212_v1 = vsub.f32 %v1210_v46, %v1211_v7 }
 0x251   : > { %2180 = vmatmul.f32.gmra.mxu2 %v1202_v13  ;;  %v1218_v13 = vsub.f32 %v551_v57, %v10509_v42 }
 0x252   : > { %v1644_v18 = vpop.f32.mrf.mxu1  ;;  %v10507_v20 = vadd.f32 %v2642_v50, %v2097_v14  ;;  %v1213_v54 = vand.u32 4294901760, %v1212_v1  ;;  %v10518_v14 = vand.u32 4294901760, %v554_v53 }
 0x253   : > { %2743 = vmatmul.f32.gmra.mxu3 %v1203_v36  ;;  %v1079_v10 = vpop.f32.mrf.mxu0 }
 0x254   : > { %14733 = vst [vmem:[#allocation95_spill] sm:$0xff] %v10507_v20  ;;  %v2101_v15 = vpop.f32.mrf.mxu2  ;;  %v1080_v55 = vadd.f32 %v10491_v58, %v1079_v10  ;;  %v1219_v10 = vand.u32 4294901760, %v1218_v13 }
 0x255   : > { %1707 = vmatmul.f32.gmra.mxu1 %v10486_v21  ;;  %14736 = vst [vmem:[#allocation98_spill] sm:$0xff] %v10518_v14 }
 0x256   : > { %v2648_v5 = vpop.f32.mrf.mxu3  ;;  %1206 = vmatmul.f32.gmra.mxu0 %v1205_v35  ;;  %v1645_v38 = vadd.f32 %v1644_v18, %v1080_v55  ;;  %v303_v35 = vld [vmem:[%s9837_s7 + $0x258] sm:$0xff] }
 0x257   : > { %v557_v49 = vsel %vm330_vm0, %v303_v35, 0 }
 0x258   : > { %v2102_v36 = vadd.f32 %v2101_v15, %v1645_v38  ;;  %v1220_v15 = vsub.f32 %v1218_v13, %v1219_v10 }
 0x259   : > { %2185 = vmatmul.f32.gmra.mxu2 %v1210_v46  ;;  %v1226_v46 = vsub.f32 %v554_v53, %v10518_v14 }
 0x25a   : > { %v1648_v50 = vpop.f32.mrf.mxu1  ;;  %v10516_v39 = vadd.f32 %v2648_v5, %v2102_v36  ;;  %v1221_v1 = vand.u32 4294901760, %v1220_v15  ;;  %v10527_v36 = vand.u32 4294901760, %v557_v49 }
 0x25b   : > { %2749 = vmatmul.f32.gmra.mxu3 %v1211_v7  ;;  %v1087_v21 = vpop.f32.mrf.mxu0 }
 0x25c   : > { %14735 = vst [vmem:[#allocation97_spill] sm:$0xff] %v10516_v39  ;;  %v2106_v20 = vpop.f32.mrf.mxu2  ;;  %v1088_v18 = vadd.f32 %v10491_v58, %v1087_v21  ;;  %v1227_v21 = vand.u32 4294901760, %v1226_v46 }
 0x25d   : > { %1711 = vmatmul.f32.gmra.mxu1 %v10500_v43  ;;  %14738 = vst [vmem:[#allocation100_spill] sm:$0xff] %v10527_v36 }
 0x25e   : > { %v2654_v57 = vpop.f32.mrf.mxu3  ;;  %1214 = vmatmul.f32.gmra.mxu0 %v1213_v54  ;;  %v1649_v55 = vadd.f32 %v1648_v50, %v1088_v18  ;;  %v304_v54 = vld [vmem:[%s9837_s7 + $0x260] sm:$0xff] }
 0x25f   : > { %v560_v35 = vsel %vm330_vm0, %v304_v54, 0 }
 0x260   : > { %v2107_v7 = vadd.f32 %v2106_v20, %v1649_v55  ;;  %v1228_v20 = vsub.f32 %v1226_v46, %v1227_v21 }
 0x261   : > { %2190 = vmatmul.f32.gmra.mxu2 %v1218_v13  ;;  %v1234_v13 = vsub.f32 %v557_v49, %v10527_v36 }
 0x262   : > { %v1652_v5 = vpop.f32.mrf.mxu1  ;;  %v10525_v38 = vadd.f32 %v2654_v57, %v2107_v7  ;;  %v1229_v15 = vand.u32 4294901760, %v1228_v20  ;;  %v10536_v7 = vand.u32 4294901760, %v560_v35 }
 0x263   : > { %2755 = vmatmul.f32.gmra.mxu3 %v1219_v10  ;;  %v1095_v43 = vpop.f32.mrf.mxu0 }
 0x264   : > { %14737 = vst [vmem:[#allocation99_spill] sm:$0xff] %v10525_v38  ;;  %v2111_v39 = vpop.f32.mrf.mxu2  ;;  %v1096_v50 = vadd.f32 %v10491_v58, %v1095_v43  ;;  %v1235_v43 = vand.u32 4294901760, %v1234_v13 }
 0x265   : > { %1715 = vmatmul.f32.gmra.mxu1 %v10509_v42  ;;  %14740 = vst [vmem:[#allocation102_spill] sm:$0xff] %v10536_v7 }
 0x266   : > { %v2660_v53 = vpop.f32.mrf.mxu3  ;;  %1222 = vmatmul.f32.gmra.mxu0 %v1221_v1  ;;  %v1653_v18 = vadd.f32 %v1652_v5, %v1096_v50  ;;  %v305_v1 = vld [vmem:[%s9837_s7 + $0x268] sm:$0xff] }
 0x267   : > { %v563_v54 = vsel %vm330_vm0, %v305_v1, 0 }
 0x268   : > { %v2112_v10 = vadd.f32 %v2111_v39, %v1653_v18  ;;  %v1236_v39 = vsub.f32 %v1234_v13, %v1235_v43 }
 0x269   : > { %2195 = vmatmul.f32.gmra.mxu2 %v1226_v46  ;;  %v1242_v46 = vsub.f32 %v560_v35, %v10536_v7 }
 0x26a   : > { %v1656_v57 = vpop.f32.mrf.mxu1  ;;  %v10534_v55 = vadd.f32 %v2660_v53, %v2112_v10  ;;  %v1237_v20 = vand.u32 4294901760, %v1236_v39  ;;  %v10545_v10 = vand.u32 4294901760, %v563_v54 }
 0x26b   : > { %2761 = vmatmul.f32.gmra.mxu3 %v1227_v21  ;;  %v1103_v42 = vpop.f32.mrf.mxu0 }
 0x26c   : > { %14739 = vst [vmem:[#allocation101_spill] sm:$0xff] %v10534_v55  ;;  %v2116_v38 = vpop.f32.mrf.mxu2  ;;  %v1104_v5 = vadd.f32 %v10491_v58, %v1103_v42  ;;  %v1243_v42 = vand.u32 4294901760, %v1242_v46 }
 0x26d   : > { %1719 = vmatmul.f32.gmra.mxu1 %v10518_v14  ;;  %14742 = vst [vmem:[#allocation104_spill] sm:$0xff] %v10545_v10 }
 0x26e   : > { %v2666_v49 = vpop.f32.mrf.mxu3  ;;  %1230 = vmatmul.f32.gmra.mxu0 %v1229_v15  ;;  %v1657_v50 = vadd.f32 %v1656_v57, %v1104_v5  ;;  %v306_v15 = vld [vmem:[%s9837_s7 + $0x270] sm:$0xff] }
 0x26f   : > { %v566_v1 = vsel %vm330_vm0, %v306_v15, 0 }
 0x270   : > { %v2117_v21 = vadd.f32 %v2116_v38, %v1657_v50  ;;  %v1244_v38 = vsub.f32 %v1242_v46, %v1243_v42 }
 0x271   : > { %2200 = vmatmul.f32.gmra.mxu2 %v1234_v13  ;;  %v1250_v13 = vsub.f32 %v563_v54, %v10545_v10 }
 0x272   : > { %v1660_v53 = vpop.f32.mrf.mxu1  ;;  %v10543_v18 = vadd.f32 %v2666_v49, %v2117_v21  ;;  %v1245_v39 = vand.u32 4294901760, %v1244_v38  ;;  %v10554_v21 = vand.u32 4294901760, %v566_v1 }
 0x273   : > { %2767 = vmatmul.f32.gmra.mxu3 %v1235_v43  ;;  %v1111_v14 = vpop.f32.mrf.mxu0 }
 0x274   : > { %14741 = vst [vmem:[#allocation103_spill] sm:$0xff] %v10543_v18  ;;  %v2121_v55 = vpop.f32.mrf.mxu2  ;;  %v1112_v57 = vadd.f32 %v10491_v58, %v1111_v14  ;;  %v1251_v14 = vand.u32 4294901760, %v1250_v13 }
 0x275   : > { %1723 = vmatmul.f32.gmra.mxu1 %v10527_v36  ;;  %14744 = vst [vmem:[#allocation106_spill] sm:$0xff] %v10554_v21 }
 0x276   : > { %v2672_v35 = vpop.f32.mrf.mxu3  ;;  %1238 = vmatmul.f32.gmra.mxu0 %v1237_v20  ;;  %v1661_v5 = vadd.f32 %v1660_v53, %v1112_v57  ;;  %v307_v20 = vld [vmem:[%s9837_s7 + $0x278] sm:$0xff] }
 0x277   : > { %v569_v15 = vsel %vm330_vm0, %v307_v20, 0 }
 0x278   : > { %v2122_v43 = vadd.f32 %v2121_v55, %v1661_v5  ;;  %v1252_v55 = vsub.f32 %v1250_v13, %v1251_v14 }
 0x279   : > { %2205 = vmatmul.f32.gmra.mxu2 %v1242_v46  ;;  %v1258_v46 = vsub.f32 %v566_v1, %v10554_v21 }
 0x27a   : > { %v1664_v49 = vpop.f32.mrf.mxu1  ;;  %v10552_v50 = vadd.f32 %v2672_v35, %v2122_v43  ;;  %v1253_v38 = vand.u32 4294901760, %v1252_v55  ;;  %v10563_v43 = vand.u32 4294901760, %v569_v15 }
 0x27b   : > { %2773 = vmatmul.f32.gmra.mxu3 %v1243_v42  ;;  %v1119_v36 = vpop.f32.mrf.mxu0 }
 0x27c   : > { %14743 = vst [vmem:[#allocation105_spill] sm:$0xff] %v10552_v50  ;;  %v2126_v18 = vpop.f32.mrf.mxu2  ;;  %v1120_v53 = vadd.f32 %v10491_v58, %v1119_v36  ;;  %v1259_v36 = vand.u32 4294901760, %v1258_v46 }
 0x27d   : > { %1727 = vmatmul.f32.gmra.mxu1 %v10536_v7  ;;  %14746 = vst [vmem:[#allocation108_spill] sm:$0xff] %v10563_v43 }
 0x27e   : > { %v2678_v54 = vpop.f32.mrf.mxu3  ;;  %1246 = vmatmul.f32.gmra.mxu0 %v1245_v39  ;;  %v1665_v57 = vadd.f32 %v1664_v49, %v1120_v53  ;;  %v308_v39 = vld [vmem:[%s9837_s7 + $0x280] sm:$0xff] }
 0x27f   : > { %v572_v20 = vsel %vm330_vm0, %v308_v39, 0 }
 0x280   : > { %v2127_v42 = vadd.f32 %v2126_v18, %v1665_v57  ;;  %v1260_v18 = vsub.f32 %v1258_v46, %v1259_v36 }
 0x281   : > { %2210 = vmatmul.f32.gmra.mxu2 %v1250_v13  ;;  %v1266_v13 = vsub.f32 %v569_v15, %v10563_v43 }
 0x282   : > { %v1668_v35 = vpop.f32.mrf.mxu1  ;;  %v10561_v5 = vadd.f32 %v2678_v54, %v2127_v42  ;;  %v1261_v55 = vand.u32 4294901760, %v1260_v18  ;;  %v10572_v42 = vand.u32 4294901760, %v572_v20 }
 0x283   : > { %2779 = vmatmul.f32.gmra.mxu3 %v1251_v14  ;;  %v1127_v7 = vpop.f32.mrf.mxu0 }
 0x284   : > { %14745 = vst [vmem:[#allocation107_spill] sm:$0xff] %v10561_v5  ;;  %v2131_v50 = vpop.f32.mrf.mxu2  ;;  %v1128_v49 = vadd.f32 %v10491_v58, %v1127_v7  ;;  %v1267_v7 = vand.u32 4294901760, %v1266_v13 }
 0x285   : > { %1731 = vmatmul.f32.gmra.mxu1 %v10545_v10  ;;  %14748 = vst [vmem:[#allocation110_spill] sm:$0xff] %v10572_v42 }
 0x286   : > { %v2684_v1 = vpop.f32.mrf.mxu3  ;;  %1254 = vmatmul.f32.gmra.mxu0 %v1253_v38  ;;  %v1669_v53 = vadd.f32 %v1668_v35, %v1128_v49  ;;  %v309_v38 = vld [vmem:[%s9837_s7 + $0x288] sm:$0xff] }
 0x287   : > { %v575_v39 = vsel %vm330_vm0, %v309_v38, 0 }
 0x288   : > { %v2132_v14 = vadd.f32 %v2131_v50, %v1669_v53  ;;  %v1268_v50 = vsub.f32 %v1266_v13, %v1267_v7 }
 0x289   : > { %2215 = vmatmul.f32.gmra.mxu2 %v1258_v46  ;;  %v1274_v46 = vsub.f32 %v572_v20, %v10572_v42 }
 0x28a   : > { %v1672_v54 = vpop.f32.mrf.mxu1  ;;  %v10570_v57 = vadd.f32 %v2684_v1, %v2132_v14  ;;  %v1269_v18 = vand.u32 4294901760, %v1268_v50  ;;  %v10581_v14 = vand.u32 4294901760, %v575_v39 }
 0x28b   : > { %2785 = vmatmul.f32.gmra.mxu3 %v1259_v36  ;;  %v1135_v10 = vpop.f32.mrf.mxu0 }
 0x28c   : > { %14747 = vst [vmem:[#allocation109_spill] sm:$0xff] %v10570_v57  ;;  %v2136_v5 = vpop.f32.mrf.mxu2  ;;  %v1136_v35 = vadd.f32 %v10491_v58, %v1135_v10  ;;  %v1275_v10 = vand.u32 4294901760, %v1274_v46 }
 0x28d   : > { %1735 = vmatmul.f32.gmra.mxu1 %v10554_v21  ;;  %14750 = vst [vmem:[#allocation112_spill] sm:$0xff] %v10581_v14 }
 0x28e   : > { %v2690_v15 = vpop.f32.mrf.mxu3  ;;  %1262 = vmatmul.f32.gmra.mxu0 %v1261_v55  ;;  %v1673_v49 = vadd.f32 %v1672_v54, %v1136_v35  ;;  %v310_v55 = vld [vmem:[%s9837_s7 + $0x290] sm:$0xff] }
 0x28f   : > { %v578_v38 = vsel %vm330_vm0, %v310_v55, 0 }
 0x290   : > { %v2137_v36 = vadd.f32 %v2136_v5, %v1673_v49  ;;  %v1276_v5 = vsub.f32 %v1274_v46, %v1275_v10 }
 0x291   : > { %2220 = vmatmul.f32.gmra.mxu2 %v1266_v13  ;;  %v1282_v13 = vsub.f32 %v575_v39, %v10581_v14 }
 0x292   : > { %v1676_v1 = vpop.f32.mrf.mxu1  ;;  %v10579_v53 = vadd.f32 %v2690_v15, %v2137_v36  ;;  %v1277_v50 = vand.u32 4294901760, %v1276_v5  ;;  %v10590_v36 = vand.u32 4294901760, %v578_v38 }
 0x293   : > { %2791 = vmatmul.f32.gmra.mxu3 %v1267_v7  ;;  %v1143_v21 = vpop.f32.mrf.mxu0 }
 0x294   : > { %14749 = vst [vmem:[#allocation111_spill] sm:$0xff] %v10579_v53  ;;  %v2141_v57 = vpop.f32.mrf.mxu2  ;;  %v1144_v54 = vadd.f32 %v10491_v58, %v1143_v21  ;;  %v1283_v21 = vand.u32 4294901760, %v1282_v13 }
 0x295   : > { %1739 = vmatmul.f32.gmra.mxu1 %v10563_v43  ;;  %14752 = vst [vmem:[#allocation114_spill] sm:$0xff] %v10590_v36 }
 0x296   : > { %v2696_v20 = vpop.f32.mrf.mxu3  ;;  %1270 = vmatmul.f32.gmra.mxu0 %v1269_v18  ;;  %v1677_v35 = vadd.f32 %v1676_v1, %v1144_v54  ;;  %v311_v18 = vld [vmem:[%s9837_s7 + $0x298] sm:$0xff] }
 0x297   : > { %v581_v55 = vsel %vm330_vm0, %v311_v18, 0 }
 0x298   : > { %v2142_v7 = vadd.f32 %v2141_v57, %v1677_v35  ;;  %v1284_v57 = vsub.f32 %v1282_v13, %v1283_v21 }
 0x299   : > { %2225 = vmatmul.f32.gmra.mxu2 %v1274_v46  ;;  %v1290_v46 = vsub.f32 %v578_v38, %v10590_v36 }
 0x29a   : > { %v1680_v15 = vpop.f32.mrf.mxu1  ;;  %v10588_v49 = vadd.f32 %v2696_v20, %v2142_v7  ;;  %v1285_v5 = vand.u32 4294901760, %v1284_v57  ;;  %v10599_v7 = vand.u32 4294901760, %v581_v55 }
 0x29b   : > { %2797 = vmatmul.f32.gmra.mxu3 %v1275_v10  ;;  %v1151_v43 = vpop.f32.mrf.mxu0 }
 0x29c   : > { %14751 = vst [vmem:[#allocation113_spill] sm:$0xff] %v10588_v49  ;;  %v2146_v53 = vpop.f32.mrf.mxu2  ;;  %v1152_v1 = vadd.f32 %v10491_v58, %v1151_v43  ;;  %v1291_v43 = vand.u32 4294901760, %v1290_v46 }
 0x29d   : > { %1743 = vmatmul.f32.gmra.mxu1 %v10572_v42  ;;  %14754 = vst [vmem:[#allocation116_spill] sm:$0xff] %v10599_v7 }
 0x29e   : > { %v2702_v39 = vpop.f32.mrf.mxu3  ;;  %1278 = vmatmul.f32.gmra.mxu0 %v1277_v50  ;;  %v1681_v54 = vadd.f32 %v1680_v15, %v1152_v1  ;;  %v312_v50 = vld [vmem:[%s9837_s7 + $0x2a0] sm:$0xff] }
 0x29f   : > { %v584_v18 = vsel %vm330_vm0, %v312_v50, 0 }
 0x2a0   : > { %v2147_v10 = vadd.f32 %v2146_v53, %v1681_v54  ;;  %v1292_v53 = vsub.f32 %v1290_v46, %v1291_v43 }
 0x2a1   : > { %2230 = vmatmul.f32.gmra.mxu2 %v1282_v13  ;;  %v1298_v13 = vsub.f32 %v581_v55, %v10599_v7 }
 0x2a2   : > { %v1684_v20 = vpop.f32.mrf.mxu1  ;;  %v10597_v35 = vadd.f32 %v2702_v39, %v2147_v10  ;;  %v1293_v57 = vand.u32 4294901760, %v1292_v53  ;;  %v10608_v10 = vand.u32 4294901760, %v584_v18 }
 0x2a3   : > { %2803 = vmatmul.f32.gmra.mxu3 %v1283_v21  ;;  %v1159_v42 = vpop.f32.mrf.mxu0 }
 0x2a4   : > { %14753 = vst [vmem:[#allocation115_spill] sm:$0xff] %v10597_v35  ;;  %v2151_v49 = vpop.f32.mrf.mxu2  ;;  %v1160_v15 = vadd.f32 %v10491_v58, %v1159_v42  ;;  %v1299_v42 = vand.u32 4294901760, %v1298_v13 }
 0x2a5   : > { %1747 = vmatmul.f32.gmra.mxu1 %v10581_v14  ;;  %14756 = vst [vmem:[#allocation118_spill] sm:$0xff] %v10608_v10 }
 0x2a6   : > { %v2708_v38 = vpop.f32.mrf.mxu3  ;;  %1286 = vmatmul.f32.gmra.mxu0 %v1285_v5  ;;  %v1685_v1 = vadd.f32 %v1684_v20, %v1160_v15  ;;  %v313_v5 = vld [vmem:[%s9837_s7 + $0x2a8] sm:$0xff] }
 0x2a7   : > { %v587_v50 = vsel %vm330_vm0, %v313_v5, 0 }
 0x2a8   : > { %v2152_v21 = vadd.f32 %v2151_v49, %v1685_v1  ;;  %v1300_v49 = vsub.f32 %v1298_v13, %v1299_v42 }
 0x2a9   : > { %2235 = vmatmul.f32.gmra.mxu2 %v1290_v46  ;;  %v1306_v46 = vsub.f32 %v584_v18, %v10608_v10 }
 0x2aa   : > { %v1688_v39 = vpop.f32.mrf.mxu1  ;;  %v10606_v54 = vadd.f32 %v2708_v38, %v2152_v21  ;;  %v1301_v53 = vand.u32 4294901760, %v1300_v49  ;;  %v10617_v21 = vand.u32 4294901760, %v587_v50 }
 0x2ab   : > { %2809 = vmatmul.f32.gmra.mxu3 %v1291_v43  ;;  %v1167_v14 = vpop.f32.mrf.mxu0 }
 0x2ac   : > { %14755 = vst [vmem:[#allocation117_spill] sm:$0xff] %v10606_v54  ;;  %v2156_v35 = vpop.f32.mrf.mxu2  ;;  %v1168_v20 = vadd.f32 %v10491_v58, %v1167_v14  ;;  %v1307_v14 = vand.u32 4294901760, %v1306_v46 }
 0x2ad   : > { %1751 = vmatmul.f32.gmra.mxu1 %v10590_v36 }
 0x2ae   : > { %v2714_v55 = vpop.f32.mrf.mxu3  ;;  %1294 = vmatmul.f32.gmra.mxu0 %v1293_v57  ;;  %v1689_v15 = vadd.f32 %v1688_v39, %v1168_v20  ;;  %v314_v57 = vld [vmem:[%s9837_s7 + $0x2b0] sm:$0xff] }
 0x2af   : > { %v590_v5 = vsel %vm330_vm0, %v314_v57, 0 }
 0x2b0   : > { %v2157_v43 = vadd.f32 %v2156_v35, %v1689_v15  ;;  %v1308_v35 = vsub.f32 %v1306_v46, %v1307_v14 }
 0x2b1   : > { %2240 = vmatmul.f32.gmra.mxu2 %v1298_v13  ;;  %v1314_v13 = vsub.f32 %v587_v50, %v10617_v21 }
 0x2b2   : > { %v1692_v38 = vpop.f32.mrf.mxu1  ;;  %v10615_v1 = vadd.f32 %v2714_v55, %v2157_v43  ;;  %v1309_v49 = vand.u32 4294901760, %v1308_v35  ;;  %v10626_v43 = vand.u32 4294901760, %v590_v5 }
 0x2b3   : > { %2815 = vmatmul.f32.gmra.mxu3 %v1299_v42  ;;  %v1175_v36 = vpop.f32.mrf.mxu0 }
 0x2b4   : > { %14757 = vst [vmem:[#allocation119_spill] sm:$0xff] %v10615_v1  ;;  %v2161_v54 = vpop.f32.mrf.mxu2  ;;  %v1176_v39 = vadd.f32 %v10491_v58, %v1175_v36  ;;  %v1315_v36 = vand.u32 4294901760, %v1314_v13 }
 0x2b5   : > { %1755 = vmatmul.f32.gmra.mxu1 %v10599_v7  ;;  %14758 = vst [vmem:[#allocation120_spill] sm:$0xff] %v10626_v43 }
 0x2b6   : > { %v2720_v18 = vpop.f32.mrf.mxu3  ;;  %1302 = vmatmul.f32.gmra.mxu0 %v1301_v53  ;;  %v1693_v20 = vadd.f32 %v1692_v38, %v1176_v39  ;;  %v315_v53 = vld [vmem:[%s9837_s7 + $0x2b8] sm:$0xff]  ;;  %v1322_v39 = vsub.f32 %v590_v5, %v10626_v43 }
 0x2b7   : > { %v593_v57 = vsel %vm330_vm0, %v315_v53, 0 }
 0x2b8   : > { %v2162_v42 = vadd.f32 %v2161_v54, %v1693_v20 }
 0x2b9   : > { %2245 = vmatmul.f32.gmra.mxu2 %v1306_v46  ;;  %v1316_v46 = vsub.f32 %v1314_v13, %v1315_v36 }
 0x2ba   : > { %v1696_v55 = vpop.f32.mrf.mxu1  ;;  %v10624_v15 = vadd.f32 %v2720_v18, %v2162_v42  ;;  %v10635_v42 = vand.u32 4294901760, %v593_v57 }
 0x2bb   : > { %2821 = vmatmul.f32.gmra.mxu3 %v1307_v14  ;;  %v1183_v7 = vpop.f32.mrf.mxu0  ;;  %v1317_v35 = vand.u32 4294901760, %v1316_v46 }
 0x2bc   : > { %v2166_v1 = vpop.f32.mrf.mxu2  ;;  %v1184_v38 = vadd.f32 %v10491_v58, %v1183_v7  ;;  %v1323_v7 = vand.u32 4294901760, %v1322_v39 }
 0x2bd   : > { %1759 = vmatmul.f32.gmra.mxu1 %v10608_v10 }
 0x2be   : > { %v2726_v50 = vpop.f32.mrf.mxu3  ;;  %1310 = vmatmul.f32.gmra.mxu0 %v1309_v49  ;;  %v1697_v54 = vadd.f32 %v1696_v55, %v1184_v38  ;;  %v316_v55 = vld [vmem:[%s9837_s7 + $0x2c0] sm:$0xff]  ;;  %v1324_v53 = vsub.f32 %v1322_v39, %v1323_v7 }
 0x2c0   : > { %v2167_v14 = vadd.f32 %v2166_v1, %v1697_v54  ;;  %v1330_v1 = vsub.f32 %v593_v57, %v10635_v42 }
 0x2c1   : > { %2250 = vmatmul.f32.gmra.mxu2 %v1314_v13  ;;  %v3775_v13 = vld [vmem:[%s14060_s3] sm:$0xff] }
 0x2c2   : > { %v1700_v18 = vpop.f32.mrf.mxu1  ;;  %v10633_v20 = vadd.f32 %v2726_v50, %v2167_v14  ;;  %v596_v50 = vsel %vm330_vm0, %v316_v55, 0  ;;  %v4083_v54 = vand.u32 4294901760, %v3775_v13  ;;  %v1331_v57 = vand.u32 4294901760, %v1330_v1 }
 0x2c3   : > { %2827 = vmatmul.f32.gmra.mxu3 %v1315_v36  ;;  %v1191_v10 = vpop.f32.mrf.mxu0 }
 0x2c4   : > { %v1192_v49 = vadd.f32 %v10491_v58, %v1191_v10  ;;  %v2171_v38 = vpop.f32.mrf.mxu2  ;;  %4084 = vmatpush.msrb.mxu2 %v4083_v54  ;;  %v4869_v10 = vsub.f32 %v3775_v13, %v4083_v54  ;;  %5765 = vmatpush.msra.mxu1 %v4083_v54 }
 0x2c5   : > { %1763 = vmatmul.f32.gmra.mxu1 %v10617_v21 }
 0x2c6   : > { %1318 = vmatmul.f32.gmra.mxu0 %v1317_v35  ;;  %v1701_v5 = vadd.f32 %v1700_v18, %v1192_v49  ;;  %v2732_v36 = vpop.f32.mrf.mxu3  ;;  %v1325_v18 = vand.u32 4294901760, %v1324_v53  ;;  %v10649_v35 = vand.u32 4294901760, %v596_v50  ;;  %v14760_v49 = vand.u32 4294901760, %v9959_v31 }
 0x2c7   : > { %5274 = vmatpush.msra.mxu0 %v4869_v10  ;;  %v1332_v53 = vsub.f32 %v1330_v1, %v1331_v57 }
 0x2c8   : > { %v2172_v46 = vadd.f32 %v2171_v38, %v1701_v5  ;;  %14759 = vst [vmem:[#allocation121_spill] sm:$0xff] %v10649_v35  ;;  %6346 = vmatpush.msra.mxu2 %v14760_v49  ;;  %v4870_v38 = vand.u32 4294901760, %v4869_v10  ;;  %v14761_v5 = vand.u32 4294901760, %v10186_v30 }
 0x2c9   : > { %2255 = vmatmul.f32.gmra.mxu2 %v1322_v39  ;;  %v317_v39 = vld [vmem:[%s9837_s7 + $0x2c8] sm:$0xff] }
 0x2ca   : > { %v10645_v58 = vpop.f32.mrf.mxu1  ;;  %v10647_v14 = vadd.f32 %v2732_v36, %v2172_v46  ;;  %6350 = vmatpush.msra.mxu2 %v14761_v5  ;;  %v4871_v13 = vsub.f32 %v4869_v10, %v4870_v38  ;;  %v14762_v36 = vand.u32 4294901760, %v10420_v63  ;;  %v599_v31 = vsel %vm330_vm0, %v317_v39, 0  ;;  %v318_v63 = vld [vmem:[%s9837_s7 + $0x2d0] sm:$0xff] }
 0x2cb   : > { %2833 = vmatmul.f32.gmra.mxu3 %v1323_v7  ;;  %v10653_v55 = vpop.f32.mrf.mxu0  ;;  %v1338_v7 = vsub.f32 %v596_v50, %v10649_v35  ;;  %v10665_v10 = vand.u32 4294901760, %v599_v31 }
 0x2cc   : > { %6354 = vmatpush.msra.mxu2 %v14762_v36  ;;  %v4872_v46 = vand.u32 4294901760, %v4871_v13 }
 0x2cd   : > { %1767 = vmatmul.f32.gmra.mxu1 %v10626_v43  ;;  %v1333_v43 = vand.u32 4294901760, %v1332_v53  ;;  %v1339_v30 = vand.u32 4294901760, %v1338_v7  ;;  %14763 = vst [vmem:[#allocation122_spill] sm:$0xff] %v10665_v10  ;;  %v1346_v50 = vsub.f32 %v599_v31, %v10665_v10 }
 0x2ce   : > { %1326 = vmatmul.f32.gmra.mxu0 %v1325_v18  ;;  %4873 = vmatpush.msrb.mxu3 %v4872_v46 }
 0x2cf   : > { %6358 = vmatpush.msra.mxu2 %v4870_v38  ;;  %v602_v38 = vsel %vm330_vm0, %v318_v63, 0 }
 0x2d0   : > { %6749 = vmatpush.msra.mxu3 %v9953_v28  ;;  %v1347_v28 = vand.u32 4294901760, %v1346_v50  ;;  %v10678_v5 = vand.u32 4294901760, %v602_v38 }
 0x2d1   : > { %2260 = vmatmul.f32.gmra.mxu2 %v1330_v1  ;;  %v1340_v1 = vsub.f32 %v1338_v7, %v1339_v30 }
 0x2d2   : > { %v10663_v49 = vpop.f32.mrf.mxu1  ;;  %6751 = vmatpush.msra.mxu3 %v10182_v24  ;;  %14764 = vst [vmem:[#allocation123_spill] sm:$0xff] %v10678_v5  ;;  %v319_v24 = vld [vmem:[%s9837_s7 + $0x2d8] sm:$0xff]  ;;  %v1354_v53 = vsub.f32 %v602_v38, %v10678_v5 }
 0x2d3   : > { %2839 = vmatmul.f32.gmra.mxu3 %v1331_v57  ;;  %v10667_v18 = vpop.f32.mrf.mxu0  ;;  %v1341_v39 = vand.u32 4294901760, %v1340_v1 }
 0x2d4   : > { %6753 = vmatpush.msra.mxu3 %v10413_v12  ;;  %v605_v12 = vsel %vm330_vm0, %v319_v24, 0  ;;  %v1355_v36 = vand.u32 4294901760, %v1354_v53 }
 0x2d5   : > { %1771 = vmatmul.f32.gmra.mxu1 %v10635_v42  ;;  %v10688_v31 = vand.u32 4294901760, %v605_v12 }
 0x2d6   : > { %1334 = vmatmul.f32.gmra.mxu0 %v1333_v43  ;;  %6755 = vmatpush.msra.mxu3 %v4083_v54  ;;  %v1348_v43 = vsub.f32 %v1346_v50, %v1347_v28  ;;  %v1356_v63 = vsub.f32 %v1354_v53, %v1355_v36 }
 0x2d7   : > { %14765 = vst [vmem:[#allocation124_spill] sm:$0xff] %v10688_v31  ;;  %v1362_v1 = vsub.f32 %v605_v12, %v10688_v31 }
 0x2d8   : > { %v1349_v54 = vand.u32 4294901760, %v1348_v43 }
 0x2d9   : > { %2265 = vmatmul.f32.gmra.mxu2 %v1338_v7 }
 0x2da   : > { %v10676_v57 = vpop.f32.mrf.mxu1 }
 0x2db   : > { %2845 = vmatmul.f32.gmra.mxu3 %v1339_v30  ;;  %v10680_v13 = vpop.f32.mrf.mxu0  ;;  %v320_v30 = vld [vmem:[%s9837_s7 + $0x2e0] sm:$0xff] }
 0x2dc   : > { %v608_v38 = vsel %vm330_vm0, %v320_v30, 0 }
 0x2dd   : > { %1775 = vmatmul.f32.gmra.mxu1 %v10649_v35  ;;  %v10698_v24 = vand.u32 4294901760, %v608_v38 }
 0x2de   : > { %1342 = vmatmul.f32.gmra.mxu0 %v1341_v39  ;;  %v1357_v39 = vand.u32 4294901760, %v1356_v63 }
 0x2df   : > { %v1370_v35 = vsub.f32 %v608_v38, %v10698_v24 }
 0x2e1   : > { %2270 = vmatmul.f32.gmra.mxu2 %v1346_v50 }
 0x2e2   : > { %v10686_v7 = vpop.f32.mrf.mxu1 }
 0x2e3   : > { %2851 = vmatmul.f32.gmra.mxu3 %v1347_v28  ;;  %v10690_v46 = vpop.f32.mrf.mxu0  ;;  %v1363_v28 = vand.u32 4294901760, %v1362_v1 }
 0x2e5   : > { %1779 = vmatmul.f32.gmra.mxu1 %v10665_v10  ;;  %v321_v10 = vld [vmem:[%s9837_s7 + $0x2e8] sm:$0xff] }
 0x2e6   : > { %1350 = vmatmul.f32.gmra.mxu0 %v1349_v54  ;;  %v1364_v54 = vsub.f32 %v1362_v1, %v1363_v28  ;;  %v611_v12 = vsel %vm330_vm0, %v321_v10, 0 }
 0x2e7   : > { %v10708_v63 = vand.u32 4294901760, %v611_v12 }
 0x2e8   : > { %v1365_v30 = vand.u32 4294901760, %v1364_v54 }
 0x2e9   : > { %2275 = vmatmul.f32.gmra.mxu2 %v1354_v53  ;;  %14768 = vst [vmem:[#allocation127_spill] sm:$0xff] %v10708_v63 }
 0x2ea   : > { %v10696_v50 = vpop.f32.mrf.mxu1 }
 0x2eb   : > { %14766 = vst [vmem:[#allocation125_spill] sm:$0xff] %v10696_v50  ;;  %2857 = vmatmul.f32.gmra.mxu3 %v1355_v36  ;;  %v10700_v43 = vpop.f32.mrf.mxu0  ;;  %v1371_v36 = vand.u32 4294901760, %v1370_v35 }
 0x2ed   : > { %1783 = vmatmul.f32.gmra.mxu1 %v10678_v5  ;;  %v1372_v5 = vsub.f32 %v1370_v35, %v1371_v36 }
 0x2ee   : > { %1358 = vmatmul.f32.gmra.mxu0 %v1357_v39  ;;  %v1378_v39 = vsub.f32 %v611_v12, %v10708_v63 }
 0x2ef   : > { %v1373_v10 = vand.u32 4294901760, %v1372_v5 }
 0x2f1   : > { %2280 = vmatmul.f32.gmra.mxu2 %v1362_v1  ;;  %v1379_v1 = vand.u32 4294901760, %v1378_v39 }
 0x2f2   : > { %v10706_v53 = vpop.f32.mrf.mxu1 }
 0x2f3   : > { %14767 = vst [vmem:[#allocation126_spill] sm:$0xff] %v10706_v53  ;;  %2863 = vmatmul.f32.gmra.mxu3 %v1363_v28  ;;  %v10710_v50 = vpop.f32.mrf.mxu0  ;;  %v1380_v28 = vsub.f32 %v1378_v39, %v1379_v1 }
 0x2f5   : > { %1787 = vmatmul.f32.gmra.mxu1 %v10688_v31  ;;  %v1381_v31 = vand.u32 4294901760, %v1380_v28 }
 0x2f6   : > { %1366 = vmatmul.f32.gmra.mxu0 %v1365_v30 }
 0x2f9   : > { %2285 = vmatmul.f32.gmra.mxu2 %v1370_v35 }
 0x2fa   : > { %v10714_v38 = vpop.f32.mrf.mxu1 }
 0x2fb   : > { %2869 = vmatmul.f32.gmra.mxu3 %v1371_v36  ;;  %v10716_v53 = vpop.f32.mrf.mxu0 }
 0x2fd   : > { %1791 = vmatmul.f32.gmra.mxu1 %v10698_v24 }
 0x2fe   : > { %1374 = vmatmul.f32.gmra.mxu0 %v1373_v10 }
 0x301   : > { %2290 = vmatmul.f32.gmra.mxu2 %v1378_v39 }
 0x302   : > { %v10719_v54 = vpop.f32.mrf.mxu1 }
 0x303   : > { %2875 = vmatmul.f32.gmra.mxu3 %v1379_v1  ;;  %v10721_v30 = vpop.f32.mrf.mxu0 }
 0x305   : > { %1795 = vmatmul.f32.gmra.mxu1 %v10708_v63 }
 0x306   : > { %1382 = vmatmul.f32.gmra.mxu0 %v1381_v31 }
 0x30a   : > { %v10724_v35 = vpop.f32.mrf.mxu1 }
 0x30b   : > { %14769 = vst [vmem:[#allocation128_spill] sm:$0xff] %v10724_v35  ;;  %v10726_v5 = vpop.f32.mrf.mxu0 }
 0x30d   : > { %3305 = vmatmul.f32.vlgmr.msrb.gmra.mxu1 %v9844_v25 }
 0x30e   : > { %2908 = vmatmul.f32.vlgmr.msrb.gmra.mxu0 %v9844_v25 }
 0x312   : > { %v10730_v12 = vpop.f32.mrf.mxu1 }
 0x313   : > { %14770 = vst [vmem:[#allocation129_spill] sm:$0xff] %v10730_v12  ;;  %v10732_v36 = vpop.f32.mrf.mxu0 }
 0x314   : > { %14771 = vst [vmem:[#allocation130_spill] sm:$0xff] %v10732_v36 }
 0x315   : > { %3309 = vmatmul.f32.gmra.mxu1 %v9849_v29 }
 0x316   : > { %2912 = vmatmul.f32.gmra.mxu0 %v9849_v29  ;;  %v10754_v29 = vpop.f32.mrf.mxu3 }
 0x31a   : > { %v10736_v39 = vpop.f32.mrf.mxu1 }
 0x31b   : > { %14772 = vst [vmem:[#allocation131_spill] sm:$0xff] %v10736_v39  ;;  %v10738_v10 = vpop.f32.mrf.mxu0 }
 0x31c   : > { %14773 = vst [vmem:[#allocation132_spill] sm:$0xff] %v10738_v10 }
 0x31d   : > { %3313 = vmatmul.f32.gmra.mxu1 %v9854_v37 }
 0x31e   : > { %2916 = vmatmul.f32.gmra.mxu0 %v9854_v37 }
 0x322   : > { %v10742_v31 = vpop.f32.mrf.mxu1 }
 0x323   : > { %14774 = vst [vmem:[#allocation133_spill] sm:$0xff] %v10742_v31  ;;  %v10744_v1 = vpop.f32.mrf.mxu0  ;;  %v10762_v31 = vpop.f32.mrf.mxu2 }
 0x324   : > { %14775 = vst [vmem:[#allocation134_spill] sm:$0xff] %v10744_v1 }
 0x325   : > { %3317 = vmatmul.f32.gmra.mxu1 %v9863_v45 }
 0x326   : > { %2920 = vmatmul.f32.gmra.mxu0 %v9863_v45  ;;  %v10764_v45 = vpop.f32.mrf.mxu3 }
 0x32a   : > { %v10748_v25 = vpop.f32.mrf.mxu1 }
 0x32b   : > { %14776 = vst [vmem:[#allocation135_spill] sm:$0xff] %v10748_v25  ;;  %v10750_v28 = vpop.f32.mrf.mxu0 }
 0x32c   : > { %14777 = vst [vmem:[#allocation136_spill] sm:$0xff] %v10750_v28 }
 0x32d   : > { %3321 = vmatmul.f32.gmra.mxu1 %v9870_v52 }
 0x32e   : > { %2924 = vmatmul.f32.gmra.mxu0 %v9870_v52  ;;  %v10772_v52 = vpop.f32.mrf.mxu2 }
 0x332   : > { %v10756_v39 = vpop.f32.mrf.mxu1 }
 0x333   : > { %14778 = vst [vmem:[#allocation137_spill] sm:$0xff] %v10756_v39  ;;  %v10758_v37 = vpop.f32.mrf.mxu0 }
 0x334   : > { %14779 = vst [vmem:[#allocation138_spill] sm:$0xff] %v10758_v37  ;;  %v10776_v37 = vpop.f32.mrf.mxu3 }
 0x335   : > { %3325 = vmatmul.f32.gmra.mxu1 %v9876_v59 }
 0x336   : > { %2928 = vmatmul.f32.gmra.mxu0 %v9876_v59 }
 0x33a   : > { %v10766_v25 = vpop.f32.mrf.mxu1 }
 0x33b   : > { %14780 = vst [vmem:[#allocation139_spill] sm:$0xff] %v10766_v25  ;;  %v10768_v28 = vpop.f32.mrf.mxu0  ;;  %v10784_v25 = vpop.f32.mrf.mxu2 }
 0x33c   : > { %14781 = vst [vmem:[#allocation140_spill] sm:$0xff] %v10768_v28 }
 0x33d   : > { %3329 = vmatmul.f32.gmra.mxu1 %v9882_v2 }
 0x33e   : > { %2932 = vmatmul.f32.gmra.mxu0 %v9882_v2  ;;  %v10789_v2 = vpop.f32.mrf.mxu3 }
 0x342   : > { %v10774_v39 = vpop.f32.mrf.mxu1 }
 0x343   : > { %14782 = vst [vmem:[#allocation141_spill] sm:$0xff] %v10774_v39  ;;  %v10778_v1 = vpop.f32.mrf.mxu0 }
 0x344   : > { %14783 = vst [vmem:[#allocation142_spill] sm:$0xff] %v10778_v1  ;;  %v10797_v1 = vpop.f32.mrf.mxu2 }
 0x345   : > { %3333 = vmatmul.f32.gmra.mxu1 %v9888_v9 }
 0x346   : > { %2936 = vmatmul.f32.gmra.mxu0 %v9888_v9  ;;  %v10800_v9 = vpop.f32.mrf.mxu3 }
 0x34a   : > { %v10782_v59 = vpop.f32.mrf.mxu1 }
 0x34b   : > { %14784 = vst [vmem:[#allocation143_spill] sm:$0xff] %v10782_v59  ;;  %v10786_v28 = vpop.f32.mrf.mxu0 }
 0x34c   : > { %14785 = vst [vmem:[#allocation144_spill] sm:$0xff] %v10786_v28 }
 0x34d   : > { %3337 = vmatmul.f32.gmra.mxu1 %v9894_v16 }
 0x34e   : > { %2940 = vmatmul.f32.gmra.mxu0 %v9894_v16  ;;  %v10808_v16 = vpop.f32.mrf.mxu2 }
 0x352   : > { %v10792_v39 = vpop.f32.mrf.mxu1 }
 0x353   : > { %14786 = vst [vmem:[#allocation145_spill] sm:$0xff] %v10792_v39  ;;  %v10794_v10 = vpop.f32.mrf.mxu0  ;;  %v10810_v39 = vpop.f32.mrf.mxu3 }
 0x354   : > { %14787 = vst [vmem:[#allocation146_spill] sm:$0xff] %v10794_v10 }
 0x355   : > { %3341 = vmatmul.f32.gmra.mxu1 %v9900_v23 }
 0x356   : > { %2944 = vmatmul.f32.gmra.mxu0 %v9900_v23  ;;  %v10818_v23 = vpop.f32.mrf.mxu2 }
 0x35a   : > { %v10802_v59 = vpop.f32.mrf.mxu1 }
 0x35b   : > { %14788 = vst [vmem:[#allocation147_spill] sm:$0xff] %v10802_v59  ;;  %v10804_v28 = vpop.f32.mrf.mxu0 }
 0x35c   : > { %14789 = vst [vmem:[#allocation148_spill] sm:$0xff] %v10804_v28  ;;  %v10822_v28 = vpop.f32.mrf.mxu3 }
 0x35d   : > { %3345 = vmatmul.f32.gmra.mxu1 %v9906_v32 }
 0x35e   : > { %2948 = vmatmul.f32.gmra.mxu0 %v9906_v32 }
 0x362   : > { %v10812_v10 = vpop.f32.mrf.mxu1 }
 0x363   : > { %14790 = vst [vmem:[#allocation149_spill] sm:$0xff] %v10812_v10  ;;  %v10814_v12 = vpop.f32.mrf.mxu0  ;;  %v10830_v10 = vpop.f32.mrf.mxu2 }
 0x364   : > { %14791 = vst [vmem:[#allocation150_spill] sm:$0xff] %v10814_v12 }
 0x365   : > { %3349 = vmatmul.f32.gmra.mxu1 %v9912_v40 }
 0x366   : > { %2952 = vmatmul.f32.gmra.mxu0 %v9912_v40  ;;  %v10835_v40 = vpop.f32.mrf.mxu3 }
 0x367   : > { %14796 = vst [vmem:[#allocation155_spill] sm:$0xff] %v10835_v40 }
 0x36a   : > { %v10820_v59 = vpop.f32.mrf.mxu1 }
 0x36b   : > { %14792 = vst [vmem:[#allocation151_spill] sm:$0xff] %v10820_v59  ;;  %v10824_v36 = vpop.f32.mrf.mxu0 }
 0x36c   : > { %14793 = vst [vmem:[#allocation152_spill] sm:$0xff] %v10824_v36  ;;  %v10843_v36 = vpop.f32.mrf.mxu2 }
 0x36d   : > { %3353 = vmatmul.f32.gmra.mxu1 %v9918_v48  ;;  %14799 = vst [vmem:[#allocation158_spill] sm:$0xff] %v10843_v36 }
 0x36e   : > { %2956 = vmatmul.f32.gmra.mxu0 %v9918_v48  ;;  %v10846_v48 = vpop.f32.mrf.mxu3 }
 0x36f   : > { %14800 = vst [vmem:[#allocation159_spill] sm:$0xff] %v10846_v48 }
 0x372   : > { %v10828_v32 = vpop.f32.mrf.mxu1 }
 0x373   : > { %14794 = vst [vmem:[#allocation153_spill] sm:$0xff] %v10828_v32  ;;  %v10832_v12 = vpop.f32.mrf.mxu0 }
 0x374   : > { %14795 = vst [vmem:[#allocation154_spill] sm:$0xff] %v10832_v12 }
 0x375   : > { %3357 = vmatmul.f32.gmra.mxu1 %v9924_v56 }
 0x376   : > { %2960 = vmatmul.f32.gmra.mxu0 %v9924_v56  ;;  %v10854_v56 = vpop.f32.mrf.mxu2 }
 0x377   : > { %14803 = vst [vmem:[#allocation162_spill] sm:$0xff] %v10854_v56 }
 0x37a   : > { %v10838_v59 = vpop.f32.mrf.mxu1 }
 0x37b   : > { %14797 = vst [vmem:[#allocation156_spill] sm:$0xff] %v10838_v59  ;;  %v10840_v63 = vpop.f32.mrf.mxu0  ;;  %v10856_v59 = vpop.f32.mrf.mxu3 }
 0x37c   : > { %14798 = vst [vmem:[#allocation157_spill] sm:$0xff] %v10840_v63 }
 0x37d   : > { %3361 = vmatmul.f32.gmra.mxu1 %v9930_v0  ;;  %14804 = vst [vmem:[#allocation163_spill] sm:$0xff] %v10856_v59 }
 0x37e   : > { %2964 = vmatmul.f32.gmra.mxu0 %v9930_v0 }
 0x382   : > { %v10848_v32 = vpop.f32.mrf.mxu1 }
 0x383   : > { %14801 = vst [vmem:[#allocation160_spill] sm:$0xff] %v10848_v32  ;;  %v10850_v12 = vpop.f32.mrf.mxu0  ;;  %v10861_v32 = vpop.f32.mrf.mxu2 }
 0x384   : > { %14802 = vst [vmem:[#allocation161_spill] sm:$0xff] %v10850_v12  ;;  %v10863_v48 = vpop.f32.mrf.mxu3 }
 0x385   : > { %3365 = vmatmul.f32.gmra.mxu1 %v9936_v8 }
 0x386   : > { %2968 = vmatmul.f32.gmra.mxu0 %v9936_v8 }
 0x38a   : > { %v3306_v63 = vpop.f32.mrf.mxu1 }
 0x38b   : > { %v2909_v40 = vpop.f32.mrf.mxu0 }
 0x38c   : > { %v2910_v35 = vadd.f32 %v2909_v40, %v9981_v62  ;;  %v10875_v40 = vpop.f32.mrf.mxu2 }
 0x38d   : > { %3369 = vmatmul.f32.gmra.mxu1 %v9942_v17 }
 0x38e   : > { %v3307_v0 = vadd.f32 %v3306_v63, %v2910_v35  ;;  %2972 = vmatmul.f32.gmra.mxu0 %v9942_v17 }
 0x390   : > { %9183 = vtanh.f32 %v3307_v0 }
 0x392   : > { %v3310_v12 = vpop.f32.mrf.mxu1 }
 0x393   : > { %v2913_v8 = vpop.f32.mrf.mxu0 }
 0x394   : > { %v2914_v56 = vadd.f32 %v2913_v8, %v9990_v19 }
 0x395   : > { %3373 = vmatmul.f32.gmra.mxu1 %v9948_v26 }
 0x396   : > { %v9184_v59 = vpop.eup %9183  ;;  %v3311_v36 = vadd.f32 %v3310_v12, %v2914_v56  ;;  %2976 = vmatmul.f32.gmra.mxu0 %v9948_v26  ;;  %v10880_v12 = vpop.f32.mrf.mxu3 }
 0x397   : > { %v3784_v62 = vsel %vm330_vm0, %v9184_v59, 0 }
 0x398   : > { %9185 = vtanh.f32 %v3311_v36  ;;  %v10869_v63 = vand.u32 4294901760, %v3784_v62 }
 0x39a   : > { %14805 = vst [vmem:[#allocation164_spill] sm:$0xff] %v10869_v63  ;;  %v3314_v17 = vpop.f32.mrf.mxu1  ;;  %v10872_v35 = vsub.f32 %v3784_v62, %v10869_v63  ;;  %4875 = vmatmul.f32.vlgmr.msrb.gmra.mxu3 %v10869_v63 }
 0x39b   : > { %v2917_v19 = vpop.f32.mrf.mxu0 }
 0x39c   : > { %v2918_v0 = vadd.f32 %v2917_v19, %v9999_v47  ;;  %v14200_v26 = vand.u32 4294901760, %v10872_v35 }
 0x39d   : > { %3377 = vmatmul.f32.gmra.mxu1 %v9974_v44 }
 0x39e   : > { %v9186_v36 = vpop.eup %9185  ;;  %v3315_v59 = vadd.f32 %v3314_v17, %v2918_v0  ;;  %2980 = vmatmul.f32.gmra.mxu0 %v9974_v44  ;;  %v4088_v56 = vsub.f32 %v10872_v35, %v14200_v26  ;;  %v10896_v26 = vpop.f32.mrf.mxu2 }
 0x39f   : > { %v3787_v8 = vsel %vm330_vm0, %v9186_v36, 0 }
 0x3a0   : > { %9187 = vtanh.f32 %v3315_v59  ;;  %v4089_v62 = vand.u32 4294901760, %v4088_v56  ;;  %v10887_v63 = vand.u32 4294901760, %v3787_v8 }
 0x3a2   : > { %14806 = vst [vmem:[#allocation165_spill] sm:$0xff] %v10887_v63  ;;  %v3318_v47 = vpop.f32.mrf.mxu1  ;;  %4090 = vmatmul.f32.vlgmr.msrb.gmra.mxu2 %v4089_v62  ;;  %4879 = vmatmul.f32.gmra.mxu3 %v10887_v63  ;;  %v10891_v19 = vsub.f32 %v3787_v8, %v10887_v63  ;;  %v10902_v62 = vpop.f32.mrf.mxu3 }
 0x3a3   : > { %v2921_v17 = vpop.f32.mrf.mxu0  ;;  %14807 = vst [vmem:[#allocation166_spill] sm:$0xff] %v10902_v62 }
 0x3a4   : > { %v2922_v44 = vadd.f32 %v2921_v17, %v10008_v6  ;;  %v14203_v0 = vand.u32 4294901760, %v10891_v19 }
 0x3a5   : > { %3381 = vmatmul.f32.gmra.mxu1 %v9983_v3 }
 0x3a6   : > { %v9188_v36 = vpop.eup %9187  ;;  %v3319_v59 = vadd.f32 %v3318_v47, %v2922_v44  ;;  %2984 = vmatmul.f32.gmra.mxu0 %v9983_v3  ;;  %v4096_v56 = vsub.f32 %v10891_v19, %v14203_v0 }
 0x3a7   : > { %v3790_v8 = vsel %vm330_vm0, %v9188_v36, 0 }
 0x3a8   : > { %9189 = vtanh.f32 %v3319_v59  ;;  %v4097_v6 = vand.u32 4294901760, %v4096_v56  ;;  %v10905_v17 = vand.u32 4294901760, %v3790_v8  ;;  %v10918_v56 = vpop.f32.mrf.mxu2 }
 0x3aa   : > { %14808 = vst [vmem:[#allocation167_spill] sm:$0xff] %v10905_v17  ;;  %v3322_v63 = vpop.f32.mrf.mxu1  ;;  %4098 = vmatmul.f32.gmra.mxu2 %v4097_v6  ;;  %4883 = vmatmul.f32.gmra.mxu3 %v10905_v17  ;;  %v10909_v47 = vsub.f32 %v3790_v8, %v10905_v17 }
 0x3ab   : > { %v2925_v3 = vpop.f32.mrf.mxu0 }
 0x3ac   : > { %v2926_v44 = vadd.f32 %v2925_v3, %v10017_v34  ;;  %v14206_v0 = vand.u32 4294901760, %v10909_v47  ;;  %v10923_v34 = vpop.f32.mrf.mxu3 }
 0x3ad   : > { %3385 = vmatmul.f32.gmra.mxu1 %v9992_v22  ;;  %14810 = vst [vmem:[#allocation169_spill] sm:$0xff] %v10923_v34 }
 0x3ae   : > { %v9190_v62 = vpop.eup %9189  ;;  %v3323_v36 = vadd.f32 %v3322_v63, %v2926_v44  ;;  %2988 = vmatmul.f32.gmra.mxu0 %v9992_v22  ;;  %v4104_v59 = vsub.f32 %v10909_v47, %v14206_v0 }
 0x3af   : > { %v3793_v8 = vsel %vm330_vm0, %v9190_v62, 0 }
 0x3b0   : > { %9191 = vtanh.f32 %v3323_v36  ;;  %v4105_v6 = vand.u32 4294901760, %v4104_v59  ;;  %v10921_v17 = vand.u32 4294901760, %v3793_v8  ;;  %v10939_v34 = vpop.f32.mrf.mxu2 }
 0x3b1   : > { %14812 = vst [vmem:[#allocation171_spill] sm:$0xff] %v10939_v34 }
 0x3b2   : > { %14809 = vst [vmem:[#allocation168_spill] sm:$0xff] %v10921_v17  ;;  %v3326_v3 = vpop.f32.mrf.mxu1  ;;  %4106 = vmatmul.f32.gmra.mxu2 %v4105_v6  ;;  %4887 = vmatmul.f32.gmra.mxu3 %v10921_v17  ;;  %v10927_v22 = vsub.f32 %v3793_v8, %v10921_v17 }
 0x3b3   : > { %v2929_v63 = vpop.f32.mrf.mxu0 }
 0x3b4   : > { %v2930_v44 = vadd.f32 %v2929_v63, %v10026_v61  ;;  %v14209_v62 = vand.u32 4294901760, %v10927_v22 }
 0x3b5   : > { %3389 = vmatmul.f32.gmra.mxu1 %v10001_v51 }
 0x3b6   : > { %v9192_v36 = vpop.eup %9191  ;;  %v3327_v59 = vadd.f32 %v3326_v3, %v2930_v44  ;;  %2992 = vmatmul.f32.gmra.mxu0 %v10001_v51  ;;  %v4112_v6 = vsub.f32 %v10927_v22, %v14209_v62  ;;  %v10945_v51 = vpop.f32.mrf.mxu3 }
 0x3b7   : > { %v3796_v0 = vsel %vm330_vm0, %v9192_v36, 0  ;;  %14814 = vst [vmem:[#allocation173_spill] sm:$0xff] %v10945_v51 }
 0x3b8   : > { %9193 = vtanh.f32 %v3327_v59  ;;  %v4113_v8 = vand.u32 4294901760, %v4112_v6  ;;  %v10937_v17 = vand.u32 4294901760, %v3796_v0 }
 0x3ba   : > { %14811 = vst [vmem:[#allocation170_spill] sm:$0xff] %v10937_v17  ;;  %v3330_v61 = vpop.f32.mrf.mxu1  ;;  %4114 = vmatmul.f32.gmra.mxu2 %v4113_v8  ;;  %4891 = vmatmul.f32.gmra.mxu3 %v10937_v17  ;;  %v10943_v3 = vsub.f32 %v3796_v0, %v10937_v17 }
 0x3bb   : > { %v2933_v63 = vpop.f32.mrf.mxu0 }
 0x3bc   : > { %14813 = vst [vmem:[#allocation172_spill] sm:$0xff] %v10943_v3  ;;  %v2934_v44 = vadd.f32 %v2933_v63, %v10035_v27  ;;  %v14212_v36 = vand.u32 4294901760, %v10943_v3 }
 0x3bd   : > { %3393 = vmatmul.f32.gmra.mxu1 %v10010_v11 }
 0x3be   : > { %v9194_v59 = vpop.eup %9193  ;;  %v3331_v6 = vadd.f32 %v3330_v61, %v2934_v44  ;;  %2996 = vmatmul.f32.gmra.mxu0 %v10010_v11  ;;  %v4120_v8 = vsub.f32 %v10943_v3, %v14212_v36  ;;  %v10961_v61 = vpop.f32.mrf.mxu2  ;;  %v14886_v3 = vld [vmem:[#allocation22_spill] sm:$0xff] }
 0x3bf   : > { %v3799_v0 = vsel %vm330_vm0, %v9194_v59, 0  ;;  %14817 = vst [vmem:[#allocation176_spill] sm:$0xff] %v10961_v61  ;;  %v10966_v59 = vpop.f32.mrf.mxu3 }
 0x3c0   : > { %9195 = vtanh.f32 %v3331_v6  ;;  %v4121_v62 = vand.u32 4294901760, %v4120_v8  ;;  %v10955_v17 = vand.u32 4294901760, %v3799_v0  ;;  %14818 = vst [vmem:[#allocation177_spill] sm:$0xff] %v10966_v59 }
 0x3c2   : > { %14815 = vst [vmem:[#allocation174_spill] sm:$0xff] %v10955_v17  ;;  %v3334_v51 = vpop.f32.mrf.mxu1  ;;  %4122 = vmatmul.f32.gmra.mxu2 %v4121_v62  ;;  %4895 = vmatmul.f32.gmra.mxu3 %v10955_v17  ;;  %v10959_v27 = vsub.f32 %v3799_v0, %v10955_v17 }
 0x3c3   : > { %v2937_v11 = vpop.f32.mrf.mxu0 }
 0x3c4   : > { %14816 = vst [vmem:[#allocation175_spill] sm:$0xff] %v10959_v27  ;;  %v2938_v63 = vadd.f32 %v2937_v11, %v10044_v60  ;;  %v14215_v44 = vand.u32 4294901760, %v10959_v27 }
 0x3c5   : > { %3397 = vmatmul.f32.gmra.mxu1 %v10019_v41 }
 0x3c6   : > { %v9196_v6 = vpop.eup %9195  ;;  %v3335_v8 = vadd.f32 %v3334_v51, %v2938_v63  ;;  %3000 = vmatmul.f32.gmra.mxu0 %v10019_v41  ;;  %v4128_v62 = vsub.f32 %v10959_v27, %v14215_v44  ;;  %v10982_v44 = vpop.f32.mrf.mxu2 }
 0x3c7   : > { %v3802_v0 = vsel %vm330_vm0, %v9196_v6, 0  ;;  %14821 = vst [vmem:[#allocation180_spill] sm:$0xff] %v10982_v44  ;;  %v14826_v44 = vld [vmem:[#allocation2_spill] sm:$0xff] }
 0x3c8   : > { %9197 = vtanh.f32 %v3335_v8  ;;  %v4129_v36 = vand.u32 4294901760, %v4128_v62  ;;  %v10973_v17 = vand.u32 4294901760, %v3802_v0  ;;  %v10988_v62 = vpop.f32.mrf.mxu3 }
 0x3c9   : > { %14822 = vst [vmem:[#allocation181_spill] sm:$0xff] %v10988_v62 }
 0x3ca   : > { %14819 = vst [vmem:[#allocation178_spill] sm:$0xff] %v10973_v17  ;;  %v3338_v60 = vpop.f32.mrf.mxu1  ;;  %4130 = vmatmul.f32.gmra.mxu2 %v4129_v36  ;;  %4899 = vmatmul.f32.gmra.mxu3 %v10973_v17  ;;  %v10977_v11 = vsub.f32 %v3802_v0, %v10973_v17 }
 0x3cb   : > { %v2941_v51 = vpop.f32.mrf.mxu0 }
 0x3cc   : > { %14820 = vst [vmem:[#allocation179_spill] sm:$0xff] %v10977_v11  ;;  %v2942_v41 = vadd.f32 %v2941_v51, %v10053_v33  ;;  %v14218_v63 = vand.u32 4294901760, %v10977_v11 }
 0x3cd   : > { %3401 = vmatmul.f32.gmra.mxu1 %v10028_v4 }
 0x3ce   : > { %v9198_v6 = vpop.eup %9197  ;;  %v3339_v8 = vadd.f32 %v3338_v60, %v2942_v41  ;;  %3004 = vmatmul.f32.gmra.mxu0 %v10028_v4  ;;  %v4136_v36 = vsub.f32 %v10977_v11, %v14218_v63  ;;  %v14825_v41 = vld [vmem:[#allocation5_spill] sm:$0xff]  ;;  %v14843_v11 = vld [vmem:[#allocation6_spill] sm:$0xff] }
 0x3cf   : > { %v3805_v0 = vsel %vm330_vm0, %v9198_v6, 0 }
 0x3d0   : > { %9199 = vtanh.f32 %v3339_v8  ;;  %v4137_v33 = vand.u32 4294901760, %v4136_v36  ;;  %v10991_v51 = vand.u32 4294901760, %v3805_v0  ;;  %v11004_v36 = vpop.f32.mrf.mxu2 }
 0x3d1   : > { %14827 = vst [vmem:[#allocation5_spill] sm:$0xff] %v11004_v36 }
 0x3d2   : > { %14823 = vst [vmem:[#allocation182_spill] sm:$0xff] %v10991_v51  ;;  %v3342_v17 = vpop.f32.mrf.mxu1  ;;  %4138 = vmatmul.f32.gmra.mxu2 %v4137_v33  ;;  %4903 = vmatmul.f32.gmra.mxu3 %v10991_v51  ;;  %v10995_v60 = vsub.f32 %v3805_v0, %v10991_v51 }
 0x3d3   : > { %v2945_v4 = vpop.f32.mrf.mxu0 }
 0x3d4   : > { %14824 = vst [vmem:[#allocation183_spill] sm:$0xff] %v10995_v60  ;;  %v2946_v59 = vadd.f32 %v2945_v4, %v14825_v41  ;;  %v14221_v63 = vand.u32 4294901760, %v10995_v60  ;;  %v11009_v4 = vpop.f32.mrf.mxu3 }
 0x3d5   : > { %3405 = vmatmul.f32.gmra.mxu1 %v14826_v44  ;;  %14829 = vst [vmem:[#allocation184_spill] sm:$0xff] %v11009_v4 }
 0x3d6   : > { %v9200_v62 = vpop.eup %9199  ;;  %v3343_v6 = vadd.f32 %v3342_v17, %v2946_v59  ;;  %3008 = vmatmul.f32.gmra.mxu0 %v14826_v44  ;;  %v4144_v8 = vsub.f32 %v10995_v60, %v14221_v63  ;;  %v14831_v59 = vld [vmem:[#allocation7_spill] sm:$0xff] }
 0x3d7   : > { %v3808_v0 = vsel %vm330_vm0, %v9200_v62, 0  ;;  %v14832_v60 = vld [vmem:[#allocation3_spill] sm:$0xff] }
 0x3d8   : > { %9201 = vtanh.f32 %v3343_v6  ;;  %v4145_v33 = vand.u32 4294901760, %v4144_v8  ;;  %v11007_v51 = vand.u32 4294901760, %v3808_v0  ;;  %v11025_v36 = vpop.f32.mrf.mxu2 }
 0x3d9   : > { %14834 = vst [vmem:[#allocation3_spill] sm:$0xff] %v11025_v36 }
 0x3da   : > { %14828 = vst [vmem:[#allocation2_spill] sm:$0xff] %v11007_v51  ;;  %v3346_v41 = vpop.f32.mrf.mxu1  ;;  %4146 = vmatmul.f32.gmra.mxu2 %v4145_v33  ;;  %4907 = vmatmul.f32.gmra.mxu3 %v11007_v51  ;;  %v11013_v17 = vsub.f32 %v3808_v0, %v11007_v51 }
 0x3db   : > { %v2949_v44 = vpop.f32.mrf.mxu0 }
 0x3dc   : > { %14830 = vst [vmem:[#allocation185_spill] sm:$0xff] %v11013_v17  ;;  %v2950_v63 = vadd.f32 %v2949_v44, %v14831_v59  ;;  %v14226_v62 = vand.u32 4294901760, %v11013_v17  ;;  %v14837_v59 = vld [vmem:[#allocation9_spill] sm:$0xff] }
 0x3dd   : > { %3409 = vmatmul.f32.gmra.mxu1 %v14832_v60 }
 0x3de   : > { %v9202_v6 = vpop.eup %9201  ;;  %v3347_v8 = vadd.f32 %v3346_v41, %v2950_v63  ;;  %3012 = vmatmul.f32.gmra.mxu0 %v14832_v60  ;;  %v4152_v33 = vsub.f32 %v11013_v17, %v14226_v62  ;;  %v11031_v60 = vpop.f32.mrf.mxu3  ;;  %v14838_v17 = vld [vmem:[#allocation4_spill] sm:$0xff] }
 0x3df   : > { %v3811_v4 = vsel %vm330_vm0, %v9202_v6, 0  ;;  %14836 = vst [vmem:[#allocation187_spill] sm:$0xff] %v11031_v60 }
 0x3e0   : > { %9203 = vtanh.f32 %v3347_v8  ;;  %v4153_v0 = vand.u32 4294901760, %v4152_v33  ;;  %v11023_v51 = vand.u32 4294901760, %v3811_v4 }
 0x3e2   : > { %14833 = vst [vmem:[#allocation7_spill] sm:$0xff] %v11023_v51  ;;  %v3350_v44 = vpop.f32.mrf.mxu1  ;;  %4154 = vmatmul.f32.gmra.mxu2 %v4153_v0  ;;  %4911 = vmatmul.f32.gmra.mxu3 %v11023_v51  ;;  %v11029_v63 = vsub.f32 %v3811_v4, %v11023_v51 }
 0x3e3   : > { %v2953_v41 = vpop.f32.mrf.mxu0 }
 0x3e4   : > { %14835 = vst [vmem:[#allocation186_spill] sm:$0xff] %v11029_v63  ;;  %v2954_v62 = vadd.f32 %v2953_v41, %v14837_v59  ;;  %v14233_v6 = vand.u32 4294901760, %v11029_v63 }
 0x3e5   : > { %3413 = vmatmul.f32.gmra.mxu1 %v14838_v17 }
 0x3e6   : > { %v9204_v8 = vpop.eup %9203  ;;  %v3351_v33 = vadd.f32 %v3350_v44, %v2954_v62  ;;  %3016 = vmatmul.f32.gmra.mxu0 %v14838_v17  ;;  %v4160_v0 = vsub.f32 %v11029_v63, %v14233_v6  ;;  %v11047_v62 = vpop.f32.mrf.mxu2  ;;  %v14842_v44 = vld [vmem:[#allocation11_spill] sm:$0xff]  ;;  %v14854_v63 = vld [vmem:[#allocation10_spill] sm:$0xff] }
 0x3e7   : > { %v3814_v4 = vsel %vm330_vm0, %v9204_v8, 0  ;;  %14841 = vst [vmem:[#allocation188_spill] sm:$0xff] %v11047_v62 }
 0x3e8   : > { %9205 = vtanh.f32 %v3351_v33  ;;  %v4161_v51 = vand.u32 4294901760, %v4160_v0  ;;  %v11041_v60 = vand.u32 4294901760, %v3814_v4  ;;  %v11052_v33 = vpop.f32.mrf.mxu3 }
 0x3e9   : > { %14844 = vst [vmem:[#allocation11_spill] sm:$0xff] %v11052_v33  ;;  %v14848_v33 = vld [vmem:[#allocation8_spill] sm:$0xff] }
 0x3ea   : > { %14839 = vst [vmem:[#allocation9_spill] sm:$0xff] %v11041_v60  ;;  %v3354_v36 = vpop.f32.mrf.mxu1  ;;  %4162 = vmatmul.f32.gmra.mxu2 %v4161_v51  ;;  %4915 = vmatmul.f32.gmra.mxu3 %v11041_v60  ;;  %v11045_v41 = vsub.f32 %v3814_v4, %v11041_v60 }
 0x3eb   : > { %v2957_v17 = vpop.f32.mrf.mxu0 }
 0x3ec   : > { %14840 = vst [vmem:[#allocation4_spill] sm:$0xff] %v11045_v41  ;;  %v2958_v59 = vadd.f32 %v2957_v17, %v14842_v44  ;;  %v14236_v8 = vand.u32 4294901760, %v11045_v41 }
 0x3ed   : > { %3417 = vmatmul.f32.gmra.mxu1 %v14843_v11 }
 0x3ee   : > { %v9206_v0 = vpop.eup %9205  ;;  %v3355_v6 = vadd.f32 %v3354_v36, %v2958_v59  ;;  %3020 = vmatmul.f32.gmra.mxu0 %v14843_v11  ;;  %v4168_v51 = vsub.f32 %v11045_v41, %v14236_v8  ;;  %v14847_v59 = vld [vmem:[#allocation13_spill] sm:$0xff]  ;;  %v11068_v41 = vpop.f32.mrf.mxu2 }
 0x3ef   : > { %v3817_v4 = vsel %vm330_vm0, %v9206_v0, 0  ;;  %14849 = vst [vmem:[#allocation13_spill] sm:$0xff] %v11068_v41 }
 0x3f0   : > { %9207 = vtanh.f32 %v3355_v6  ;;  %v4169_v60 = vand.u32 4294901760, %v4168_v51  ;;  %v11059_v62 = vand.u32 4294901760, %v3817_v4  ;;  %v11074_v51 = vpop.f32.mrf.mxu3 }
 0x3f1   : > { %14850 = vst [vmem:[#allocation8_spill] sm:$0xff] %v11074_v51 }
 0x3f2   : > { %14845 = vst [vmem:[#allocation6_spill] sm:$0xff] %v11059_v62  ;;  %v3358_v17 = vpop.f32.mrf.mxu1  ;;  %4170 = vmatmul.f32.gmra.mxu2 %v4169_v60  ;;  %4919 = vmatmul.f32.gmra.mxu3 %v11059_v62  ;;  %v11063_v44 = vsub.f32 %v3817_v4, %v11059_v62 }
 0x3f3   : > { %v2961_v36 = vpop.f32.mrf.mxu0 }
 0x3f4   : > { %14846 = vst [vmem:[#allocation189_spill] sm:$0xff] %v11063_v44  ;;  %v2962_v11 = vadd.f32 %v2961_v36, %v14847_v59  ;;  %v14243_v8 = vand.u32 4294901760, %v11063_v44 }
 0x3f5   : > { %3421 = vmatmul.f32.gmra.mxu1 %v14848_v33 }
 0x3f6   : > { %v9208_v6 = vpop.eup %9207  ;;  %v3359_v0 = vadd.f32 %v3358_v17, %v2962_v11  ;;  %3024 = vmatmul.f32.gmra.mxu0 %v14848_v33  ;;  %v4176_v60 = vsub.f32 %v11063_v44, %v14243_v8  ;;  %v14853_v11 = vld [vmem:[#allocation15_spill] sm:$0xff]  ;;  %v14871_v44 = vld [vmem:[#allocation16_spill] sm:$0xff] }
 0x3f7   : > { %v3820_v4 = vsel %vm330_vm0, %v9208_v6, 0 }
 0x3f8   : > { %9209 = vtanh.f32 %v3359_v0  ;;  %v4177_v36 = vand.u32 4294901760, %v4176_v60  ;;  %v11077_v59 = vand.u32 4294901760, %v3820_v4  ;;  %v11090_v60 = vpop.f32.mrf.mxu2 }
 0x3f9   : > { %14855 = vst [vmem:[#allocation15_spill] sm:$0xff] %v11090_v60 }
 0x3fa   : > { %14851 = vst [vmem:[#allocation190_spill] sm:$0xff] %v11077_v59  ;;  %v3362_v62 = vpop.f32.mrf.mxu1  ;;  %4178 = vmatmul.f32.gmra.mxu2 %v4177_v36  ;;  %4923 = vmatmul.f32.gmra.mxu3 %v11077_v59  ;;  %v11081_v17 = vsub.f32 %v3820_v4, %v11077_v59 }
 0x3fb   : > { %v2965_v33 = vpop.f32.mrf.mxu0 }
 0x3fc   : > { %14852 = vst [vmem:[#allocation191_spill] sm:$0xff] %v11081_v17  ;;  %v2966_v41 = vadd.f32 %v2965_v33, %v14853_v11  ;;  %v14246_v8 = vand.u32 4294901760, %v11081_v17  ;;  %v11095_v33 = vpop.f32.mrf.mxu3 }
 0x3fd   : > { %3425 = vmatmul.f32.gmra.mxu1 %v14854_v63  ;;  %14857 = vst [vmem:[#allocation192_spill] sm:$0xff] %v11095_v33 }
 0x3fe   : > { %v9210_v51 = vpop.eup %9209  ;;  %v3363_v6 = vadd.f32 %v3362_v62, %v2966_v41  ;;  %3028 = vmatmul.f32.gmra.mxu0 %v14854_v63  ;;  %v4184_v0 = vsub.f32 %v11081_v17, %v14246_v8  ;;  %v14859_v62 = vld [vmem:[#allocation17_spill] sm:$0xff]  ;;  %v14860_v17 = vld [vmem:[#allocation12_spill] sm:$0xff] }
 0x3ff   : > { %v3823_v4 = vsel %vm330_vm0, %v9210_v51, 0 }
 0x400   : > { %9211 = vtanh.f32 %v3363_v6  ;;  %v4185_v36 = vand.u32 4294901760, %v4184_v0  ;;  %v11093_v59 = vand.u32 4294901760, %v3823_v4  ;;  %v11111_v60 = vpop.f32.mrf.mxu2 }
 0x401   : > { %14862 = vst [vmem:[#allocation12_spill] sm:$0xff] %v11111_v60 }
 0x402   : > { %14856 = vst [vmem:[#allocation10_spill] sm:$0xff] %v11093_v59  ;;  %v3366_v11 = vpop.f32.mrf.mxu1  ;;  %4186 = vmatmul.f32.gmra.mxu2 %v4185_v36  ;;  %4927 = vmatmul.f32.gmra.mxu3 %v11093_v59  ;;  %v11099_v63 = vsub.f32 %v3823_v4, %v11093_v59 }
 0x403   : > { %v2969_v41 = vpop.f32.mrf.mxu0 }
 0x404   : > { %14858 = vst [vmem:[#allocation193_spill] sm:$0xff] %v11099_v63  ;;  %v2970_v8 = vadd.f32 %v2969_v41, %v14859_v62  ;;  %v14251_v51 = vand.u32 4294901760, %v11099_v63  ;;  %v14865_v62 = vld [vmem:[#allocation19_spill] sm:$0xff] }
 0x405   : > { %3429 = vmatmul.f32.gmra.mxu1 %v14860_v17 }
 0x406   : > { %v9212_v6 = vpop.eup %9211  ;;  %v3367_v0 = vadd.f32 %v3366_v11, %v2970_v8  ;;  %3032 = vmatmul.f32.gmra.mxu0 %v14860_v17  ;;  %v4192_v36 = vsub.f32 %v11099_v63, %v14251_v51  ;;  %v11117_v17 = vpop.f32.mrf.mxu3  ;;  %v14866_v63 = vld [vmem:[#allocation14_spill] sm:$0xff] }
 0x407   : > { %v3826_v33 = vsel %vm330_vm0, %v9212_v6, 0  ;;  %14864 = vst [vmem:[#allocation195_spill] sm:$0xff] %v11117_v17 }
 0x408   : > { %9213 = vtanh.f32 %v3367_v0  ;;  %v4193_v4 = vand.u32 4294901760, %v4192_v36  ;;  %v11109_v59 = vand.u32 4294901760, %v3826_v33 }
 0x40a   : > { %14861 = vst [vmem:[#allocation17_spill] sm:$0xff] %v11109_v59  ;;  %v3370_v41 = vpop.f32.mrf.mxu1  ;;  %4194 = vmatmul.f32.gmra.mxu2 %v4193_v4  ;;  %4931 = vmatmul.f32.gmra.mxu3 %v11109_v59  ;;  %v11115_v8 = vsub.f32 %v3826_v33, %v11109_v59 }
 0x40b   : > { %v2973_v11 = vpop.f32.mrf.mxu0 }
 0x40c   : > { %14863 = vst [vmem:[#allocation194_spill] sm:$0xff] %v11115_v8  ;;  %v2974_v51 = vadd.f32 %v2973_v11, %v14865_v62  ;;  %v14258_v6 = vand.u32 4294901760, %v11115_v8 }
 0x40d   : > { %3433 = vmatmul.f32.gmra.mxu1 %v14866_v63 }
 0x40e   : > { %v9214_v0 = vpop.eup %9213  ;;  %v3371_v36 = vadd.f32 %v3370_v41, %v2974_v51  ;;  %3036 = vmatmul.f32.gmra.mxu0 %v14866_v63  ;;  %v4200_v4 = vsub.f32 %v11115_v8, %v14258_v6  ;;  %v11133_v51 = vpop.f32.mrf.mxu2  ;;  %v14870_v41 = vld [vmem:[#allocation21_spill] sm:$0xff] }
 0x40f   : > { %v3829_v33 = vsel %vm330_vm0, %v9214_v0, 0  ;;  %14869 = vst [vmem:[#allocation196_spill] sm:$0xff] %v11133_v51 }
 0x410   : > { %9215 = vtanh.f32 %v3371_v36  ;;  %v4201_v59 = vand.u32 4294901760, %v4200_v4  ;;  %v11127_v17 = vand.u32 4294901760, %v3829_v33  ;;  %v11138_v36 = vpop.f32.mrf.mxu3 }
 0x411   : > { %14872 = vst [vmem:[#allocation21_spill] sm:$0xff] %v11138_v36  ;;  %v14876_v36 = vld [vmem:[#allocation18_spill] sm:$0xff] }
 0x412   : > { %14867 = vst [vmem:[#allocation19_spill] sm:$0xff] %v11127_v17  ;;  %v3374_v60 = vpop.f32.mrf.mxu1  ;;  %4202 = vmatmul.f32.gmra.mxu2 %v4201_v59  ;;  %4935 = vmatmul.f32.gmra.mxu3 %v11127_v17  ;;  %v11131_v11 = vsub.f32 %v3829_v33, %v11127_v17 }
 0x413   : > { %v2977_v63 = vpop.f32.mrf.mxu0 }
 0x414   : > { %14868 = vst [vmem:[#allocation14_spill] sm:$0xff] %v11131_v11  ;;  %v2978_v62 = vadd.f32 %v2977_v63, %v14870_v41  ;;  %v14263_v0 = vand.u32 4294901760, %v11131_v11 }
 0x415   : > { %3437 = vmatmul.f32.gmra.mxu1 %v14871_v44 }
 0x416   : > { %v9216_v4 = vpop.eup %9215  ;;  %v3375_v6 = vadd.f32 %v3374_v60, %v2978_v62  ;;  %3040 = vmatmul.f32.gmra.mxu0 %v14871_v44  ;;  %v4208_v59 = vsub.f32 %v11131_v11, %v14263_v0  ;;  %v14875_v62 = vld [vmem:[#allocation23_spill] sm:$0xff]  ;;  %v11154_v11 = vpop.f32.mrf.mxu2 }
 0x417   : > { %v3832_v33 = vsel %vm330_vm0, %v9216_v4, 0  ;;  %14877 = vst [vmem:[#allocation23_spill] sm:$0xff] %v11154_v11 }
 0x418   : > { %9217 = vtanh.f32 %v3375_v6  ;;  %v4209_v17 = vand.u32 4294901760, %v4208_v59  ;;  %v11145_v8 = vand.u32 4294901760, %v3832_v33 }
 0x41a   : > { %14873 = vst [vmem:[#allocation16_spill] sm:$0xff] %v11145_v8  ;;  %v3378_v63 = vpop.f32.mrf.mxu1  ;;  %4210 = vmatmul.f32.gmra.mxu2 %v4209_v17  ;;  %4939 = vmatmul.f32.gmra.mxu3 %v11145_v8  ;;  %v11149_v41 = vsub.f32 %v3832_v33, %v11145_v8 }
 0x41b   : > { %v2981_v60 = vpop.f32.mrf.mxu0 }
 0x41c   : > { %14874 = vst [vmem:[#allocation197_spill] sm:$0xff] %v11149_v41  ;;  %v2982_v44 = vadd.f32 %v2981_v60, %v14875_v62  ;;  %v14268_v0 = vand.u32 4294901760, %v11149_v41 }
 0x41d   : > { %3441 = vmatmul.f32.gmra.mxu1 %v14876_v36  ;;  %v4876_v6 = vpop.f32.mrf.mxu3 }
 0x41e   : > { %v9218_v4 = vpop.eup %9217  ;;  %v3379_v59 = vadd.f32 %v3378_v63, %v2982_v44  ;;  %3044 = vmatmul.f32.gmra.mxu0 %v14876_v36  ;;  %v4216_v17 = vsub.f32 %v11149_v41, %v14268_v0  ;;  %v11167_v63 = vld [vmem:[%s14061_s4] ss:$0 sm:$0xff]  ;;  %v14880_v0 = vld [vmem:[#allocation25_spill] sm:$0xff] }
 0x41f   : > { %v3835_v33 = vsel %vm330_vm0, %v9218_v4, 0  ;;  %v14881_v4 = vld [vmem:[#allocation20_spill] sm:$0xff] }
 0x420   : > { %9219 = vtanh.f32 %v3379_v59  ;;  %v4217_v8 = vand.u32 4294901760, %v4216_v17  ;;  %v11161_v60 = vand.u32 4294901760, %v3835_v33 }
 0x422   : > { %14878 = vst [vmem:[#allocation18_spill] sm:$0xff] %v11161_v60  ;;  %v3382_v62 = vpop.f32.mrf.mxu1  ;;  %4218 = vmatmul.f32.gmra.mxu2 %v4217_v8  ;;  %4943 = vmatmul.f32.gmra.mxu3 %v11161_v60  ;;  %v11170_v36 = vsub.f32 %v3835_v33, %v11161_v60 }
 0x423   : > { %v2985_v44 = vpop.f32.mrf.mxu0 }
 0x424   : > { %14879 = vst [vmem:[#allocation198_spill] sm:$0xff] %v11170_v36  ;;  %v2986_v41 = vadd.f32 %v2985_v44, %v14880_v0  ;;  %v14277_v59 = vand.u32 4294901760, %v11170_v36 }
 0x425   : > { %3445 = vmatmul.f32.gmra.mxu1 %v14881_v4  ;;  %v4091_v17 = vpop.f32.mrf.mxu2  ;;  %v4880_v11 = vpop.f32.mrf.mxu3 }
 0x426   : > { %v9220_v8 = vpop.eup %9219  ;;  %v3383_v51 = vadd.f32 %v3382_v62, %v2986_v41  ;;  %v4092_v61 = vadd.f32 %v11167_v63, %v4091_v17  ;;  %3048 = vmatmul.f32.gmra.mxu0 %v14881_v4  ;;  %v4224_v33 = vsub.f32 %v11170_v36, %v14277_v59  ;;  %v14885_v4 = vld [vmem:[#allocation27_spill] sm:$0xff] }
 0x427   : > { %v3838_v60 = vsel %vm330_vm0, %v9220_v8, 0 }
 0x428   : > { %9221 = vtanh.f32 %v3383_v51  ;;  %v4225_v0 = vand.u32 4294901760, %v4224_v33  ;;  %v11181_v44 = vand.u32 4294901760, %v3838_v60  ;;  %v11183_v27 = vadd.f32 %v4876_v6, %v4092_v61 }
 0x42a   : > { %14882 = vst [vmem:[#allocation25_spill] sm:$0xff] %v11181_v44  ;;  %v3386_v34 = vpop.f32.mrf.mxu1  ;;  %4226 = vmatmul.f32.gmra.mxu2 %v4225_v0  ;;  %4947 = vmatmul.f32.gmra.mxu3 %v11181_v44  ;;  %v11187_v41 = vsub.f32 %v3838_v60, %v11181_v44 }
 0x42b   : > { %14883 = vst [vmem:[#allocation20_spill] sm:$0xff] %v11183_v27  ;;  %v2989_v62 = vpop.f32.mrf.mxu0  ;;  %v14891_v27 = vld [vmem:[#allocation24_spill] sm:$0xff] }
 0x42c   : > { %14884 = vst [vmem:[#allocation199_spill] sm:$0xff] %v11187_v41  ;;  %v2990_v17 = vadd.f32 %v2989_v62, %v14885_v4  ;;  %v14282_v8 = vand.u32 4294901760, %v11187_v41 }
 0x42d   : > { %3449 = vmatmul.f32.gmra.mxu1 %v14886_v3  ;;  %v4099_v51 = vpop.f32.mrf.mxu2  ;;  %v4884_v33 = vpop.f32.mrf.mxu3 }
 0x42e   : > { %v9222_v59 = vpop.eup %9221  ;;  %v3387_v36 = vadd.f32 %v3386_v34, %v2990_v17  ;;  %v4100_v61 = vadd.f32 %v11167_v63, %v4099_v51  ;;  %3052 = vmatmul.f32.gmra.mxu0 %v14886_v3  ;;  %v4232_v6 = vsub.f32 %v11187_v41, %v14282_v8  ;;  %v14890_v17 = vld [vmem:[#allocation29_spill] sm:$0xff] }
 0x42f   : > { %v3841_v60 = vsel %vm330_vm0, %v9222_v59, 0 }
 0x430   : > { %9223 = vtanh.f32 %v3387_v36  ;;  %v4233_v0 = vand.u32 4294901760, %v4232_v6  ;;  %v11198_v62 = vand.u32 4294901760, %v3841_v60  ;;  %v11200_v4 = vadd.f32 %v4880_v11, %v4100_v61 }
 0x432   : > { %14887 = vst [vmem:[#allocation27_spill] sm:$0xff] %v11198_v62  ;;  %v3390_v44 = vpop.f32.mrf.mxu1  ;;  %4234 = vmatmul.f32.gmra.mxu2 %v4233_v0  ;;  %4951 = vmatmul.f32.gmra.mxu3 %v11198_v62  ;;  %v11204_v34 = vsub.f32 %v3841_v60, %v11198_v62 }
 0x433   : > { %14888 = vst [vmem:[#allocation22_spill] sm:$0xff] %v11200_v4  ;;  %v2993_v3 = vpop.f32.mrf.mxu0  ;;  %v14896_v4 = vld [vmem:[#allocation26_spill] sm:$0xff] }
 0x434   : > { %14889 = vst [vmem:[#allocation200_spill] sm:$0xff] %v11204_v34  ;;  %v2994_v51 = vadd.f32 %v2993_v3, %v14890_v17  ;;  %v14287_v59 = vand.u32 4294901760, %v11204_v34 }
 0x435   : > { %3453 = vmatmul.f32.gmra.mxu1 %v14891_v27  ;;  %v4107_v36 = vpop.f32.mrf.mxu2  ;;  %v4888_v6 = vpop.f32.mrf.mxu3 }
 0x436   : > { %v9224_v8 = vpop.eup %9223  ;;  %v3391_v41 = vadd.f32 %v3390_v44, %v2994_v51  ;;  %v4108_v11 = vadd.f32 %v11167_v63, %v4107_v36  ;;  %3056 = vmatmul.f32.gmra.mxu0 %v14891_v27  ;;  %v4240_v61 = vsub.f32 %v11204_v34, %v14287_v59  ;;  %v14895_v51 = vld [vmem:[#allocation31_spill] sm:$0xff] }
 0x437   : > { %v3844_v60 = vsel %vm330_vm0, %v9224_v8, 0 }
 0x438   : > { %9225 = vtanh.f32 %v3391_v41  ;;  %v4241_v0 = vand.u32 4294901760, %v4240_v61  ;;  %v11215_v3 = vand.u32 4294901760, %v3844_v60  ;;  %v11217_v17 = vadd.f32 %v4884_v33, %v4108_v11 }
 0x43a   : > { %14892 = vst [vmem:[#allocation29_spill] sm:$0xff] %v11215_v3  ;;  %v3394_v62 = vpop.f32.mrf.mxu1  ;;  %4242 = vmatmul.f32.gmra.mxu2 %v4241_v0  ;;  %4955 = vmatmul.f32.gmra.mxu3 %v11215_v3  ;;  %v11221_v44 = vsub.f32 %v3844_v60, %v11215_v3 }
 0x43b   : > { %14893 = vst [vmem:[#allocation24_spill] sm:$0xff] %v11217_v17  ;;  %v2997_v27 = vpop.f32.mrf.mxu0  ;;  %v14901_v17 = vld [vmem:[#allocation28_spill] sm:$0xff] }
 0x43c   : > { %14894 = vst [vmem:[#allocation201_spill] sm:$0xff] %v11221_v44  ;;  %v2998_v36 = vadd.f32 %v2997_v27, %v14895_v51  ;;  %v14292_v8 = vand.u32 4294901760, %v11221_v44 }
 0x43d   : > { %3457 = vmatmul.f32.gmra.mxu1 %v14896_v4  ;;  %v4115_v41 = vpop.f32.mrf.mxu2  ;;  %v4892_v61 = vpop.f32.mrf.mxu3 }
 0x43e   : > { %v9226_v59 = vpop.eup %9225  ;;  %v3395_v34 = vadd.f32 %v3394_v62, %v2998_v36  ;;  %v4116_v33 = vadd.f32 %v11167_v63, %v4115_v41  ;;  %3060 = vmatmul.f32.gmra.mxu0 %v14896_v4  ;;  %v4248_v11 = vsub.f32 %v11221_v44, %v14292_v8  ;;  %v14900_v36 = vld [vmem:[#allocation33_spill] sm:$0xff] }
 0x43f   : > { %v3847_v60 = vsel %vm330_vm0, %v9226_v59, 0 }
 0x440   : > { %9227 = vtanh.f32 %v3395_v34  ;;  %v4249_v0 = vand.u32 4294901760, %v4248_v11  ;;  %v11232_v27 = vand.u32 4294901760, %v3847_v60  ;;  %v11234_v51 = vadd.f32 %v4888_v6, %v4116_v33 }
 0x442   : > { %14897 = vst [vmem:[#allocation31_spill] sm:$0xff] %v11232_v27  ;;  %v3398_v3 = vpop.f32.mrf.mxu1  ;;  %4250 = vmatmul.f32.gmra.mxu2 %v4249_v0  ;;  %4959 = vmatmul.f32.gmra.mxu3 %v11232_v27  ;;  %v11238_v62 = vsub.f32 %v3847_v60, %v11232_v27 }
 0x443   : > { %14898 = vst [vmem:[#allocation26_spill] sm:$0xff] %v11234_v51  ;;  %v3001_v4 = vpop.f32.mrf.mxu0  ;;  %v14906_v51 = vld [vmem:[#allocation30_spill] sm:$0xff] }
 0x444   : > { %14899 = vst [vmem:[#allocation202_spill] sm:$0xff] %v11238_v62  ;;  %v3002_v41 = vadd.f32 %v3001_v4, %v14900_v36  ;;  %v14297_v59 = vand.u32 4294901760, %v11238_v62 }
 0x445   : > { %3461 = vmatmul.f32.gmra.mxu1 %v14901_v17  ;;  %v4123_v34 = vpop.f32.mrf.mxu2  ;;  %v4896_v11 = vpop.f32.mrf.mxu3 }
 0x446   : > { %v9228_v8 = vpop.eup %9227  ;;  %v3399_v44 = vadd.f32 %v3398_v3, %v3002_v41  ;;  %v4124_v6 = vadd.f32 %v11167_v63, %v4123_v34  ;;  %3064 = vmatmul.f32.gmra.mxu0 %v14901_v17  ;;  %v4256_v33 = vsub.f32 %v11238_v62, %v14297_v59  ;;  %v14905_v41 = vld [vmem:[#allocation35_spill] sm:$0xff] }
 0x447   : > { %v3850_v60 = vsel %vm330_vm0, %v9228_v8, 0 }
 0x448   : > { %9229 = vtanh.f32 %v3399_v44  ;;  %v4257_v0 = vand.u32 4294901760, %v4256_v33  ;;  %v11249_v4 = vand.u32 4294901760, %v3850_v60  ;;  %v11251_v36 = vadd.f32 %v4892_v61, %v4124_v6 }
 0x44a   : > { %14902 = vst [vmem:[#allocation33_spill] sm:$0xff] %v11249_v4  ;;  %v3402_v27 = vpop.f32.mrf.mxu1  ;;  %4258 = vmatmul.f32.gmra.mxu2 %v4257_v0  ;;  %4963 = vmatmul.f32.gmra.mxu3 %v11249_v4  ;;  %v11255_v3 = vsub.f32 %v3850_v60, %v11249_v4 }
 0x44b   : > { %14903 = vst [vmem:[#allocation28_spill] sm:$0xff] %v11251_v36  ;;  %v3005_v17 = vpop.f32.mrf.mxu0  ;;  %v14911_v36 = vld [vmem:[#allocation32_spill] sm:$0xff] }
 0x44c   : > { %14904 = vst [vmem:[#allocation203_spill] sm:$0xff] %v11255_v3  ;;  %v3006_v34 = vadd.f32 %v3005_v17, %v14905_v41  ;;  %v14302_v8 = vand.u32 4294901760, %v11255_v3 }
 0x44d   : > { %3465 = vmatmul.f32.gmra.mxu1 %v14906_v51  ;;  %v4131_v44 = vpop.f32.mrf.mxu2  ;;  %v4900_v33 = vpop.f32.mrf.mxu3 }
 0x44e   : > { %v9230_v59 = vpop.eup %9229  ;;  %v3403_v62 = vadd.f32 %v3402_v27, %v3006_v34  ;;  %v4132_v61 = vadd.f32 %v11167_v63, %v4131_v44  ;;  %3068 = vmatmul.f32.gmra.mxu0 %v14906_v51  ;;  %v4264_v6 = vsub.f32 %v11255_v3, %v14302_v8  ;;  %v14910_v34 = vld [vmem:[#allocation37_spill] sm:$0xff] }
 0x44f   : > { %v3853_v60 = vsel %vm330_vm0, %v9230_v59, 0 }
 0x450   : > { %9231 = vtanh.f32 %v3403_v62  ;;  %v4265_v0 = vand.u32 4294901760, %v4264_v6  ;;  %v11266_v17 = vand.u32 4294901760, %v3853_v60  ;;  %v11268_v41 = vadd.f32 %v4896_v11, %v4132_v61 }
 0x452   : > { %14907 = vst [vmem:[#allocation35_spill] sm:$0xff] %v11266_v17  ;;  %v3406_v4 = vpop.f32.mrf.mxu1  ;;  %4266 = vmatmul.f32.gmra.mxu2 %v4265_v0  ;;  %4967 = vmatmul.f32.gmra.mxu3 %v11266_v17  ;;  %v11272_v27 = vsub.f32 %v3853_v60, %v11266_v17 }
 0x453   : > { %14908 = vst [vmem:[#allocation30_spill] sm:$0xff] %v11268_v41  ;;  %v3009_v51 = vpop.f32.mrf.mxu0  ;;  %v14916_v41 = vld [vmem:[#allocation34_spill] sm:$0xff] }
 0x454   : > { %14909 = vst [vmem:[#allocation204_spill] sm:$0xff] %v11272_v27  ;;  %v3010_v44 = vadd.f32 %v3009_v51, %v14910_v34  ;;  %v14307_v59 = vand.u32 4294901760, %v11272_v27 }
 0x455   : > { %3469 = vmatmul.f32.gmra.mxu1 %v14911_v36  ;;  %v4139_v62 = vpop.f32.mrf.mxu2  ;;  %v4904_v6 = vpop.f32.mrf.mxu3 }
 0x456   : > { %v9232_v8 = vpop.eup %9231  ;;  %v3407_v3 = vadd.f32 %v3406_v4, %v3010_v44  ;;  %v4140_v11 = vadd.f32 %v11167_v63, %v4139_v62  ;;  %3072 = vmatmul.f32.gmra.mxu0 %v14911_v36  ;;  %v4272_v61 = vsub.f32 %v11272_v27, %v14307_v59  ;;  %v14915_v44 = vld [vmem:[#allocation39_spill] sm:$0xff] }
 0x457   : > { %v3856_v60 = vsel %vm330_vm0, %v9232_v8, 0 }
 0x458   : > { %9233 = vtanh.f32 %v3407_v3  ;;  %v4273_v0 = vand.u32 4294901760, %v4272_v61  ;;  %v11283_v51 = vand.u32 4294901760, %v3856_v60  ;;  %v11285_v34 = vadd.f32 %v4900_v33, %v4140_v11 }
 0x45a   : > { %14912 = vst [vmem:[#allocation37_spill] sm:$0xff] %v11283_v51  ;;  %v3410_v17 = vpop.f32.mrf.mxu1  ;;  %4274 = vmatmul.f32.gmra.mxu2 %v4273_v0  ;;  %4971 = vmatmul.f32.gmra.mxu3 %v11283_v51  ;;  %v11289_v4 = vsub.f32 %v3856_v60, %v11283_v51 }
 0x45b   : > { %14913 = vst [vmem:[#allocation32_spill] sm:$0xff] %v11285_v34  ;;  %v3013_v36 = vpop.f32.mrf.mxu0  ;;  %v14921_v34 = vld [vmem:[#allocation36_spill] sm:$0xff] }
 0x45c   : > { %14914 = vst [vmem:[#allocation205_spill] sm:$0xff] %v11289_v4  ;;  %v3014_v62 = vadd.f32 %v3013_v36, %v14915_v44  ;;  %v14312_v8 = vand.u32 4294901760, %v11289_v4 }
 0x45d   : > { %3473 = vmatmul.f32.gmra.mxu1 %v14916_v41  ;;  %v4147_v3 = vpop.f32.mrf.mxu2  ;;  %v4908_v61 = vpop.f32.mrf.mxu3 }
 0x45e   : > { %v9234_v59 = vpop.eup %9233  ;;  %v3411_v27 = vadd.f32 %v3410_v17, %v3014_v62  ;;  %v4148_v33 = vadd.f32 %v11167_v63, %v4147_v3  ;;  %3076 = vmatmul.f32.gmra.mxu0 %v14916_v41  ;;  %v4280_v11 = vsub.f32 %v11289_v4, %v14312_v8  ;;  %v14920_v62 = vld [vmem:[#allocation41_spill] sm:$0xff] }
 0x45f   : > { %v3859_v60 = vsel %vm330_vm0, %v9234_v59, 0 }
 0x460   : > { %9235 = vtanh.f32 %v3411_v27  ;;  %v4281_v0 = vand.u32 4294901760, %v4280_v11  ;;  %v11300_v36 = vand.u32 4294901760, %v3859_v60  ;;  %v11302_v44 = vadd.f32 %v4904_v6, %v4148_v33 }
 0x462   : > { %14917 = vst [vmem:[#allocation39_spill] sm:$0xff] %v11300_v36  ;;  %v3414_v51 = vpop.f32.mrf.mxu1  ;;  %4282 = vmatmul.f32.gmra.mxu2 %v4281_v0  ;;  %4975 = vmatmul.f32.gmra.mxu3 %v11300_v36  ;;  %v11306_v17 = vsub.f32 %v3859_v60, %v11300_v36 }
 0x463   : > { %14918 = vst [vmem:[#allocation34_spill] sm:$0xff] %v11302_v44  ;;  %v3017_v41 = vpop.f32.mrf.mxu0  ;;  %v14926_v44 = vld [vmem:[#allocation38_spill] sm:$0xff] }
 0x464   : > { %14919 = vst [vmem:[#allocation206_spill] sm:$0xff] %v11306_v17  ;;  %v3018_v3 = vadd.f32 %v3017_v41, %v14920_v62  ;;  %v14317_v59 = vand.u32 4294901760, %v11306_v17 }
 0x465   : > { %3477 = vmatmul.f32.gmra.mxu1 %v14921_v34  ;;  %v4155_v27 = vpop.f32.mrf.mxu2  ;;  %v4912_v11 = vpop.f32.mrf.mxu3 }
 0x466   : > { %v9236_v8 = vpop.eup %9235  ;;  %v3415_v4 = vadd.f32 %v3414_v51, %v3018_v3  ;;  %v4156_v6 = vadd.f32 %v11167_v63, %v4155_v27  ;;  %3080 = vmatmul.f32.gmra.mxu0 %v14921_v34  ;;  %v4288_v33 = vsub.f32 %v11306_v17, %v14317_v59  ;;  %v14925_v3 = vld [vmem:[#allocation43_spill] sm:$0xff] }
 0x467   : > { %v3862_v60 = vsel %vm330_vm0, %v9236_v8, 0 }
 0x468   : > { %9237 = vtanh.f32 %v3415_v4  ;;  %v4289_v0 = vand.u32 4294901760, %v4288_v33  ;;  %v11317_v41 = vand.u32 4294901760, %v3862_v60  ;;  %v11319_v62 = vadd.f32 %v4908_v61, %v4156_v6 }
 0x46a   : > { %14922 = vst [vmem:[#allocation41_spill] sm:$0xff] %v11317_v41  ;;  %v3418_v36 = vpop.f32.mrf.mxu1  ;;  %4290 = vmatmul.f32.gmra.mxu2 %v4289_v0  ;;  %4979 = vmatmul.f32.gmra.mxu3 %v11317_v41  ;;  %v11323_v51 = vsub.f32 %v3862_v60, %v11317_v41 }
 0x46b   : > { %14923 = vst [vmem:[#allocation36_spill] sm:$0xff] %v11319_v62  ;;  %v3021_v34 = vpop.f32.mrf.mxu0  ;;  %v14931_v62 = vld [vmem:[#allocation40_spill] sm:$0xff] }
 0x46c   : > { %14924 = vst [vmem:[#allocation207_spill] sm:$0xff] %v11323_v51  ;;  %v3022_v27 = vadd.f32 %v3021_v34, %v14925_v3  ;;  %v14322_v8 = vand.u32 4294901760, %v11323_v51 }
 0x46d   : > { %3481 = vmatmul.f32.gmra.mxu1 %v14926_v44  ;;  %v4163_v4 = vpop.f32.mrf.mxu2  ;;  %v4916_v33 = vpop.f32.mrf.mxu3 }
 0x46e   : > { %v9238_v59 = vpop.eup %9237  ;;  %v3419_v17 = vadd.f32 %v3418_v36, %v3022_v27  ;;  %v4164_v61 = vadd.f32 %v11167_v63, %v4163_v4  ;;  %3084 = vmatmul.f32.gmra.mxu0 %v14926_v44  ;;  %v4296_v6 = vsub.f32 %v11323_v51, %v14322_v8  ;;  %v14930_v27 = vld [vmem:[#allocation45_spill] sm:$0xff] }
 0x46f   : > { %v3865_v60 = vsel %vm330_vm0, %v9238_v59, 0 }
 0x470   : > { %9239 = vtanh.f32 %v3419_v17  ;;  %v4297_v0 = vand.u32 4294901760, %v4296_v6  ;;  %v11334_v34 = vand.u32 4294901760, %v3865_v60  ;;  %v11336_v3 = vadd.f32 %v4912_v11, %v4164_v61 }
 0x472   : > { %14927 = vst [vmem:[#allocation43_spill] sm:$0xff] %v11334_v34  ;;  %v3422_v41 = vpop.f32.mrf.mxu1  ;;  %4298 = vmatmul.f32.gmra.mxu2 %v4297_v0  ;;  %4983 = vmatmul.f32.gmra.mxu3 %v11334_v34  ;;  %v11340_v36 = vsub.f32 %v3865_v60, %v11334_v34 }
 0x473   : > { %14928 = vst [vmem:[#allocation38_spill] sm:$0xff] %v11336_v3  ;;  %v3025_v44 = vpop.f32.mrf.mxu0  ;;  %v14936_v3 = vld [vmem:[#allocation42_spill] sm:$0xff] }
 0x474   : > { %14929 = vst [vmem:[#allocation208_spill] sm:$0xff] %v11340_v36  ;;  %v3026_v4 = vadd.f32 %v3025_v44, %v14930_v27  ;;  %v14327_v59 = vand.u32 4294901760, %v11340_v36 }
 0x475   : > { %3485 = vmatmul.f32.gmra.mxu1 %v14931_v62  ;;  %v4171_v17 = vpop.f32.mrf.mxu2  ;;  %v4920_v6 = vpop.f32.mrf.mxu3 }
 0x476   : > { %v9240_v8 = vpop.eup %9239  ;;  %v3423_v51 = vadd.f32 %v3422_v41, %v3026_v4  ;;  %v4172_v11 = vadd.f32 %v11167_v63, %v4171_v17  ;;  %3088 = vmatmul.f32.gmra.mxu0 %v14931_v62  ;;  %v4304_v61 = vsub.f32 %v11340_v36, %v14327_v59  ;;  %v14935_v4 = vld [vmem:[#allocation47_spill] sm:$0xff] }
 0x477   : > { %v3868_v60 = vsel %vm330_vm0, %v9240_v8, 0 }
 0x478   : > { %9241 = vtanh.f32 %v3423_v51  ;;  %v4305_v0 = vand.u32 4294901760, %v4304_v61  ;;  %v11351_v44 = vand.u32 4294901760, %v3868_v60  ;;  %v11353_v27 = vadd.f32 %v4916_v33, %v4172_v11 }
 0x47a   : > { %14932 = vst [vmem:[#allocation45_spill] sm:$0xff] %v11351_v44  ;;  %v3426_v34 = vpop.f32.mrf.mxu1  ;;  %4306 = vmatmul.f32.gmra.mxu2 %v4305_v0  ;;  %4987 = vmatmul.f32.gmra.mxu3 %v11351_v44  ;;  %v11357_v41 = vsub.f32 %v3868_v60, %v11351_v44 }
 0x47b   : > { %14933 = vst [vmem:[#allocation40_spill] sm:$0xff] %v11353_v27  ;;  %v3029_v62 = vpop.f32.mrf.mxu0  ;;  %v14941_v27 = vld [vmem:[#allocation44_spill] sm:$0xff] }
 0x47c   : > { %14934 = vst [vmem:[#allocation209_spill] sm:$0xff] %v11357_v41  ;;  %v3030_v17 = vadd.f32 %v3029_v62, %v14935_v4  ;;  %v14332_v8 = vand.u32 4294901760, %v11357_v41 }
 0x47d   : > { %3489 = vmatmul.f32.gmra.mxu1 %v14936_v3  ;;  %v4179_v51 = vpop.f32.mrf.mxu2  ;;  %v4924_v61 = vpop.f32.mrf.mxu3 }
 0x47e   : > { %v9242_v59 = vpop.eup %9241  ;;  %v3427_v36 = vadd.f32 %v3426_v34, %v3030_v17  ;;  %v4180_v33 = vadd.f32 %v11167_v63, %v4179_v51  ;;  %3092 = vmatmul.f32.gmra.mxu0 %v14936_v3  ;;  %v4312_v11 = vsub.f32 %v11357_v41, %v14332_v8  ;;  %v14940_v17 = vld [vmem:[#allocation49_spill] sm:$0xff] }
 0x47f   : > { %v3871_v60 = vsel %vm330_vm0, %v9242_v59, 0 }
 0x480   : > { %9243 = vtanh.f32 %v3427_v36  ;;  %v4313_v0 = vand.u32 4294901760, %v4312_v11  ;;  %v11368_v62 = vand.u32 4294901760, %v3871_v60  ;;  %v11370_v4 = vadd.f32 %v4920_v6, %v4180_v33 }
 0x482   : > { %14937 = vst [vmem:[#allocation47_spill] sm:$0xff] %v11368_v62  ;;  %v3430_v44 = vpop.f32.mrf.mxu1  ;;  %4314 = vmatmul.f32.gmra.mxu2 %v4313_v0  ;;  %4991 = vmatmul.f32.gmra.mxu3 %v11368_v62  ;;  %v11374_v34 = vsub.f32 %v3871_v60, %v11368_v62 }
 0x483   : > { %14938 = vst [vmem:[#allocation42_spill] sm:$0xff] %v11370_v4  ;;  %v3033_v3 = vpop.f32.mrf.mxu0  ;;  %v14946_v4 = vld [vmem:[#allocation46_spill] sm:$0xff] }
 0x484   : > { %14939 = vst [vmem:[#allocation210_spill] sm:$0xff] %v11374_v34  ;;  %v3034_v51 = vadd.f32 %v3033_v3, %v14940_v17  ;;  %v14337_v59 = vand.u32 4294901760, %v11374_v34 }
 0x485   : > { %3493 = vmatmul.f32.gmra.mxu1 %v14941_v27  ;;  %v4187_v36 = vpop.f32.mrf.mxu2  ;;  %v4928_v11 = vpop.f32.mrf.mxu3 }
 0x486   : > { %v9244_v8 = vpop.eup %9243  ;;  %v3431_v41 = vadd.f32 %v3430_v44, %v3034_v51  ;;  %v4188_v6 = vadd.f32 %v11167_v63, %v4187_v36  ;;  %3096 = vmatmul.f32.gmra.mxu0 %v14941_v27  ;;  %v4320_v33 = vsub.f32 %v11374_v34, %v14337_v59  ;;  %v14945_v51 = vld [vmem:[#allocation51_spill] sm:$0xff] }
 0x487   : > { %v3874_v60 = vsel %vm330_vm0, %v9244_v8, 0 }
 0x488   : > { %9245 = vtanh.f32 %v3431_v41  ;;  %v4321_v0 = vand.u32 4294901760, %v4320_v33  ;;  %v11385_v3 = vand.u32 4294901760, %v3874_v60  ;;  %v11387_v17 = vadd.f32 %v4924_v61, %v4188_v6 }
 0x48a   : > { %14942 = vst [vmem:[#allocation49_spill] sm:$0xff] %v11385_v3  ;;  %v3434_v62 = vpop.f32.mrf.mxu1  ;;  %4322 = vmatmul.f32.gmra.mxu2 %v4321_v0  ;;  %4995 = vmatmul.f32.gmra.mxu3 %v11385_v3  ;;  %v11391_v44 = vsub.f32 %v3874_v60, %v11385_v3 }
 0x48b   : > { %14943 = vst [vmem:[#allocation44_spill] sm:$0xff] %v11387_v17  ;;  %v3037_v27 = vpop.f32.mrf.mxu0  ;;  %v14951_v17 = vld [vmem:[#allocation48_spill] sm:$0xff] }
 0x48c   : > { %14944 = vst [vmem:[#allocation211_spill] sm:$0xff] %v11391_v44  ;;  %v3038_v36 = vadd.f32 %v3037_v27, %v14945_v51  ;;  %v14342_v8 = vand.u32 4294901760, %v11391_v44 }
 0x48d   : > { %3497 = vmatmul.f32.gmra.mxu1 %v14946_v4  ;;  %v4195_v41 = vpop.f32.mrf.mxu2  ;;  %v4932_v33 = vpop.f32.mrf.mxu3 }
 0x48e   : > { %v9246_v59 = vpop.eup %9245  ;;  %v3435_v34 = vadd.f32 %v3434_v62, %v3038_v36  ;;  %v4196_v61 = vadd.f32 %v11167_v63, %v4195_v41  ;;  %3100 = vmatmul.f32.gmra.mxu0 %v14946_v4  ;;  %v4328_v6 = vsub.f32 %v11391_v44, %v14342_v8  ;;  %v14950_v36 = vld [vmem:[#allocation53_spill] sm:$0xff] }
 0x48f   : > { %v3877_v60 = vsel %vm330_vm0, %v9246_v59, 0 }
 0x490   : > { %9247 = vtanh.f32 %v3435_v34  ;;  %v4329_v0 = vand.u32 4294901760, %v4328_v6  ;;  %v11402_v27 = vand.u32 4294901760, %v3877_v60  ;;  %v11404_v51 = vadd.f32 %v4928_v11, %v4196_v61 }
 0x492   : > { %14947 = vst [vmem:[#allocation51_spill] sm:$0xff] %v11402_v27  ;;  %v3438_v3 = vpop.f32.mrf.mxu1  ;;  %4330 = vmatmul.f32.gmra.mxu2 %v4329_v0  ;;  %4999 = vmatmul.f32.gmra.mxu3 %v11402_v27  ;;  %v11408_v62 = vsub.f32 %v3877_v60, %v11402_v27 }
 0x493   : > { %14948 = vst [vmem:[#allocation46_spill] sm:$0xff] %v11404_v51  ;;  %v3041_v4 = vpop.f32.mrf.mxu0  ;;  %v14956_v51 = vld [vmem:[#allocation50_spill] sm:$0xff] }
 0x494   : > { %14949 = vst [vmem:[#allocation212_spill] sm:$0xff] %v11408_v62  ;;  %v3042_v41 = vadd.f32 %v3041_v4, %v14950_v36  ;;  %v14347_v59 = vand.u32 4294901760, %v11408_v62 }
 0x495   : > { %3501 = vmatmul.f32.gmra.mxu1 %v14951_v17  ;;  %v4203_v34 = vpop.f32.mrf.mxu2  ;;  %v4936_v6 = vpop.f32.mrf.mxu3 }
 0x496   : > { %v9248_v8 = vpop.eup %9247  ;;  %v3439_v44 = vadd.f32 %v3438_v3, %v3042_v41  ;;  %v4204_v11 = vadd.f32 %v11167_v63, %v4203_v34  ;;  %3104 = vmatmul.f32.gmra.mxu0 %v14951_v17  ;;  %v4336_v61 = vsub.f32 %v11408_v62, %v14347_v59  ;;  %v14955_v41 = vld [vmem:[#allocation55_spill] sm:$0xff] }
 0x497   : > { %v3880_v60 = vsel %vm330_vm0, %v9248_v8, 0 }
 0x498   : > { %9249 = vtanh.f32 %v3439_v44  ;;  %v4337_v0 = vand.u32 4294901760, %v4336_v61  ;;  %v11419_v4 = vand.u32 4294901760, %v3880_v60  ;;  %v11421_v36 = vadd.f32 %v4932_v33, %v4204_v11 }
 0x49a   : > { %14952 = vst [vmem:[#allocation53_spill] sm:$0xff] %v11419_v4  ;;  %v3442_v27 = vpop.f32.mrf.mxu1  ;;  %4338 = vmatmul.f32.gmra.mxu2 %v4337_v0  ;;  %5003 = vmatmul.f32.gmra.mxu3 %v11419_v4  ;;  %v11425_v3 = vsub.f32 %v3880_v60, %v11419_v4 }
 0x49b   : > { %14953 = vst [vmem:[#allocation48_spill] sm:$0xff] %v11421_v36  ;;  %v3045_v17 = vpop.f32.mrf.mxu0  ;;  %v14961_v36 = vld [vmem:[#allocation52_spill] sm:$0xff] }
 0x49c   : > { %14954 = vst [vmem:[#allocation213_spill] sm:$0xff] %v11425_v3  ;;  %v3046_v34 = vadd.f32 %v3045_v17, %v14955_v41  ;;  %v14352_v8 = vand.u32 4294901760, %v11425_v3 }
 0x49d   : > { %3505 = vmatmul.f32.gmra.mxu1 %v14956_v51  ;;  %v4211_v44 = vpop.f32.mrf.mxu2  ;;  %v4940_v61 = vpop.f32.mrf.mxu3 }
 0x49e   : > { %v9250_v59 = vpop.eup %9249  ;;  %v3443_v62 = vadd.f32 %v3442_v27, %v3046_v34  ;;  %v4212_v33 = vadd.f32 %v11167_v63, %v4211_v44  ;;  %3108 = vmatmul.f32.gmra.mxu0 %v14956_v51  ;;  %v4344_v11 = vsub.f32 %v11425_v3, %v14352_v8  ;;  %v14960_v34 = vld [vmem:[#allocation57_spill] sm:$0xff] }
 0x49f   : > { %v3883_v60 = vsel %vm330_vm0, %v9250_v59, 0 }
 0x4a0   : > { %9251 = vtanh.f32 %v3443_v62  ;;  %v4345_v0 = vand.u32 4294901760, %v4344_v11  ;;  %v11436_v17 = vand.u32 4294901760, %v3883_v60  ;;  %v11438_v41 = vadd.f32 %v4936_v6, %v4212_v33 }
 0x4a2   : > { %14957 = vst [vmem:[#allocation55_spill] sm:$0xff] %v11436_v17  ;;  %v3446_v4 = vpop.f32.mrf.mxu1  ;;  %4346 = vmatmul.f32.gmra.mxu2 %v4345_v0  ;;  %5007 = vmatmul.f32.gmra.mxu3 %v11436_v17  ;;  %v11442_v27 = vsub.f32 %v3883_v60, %v11436_v17 }
 0x4a3   : > { %14958 = vst [vmem:[#allocation50_spill] sm:$0xff] %v11438_v41  ;;  %v3049_v51 = vpop.f32.mrf.mxu0  ;;  %v14966_v41 = vld [vmem:[#allocation54_spill] sm:$0xff] }
 0x4a4   : > { %14959 = vst [vmem:[#allocation214_spill] sm:$0xff] %v11442_v27  ;;  %v3050_v44 = vadd.f32 %v3049_v51, %v14960_v34  ;;  %v14357_v59 = vand.u32 4294901760, %v11442_v27 }
 0x4a5   : > { %3509 = vmatmul.f32.gmra.mxu1 %v14961_v36  ;;  %v4219_v62 = vpop.f32.mrf.mxu2  ;;  %v4944_v11 = vpop.f32.mrf.mxu3 }
 0x4a6   : > { %v9252_v8 = vpop.eup %9251  ;;  %v3447_v3 = vadd.f32 %v3446_v4, %v3050_v44  ;;  %v4220_v6 = vadd.f32 %v11167_v63, %v4219_v62  ;;  %3112 = vmatmul.f32.gmra.mxu0 %v14961_v36  ;;  %v4352_v33 = vsub.f32 %v11442_v27, %v14357_v59  ;;  %v14965_v44 = vld [vmem:[#allocation59_spill] sm:$0xff] }
 0x4a7   : > { %v3886_v60 = vsel %vm330_vm0, %v9252_v8, 0 }
 0x4a8   : > { %9253 = vtanh.f32 %v3447_v3  ;;  %v4353_v0 = vand.u32 4294901760, %v4352_v33  ;;  %v11453_v51 = vand.u32 4294901760, %v3886_v60  ;;  %v11455_v34 = vadd.f32 %v4940_v61, %v4220_v6 }
 0x4aa   : > { %14962 = vst [vmem:[#allocation57_spill] sm:$0xff] %v11453_v51  ;;  %v3450_v17 = vpop.f32.mrf.mxu1  ;;  %4354 = vmatmul.f32.gmra.mxu2 %v4353_v0  ;;  %5011 = vmatmul.f32.gmra.mxu3 %v11453_v51  ;;  %v11459_v4 = vsub.f32 %v3886_v60, %v11453_v51 }
 0x4ab   : > { %14963 = vst [vmem:[#allocation52_spill] sm:$0xff] %v11455_v34  ;;  %v3053_v36 = vpop.f32.mrf.mxu0  ;;  %v14971_v34 = vld [vmem:[#allocation56_spill] sm:$0xff] }
 0x4ac   : > { %14964 = vst [vmem:[#allocation215_spill] sm:$0xff] %v11459_v4  ;;  %v3054_v62 = vadd.f32 %v3053_v36, %v14965_v44  ;;  %v14362_v8 = vand.u32 4294901760, %v11459_v4 }
 0x4ad   : > { %3513 = vmatmul.f32.gmra.mxu1 %v14966_v41  ;;  %v4227_v3 = vpop.f32.mrf.mxu2  ;;  %v4948_v33 = vpop.f32.mrf.mxu3 }
 0x4ae   : > { %v9254_v59 = vpop.eup %9253  ;;  %v3451_v27 = vadd.f32 %v3450_v17, %v3054_v62  ;;  %v4228_v61 = vadd.f32 %v11167_v63, %v4227_v3  ;;  %3116 = vmatmul.f32.gmra.mxu0 %v14966_v41  ;;  %v4360_v6 = vsub.f32 %v11459_v4, %v14362_v8  ;;  %v14970_v62 = vld [vmem:[#allocation61_spill] sm:$0xff] }
 0x4af   : > { %v3889_v60 = vsel %vm330_vm0, %v9254_v59, 0 }
 0x4b0   : > { %9255 = vtanh.f32 %v3451_v27  ;;  %v4361_v0 = vand.u32 4294901760, %v4360_v6  ;;  %v11470_v36 = vand.u32 4294901760, %v3889_v60  ;;  %v11472_v44 = vadd.f32 %v4944_v11, %v4228_v61 }
 0x4b2   : > { %14967 = vst [vmem:[#allocation59_spill] sm:$0xff] %v11470_v36  ;;  %v3454_v51 = vpop.f32.mrf.mxu1  ;;  %4362 = vmatmul.f32.gmra.mxu2 %v4361_v0  ;;  %5015 = vmatmul.f32.gmra.mxu3 %v11470_v36  ;;  %v11476_v17 = vsub.f32 %v3889_v60, %v11470_v36 }
 0x4b3   : > { %14968 = vst [vmem:[#allocation54_spill] sm:$0xff] %v11472_v44  ;;  %v3057_v41 = vpop.f32.mrf.mxu0  ;;  %v14976_v44 = vld [vmem:[#allocation58_spill] sm:$0xff] }
 0x4b4   : > { %14969 = vst [vmem:[#allocation216_spill] sm:$0xff] %v11476_v17  ;;  %v3058_v3 = vadd.f32 %v3057_v41, %v14970_v62  ;;  %v14367_v59 = vand.u32 4294901760, %v11476_v17 }
 0x4b5   : > { %3517 = vmatmul.f32.gmra.mxu1 %v14971_v34  ;;  %v4235_v27 = vpop.f32.mrf.mxu2  ;;  %v4952_v6 = vpop.f32.mrf.mxu3 }
 0x4b6   : > { %v9256_v8 = vpop.eup %9255  ;;  %v3455_v4 = vadd.f32 %v3454_v51, %v3058_v3  ;;  %v4236_v11 = vadd.f32 %v11167_v63, %v4235_v27  ;;  %3120 = vmatmul.f32.gmra.mxu0 %v14971_v34  ;;  %v4368_v61 = vsub.f32 %v11476_v17, %v14367_v59  ;;  %v14975_v3 = vld [vmem:[#allocation63_spill] sm:$0xff] }
 0x4b7   : > { %v3892_v60 = vsel %vm330_vm0, %v9256_v8, 0 }
 0x4b8   : > { %9257 = vtanh.f32 %v3455_v4  ;;  %v4369_v0 = vand.u32 4294901760, %v4368_v61  ;;  %v11487_v41 = vand.u32 4294901760, %v3892_v60  ;;  %v11489_v62 = vadd.f32 %v4948_v33, %v4236_v11 }
 0x4ba   : > { %14972 = vst [vmem:[#allocation61_spill] sm:$0xff] %v11487_v41  ;;  %v3458_v36 = vpop.f32.mrf.mxu1  ;;  %4370 = vmatmul.f32.gmra.mxu2 %v4369_v0  ;;  %5019 = vmatmul.f32.gmra.mxu3 %v11487_v41  ;;  %v11493_v51 = vsub.f32 %v3892_v60, %v11487_v41 }
 0x4bb   : > { %14973 = vst [vmem:[#allocation56_spill] sm:$0xff] %v11489_v62  ;;  %v3061_v34 = vpop.f32.mrf.mxu0  ;;  %v14981_v62 = vld [vmem:[#allocation60_spill] sm:$0xff] }
 0x4bc   : > { %14974 = vst [vmem:[#allocation217_spill] sm:$0xff] %v11493_v51  ;;  %v3062_v27 = vadd.f32 %v3061_v34, %v14975_v3  ;;  %v14372_v8 = vand.u32 4294901760, %v11493_v51 }
 0x4bd   : > { %3521 = vmatmul.f32.gmra.mxu1 %v14976_v44  ;;  %v4243_v4 = vpop.f32.mrf.mxu2  ;;  %v4956_v61 = vpop.f32.mrf.mxu3 }
 0x4be   : > { %v9258_v59 = vpop.eup %9257  ;;  %v3459_v17 = vadd.f32 %v3458_v36, %v3062_v27  ;;  %v4244_v33 = vadd.f32 %v11167_v63, %v4243_v4  ;;  %3124 = vmatmul.f32.gmra.mxu0 %v14976_v44  ;;  %v4376_v11 = vsub.f32 %v11493_v51, %v14372_v8  ;;  %v14980_v27 = vld [vmem:[#allocation65_spill] sm:$0xff] }
 0x4bf   : > { %v3895_v60 = vsel %vm330_vm0, %v9258_v59, 0 }
 0x4c0   : > { %9259 = vtanh.f32 %v3459_v17  ;;  %v4377_v0 = vand.u32 4294901760, %v4376_v11  ;;  %v11504_v34 = vand.u32 4294901760, %v3895_v60  ;;  %v11506_v3 = vadd.f32 %v4952_v6, %v4244_v33 }
 0x4c2   : > { %14977 = vst [vmem:[#allocation63_spill] sm:$0xff] %v11504_v34  ;;  %v3462_v41 = vpop.f32.mrf.mxu1  ;;  %4378 = vmatmul.f32.gmra.mxu2 %v4377_v0  ;;  %5023 = vmatmul.f32.gmra.mxu3 %v11504_v34  ;;  %v11510_v36 = vsub.f32 %v3895_v60, %v11504_v34 }
 0x4c3   : > { %14978 = vst [vmem:[#allocation58_spill] sm:$0xff] %v11506_v3  ;;  %v3065_v44 = vpop.f32.mrf.mxu0  ;;  %v14986_v3 = vld [vmem:[#allocation62_spill] sm:$0xff] }
 0x4c4   : > { %14979 = vst [vmem:[#allocation218_spill] sm:$0xff] %v11510_v36  ;;  %v3066_v4 = vadd.f32 %v3065_v44, %v14980_v27  ;;  %v14377_v59 = vand.u32 4294901760, %v11510_v36 }
 0x4c5   : > { %3525 = vmatmul.f32.gmra.mxu1 %v14981_v62  ;;  %v4251_v17 = vpop.f32.mrf.mxu2  ;;  %v4960_v11 = vpop.f32.mrf.mxu3 }
 0x4c6   : > { %v9260_v8 = vpop.eup %9259  ;;  %v3463_v51 = vadd.f32 %v3462_v41, %v3066_v4  ;;  %v4252_v6 = vadd.f32 %v11167_v63, %v4251_v17  ;;  %3128 = vmatmul.f32.gmra.mxu0 %v14981_v62  ;;  %v4384_v33 = vsub.f32 %v11510_v36, %v14377_v59  ;;  %v14985_v4 = vld [vmem:[#allocation67_spill] sm:$0xff] }
 0x4c7   : > { %v3898_v60 = vsel %vm330_vm0, %v9260_v8, 0 }
 0x4c8   : > { %9261 = vtanh.f32 %v3463_v51  ;;  %v4385_v0 = vand.u32 4294901760, %v4384_v33  ;;  %v11521_v44 = vand.u32 4294901760, %v3898_v60  ;;  %v11523_v27 = vadd.f32 %v4956_v61, %v4252_v6 }
 0x4ca   : > { %14982 = vst [vmem:[#allocation65_spill] sm:$0xff] %v11521_v44  ;;  %v3466_v34 = vpop.f32.mrf.mxu1  ;;  %4386 = vmatmul.f32.gmra.mxu2 %v4385_v0  ;;  %5027 = vmatmul.f32.gmra.mxu3 %v11521_v44  ;;  %v11527_v41 = vsub.f32 %v3898_v60, %v11521_v44 }
 0x4cb   : > { %14983 = vst [vmem:[#allocation60_spill] sm:$0xff] %v11523_v27  ;;  %v3069_v62 = vpop.f32.mrf.mxu0  ;;  %v14991_v27 = vld [vmem:[#allocation64_spill] sm:$0xff] }
 0x4cc   : > { %14984 = vst [vmem:[#allocation219_spill] sm:$0xff] %v11527_v41  ;;  %v3070_v17 = vadd.f32 %v3069_v62, %v14985_v4  ;;  %v14382_v8 = vand.u32 4294901760, %v11527_v41 }
 0x4cd   : > { %3529 = vmatmul.f32.gmra.mxu1 %v14986_v3  ;;  %v4259_v51 = vpop.f32.mrf.mxu2  ;;  %v4964_v33 = vpop.f32.mrf.mxu3 }
 0x4ce   : > { %v9262_v59 = vpop.eup %9261  ;;  %v3467_v36 = vadd.f32 %v3466_v34, %v3070_v17  ;;  %v4260_v61 = vadd.f32 %v11167_v63, %v4259_v51  ;;  %3132 = vmatmul.f32.gmra.mxu0 %v14986_v3  ;;  %v4392_v6 = vsub.f32 %v11527_v41, %v14382_v8  ;;  %v14990_v17 = vld [vmem:[#allocation69_spill] sm:$0xff] }
 0x4cf   : > { %v3901_v60 = vsel %vm330_vm0, %v9262_v59, 0 }
 0x4d0   : > { %9263 = vtanh.f32 %v3467_v36  ;;  %v4393_v0 = vand.u32 4294901760, %v4392_v6  ;;  %v11538_v62 = vand.u32 4294901760, %v3901_v60  ;;  %v11540_v4 = vadd.f32 %v4960_v11, %v4260_v61 }
 0x4d2   : > { %14987 = vst [vmem:[#allocation67_spill] sm:$0xff] %v11538_v62  ;;  %v3470_v44 = vpop.f32.mrf.mxu1  ;;  %4394 = vmatmul.f32.gmra.mxu2 %v4393_v0  ;;  %5031 = vmatmul.f32.gmra.mxu3 %v11538_v62  ;;  %v11544_v34 = vsub.f32 %v3901_v60, %v11538_v62 }
 0x4d3   : > { %14988 = vst [vmem:[#allocation62_spill] sm:$0xff] %v11540_v4  ;;  %v3073_v3 = vpop.f32.mrf.mxu0  ;;  %v14996_v4 = vld [vmem:[#allocation66_spill] sm:$0xff] }
 0x4d4   : > { %14989 = vst [vmem:[#allocation220_spill] sm:$0xff] %v11544_v34  ;;  %v3074_v51 = vadd.f32 %v3073_v3, %v14990_v17  ;;  %v14387_v59 = vand.u32 4294901760, %v11544_v34 }
 0x4d5   : > { %3533 = vmatmul.f32.gmra.mxu1 %v14991_v27  ;;  %v4267_v36 = vpop.f32.mrf.mxu2  ;;  %v4968_v6 = vpop.f32.mrf.mxu3 }
 0x4d6   : > { %v9264_v8 = vpop.eup %9263  ;;  %v3471_v41 = vadd.f32 %v3470_v44, %v3074_v51  ;;  %v4268_v11 = vadd.f32 %v11167_v63, %v4267_v36  ;;  %3136 = vmatmul.f32.gmra.mxu0 %v14991_v27  ;;  %v4400_v61 = vsub.f32 %v11544_v34, %v14387_v59  ;;  %v14995_v51 = vld [vmem:[#allocation71_spill] sm:$0xff] }
 0x4d7   : > { %v3904_v60 = vsel %vm330_vm0, %v9264_v8, 0 }
 0x4d8   : > { %9265 = vtanh.f32 %v3471_v41  ;;  %v4401_v0 = vand.u32 4294901760, %v4400_v61  ;;  %v11555_v3 = vand.u32 4294901760, %v3904_v60  ;;  %v11557_v17 = vadd.f32 %v4964_v33, %v4268_v11 }
 0x4da   : > { %14992 = vst [vmem:[#allocation69_spill] sm:$0xff] %v11555_v3  ;;  %v3474_v62 = vpop.f32.mrf.mxu1  ;;  %4402 = vmatmul.f32.gmra.mxu2 %v4401_v0  ;;  %5035 = vmatmul.f32.gmra.mxu3 %v11555_v3  ;;  %v11561_v44 = vsub.f32 %v3904_v60, %v11555_v3 }
 0x4db   : > { %14993 = vst [vmem:[#allocation64_spill] sm:$0xff] %v11557_v17  ;;  %v3077_v27 = vpop.f32.mrf.mxu0  ;;  %v15001_v17 = vld [vmem:[#allocation68_spill] sm:$0xff] }
 0x4dc   : > { %14994 = vst [vmem:[#allocation221_spill] sm:$0xff] %v11561_v44  ;;  %v3078_v36 = vadd.f32 %v3077_v27, %v14995_v51  ;;  %v14392_v8 = vand.u32 4294901760, %v11561_v44 }
 0x4dd   : > { %3537 = vmatmul.f32.gmra.mxu1 %v14996_v4  ;;  %v4275_v41 = vpop.f32.mrf.mxu2  ;;  %v4972_v61 = vpop.f32.mrf.mxu3 }
 0x4de   : > { %v9266_v59 = vpop.eup %9265  ;;  %v3475_v34 = vadd.f32 %v3474_v62, %v3078_v36  ;;  %v4276_v33 = vadd.f32 %v11167_v63, %v4275_v41  ;;  %3140 = vmatmul.f32.gmra.mxu0 %v14996_v4  ;;  %v4408_v11 = vsub.f32 %v11561_v44, %v14392_v8  ;;  %v15000_v36 = vld [vmem:[#allocation73_spill] sm:$0xff] }
 0x4df   : > { %v3907_v60 = vsel %vm330_vm0, %v9266_v59, 0 }
 0x4e0   : > { %9267 = vtanh.f32 %v3475_v34  ;;  %v4409_v0 = vand.u32 4294901760, %v4408_v11  ;;  %v11572_v27 = vand.u32 4294901760, %v3907_v60  ;;  %v11574_v51 = vadd.f32 %v4968_v6, %v4276_v33 }
 0x4e2   : > { %14997 = vst [vmem:[#allocation71_spill] sm:$0xff] %v11572_v27  ;;  %v3478_v3 = vpop.f32.mrf.mxu1  ;;  %4410 = vmatmul.f32.gmra.mxu2 %v4409_v0  ;;  %5039 = vmatmul.f32.gmra.mxu3 %v11572_v27  ;;  %v11578_v62 = vsub.f32 %v3907_v60, %v11572_v27 }
 0x4e3   : > { %14998 = vst [vmem:[#allocation66_spill] sm:$0xff] %v11574_v51  ;;  %v3081_v4 = vpop.f32.mrf.mxu0  ;;  %v15006_v51 = vld [vmem:[#allocation70_spill] sm:$0xff] }
 0x4e4   : > { %14999 = vst [vmem:[#allocation222_spill] sm:$0xff] %v11578_v62  ;;  %v3082_v41 = vadd.f32 %v3081_v4, %v15000_v36  ;;  %v14397_v59 = vand.u32 4294901760, %v11578_v62 }
 0x4e5   : > { %3541 = vmatmul.f32.gmra.mxu1 %v15001_v17  ;;  %v4283_v34 = vpop.f32.mrf.mxu2  ;;  %v4976_v11 = vpop.f32.mrf.mxu3 }
 0x4e6   : > { %v9268_v8 = vpop.eup %9267  ;;  %v3479_v44 = vadd.f32 %v3478_v3, %v3082_v41  ;;  %v4284_v6 = vadd.f32 %v11167_v63, %v4283_v34  ;;  %3144 = vmatmul.f32.gmra.mxu0 %v15001_v17  ;;  %v4416_v33 = vsub.f32 %v11578_v62, %v14397_v59  ;;  %v15005_v41 = vld [vmem:[#allocation75_spill] sm:$0xff] }
 0x4e7   : > { %v3910_v60 = vsel %vm330_vm0, %v9268_v8, 0 }
 0x4e8   : > { %9269 = vtanh.f32 %v3479_v44  ;;  %v4417_v0 = vand.u32 4294901760, %v4416_v33  ;;  %v11589_v4 = vand.u32 4294901760, %v3910_v60  ;;  %v11591_v36 = vadd.f32 %v4972_v61, %v4284_v6 }
 0x4ea   : > { %15002 = vst [vmem:[#allocation73_spill] sm:$0xff] %v11589_v4  ;;  %v3482_v27 = vpop.f32.mrf.mxu1  ;;  %4418 = vmatmul.f32.gmra.mxu2 %v4417_v0  ;;  %5043 = vmatmul.f32.gmra.mxu3 %v11589_v4  ;;  %v11595_v3 = vsub.f32 %v3910_v60, %v11589_v4 }
 0x4eb   : > { %15003 = vst [vmem:[#allocation68_spill] sm:$0xff] %v11591_v36  ;;  %v3085_v17 = vpop.f32.mrf.mxu0  ;;  %v15016_v36 = vld [vmem:[#allocation74_spill] sm:$0xff] }
 0x4ec   : > { %15004 = vst [vmem:[#allocation223_spill] sm:$0xff] %v11595_v3  ;;  %v3086_v34 = vadd.f32 %v3085_v17, %v15005_v41  ;;  %v14402_v8 = vand.u32 4294901760, %v11595_v3 }
 0x4ed   : > { %3545 = vmatmul.f32.gmra.mxu1 %v15006_v51  ;;  %v4291_v44 = vpop.f32.mrf.mxu2  ;;  %v4980_v33 = vpop.f32.mrf.mxu3 }
 0x4ee   : > { %v9270_v59 = vpop.eup %9269  ;;  %v3483_v62 = vadd.f32 %v3482_v27, %v3086_v34  ;;  %v4292_v61 = vadd.f32 %v11167_v63, %v4291_v44  ;;  %3148 = vmatmul.f32.gmra.mxu0 %v15006_v51  ;;  %v4424_v6 = vsub.f32 %v11595_v3, %v14402_v8  ;;  %v15010_v51 = vld [vmem:[#allocation77_spill] sm:$0xff]  ;;  %v15011_v44 = vld [vmem:[#allocation72_spill] sm:$0xff] }
 0x4ef   : > { %v3913_v60 = vsel %vm330_vm0, %v9270_v59, 0 }
 0x4f0   : > { %9271 = vtanh.f32 %v3483_v62  ;;  %v4425_v0 = vand.u32 4294901760, %v4424_v6  ;;  %v11606_v17 = vand.u32 4294901760, %v3913_v60  ;;  %v11608_v41 = vadd.f32 %v4976_v11, %v4292_v61  ;;  %v11620_v11 = vld [vmem:[%s14061_s4] ss:$0 sm:$0xff] }
 0x4f2   : > { %15007 = vst [vmem:[#allocation75_spill] sm:$0xff] %v11606_v17  ;;  %v3486_v4 = vpop.f32.mrf.mxu1  ;;  %4426 = vmatmul.f32.gmra.mxu2 %v4425_v0  ;;  %5047 = vmatmul.f32.gmra.mxu3 %v11606_v17  ;;  %v11612_v63 = vsub.f32 %v3913_v60, %v11606_v17  ;;  %v15015_v17 = vld [vmem:[#allocation79_spill] sm:$0xff] }
 0x4f3   : > { %15008 = vst [vmem:[#allocation70_spill] sm:$0xff] %v11608_v41  ;;  %v3089_v27 = vpop.f32.mrf.mxu0 }
 0x4f4   : > { %15009 = vst [vmem:[#allocation224_spill] sm:$0xff] %v11612_v63  ;;  %v3090_v34 = vadd.f32 %v3089_v27, %v15010_v51  ;;  %v14407_v59 = vand.u32 4294901760, %v11612_v63 }
 0x4f5   : > { %3549 = vmatmul.f32.gmra.mxu1 %v15011_v44  ;;  %v4299_v62 = vpop.f32.mrf.mxu2  ;;  %v4984_v6 = vpop.f32.mrf.mxu3 }
 0x4f6   : > { %v9272_v8 = vpop.eup %9271  ;;  %v3487_v3 = vadd.f32 %v3486_v4, %v3090_v34  ;;  %v4300_v61 = vadd.f32 %v11620_v11, %v4299_v62  ;;  %3152 = vmatmul.f32.gmra.mxu0 %v15011_v44  ;;  %v4432_v60 = vsub.f32 %v11612_v63, %v14407_v59 }
 0x4f7   : > { %v3916_v0 = vsel %vm330_vm0, %v9272_v8, 0 }
 0x4f8   : > { %9273 = vtanh.f32 %v3487_v3  ;;  %v4433_v27 = vand.u32 4294901760, %v4432_v60  ;;  %v11628_v51 = vand.u32 4294901760, %v3916_v0  ;;  %v11630_v4 = vadd.f32 %v4980_v33, %v4300_v61 }
 0x4fa   : > { %15012 = vst [vmem:[#allocation77_spill] sm:$0xff] %v11628_v51  ;;  %v3490_v34 = vpop.f32.mrf.mxu1  ;;  %4434 = vmatmul.f32.gmra.mxu2 %v4433_v27  ;;  %5051 = vmatmul.f32.gmra.mxu3 %v11628_v51  ;;  %v11634_v62 = vsub.f32 %v3916_v0, %v11628_v51 }
 0x4fb   : > { %15013 = vst [vmem:[#allocation72_spill] sm:$0xff] %v11630_v4  ;;  %v3093_v44 = vpop.f32.mrf.mxu0  ;;  %v15021_v4 = vld [vmem:[#allocation76_spill] sm:$0xff] }
 0x4fc   : > { %15014 = vst [vmem:[#allocation225_spill] sm:$0xff] %v11634_v62  ;;  %v3094_v41 = vadd.f32 %v3093_v44, %v15015_v17  ;;  %v14412_v8 = vand.u32 4294901760, %v11634_v62 }
 0x4fd   : > { %3553 = vmatmul.f32.gmra.mxu1 %v15016_v36  ;;  %v4307_v3 = vpop.f32.mrf.mxu2  ;;  %v4988_v60 = vpop.f32.mrf.mxu3 }
 0x4fe   : > { %v9274_v59 = vpop.eup %9273  ;;  %v3491_v63 = vadd.f32 %v3490_v34, %v3094_v41  ;;  %v4308_v33 = vadd.f32 %v11620_v11, %v4307_v3  ;;  %3156 = vmatmul.f32.gmra.mxu0 %v15016_v36  ;;  %v4440_v61 = vsub.f32 %v11634_v62, %v14412_v8  ;;  %v15020_v34 = vld [vmem:[#allocation81_spill] sm:$0xff] }
 0x4ff   : > { %v3919_v0 = vsel %vm330_vm0, %v9274_v59, 0 }
 0x500   : > { %9275 = vtanh.f32 %v3491_v63  ;;  %v4441_v17 = vand.u32 4294901760, %v4440_v61  ;;  %v11645_v27 = vand.u32 4294901760, %v3919_v0  ;;  %v11647_v44 = vadd.f32 %v4984_v6, %v4308_v33 }
 0x502   : > { %15017 = vst [vmem:[#allocation79_spill] sm:$0xff] %v11645_v27  ;;  %v3494_v51 = vpop.f32.mrf.mxu1  ;;  %4442 = vmatmul.f32.gmra.mxu2 %v4441_v17  ;;  %5055 = vmatmul.f32.gmra.mxu3 %v11645_v27  ;;  %v11651_v41 = vsub.f32 %v3919_v0, %v11645_v27 }
 0x503   : > { %15018 = vst [vmem:[#allocation74_spill] sm:$0xff] %v11647_v44  ;;  %v3097_v36 = vpop.f32.mrf.mxu0  ;;  %v15026_v44 = vld [vmem:[#allocation78_spill] sm:$0xff] }
 0x504   : > { %15019 = vst [vmem:[#allocation226_spill] sm:$0xff] %v11651_v41  ;;  %v3098_v3 = vadd.f32 %v3097_v36, %v15020_v34  ;;  %v14417_v59 = vand.u32 4294901760, %v11651_v41 }
 0x505   : > { %3557 = vmatmul.f32.gmra.mxu1 %v15021_v4  ;;  %v4315_v63 = vpop.f32.mrf.mxu2  ;;  %v4992_v61 = vpop.f32.mrf.mxu3 }
 0x506   : > { %v9276_v8 = vpop.eup %9275  ;;  %v3495_v62 = vadd.f32 %v3494_v51, %v3098_v3  ;;  %v4316_v6 = vadd.f32 %v11620_v11, %v4315_v63  ;;  %3160 = vmatmul.f32.gmra.mxu0 %v15021_v4  ;;  %v4448_v33 = vsub.f32 %v11651_v41, %v14417_v59  ;;  %v15025_v3 = vld [vmem:[#allocation83_spill] sm:$0xff] }
 0x507   : > { %v3922_v0 = vsel %vm330_vm0, %v9276_v8, 0 }
 0x508   : > { %9277 = vtanh.f32 %v3495_v62  ;;  %v4449_v17 = vand.u32 4294901760, %v4448_v33  ;;  %v11662_v36 = vand.u32 4294901760, %v3922_v0  ;;  %v11664_v34 = vadd.f32 %v4988_v60, %v4316_v6 }
 0x50a   : > { %15022 = vst [vmem:[#allocation81_spill] sm:$0xff] %v11662_v36  ;;  %v3498_v27 = vpop.f32.mrf.mxu1  ;;  %4450 = vmatmul.f32.gmra.mxu2 %v4449_v17  ;;  %5059 = vmatmul.f32.gmra.mxu3 %v11662_v36  ;;  %v11668_v51 = vsub.f32 %v3922_v0, %v11662_v36 }
 0x50b   : > { %15023 = vst [vmem:[#allocation76_spill] sm:$0xff] %v11664_v34  ;;  %v3101_v4 = vpop.f32.mrf.mxu0  ;;  %v15031_v34 = vld [vmem:[#allocation80_spill] sm:$0xff] }
 0x50c   : > { %15024 = vst [vmem:[#allocation227_spill] sm:$0xff] %v11668_v51  ;;  %v3102_v63 = vadd.f32 %v3101_v4, %v15025_v3  ;;  %v14422_v8 = vand.u32 4294901760, %v11668_v51 }
 0x50d   : > { %3561 = vmatmul.f32.gmra.mxu1 %v15026_v44  ;;  %v4323_v62 = vpop.f32.mrf.mxu2  ;;  %v4996_v33 = vpop.f32.mrf.mxu3 }
 0x50e   : > { %v9278_v59 = vpop.eup %9277  ;;  %v3499_v41 = vadd.f32 %v3498_v27, %v3102_v63  ;;  %v4324_v60 = vadd.f32 %v11620_v11, %v4323_v62  ;;  %3164 = vmatmul.f32.gmra.mxu0 %v15026_v44  ;;  %v4456_v6 = vsub.f32 %v11668_v51, %v14422_v8  ;;  %v15030_v63 = vld [vmem:[#allocation85_spill] sm:$0xff] }
 0x50f   : > { %v3925_v0 = vsel %vm330_vm0, %v9278_v59, 0 }
 0x510   : > { %9279 = vtanh.f32 %v3499_v41  ;;  %v4457_v17 = vand.u32 4294901760, %v4456_v6  ;;  %v11679_v4 = vand.u32 4294901760, %v3925_v0  ;;  %v11681_v3 = vadd.f32 %v4992_v61, %v4324_v60 }
 0x512   : > { %15027 = vst [vmem:[#allocation83_spill] sm:$0xff] %v11679_v4  ;;  %v3502_v36 = vpop.f32.mrf.mxu1  ;;  %4458 = vmatmul.f32.gmra.mxu2 %v4457_v17  ;;  %5063 = vmatmul.f32.gmra.mxu3 %v11679_v4  ;;  %v11685_v27 = vsub.f32 %v3925_v0, %v11679_v4 }
 0x513   : > { %15028 = vst [vmem:[#allocation78_spill] sm:$0xff] %v11681_v3  ;;  %v3105_v44 = vpop.f32.mrf.mxu0  ;;  %v15036_v3 = vld [vmem:[#allocation82_spill] sm:$0xff] }
 0x514   : > { %15029 = vst [vmem:[#allocation228_spill] sm:$0xff] %v11685_v27  ;;  %v3106_v62 = vadd.f32 %v3105_v44, %v15030_v63  ;;  %v14427_v59 = vand.u32 4294901760, %v11685_v27 }
 0x515   : > { %3565 = vmatmul.f32.gmra.mxu1 %v15031_v34  ;;  %v4331_v41 = vpop.f32.mrf.mxu2  ;;  %v5000_v6 = vpop.f32.mrf.mxu3 }
 0x516   : > { %v9280_v8 = vpop.eup %9279  ;;  %v3503_v51 = vadd.f32 %v3502_v36, %v3106_v62  ;;  %v4332_v61 = vadd.f32 %v11620_v11, %v4331_v41  ;;  %3168 = vmatmul.f32.gmra.mxu0 %v15031_v34  ;;  %v4464_v60 = vsub.f32 %v11685_v27, %v14427_v59  ;;  %v15035_v62 = vld [vmem:[#allocation87_spill] sm:$0xff] }
 0x517   : > { %v3928_v0 = vsel %vm330_vm0, %v9280_v8, 0 }
 0x518   : > { %9281 = vtanh.f32 %v3503_v51  ;;  %v4465_v17 = vand.u32 4294901760, %v4464_v60  ;;  %v11696_v44 = vand.u32 4294901760, %v3928_v0  ;;  %v11698_v63 = vadd.f32 %v4996_v33, %v4332_v61 }
 0x51a   : > { %15032 = vst [vmem:[#allocation85_spill] sm:$0xff] %v11696_v44  ;;  %v3506_v4 = vpop.f32.mrf.mxu1  ;;  %4466 = vmatmul.f32.gmra.mxu2 %v4465_v17  ;;  %5067 = vmatmul.f32.gmra.mxu3 %v11696_v44  ;;  %v11702_v36 = vsub.f32 %v3928_v0, %v11696_v44 }
 0x51b   : > { %15033 = vst [vmem:[#allocation80_spill] sm:$0xff] %v11698_v63  ;;  %v3109_v34 = vpop.f32.mrf.mxu0  ;;  %v15041_v63 = vld [vmem:[#allocation84_spill] sm:$0xff] }
 0x51c   : > { %15034 = vst [vmem:[#allocation229_spill] sm:$0xff] %v11702_v36  ;;  %v3110_v41 = vadd.f32 %v3109_v34, %v15035_v62  ;;  %v14432_v8 = vand.u32 4294901760, %v11702_v36 }
 0x51d   : > { %3569 = vmatmul.f32.gmra.mxu1 %v15036_v3  ;;  %v4339_v51 = vpop.f32.mrf.mxu2  ;;  %v5004_v60 = vpop.f32.mrf.mxu3 }
 0x51e   : > { %v9282_v59 = vpop.eup %9281  ;;  %v3507_v27 = vadd.f32 %v3506_v4, %v3110_v41  ;;  %v4340_v33 = vadd.f32 %v11620_v11, %v4339_v51  ;;  %3172 = vmatmul.f32.gmra.mxu0 %v15036_v3  ;;  %v4472_v61 = vsub.f32 %v11702_v36, %v14432_v8  ;;  %v15040_v41 = vld [vmem:[#allocation89_spill] sm:$0xff] }
 0x51f   : > { %v3931_v0 = vsel %vm330_vm0, %v9282_v59, 0 }
 0x520   : > { %9283 = vtanh.f32 %v3507_v27  ;;  %v4473_v17 = vand.u32 4294901760, %v4472_v61  ;;  %v11713_v34 = vand.u32 4294901760, %v3931_v0  ;;  %v11715_v62 = vadd.f32 %v5000_v6, %v4340_v33 }
 0x522   : > { %15037 = vst [vmem:[#allocation87_spill] sm:$0xff] %v11713_v34  ;;  %v3510_v44 = vpop.f32.mrf.mxu1  ;;  %4474 = vmatmul.f32.gmra.mxu2 %v4473_v17  ;;  %5071 = vmatmul.f32.gmra.mxu3 %v11713_v34  ;;  %v11719_v4 = vsub.f32 %v3931_v0, %v11713_v34 }
 0x523   : > { %15038 = vst [vmem:[#allocation82_spill] sm:$0xff] %v11715_v62  ;;  %v3113_v3 = vpop.f32.mrf.mxu0  ;;  %v15046_v62 = vld [vmem:[#allocation86_spill] sm:$0xff] }
 0x524   : > { %15039 = vst [vmem:[#allocation230_spill] sm:$0xff] %v11719_v4  ;;  %v3114_v51 = vadd.f32 %v3113_v3, %v15040_v41  ;;  %v14437_v59 = vand.u32 4294901760, %v11719_v4 }
 0x525   : > { %3573 = vmatmul.f32.gmra.mxu1 %v15041_v63  ;;  %v4347_v27 = vpop.f32.mrf.mxu2  ;;  %v5008_v61 = vpop.f32.mrf.mxu3 }
 0x526   : > { %v9284_v8 = vpop.eup %9283  ;;  %v3511_v36 = vadd.f32 %v3510_v44, %v3114_v51  ;;  %v4348_v6 = vadd.f32 %v11620_v11, %v4347_v27  ;;  %3176 = vmatmul.f32.gmra.mxu0 %v15041_v63  ;;  %v4480_v33 = vsub.f32 %v11719_v4, %v14437_v59  ;;  %v15045_v51 = vld [vmem:[#allocation91_spill] sm:$0xff] }
 0x527   : > { %v3934_v0 = vsel %vm330_vm0, %v9284_v8, 0 }
 0x528   : > { %9285 = vtanh.f32 %v3511_v36  ;;  %v4481_v17 = vand.u32 4294901760, %v4480_v33  ;;  %v11730_v3 = vand.u32 4294901760, %v3934_v0  ;;  %v11732_v41 = vadd.f32 %v5004_v60, %v4348_v6 }
 0x52a   : > { %15042 = vst [vmem:[#allocation89_spill] sm:$0xff] %v11730_v3  ;;  %v3514_v34 = vpop.f32.mrf.mxu1  ;;  %4482 = vmatmul.f32.gmra.mxu2 %v4481_v17  ;;  %5075 = vmatmul.f32.gmra.mxu3 %v11730_v3  ;;  %v11736_v44 = vsub.f32 %v3934_v0, %v11730_v3 }
 0x52b   : > { %15043 = vst [vmem:[#allocation84_spill] sm:$0xff] %v11732_v41  ;;  %v3117_v63 = vpop.f32.mrf.mxu0  ;;  %v15051_v41 = vld [vmem:[#allocation88_spill] sm:$0xff] }
 0x52c   : > { %15044 = vst [vmem:[#allocation231_spill] sm:$0xff] %v11736_v44  ;;  %v3118_v27 = vadd.f32 %v3117_v63, %v15045_v51  ;;  %v14442_v8 = vand.u32 4294901760, %v11736_v44 }
 0x52d   : > { %3577 = vmatmul.f32.gmra.mxu1 %v15046_v62  ;;  %v4355_v36 = vpop.f32.mrf.mxu2  ;;  %v5012_v33 = vpop.f32.mrf.mxu3 }
 0x52e   : > { %v9286_v59 = vpop.eup %9285  ;;  %v3515_v4 = vadd.f32 %v3514_v34, %v3118_v27  ;;  %v4356_v60 = vadd.f32 %v11620_v11, %v4355_v36  ;;  %3180 = vmatmul.f32.gmra.mxu0 %v15046_v62  ;;  %v4488_v6 = vsub.f32 %v11736_v44, %v14442_v8  ;;  %v15050_v27 = vld [vmem:[#allocation93_spill] sm:$0xff] }
 0x52f   : > { %v3937_v0 = vsel %vm330_vm0, %v9286_v59, 0 }
 0x530   : > { %9287 = vtanh.f32 %v3515_v4  ;;  %v4489_v17 = vand.u32 4294901760, %v4488_v6  ;;  %v11747_v63 = vand.u32 4294901760, %v3937_v0  ;;  %v11749_v51 = vadd.f32 %v5008_v61, %v4356_v60 }
 0x532   : > { %15047 = vst [vmem:[#allocation91_spill] sm:$0xff] %v11747_v63  ;;  %v3518_v3 = vpop.f32.mrf.mxu1  ;;  %4490 = vmatmul.f32.gmra.mxu2 %v4489_v17  ;;  %5079 = vmatmul.f32.gmra.mxu3 %v11747_v63  ;;  %v11753_v34 = vsub.f32 %v3937_v0, %v11747_v63 }
 0x533   : > { %15048 = vst [vmem:[#allocation86_spill] sm:$0xff] %v11749_v51  ;;  %v3121_v62 = vpop.f32.mrf.mxu0  ;;  %v15056_v51 = vld [vmem:[#allocation90_spill] sm:$0xff] }
 0x534   : > { %15049 = vst [vmem:[#allocation232_spill] sm:$0xff] %v11753_v34  ;;  %v3122_v36 = vadd.f32 %v3121_v62, %v15050_v27  ;;  %v14447_v59 = vand.u32 4294901760, %v11753_v34 }
 0x535   : > { %3581 = vmatmul.f32.gmra.mxu1 %v15051_v41  ;;  %v4363_v4 = vpop.f32.mrf.mxu2  ;;  %v5016_v6 = vpop.f32.mrf.mxu3 }
 0x536   : > { %v9288_v8 = vpop.eup %9287  ;;  %v3519_v44 = vadd.f32 %v3518_v3, %v3122_v36  ;;  %v4364_v61 = vadd.f32 %v11620_v11, %v4363_v4  ;;  %3184 = vmatmul.f32.gmra.mxu0 %v15051_v41  ;;  %v4496_v60 = vsub.f32 %v11753_v34, %v14447_v59  ;;  %v15055_v36 = vld [vmem:[#allocation95_spill] sm:$0xff] }
 0x537   : > { %v3940_v0 = vsel %vm330_vm0, %v9288_v8, 0 }
 0x538   : > { %9289 = vtanh.f32 %v3519_v44  ;;  %v4497_v17 = vand.u32 4294901760, %v4496_v60  ;;  %v11764_v62 = vand.u32 4294901760, %v3940_v0  ;;  %v11766_v27 = vadd.f32 %v5012_v33, %v4364_v61 }
 0x53a   : > { %15052 = vst [vmem:[#allocation93_spill] sm:$0xff] %v11764_v62  ;;  %v3522_v63 = vpop.f32.mrf.mxu1  ;;  %4498 = vmatmul.f32.gmra.mxu2 %v4497_v17  ;;  %5083 = vmatmul.f32.gmra.mxu3 %v11764_v62  ;;  %v11770_v3 = vsub.f32 %v3940_v0, %v11764_v62 }
 0x53b   : > { %15053 = vst [vmem:[#allocation88_spill] sm:$0xff] %v11766_v27  ;;  %v3125_v41 = vpop.f32.mrf.mxu0  ;;  %v15061_v27 = vld [vmem:[#allocation92_spill] sm:$0xff] }
 0x53c   : > { %15054 = vst [vmem:[#allocation233_spill] sm:$0xff] %v11770_v3  ;;  %v3126_v4 = vadd.f32 %v3125_v41, %v15055_v36  ;;  %v14452_v8 = vand.u32 4294901760, %v11770_v3 }
 0x53d   : > { %3585 = vmatmul.f32.gmra.mxu1 %v15056_v51  ;;  %v4371_v44 = vpop.f32.mrf.mxu2  ;;  %v5020_v60 = vpop.f32.mrf.mxu3 }
 0x53e   : > { %v9290_v59 = vpop.eup %9289  ;;  %v3523_v34 = vadd.f32 %v3522_v63, %v3126_v4  ;;  %v4372_v33 = vadd.f32 %v11620_v11, %v4371_v44  ;;  %3188 = vmatmul.f32.gmra.mxu0 %v15056_v51  ;;  %v4504_v61 = vsub.f32 %v11770_v3, %v14452_v8  ;;  %v15060_v4 = vld [vmem:[#allocation97_spill] sm:$0xff] }
 0x53f   : > { %v3943_v0 = vsel %vm330_vm0, %v9290_v59, 0 }
 0x540   : > { %9291 = vtanh.f32 %v3523_v34  ;;  %v4505_v17 = vand.u32 4294901760, %v4504_v61  ;;  %v11781_v41 = vand.u32 4294901760, %v3943_v0  ;;  %v11783_v36 = vadd.f32 %v5016_v6, %v4372_v33 }
 0x542   : > { %15057 = vst [vmem:[#allocation95_spill] sm:$0xff] %v11781_v41  ;;  %v3526_v62 = vpop.f32.mrf.mxu1  ;;  %4506 = vmatmul.f32.gmra.mxu2 %v4505_v17  ;;  %5087 = vmatmul.f32.gmra.mxu3 %v11781_v41  ;;  %v11787_v63 = vsub.f32 %v3943_v0, %v11781_v41 }
 0x543   : > { %15058 = vst [vmem:[#allocation90_spill] sm:$0xff] %v11783_v36  ;;  %v3129_v51 = vpop.f32.mrf.mxu0  ;;  %v15066_v36 = vld [vmem:[#allocation94_spill] sm:$0xff] }
 0x544   : > { %15059 = vst [vmem:[#allocation234_spill] sm:$0xff] %v11787_v63  ;;  %v3130_v44 = vadd.f32 %v3129_v51, %v15060_v4  ;;  %v14457_v59 = vand.u32 4294901760, %v11787_v63 }
 0x545   : > { %3589 = vmatmul.f32.gmra.mxu1 %v15061_v27  ;;  %v4379_v34 = vpop.f32.mrf.mxu2  ;;  %v5024_v61 = vpop.f32.mrf.mxu3 }
 0x546   : > { %v9292_v8 = vpop.eup %9291  ;;  %v3527_v3 = vadd.f32 %v3526_v62, %v3130_v44  ;;  %v4380_v6 = vadd.f32 %v11620_v11, %v4379_v34  ;;  %3192 = vmatmul.f32.gmra.mxu0 %v15061_v27  ;;  %v4512_v33 = vsub.f32 %v11787_v63, %v14457_v59  ;;  %v15065_v44 = vld [vmem:[#allocation99_spill] sm:$0xff] }
 0x547   : > { %v3946_v0 = vsel %vm330_vm0, %v9292_v8, 0 }
 0x548   : > { %9293 = vtanh.f32 %v3527_v3  ;;  %v4513_v17 = vand.u32 4294901760, %v4512_v33  ;;  %v11798_v51 = vand.u32 4294901760, %v3946_v0  ;;  %v11800_v4 = vadd.f32 %v5020_v60, %v4380_v6 }
 0x54a   : > { %15062 = vst [vmem:[#allocation97_spill] sm:$0xff] %v11798_v51  ;;  %v3530_v41 = vpop.f32.mrf.mxu1  ;;  %4514 = vmatmul.f32.gmra.mxu2 %v4513_v17  ;;  %5091 = vmatmul.f32.gmra.mxu3 %v11798_v51  ;;  %v11804_v62 = vsub.f32 %v3946_v0, %v11798_v51 }
 0x54b   : > { %15063 = vst [vmem:[#allocation92_spill] sm:$0xff] %v11800_v4  ;;  %v3133_v27 = vpop.f32.mrf.mxu0  ;;  %v15071_v4 = vld [vmem:[#allocation96_spill] sm:$0xff] }
 0x54c   : > { %15064 = vst [vmem:[#allocation235_spill] sm:$0xff] %v11804_v62  ;;  %v3134_v34 = vadd.f32 %v3133_v27, %v15065_v44  ;;  %v14462_v8 = vand.u32 4294901760, %v11804_v62 }
 0x54d   : > { %3593 = vmatmul.f32.gmra.mxu1 %v15066_v36  ;;  %v4387_v3 = vpop.f32.mrf.mxu2  ;;  %v5028_v33 = vpop.f32.mrf.mxu3 }
 0x54e   : > { %v9294_v59 = vpop.eup %9293  ;;  %v3531_v63 = vadd.f32 %v3530_v41, %v3134_v34  ;;  %v4388_v60 = vadd.f32 %v11620_v11, %v4387_v3  ;;  %3196 = vmatmul.f32.gmra.mxu0 %v15066_v36  ;;  %v4520_v6 = vsub.f32 %v11804_v62, %v14462_v8  ;;  %v15070_v34 = vld [vmem:[#allocation101_spill] sm:$0xff] }
 0x54f   : > { %v3949_v0 = vsel %vm330_vm0, %v9294_v59, 0 }
 0x550   : > { %9295 = vtanh.f32 %v3531_v63  ;;  %v4521_v17 = vand.u32 4294901760, %v4520_v6  ;;  %v11815_v27 = vand.u32 4294901760, %v3949_v0  ;;  %v11817_v44 = vadd.f32 %v5024_v61, %v4388_v60 }
 0x552   : > { %15067 = vst [vmem:[#allocation99_spill] sm:$0xff] %v11815_v27  ;;  %v3534_v51 = vpop.f32.mrf.mxu1  ;;  %4522 = vmatmul.f32.gmra.mxu2 %v4521_v17  ;;  %5095 = vmatmul.f32.gmra.mxu3 %v11815_v27  ;;  %v11821_v41 = vsub.f32 %v3949_v0, %v11815_v27 }
 0x553   : > { %15068 = vst [vmem:[#allocation94_spill] sm:$0xff] %v11817_v44  ;;  %v3137_v36 = vpop.f32.mrf.mxu0  ;;  %v15076_v44 = vld [vmem:[#allocation98_spill] sm:$0xff] }
 0x554   : > { %15069 = vst [vmem:[#allocation236_spill] sm:$0xff] %v11821_v41  ;;  %v3138_v3 = vadd.f32 %v3137_v36, %v15070_v34  ;;  %v14467_v59 = vand.u32 4294901760, %v11821_v41 }
 0x555   : > { %3597 = vmatmul.f32.gmra.mxu1 %v15071_v4  ;;  %v4395_v63 = vpop.f32.mrf.mxu2  ;;  %v5032_v6 = vpop.f32.mrf.mxu3 }
 0x556   : > { %v9296_v8 = vpop.eup %9295  ;;  %v3535_v62 = vadd.f32 %v3534_v51, %v3138_v3  ;;  %v4396_v61 = vadd.f32 %v11620_v11, %v4395_v63  ;;  %3200 = vmatmul.f32.gmra.mxu0 %v15071_v4  ;;  %v4528_v60 = vsub.f32 %v11821_v41, %v14467_v59  ;;  %v15075_v3 = vld [vmem:[#allocation103_spill] sm:$0xff] }
 0x557   : > { %v3952_v0 = vsel %vm330_vm0, %v9296_v8, 0 }
 0x558   : > { %9297 = vtanh.f32 %v3535_v62  ;;  %v4529_v17 = vand.u32 4294901760, %v4528_v60  ;;  %v11832_v36 = vand.u32 4294901760, %v3952_v0  ;;  %v11834_v34 = vadd.f32 %v5028_v33, %v4396_v61 }
 0x55a   : > { %15072 = vst [vmem:[#allocation101_spill] sm:$0xff] %v11832_v36  ;;  %v3538_v27 = vpop.f32.mrf.mxu1  ;;  %4530 = vmatmul.f32.gmra.mxu2 %v4529_v17  ;;  %5099 = vmatmul.f32.gmra.mxu3 %v11832_v36  ;;  %v11838_v51 = vsub.f32 %v3952_v0, %v11832_v36 }
 0x55b   : > { %15073 = vst [vmem:[#allocation96_spill] sm:$0xff] %v11834_v34  ;;  %v3141_v4 = vpop.f32.mrf.mxu0  ;;  %v15081_v34 = vld [vmem:[#allocation100_spill] sm:$0xff] }
 0x55c   : > { %15074 = vst [vmem:[#allocation237_spill] sm:$0xff] %v11838_v51  ;;  %v3142_v63 = vadd.f32 %v3141_v4, %v15075_v3  ;;  %v14472_v8 = vand.u32 4294901760, %v11838_v51 }
 0x55d   : > { %3601 = vmatmul.f32.gmra.mxu1 %v15076_v44  ;;  %v4403_v62 = vpop.f32.mrf.mxu2  ;;  %v5036_v60 = vpop.f32.mrf.mxu3 }
 0x55e   : > { %v9298_v59 = vpop.eup %9297  ;;  %v3539_v41 = vadd.f32 %v3538_v27, %v3142_v63  ;;  %v4404_v33 = vadd.f32 %v11620_v11, %v4403_v62  ;;  %3204 = vmatmul.f32.gmra.mxu0 %v15076_v44  ;;  %v4536_v61 = vsub.f32 %v11838_v51, %v14472_v8  ;;  %v15080_v63 = vld [vmem:[#allocation105_spill] sm:$0xff] }
 0x55f   : > { %v3955_v0 = vsel %vm330_vm0, %v9298_v59, 0 }
 0x560   : > { %9299 = vtanh.f32 %v3539_v41  ;;  %v4537_v17 = vand.u32 4294901760, %v4536_v61  ;;  %v11849_v4 = vand.u32 4294901760, %v3955_v0  ;;  %v11851_v3 = vadd.f32 %v5032_v6, %v4404_v33 }
 0x562   : > { %15077 = vst [vmem:[#allocation103_spill] sm:$0xff] %v11849_v4  ;;  %v3542_v36 = vpop.f32.mrf.mxu1  ;;  %4538 = vmatmul.f32.gmra.mxu2 %v4537_v17  ;;  %5103 = vmatmul.f32.gmra.mxu3 %v11849_v4  ;;  %v11855_v27 = vsub.f32 %v3955_v0, %v11849_v4 }
 0x563   : > { %15078 = vst [vmem:[#allocation98_spill] sm:$0xff] %v11851_v3  ;;  %v3145_v44 = vpop.f32.mrf.mxu0  ;;  %v15086_v3 = vld [vmem:[#allocation102_spill] sm:$0xff] }
 0x564   : > { %15079 = vst [vmem:[#allocation238_spill] sm:$0xff] %v11855_v27  ;;  %v3146_v62 = vadd.f32 %v3145_v44, %v15080_v63  ;;  %v14477_v59 = vand.u32 4294901760, %v11855_v27 }
 0x565   : > { %3605 = vmatmul.f32.gmra.mxu1 %v15081_v34  ;;  %v4411_v41 = vpop.f32.mrf.mxu2  ;;  %v5040_v61 = vpop.f32.mrf.mxu3 }
 0x566   : > { %v9300_v8 = vpop.eup %9299  ;;  %v3543_v51 = vadd.f32 %v3542_v36, %v3146_v62  ;;  %v4412_v6 = vadd.f32 %v11620_v11, %v4411_v41  ;;  %3208 = vmatmul.f32.gmra.mxu0 %v15081_v34  ;;  %v4544_v33 = vsub.f32 %v11855_v27, %v14477_v59  ;;  %v15085_v62 = vld [vmem:[#allocation107_spill] sm:$0xff] }
 0x567   : > { %v3958_v0 = vsel %vm330_vm0, %v9300_v8, 0 }
 0x568   : > { %9301 = vtanh.f32 %v3543_v51  ;;  %v4545_v17 = vand.u32 4294901760, %v4544_v33  ;;  %v11866_v44 = vand.u32 4294901760, %v3958_v0  ;;  %v11868_v63 = vadd.f32 %v5036_v60, %v4412_v6 }
 0x56a   : > { %15082 = vst [vmem:[#allocation105_spill] sm:$0xff] %v11866_v44  ;;  %v3546_v4 = vpop.f32.mrf.mxu1  ;;  %4546 = vmatmul.f32.gmra.mxu2 %v4545_v17  ;;  %5107 = vmatmul.f32.gmra.mxu3 %v11866_v44  ;;  %v11872_v36 = vsub.f32 %v3958_v0, %v11866_v44 }
 0x56b   : > { %15083 = vst [vmem:[#allocation100_spill] sm:$0xff] %v11868_v63  ;;  %v3149_v34 = vpop.f32.mrf.mxu0  ;;  %v15091_v63 = vld [vmem:[#allocation104_spill] sm:$0xff] }
 0x56c   : > { %15084 = vst [vmem:[#allocation239_spill] sm:$0xff] %v11872_v36  ;;  %v3150_v41 = vadd.f32 %v3149_v34, %v15085_v62  ;;  %v14482_v8 = vand.u32 4294901760, %v11872_v36 }
 0x56d   : > { %3609 = vmatmul.f32.gmra.mxu1 %v15086_v3  ;;  %v4419_v51 = vpop.f32.mrf.mxu2  ;;  %v5044_v33 = vpop.f32.mrf.mxu3 }
 0x56e   : > { %v9302_v59 = vpop.eup %9301  ;;  %v3547_v27 = vadd.f32 %v3546_v4, %v3150_v41  ;;  %v4420_v60 = vadd.f32 %v11620_v11, %v4419_v51  ;;  %3212 = vmatmul.f32.gmra.mxu0 %v15086_v3  ;;  %v4552_v6 = vsub.f32 %v11872_v36, %v14482_v8  ;;  %v15090_v41 = vld [vmem:[#allocation109_spill] sm:$0xff] }
 0x56f   : > { %v3961_v0 = vsel %vm330_vm0, %v9302_v59, 0 }
 0x570   : > { %9303 = vtanh.f32 %v3547_v27  ;;  %v4553_v17 = vand.u32 4294901760, %v4552_v6  ;;  %v11883_v34 = vand.u32 4294901760, %v3961_v0  ;;  %v11885_v62 = vadd.f32 %v5040_v61, %v4420_v60 }
 0x572   : > { %15087 = vst [vmem:[#allocation107_spill] sm:$0xff] %v11883_v34  ;;  %v3550_v44 = vpop.f32.mrf.mxu1  ;;  %4554 = vmatmul.f32.gmra.mxu2 %v4553_v17  ;;  %5111 = vmatmul.f32.gmra.mxu3 %v11883_v34  ;;  %v11889_v4 = vsub.f32 %v3961_v0, %v11883_v34 }
 0x573   : > { %15088 = vst [vmem:[#allocation102_spill] sm:$0xff] %v11885_v62  ;;  %v3153_v3 = vpop.f32.mrf.mxu0  ;;  %v15096_v62 = vld [vmem:[#allocation106_spill] sm:$0xff] }
 0x574   : > { %15089 = vst [vmem:[#allocation240_spill] sm:$0xff] %v11889_v4  ;;  %v3154_v51 = vadd.f32 %v3153_v3, %v15090_v41  ;;  %v14487_v59 = vand.u32 4294901760, %v11889_v4 }
 0x575   : > { %3613 = vmatmul.f32.gmra.mxu1 %v15091_v63  ;;  %v4427_v27 = vpop.f32.mrf.mxu2  ;;  %v5048_v6 = vpop.f32.mrf.mxu3 }
 0x576   : > { %v9304_v8 = vpop.eup %9303  ;;  %v3551_v36 = vadd.f32 %v3550_v44, %v3154_v51  ;;  %v4428_v61 = vadd.f32 %v11620_v11, %v4427_v27  ;;  %3216 = vmatmul.f32.gmra.mxu0 %v15091_v63  ;;  %v4560_v60 = vsub.f32 %v11889_v4, %v14487_v59  ;;  %v15095_v51 = vld [vmem:[#allocation111_spill] sm:$0xff] }
 0x577   : > { %v3964_v0 = vsel %vm330_vm0, %v9304_v8, 0 }
 0x578   : > { %9305 = vtanh.f32 %v3551_v36  ;;  %v4561_v17 = vand.u32 4294901760, %v4560_v60  ;;  %v11900_v3 = vand.u32 4294901760, %v3964_v0  ;;  %v11902_v41 = vadd.f32 %v5044_v33, %v4428_v61 }
 0x57a   : > { %15092 = vst [vmem:[#allocation109_spill] sm:$0xff] %v11900_v3  ;;  %v3554_v34 = vpop.f32.mrf.mxu1  ;;  %4562 = vmatmul.f32.gmra.mxu2 %v4561_v17  ;;  %5115 = vmatmul.f32.gmra.mxu3 %v11900_v3  ;;  %v11906_v44 = vsub.f32 %v3964_v0, %v11900_v3 }
 0x57b   : > { %15093 = vst [vmem:[#allocation104_spill] sm:$0xff] %v11902_v41  ;;  %v3157_v63 = vpop.f32.mrf.mxu0  ;;  %v15101_v41 = vld [vmem:[#allocation108_spill] sm:$0xff] }
 0x57c   : > { %15094 = vst [vmem:[#allocation241_spill] sm:$0xff] %v11906_v44  ;;  %v3158_v27 = vadd.f32 %v3157_v63, %v15095_v51  ;;  %v14492_v8 = vand.u32 4294901760, %v11906_v44 }
 0x57d   : > { %3617 = vmatmul.f32.gmra.mxu1 %v15096_v62  ;;  %v4435_v36 = vpop.f32.mrf.mxu2  ;;  %v5052_v60 = vpop.f32.mrf.mxu3 }
 0x57e   : > { %v9306_v59 = vpop.eup %9305  ;;  %v3555_v4 = vadd.f32 %v3554_v34, %v3158_v27  ;;  %v4436_v33 = vadd.f32 %v11620_v11, %v4435_v36  ;;  %3220 = vmatmul.f32.gmra.mxu0 %v15096_v62  ;;  %v4568_v61 = vsub.f32 %v11906_v44, %v14492_v8  ;;  %v15100_v27 = vld [vmem:[#allocation113_spill] sm:$0xff] }
 0x57f   : > { %v3967_v0 = vsel %vm330_vm0, %v9306_v59, 0 }
 0x580   : > { %9307 = vtanh.f32 %v3555_v4  ;;  %v4569_v17 = vand.u32 4294901760, %v4568_v61  ;;  %v11917_v63 = vand.u32 4294901760, %v3967_v0  ;;  %v11919_v51 = vadd.f32 %v5048_v6, %v4436_v33 }
 0x582   : > { %15097 = vst [vmem:[#allocation111_spill] sm:$0xff] %v11917_v63  ;;  %v3558_v3 = vpop.f32.mrf.mxu1  ;;  %4570 = vmatmul.f32.gmra.mxu2 %v4569_v17  ;;  %5119 = vmatmul.f32.gmra.mxu3 %v11917_v63  ;;  %v11923_v34 = vsub.f32 %v3967_v0, %v11917_v63 }
 0x583   : > { %15098 = vst [vmem:[#allocation106_spill] sm:$0xff] %v11919_v51  ;;  %v3161_v62 = vpop.f32.mrf.mxu0  ;;  %v15106_v51 = vld [vmem:[#allocation110_spill] sm:$0xff] }
 0x584   : > { %15099 = vst [vmem:[#allocation242_spill] sm:$0xff] %v11923_v34  ;;  %v3162_v36 = vadd.f32 %v3161_v62, %v15100_v27  ;;  %v14497_v59 = vand.u32 4294901760, %v11923_v34 }
 0x585   : > { %3621 = vmatmul.f32.gmra.mxu1 %v15101_v41  ;;  %v4443_v4 = vpop.f32.mrf.mxu2  ;;  %v5056_v61 = vpop.f32.mrf.mxu3 }
 0x586   : > { %v9308_v8 = vpop.eup %9307  ;;  %v3559_v44 = vadd.f32 %v3558_v3, %v3162_v36  ;;  %v4444_v6 = vadd.f32 %v11620_v11, %v4443_v4  ;;  %3224 = vmatmul.f32.gmra.mxu0 %v15101_v41  ;;  %v4576_v33 = vsub.f32 %v11923_v34, %v14497_v59  ;;  %v15105_v36 = vld [vmem:[#allocation115_spill] sm:$0xff] }
 0x587   : > { %v3970_v0 = vsel %vm330_vm0, %v9308_v8, 0 }
 0x588   : > { %9309 = vtanh.f32 %v3559_v44  ;;  %v4577_v17 = vand.u32 4294901760, %v4576_v33  ;;  %v11934_v62 = vand.u32 4294901760, %v3970_v0  ;;  %v11936_v27 = vadd.f32 %v5052_v60, %v4444_v6 }
 0x58a   : > { %15102 = vst [vmem:[#allocation113_spill] sm:$0xff] %v11934_v62  ;;  %v3562_v63 = vpop.f32.mrf.mxu1  ;;  %4578 = vmatmul.f32.gmra.mxu2 %v4577_v17  ;;  %5123 = vmatmul.f32.gmra.mxu3 %v11934_v62  ;;  %v11940_v3 = vsub.f32 %v3970_v0, %v11934_v62 }
 0x58b   : > { %15103 = vst [vmem:[#allocation108_spill] sm:$0xff] %v11936_v27  ;;  %v3165_v41 = vpop.f32.mrf.mxu0  ;;  %v15111_v27 = vld [vmem:[#allocation112_spill] sm:$0xff] }
 0x58c   : > { %15104 = vst [vmem:[#allocation243_spill] sm:$0xff] %v11940_v3  ;;  %v3166_v4 = vadd.f32 %v3165_v41, %v15105_v36  ;;  %v14502_v8 = vand.u32 4294901760, %v11940_v3 }
 0x58d   : > { %3625 = vmatmul.f32.gmra.mxu1 %v15106_v51  ;;  %v4451_v44 = vpop.f32.mrf.mxu2  ;;  %v5060_v33 = vpop.f32.mrf.mxu3 }
 0x58e   : > { %v9310_v59 = vpop.eup %9309  ;;  %v3563_v34 = vadd.f32 %v3562_v63, %v3166_v4  ;;  %v4452_v60 = vadd.f32 %v11620_v11, %v4451_v44  ;;  %3228 = vmatmul.f32.gmra.mxu0 %v15106_v51  ;;  %v4584_v6 = vsub.f32 %v11940_v3, %v14502_v8  ;;  %v15110_v4 = vld [vmem:[#allocation117_spill] sm:$0xff] }
 0x58f   : > { %v3973_v0 = vsel %vm330_vm0, %v9310_v59, 0 }
 0x590   : > { %9311 = vtanh.f32 %v3563_v34  ;;  %v4585_v17 = vand.u32 4294901760, %v4584_v6  ;;  %v11951_v41 = vand.u32 4294901760, %v3973_v0  ;;  %v11953_v36 = vadd.f32 %v5056_v61, %v4452_v60 }
 0x592   : > { %15107 = vst [vmem:[#allocation115_spill] sm:$0xff] %v11951_v41  ;;  %v3566_v62 = vpop.f32.mrf.mxu1  ;;  %4586 = vmatmul.f32.gmra.mxu2 %v4585_v17  ;;  %5127 = vmatmul.f32.gmra.mxu3 %v11951_v41  ;;  %v11957_v63 = vsub.f32 %v3973_v0, %v11951_v41 }
 0x593   : > { %15108 = vst [vmem:[#allocation110_spill] sm:$0xff] %v11953_v36  ;;  %v3169_v51 = vpop.f32.mrf.mxu0  ;;  %v15115_v36 = vld [vmem:[#allocation114_spill] sm:$0xff] }
 0x594   : > { %15109 = vst [vmem:[#allocation244_spill] sm:$0xff] %v11957_v63  ;;  %v3170_v44 = vadd.f32 %v3169_v51, %v15110_v4  ;;  %v14507_v59 = vand.u32 4294901760, %v11957_v63 }
 0x595   : > { %3629 = vmatmul.f32.gmra.mxu1 %v15111_v27  ;;  %v4459_v34 = vpop.f32.mrf.mxu2  ;;  %v5064_v6 = vpop.f32.mrf.mxu3 }
 0x596   : > { %v9312_v8 = vpop.eup %9311  ;;  %v3567_v3 = vadd.f32 %v3566_v62, %v3170_v44  ;;  %v4460_v61 = vadd.f32 %v11620_v11, %v4459_v34  ;;  %3232 = vmatmul.f32.gmra.mxu0 %v15111_v27  ;;  %v4592_v60 = vsub.f32 %v11957_v63, %v14507_v59  ;;  %v15114_v44 = vld [vmem:[#allocation119_spill] sm:$0xff] }
 0x597   : > { %v3976_v0 = vsel %vm330_vm0, %v9312_v8, 0 }
 0x598   : > { %9313 = vtanh.f32 %v3567_v3  ;;  %v4593_v17 = vand.u32 4294901760, %v4592_v60  ;;  %v11968_v51 = vand.u32 4294901760, %v3976_v0  ;;  %v11970_v4 = vadd.f32 %v5060_v33, %v4460_v61 }
 0x59a   : > { %15112 = vst [vmem:[#allocation117_spill] sm:$0xff] %v11968_v51  ;;  %v3570_v41 = vpop.f32.mrf.mxu1  ;;  %4594 = vmatmul.f32.gmra.mxu2 %v4593_v17  ;;  %5131 = vmatmul.f32.gmra.mxu3 %v11968_v51  ;;  %v11974_v62 = vsub.f32 %v3976_v0, %v11968_v51 }
 0x59b   : > { %v3173_v27 = vpop.f32.mrf.mxu0 }
 0x59c   : > { %15113 = vst [vmem:[#allocation112_spill] sm:$0xff] %v11974_v62  ;;  %v3174_v34 = vadd.f32 %v3173_v27, %v15114_v44  ;;  %v14512_v8 = vand.u32 4294901760, %v11974_v62 }
 0x59d   : > { %3633 = vmatmul.f32.gmra.mxu1 %v15115_v36  ;;  %v4467_v3 = vpop.f32.mrf.mxu2  ;;  %v5068_v60 = vpop.f32.mrf.mxu3 }
 0x59e   : > { %v9314_v59 = vpop.eup %9313  ;;  %v3571_v63 = vadd.f32 %v3570_v41, %v3174_v34  ;;  %v4468_v33 = vadd.f32 %v11620_v11, %v4467_v3  ;;  %3236 = vmatmul.f32.gmra.mxu0 %v15115_v36  ;;  %v4600_v61 = vsub.f32 %v11974_v62, %v14512_v8  ;;  %v15119_v3 = vld [vmem:[#allocation116_spill] sm:$0xff] }
 0x59f   : > { %v3979_v0 = vsel %vm330_vm0, %v9314_v59, 0 }
 0x5a0   : > { %9315 = vtanh.f32 %v3571_v63  ;;  %v4601_v17 = vand.u32 4294901760, %v4600_v61  ;;  %v11985_v27 = vand.u32 4294901760, %v3979_v0  ;;  %v11987_v44 = vadd.f32 %v5064_v6, %v4468_v33 }
 0x5a2   : > { %15116 = vst [vmem:[#allocation119_spill] sm:$0xff] %v11985_v27  ;;  %v3574_v51 = vpop.f32.mrf.mxu1  ;;  %4602 = vmatmul.f32.gmra.mxu2 %v4601_v17  ;;  %5135 = vmatmul.f32.gmra.mxu3 %v11985_v27  ;;  %v11991_v41 = vsub.f32 %v3979_v0, %v11985_v27 }
 0x5a3   : > { %15117 = vst [vmem:[#allocation114_spill] sm:$0xff] %v11987_v44  ;;  %v3177_v36 = vpop.f32.mrf.mxu0 }
 0x5a4   : > { %15118 = vst [vmem:[#allocation245_spill] sm:$0xff] %v11991_v41  ;;  %v3178_v34 = vadd.f32 %v3177_v36, %v10624_v15  ;;  %v14517_v59 = vand.u32 4294901760, %v11991_v41 }
 0x5a5   : > { %3637 = vmatmul.f32.gmra.mxu1 %v15119_v3  ;;  %v4475_v63 = vpop.f32.mrf.mxu2  ;;  %v5072_v61 = vpop.f32.mrf.mxu3 }
 0x5a6   : > { %v9316_v8 = vpop.eup %9315  ;;  %v3575_v62 = vadd.f32 %v3574_v51, %v3178_v34  ;;  %v4476_v6 = vadd.f32 %v11620_v11, %v4475_v63  ;;  %3240 = vmatmul.f32.gmra.mxu0 %v15119_v3  ;;  %v4608_v33 = vsub.f32 %v11991_v41, %v14517_v59  ;;  %v15122_v63 = vld [vmem:[#allocation118_spill] sm:$0xff] }
 0x5a7   : > { %v3982_v0 = vsel %vm330_vm0, %v9316_v8, 0 }
 0x5a8   : > { %9317 = vtanh.f32 %v3575_v62  ;;  %v4609_v15 = vand.u32 4294901760, %v4608_v33  ;;  %v12002_v17 = vand.u32 4294901760, %v3982_v0  ;;  %v12004_v36 = vadd.f32 %v5068_v60, %v4476_v6  ;;  %v12016_v62 = vld [vmem:[%s14059_s2] ss:$0 sm:$0xff] }
 0x5a9   : > { %v1200_v60 = vadd.f32 %v12016_v62, %v10653_v55 }
 0x5aa   : > { %15120 = vst [vmem:[#allocation116_spill] sm:$0xff] %v12002_v17  ;;  %v3578_v27 = vpop.f32.mrf.mxu1  ;;  %4610 = vmatmul.f32.gmra.mxu2 %v4609_v15  ;;  %5139 = vmatmul.f32.gmra.mxu3 %v12002_v17  ;;  %v12008_v51 = vsub.f32 %v3982_v0, %v12002_v17 }
 0x5ab   : > { %15121 = vst [vmem:[#allocation246_spill] sm:$0xff] %v12004_v36  ;;  %v3181_v34 = vpop.f32.mrf.mxu0  ;;  %v1705_v55 = vadd.f32 %v10645_v58, %v1200_v60  ;;  %v1208_v58 = vadd.f32 %v12016_v62, %v10667_v18 }
 0x5ac   : > { %v3182_v3 = vadd.f32 %v3181_v34, %v10633_v20  ;;  %v14533_v8 = vand.u32 4294901760, %v12008_v51 }
 0x5ad   : > { %3641 = vmatmul.f32.gmra.mxu1 %v15122_v63  ;;  %v4483_v6 = vpop.f32.mrf.mxu2  ;;  %v5076_v33 = vpop.f32.mrf.mxu3 }
 0x5ae   : > { %v9318_v15 = vpop.eup %9317  ;;  %v3579_v0 = vadd.f32 %v3578_v27, %v3182_v3  ;;  %v4484_v59 = vadd.f32 %v11620_v11, %v4483_v6  ;;  %3244 = vmatmul.f32.gmra.mxu0 %v15122_v63  ;;  %v4616_v20 = vsub.f32 %v12008_v51, %v14533_v8 }
 0x5af   : > { %v3985_v34 = vsel %vm330_vm0, %v9318_v15, 0  ;;  %v2177_v15 = vadd.f32 %v10762_v31, %v1705_v55 }
 0x5b0   : > { %9319 = vtanh.f32 %v3579_v0  ;;  %v4617_v17 = vand.u32 4294901760, %v4616_v20  ;;  %v12026_v41 = vand.u32 4294901760, %v3985_v34  ;;  %v12028_v36 = vadd.f32 %v5072_v61, %v4484_v59 }
 0x5b1   : > { %v2739_v18 = vadd.f32 %v10754_v29, %v2177_v15 }
 0x5b2   : > { %15123 = vst [vmem:[#allocation118_spill] sm:$0xff] %v12026_v41  ;;  %v3582_v44 = vpop.f32.mrf.mxu1  ;;  %4618 = vmatmul.f32.gmra.mxu2 %v4617_v17  ;;  %5143 = vmatmul.f32.gmra.mxu3 %v12026_v41  ;;  %v12033_v27 = vsub.f32 %v3985_v34, %v12026_v41 }
 0x5b3   : > { %v3185_v3 = vpop.f32.mrf.mxu0 }
 0x5b4   : > { %v3186_v63 = vadd.f32 %v3185_v3, %v10647_v14  ;;  %v14522_v6 = vand.u32 4294901760, %v12033_v27 }
 0x5b5   : > { %3645 = vmatmul.f32.gmra.mxu1 %v10617_v21  ;;  %v4491_v59 = vpop.f32.mrf.mxu2  ;;  %v5080_v61 = vpop.f32.mrf.mxu3 }
 0x5b6   : > { %v9320_v0 = vpop.eup %9319  ;;  %v3583_v17 = vadd.f32 %v3582_v44, %v3186_v63  ;;  %v4492_v60 = vadd.f32 %v11620_v11, %v4491_v59  ;;  %3248 = vmatmul.f32.gmra.mxu0 %v10617_v21  ;;  %v4624_v14 = vsub.f32 %v12033_v27, %v14522_v6  ;;  %v1709_v44 = vadd.f32 %v10663_v49, %v1208_v58 }
 0x5b7   : > { %v3988_v20 = vsel %vm330_vm0, %v9320_v0, 0  ;;  %v15125_v0 = vld [vmem:[#allocation120_spill] sm:$0xff] }
 0x5b8   : > { %9321 = vtanh.f32 %v3583_v17  ;;  %v4625_v34 = vand.u32 4294901760, %v4624_v14  ;;  %v12047_v31 = vand.u32 4294901760, %v3988_v20  ;;  %v12049_v55 = vadd.f32 %v5076_v33, %v4492_v60 }
 0x5b9   : > { %v1216_v33 = vadd.f32 %v12016_v62, %v10680_v13  ;;  %v2182_v49 = vadd.f32 %v10772_v52, %v1709_v44 }
 0x5ba   : > { %15124 = vst [vmem:[#allocation247_spill] sm:$0xff] %v12047_v31  ;;  %v3586_v3 = vpop.f32.mrf.mxu1  ;;  %4626 = vmatmul.f32.gmra.mxu2 %v4625_v34  ;;  %5147 = vmatmul.f32.gmra.mxu3 %v12047_v31  ;;  %v12055_v21 = vsub.f32 %v3988_v20, %v12047_v31 }
 0x5bb   : > { %v3189_v63 = vpop.f32.mrf.mxu0  ;;  %v1713_v6 = vadd.f32 %v10676_v57, %v1216_v33 }
 0x5bc   : > { %v3190_v59 = vadd.f32 %v3189_v63, %v2739_v18  ;;  %v14530_v17 = vand.u32 4294901760, %v12055_v21 }
 0x5bd   : > { %3649 = vmatmul.f32.gmra.mxu1 %v15125_v0  ;;  %v4499_v60 = vpop.f32.mrf.mxu2  ;;  %v5084_v14 = vpop.f32.mrf.mxu3 }
 0x5be   : > { %v9322_v29 = vpop.eup %9321  ;;  %v3587_v15 = vadd.f32 %v3586_v3, %v3190_v59  ;;  %v4500_v58 = vadd.f32 %v11620_v11, %v4499_v60  ;;  %3252 = vmatmul.f32.gmra.mxu0 %v15125_v0  ;;  %v4632_v20 = vsub.f32 %v12055_v21, %v14530_v17  ;;  %v2745_v3 = vadd.f32 %v10764_v45, %v2182_v49  ;;  %v12086_v49 = vld [vmem:[%s14061_s4] ss:$0 sm:$0xff] }
 0x5bf   : > { %v3991_v34 = vsel %vm330_vm0, %v9322_v29, 0  ;;  %v1224_v45 = vadd.f32 %v12016_v62, %v10690_v46 }
 0x5c0   : > { %9323 = vtanh.f32 %v3587_v15  ;;  %v4633_v18 = vand.u32 4294901760, %v4632_v20  ;;  %v12068_v63 = vand.u32 4294901760, %v3991_v34  ;;  %v12070_v13 = vadd.f32 %v5080_v61, %v4500_v58 }
 0x5c1   : > { %v2187_v61 = vadd.f32 %v10784_v25, %v1713_v6 }
 0x5c2   : > { %15126 = vst [vmem:[#allocation120_spill] sm:$0xff] %v12068_v63  ;;  %v3590_v52 = vpop.f32.mrf.mxu1  ;;  %4634 = vmatmul.f32.gmra.mxu2 %v4633_v18  ;;  %5151 = vmatmul.f32.gmra.mxu3 %v12068_v63  ;;  %v12076_v11 = vsub.f32 %v3991_v34, %v12068_v63  ;;  %v15223_v63 = vld [vmem:[#allocation150_spill] sm:$0xff] }
 0x5c3   : > { %v3193_v44 = vpop.f32.mrf.mxu0  ;;  %v2751_v18 = vadd.f32 %v10776_v37, %v2187_v61 }
 0x5c4   : > { %v3194_v59 = vadd.f32 %v3193_v44, %v2745_v3  ;;  %v14529_v0 = vand.u32 4294901760, %v12076_v11 }
 0x5c5   : > { %3653 = vmatmul.f32.gmra.mxu1 %v10635_v42  ;;  %v4507_v60 = vpop.f32.mrf.mxu2  ;;  %v5088_v29 = vpop.f32.mrf.mxu3 }
 0x5c6   : > { %v9324_v57 = vpop.eup %9323  ;;  %v3591_v33 = vadd.f32 %v3590_v52, %v3194_v59  ;;  %v4508_v15 = vadd.f32 %v12086_v49, %v4507_v60  ;;  %3256 = vmatmul.f32.gmra.mxu0 %v10635_v42  ;;  %v4640_v25 = vsub.f32 %v12076_v11, %v14529_v0  ;;  %v1717_v52 = vadd.f32 %v10686_v7, %v1224_v45  ;;  %v15128_v59 = vld [vmem:[#allocation121_spill] sm:$0xff]  ;;  %v15153_v0 = vld [vmem:[#allocation131_spill] sm:$0xff] }
 0x5c7   : > { %v3994_v6 = vsel %vm330_vm0, %v9324_v57, 0 }
 0x5c8   : > { %9325 = vtanh.f32 %v3591_v33  ;;  %v4641_v58 = vand.u32 4294901760, %v4640_v25  ;;  %v12094_v20 = vand.u32 4294901760, %v3994_v6  ;;  %v12096_v46 = vadd.f32 %v5084_v14, %v4508_v15 }
 0x5c9   : > { %v1232_v14 = vadd.f32 %v12016_v62, %v10700_v43  ;;  %v2192_v7 = vadd.f32 %v10797_v1, %v1717_v52 }
 0x5ca   : > { %15127 = vst [vmem:[#allocation248_spill] sm:$0xff] %v12094_v20  ;;  %v3594_v34 = vpop.f32.mrf.mxu1  ;;  %4642 = vmatmul.f32.gmra.mxu2 %v4641_v58  ;;  %5155 = vmatmul.f32.gmra.mxu3 %v12094_v20  ;;  %v12102_v42 = vsub.f32 %v3994_v6, %v12094_v20 }
 0x5cb   : > { %v3197_v3 = vpop.f32.mrf.mxu0 }
 0x5cc   : > { %v3198_v44 = vadd.f32 %v3197_v3, %v2751_v18  ;;  %v14527_v60 = vand.u32 4294901760, %v12102_v42  ;;  %v15130_v18 = vld [vmem:[#allocation125_spill] sm:$0xff] }
 0x5cd   : > { %3657 = vmatmul.f32.gmra.mxu1 %v15128_v59  ;;  %v4515_v57 = vpop.f32.mrf.mxu2  ;;  %v5092_v33 = vpop.f32.mrf.mxu3  ;;  %v1721_v3 = vadd.f32 %v15130_v18, %v1232_v14 }
 0x5ce   : > { %v9326_v37 = vpop.eup %9325  ;;  %v3595_v61 = vadd.f32 %v3594_v34, %v3198_v44  ;;  %v4516_v45 = vadd.f32 %v12086_v49, %v4515_v57  ;;  %3260 = vmatmul.f32.gmra.mxu0 %v15128_v59  ;;  %v4648_v15 = vsub.f32 %v12102_v42, %v14527_v60  ;;  %v2757_v34 = vadd.f32 %v10789_v2, %v2192_v7  ;;  %v15131_v57 = vld [vmem:[#allocation122_spill] sm:$0xff]  ;;  %v15146_v60 = vld [vmem:[#allocation159_spill] sm:$0xff] }
 0x5cf   : > { %v3997_v25 = vsel %vm330_vm0, %v9326_v37, 0  ;;  %v1240_v2 = vadd.f32 %v12016_v62, %v10710_v50 }
 0x5d0   : > { %9327 = vtanh.f32 %v3595_v61  ;;  %v4649_v6 = vand.u32 4294901760, %v4648_v15  ;;  %v12115_v58 = vand.u32 4294901760, %v3997_v25  ;;  %v12117_v43 = vadd.f32 %v5088_v29, %v4516_v45 }
 0x5d1   : > { %v2197_v29 = vadd.f32 %v10808_v16, %v1721_v3 }
 0x5d2   : > { %15129 = vst [vmem:[#allocation121_spill] sm:$0xff] %v12115_v58  ;;  %v3598_v1 = vpop.f32.mrf.mxu1  ;;  %4650 = vmatmul.f32.gmra.mxu2 %v4649_v6  ;;  %5159 = vmatmul.f32.gmra.mxu3 %v12115_v58  ;;  %v12123_v52 = vsub.f32 %v3997_v25, %v12115_v58 }
 0x5d3   : > { %v3201_v44 = vpop.f32.mrf.mxu0  ;;  %v2763_v50 = vadd.f32 %v10800_v9, %v2197_v29 }
 0x5d4   : > { %v3202_v59 = vadd.f32 %v3201_v44, %v2757_v34  ;;  %v14523_v37 = vand.u32 4294901760, %v12123_v52 }
 0x5d5   : > { %3661 = vmatmul.f32.gmra.mxu1 %v15131_v57  ;;  %v4523_v61 = vpop.f32.mrf.mxu2  ;;  %v5096_v45 = vpop.f32.mrf.mxu3 }
 0x5d6   : > { %v9328_v14 = vpop.eup %9327  ;;  %v3599_v7 = vadd.f32 %v3598_v1, %v3202_v59  ;;  %v4524_v15 = vadd.f32 %v12086_v49, %v4523_v61  ;;  %3264 = vmatmul.f32.gmra.mxu0 %v15131_v57  ;;  %v4656_v25 = vsub.f32 %v12123_v52, %v14523_v37  ;;  %v15133_v1 = vld [vmem:[#allocation126_spill] sm:$0xff] }
 0x5d7   : > { %v4000_v6 = vsel %vm330_vm0, %v9328_v14, 0  ;;  %v1725_v44 = vadd.f32 %v15133_v1, %v1240_v2  ;;  %v15134_v14 = vld [vmem:[#allocation123_spill] sm:$0xff] }
 0x5d8   : > { %9329 = vtanh.f32 %v3599_v7  ;;  %v4657_v18 = vand.u32 4294901760, %v4656_v25  ;;  %v12136_v16 = vand.u32 4294901760, %v4000_v6  ;;  %v12138_v3 = vadd.f32 %v5092_v33, %v4524_v15 }
 0x5d9   : > { %v1248_v33 = vadd.f32 %v12016_v62, %v10716_v53  ;;  %v2202_v29 = vadd.f32 %v10818_v23, %v1725_v44 }
 0x5da   : > { %15132 = vst [vmem:[#allocation125_spill] sm:$0xff] %v12136_v16  ;;  %v3602_v34 = vpop.f32.mrf.mxu1  ;;  %4658 = vmatmul.f32.gmra.mxu2 %v4657_v18  ;;  %5163 = vmatmul.f32.gmra.mxu3 %v12136_v16  ;;  %v12144_v59 = vsub.f32 %v4000_v6, %v12136_v16 }
 0x5db   : > { %v3205_v57 = vpop.f32.mrf.mxu0  ;;  %v1729_v37 = vadd.f32 %v10714_v38, %v1248_v33 }
 0x5dc   : > { %v3206_v61 = vadd.f32 %v3205_v57, %v2763_v50  ;;  %v14526_v7 = vand.u32 4294901760, %v12144_v59 }
 0x5dd   : > { %3665 = vmatmul.f32.gmra.mxu1 %v15134_v14  ;;  %v4531_v15 = vpop.f32.mrf.mxu2  ;;  %v5100_v25 = vpop.f32.mrf.mxu3 }
 0x5de   : > { %v9330_v9 = vpop.eup %9329  ;;  %v3603_v2 = vadd.f32 %v3602_v34, %v3206_v61  ;;  %v4532_v18 = vadd.f32 %v12086_v49, %v4531_v15  ;;  %3268 = vmatmul.f32.gmra.mxu0 %v15134_v14  ;;  %v4664_v6 = vsub.f32 %v12144_v59, %v14526_v7  ;;  %v2769_v34 = vadd.f32 %v10810_v39, %v2202_v29  ;;  %v15136_v15 = vld [vmem:[#allocation124_spill] sm:$0xff] }
 0x5df   : > { %v4003_v50 = vsel %vm330_vm0, %v9330_v9, 0  ;;  %v1256_v39 = vadd.f32 %v12016_v62, %v10721_v30 }
 0x5e0   : > { %9331 = vtanh.f32 %v3603_v2  ;;  %v4665_v1 = vand.u32 4294901760, %v4664_v6  ;;  %v12157_v57 = vand.u32 4294901760, %v4003_v50  ;;  %v12159_v53 = vadd.f32 %v5096_v45, %v4532_v18 }
 0x5e1   : > { %v2207_v45 = vadd.f32 %v10830_v10, %v1729_v37 }
 0x5e2   : > { %15135 = vst [vmem:[#allocation122_spill] sm:$0xff] %v12157_v57  ;;  %v3606_v23 = vpop.f32.mrf.mxu1  ;;  %4666 = vmatmul.f32.gmra.mxu2 %v4665_v1  ;;  %5167 = vmatmul.f32.gmra.mxu3 %v12157_v57  ;;  %v12165_v44 = vsub.f32 %v4003_v50, %v12157_v57  ;;  %v15205_v57 = vld [vmem:[#allocation146_spill] sm:$0xff] }
 0x5e3   : > { %v3209_v61 = vpop.f32.mrf.mxu0  ;;  %v2775_v30 = vadd.f32 %v10822_v28, %v2207_v45  ;;  %v15138_v45 = vld [vmem:[#allocation158_spill] sm:$0xff] }
 0x5e4   : > { %v3210_v14 = vadd.f32 %v3209_v61, %v2769_v34  ;;  %v14524_v9 = vand.u32 4294901760, %v12165_v44 }
 0x5e5   : > { %3669 = vmatmul.f32.gmra.mxu1 %v15136_v15  ;;  %v4539_v2 = vpop.f32.mrf.mxu2  ;;  %v5104_v18 = vpop.f32.mrf.mxu3 }
 0x5e6   : > { %v9332_v38 = vpop.eup %9331  ;;  %v3607_v33 = vadd.f32 %v3606_v23, %v3210_v14  ;;  %v4540_v29 = vadd.f32 %v12086_v49, %v4539_v2  ;;  %3272 = vmatmul.f32.gmra.mxu0 %v15136_v15  ;;  %v4672_v6 = vsub.f32 %v12165_v44, %v14524_v9  ;;  %v1733_v23 = vadd.f32 %v10719_v54, %v1256_v39 }
 0x5e7   : > { %v4006_v50 = vsel %vm330_vm0, %v9332_v38, 0 }
 0x5e8   : > { %9333 = vtanh.f32 %v3607_v33  ;;  %v4673_v1 = vand.u32 4294901760, %v4672_v6  ;;  %v12178_v10 = vand.u32 4294901760, %v4006_v50  ;;  %v12180_v37 = vadd.f32 %v5100_v25, %v4540_v29 }
 0x5e9   : > { %v1264_v25 = vadd.f32 %v12016_v62, %v10726_v5  ;;  %v2212_v54 = vadd.f32 %v15138_v45, %v1733_v23 }
 0x5ea   : > { %15137 = vst [vmem:[#allocation126_spill] sm:$0xff] %v12178_v10  ;;  %v3610_v34 = vpop.f32.mrf.mxu1  ;;  %4674 = vmatmul.f32.gmra.mxu2 %v4673_v1  ;;  %5171 = vmatmul.f32.gmra.mxu3 %v12178_v10  ;;  %v12186_v61 = vsub.f32 %v4006_v50, %v12178_v10 }
 0x5eb   : > { %v3213_v14 = vpop.f32.mrf.mxu0 }
 0x5ec   : > { %v3214_v15 = vadd.f32 %v3213_v14, %v2775_v30  ;;  %v14525_v2 = vand.u32 4294901760, %v12186_v61  ;;  %v15140_v14 = vld [vmem:[#allocation128_spill] sm:$0xff] }
 0x5ed   : > { %3673 = vmatmul.f32.gmra.mxu1 %v10698_v24  ;;  %v4547_v38 = vpop.f32.mrf.mxu2  ;;  %v5108_v33 = vpop.f32.mrf.mxu3  ;;  %v1737_v9 = vadd.f32 %v15140_v14, %v1264_v25  ;;  %v15144_v14 = vld [vmem:[#allocation130_spill] sm:$0xff] }
 0x5ee   : > { %v9334_v28 = vpop.eup %9333  ;;  %v3611_v39 = vadd.f32 %v3610_v34, %v3214_v15  ;;  %v4548_v29 = vadd.f32 %v12086_v49, %v4547_v38  ;;  %3276 = vmatmul.f32.gmra.mxu0 %v10698_v24  ;;  %v4680_v6 = vsub.f32 %v12186_v61, %v14525_v2  ;;  %v15141_v34 = vld [vmem:[#allocation155_spill] sm:$0xff] }
 0x5ef   : > { %v4009_v50 = vsel %vm330_vm0, %v9334_v28, 0  ;;  %v2781_v15 = vadd.f32 %v15141_v34, %v2212_v54  ;;  %v15142_v28 = vld [vmem:[#allocation127_spill] sm:$0xff]  ;;  %v1272_v54 = vadd.f32 %v12016_v62, %v15144_v14 }
 0x5f0   : > { %9335 = vtanh.f32 %v3611_v39  ;;  %v4681_v1 = vand.u32 4294901760, %v4680_v6  ;;  %v12199_v30 = vand.u32 4294901760, %v4009_v50  ;;  %v12201_v5 = vadd.f32 %v5104_v18, %v4548_v29  ;;  %v15143_v6 = vld [vmem:[#allocation162_spill] sm:$0xff] }
 0x5f1   : > { %v2217_v18 = vadd.f32 %v15143_v6, %v1737_v9 }
 0x5f2   : > { %15139 = vst [vmem:[#allocation123_spill] sm:$0xff] %v12199_v30  ;;  %v3614_v23 = vpop.f32.mrf.mxu1  ;;  %4682 = vmatmul.f32.gmra.mxu2 %v4681_v1  ;;  %5175 = vmatmul.f32.gmra.mxu3 %v12199_v30  ;;  %v12207_v24 = vsub.f32 %v4009_v50, %v12199_v30 }
 0x5f3   : > { %v3217_v38 = vpop.f32.mrf.mxu0  ;;  %v2787_v14 = vadd.f32 %v15146_v60, %v2217_v18 }
 0x5f4   : > { %v3218_v45 = vadd.f32 %v3217_v38, %v2781_v15  ;;  %v14528_v39 = vand.u32 4294901760, %v12207_v24 }
 0x5f5   : > { %3677 = vmatmul.f32.gmra.mxu1 %v15142_v28  ;;  %v4555_v29 = vpop.f32.mrf.mxu2  ;;  %v5112_v2 = vpop.f32.mrf.mxu3 }
 0x5f6   : > { %v9336_v25 = vpop.eup %9335  ;;  %v3615_v1 = vadd.f32 %v3614_v23, %v3218_v45  ;;  %v4556_v34 = vadd.f32 %v12086_v49, %v4555_v29  ;;  %3280 = vmatmul.f32.gmra.mxu0 %v15142_v28  ;;  %v4688_v50 = vsub.f32 %v12207_v24, %v14528_v39  ;;  %v15147_v23 = vld [vmem:[#allocation129_spill] sm:$0xff] }
 0x5f7   : > { %v4012_v15 = vsel %vm330_vm0, %v9336_v25, 0  ;;  %v1741_v45 = vadd.f32 %v15147_v23, %v1272_v54  ;;  %v15149_v25 = vand.u32 4294901760, %v10872_v35 }
 0x5f8   : > { %9337 = vtanh.f32 %v3615_v1  ;;  %v4689_v38 = vand.u32 4294901760, %v4688_v50  ;;  %v12220_v9 = vand.u32 4294901760, %v4012_v15  ;;  %v12222_v6 = vadd.f32 %v5108_v33, %v4556_v34  ;;  %v15150_v33 = vld [vmem:[#allocation132_spill] sm:$0xff] }
 0x5f9   : > { %v1280_v34 = vadd.f32 %v12016_v62, %v15150_v33  ;;  %v2222_v54 = vadd.f32 %v10861_v32, %v1741_v45 }
 0x5fa   : > { %15145 = vst [vmem:[#allocation124_spill] sm:$0xff] %v12220_v9  ;;  %v3618_v7 = vpop.f32.mrf.mxu1  ;;  %4690 = vmatmul.f32.gmra.mxu2 %v4689_v38  ;;  %5179 = vmatmul.f32.gmra.mxu3 %v12220_v9  ;;  %v12228_v28 = vsub.f32 %v4012_v15, %v12220_v9 }
 0x5fb   : > { %v3221_v29 = vpop.f32.mrf.mxu0  ;;  %v1745_v17 = vadd.f32 %v15153_v0, %v1280_v34 }
 0x5fc   : > { %15148 = vst [vmem:[#allocation158_spill] sm:$0xff] %v12228_v28  ;;  %v3222_v39 = vadd.f32 %v3221_v29, %v2787_v14  ;;  %v14532_v1 = vand.u32 4294901760, %v12228_v28 }
 0x5fd   : > { %5769 = vmatmul.f32.vlgmr.msra.gmra.mxu1 %v15149_v25  ;;  %v4563_v50 = vpop.f32.mrf.mxu2  ;;  %v5116_v60 = vpop.f32.mrf.mxu3 }
 0x5fe   : > { %v9338_v18 = vpop.eup %9337  ;;  %v3619_v38 = vadd.f32 %v3618_v7, %v3222_v39  ;;  %v4564_v23 = vadd.f32 %v12086_v49, %v4563_v50  ;;  %5277 = vmatmul.f32.vlgmr.msra.gmra.mxu0 %v10872_v35  ;;  %v4696_v15 = vsub.f32 %v12228_v28, %v14532_v1  ;;  %v15154_v7 = vld [vmem:[#allocation163_spill] sm:$0xff] }
 0x5ff   : > { %v4015_v14 = vsel %vm330_vm0, %v9338_v18, 0  ;;  %v2793_v39 = vadd.f32 %v15154_v7, %v2222_v54  ;;  %v15156_v18 = vand.u32 4294901760, %v10891_v19  ;;  %v15166_v1 = vld [vmem:[#allocation135_spill] sm:$0xff] }
 0x600   : > { %9339 = vtanh.f32 %v3619_v38  ;;  %v4697_v29 = vand.u32 4294901760, %v4696_v15  ;;  %v12242_v25 = vand.u32 4294901760, %v4015_v14  ;;  %v12244_v33 = vadd.f32 %v5112_v2, %v4564_v23  ;;  %v15157_v15 = vld [vmem:[#allocation134_spill] sm:$0xff] }
 0x601   : > { %v2227_v2 = vadd.f32 %v10875_v40, %v1745_v17  ;;  %v1288_v54 = vadd.f32 %v12016_v62, %v15157_v15 }
 0x602   : > { %15151 = vst [vmem:[#allocation128_spill] sm:$0xff] %v12242_v25  ;;  %v3622_v32 = vpop.f32.mrf.mxu1  ;;  %4698 = vmatmul.f32.gmra.mxu2 %v4697_v29  ;;  %5183 = vmatmul.f32.gmra.mxu3 %v12242_v25  ;;  %v12250_v35 = vsub.f32 %v4015_v14, %v12242_v25  ;;  %v15187_v25 = vld [vmem:[#allocation142_spill] sm:$0xff] }
 0x603   : > { %15152 = vst [vmem:[#allocation155_spill] sm:$0xff] %v12244_v33  ;;  %v3225_v45 = vpop.f32.mrf.mxu0  ;;  %v2799_v15 = vadd.f32 %v10863_v48, %v2227_v2 }
 0x604   : > { %15155 = vst [vmem:[#allocation127_spill] sm:$0xff] %v12250_v35  ;;  %v3226_v50 = vadd.f32 %v3225_v45, %v2793_v39  ;;  %v14531_v38 = vand.u32 4294901760, %v12250_v35 }
 0x605   : > { %5775 = vmatmul.f32.gmra.mxu1 %v15156_v18  ;;  %v4571_v23 = vpop.f32.mrf.mxu2  ;;  %v5120_v0 = vpop.f32.mrf.mxu3 }
 0x606   : > { %v9340_v34 = vpop.eup %9339  ;;  %v3623_v29 = vadd.f32 %v3622_v32, %v3226_v50  ;;  %v4572_v7 = vadd.f32 %v12086_v49, %v4571_v23  ;;  %5282 = vmatmul.f32.gmra.mxu0 %v10891_v19  ;;  %v4704_v14 = vsub.f32 %v12250_v35, %v14531_v38  ;;  %v15160_v32 = vld [vmem:[#allocation133_spill] sm:$0xff] }
 0x607   : > { %v4018_v39 = vsel %vm330_vm0, %v9340_v34, 0  ;;  %v1749_v50 = vadd.f32 %v15160_v32, %v1288_v54  ;;  %v15162_v34 = vand.u32 4294901760, %v10909_v47 }
 0x608   : > { %9341 = vtanh.f32 %v3623_v29  ;;  %v4705_v45 = vand.u32 4294901760, %v4704_v14  ;;  %v12264_v40 = vand.u32 4294901760, %v4018_v39  ;;  %v12266_v17 = vadd.f32 %v5116_v60, %v4572_v7  ;;  %v15163_v60 = vld [vmem:[#allocation136_spill] sm:$0xff] }
 0x609   : > { %v1296_v7 = vadd.f32 %v12016_v62, %v15163_v60  ;;  %v2232_v54 = vadd.f32 %v10896_v26, %v1749_v50 }
 0x60a   : > { %15158 = vst [vmem:[#allocation162_spill] sm:$0xff] %v12264_v40  ;;  %v3626_v18 = vpop.f32.mrf.mxu1  ;;  %4706 = vmatmul.f32.gmra.mxu2 %v4705_v45  ;;  %5187 = vmatmul.f32.gmra.mxu3 %v12264_v40  ;;  %v12272_v19 = vsub.f32 %v4018_v39, %v12264_v40 }
 0x60b   : > { %15159 = vst [vmem:[#allocation130_spill] sm:$0xff] %v12266_v17  ;;  %v3229_v23 = vpop.f32.mrf.mxu0  ;;  %v1753_v8 = vadd.f32 %v15166_v1, %v1296_v7 }
 0x60c   : > { %15161 = vst [vmem:[#allocation159_spill] sm:$0xff] %v12272_v19  ;;  %v3230_v38 = vadd.f32 %v3229_v23, %v2799_v15  ;;  %v14535_v29 = vand.u32 4294901760, %v12272_v19 }
 0x60d   : > { %5781 = vmatmul.f32.gmra.mxu1 %v15162_v34  ;;  %v4579_v14 = vpop.f32.mrf.mxu2  ;;  %v5124_v48 = vpop.f32.mrf.mxu3 }
 0x60e   : > { %v9342_v2 = vpop.eup %9341  ;;  %v3627_v45 = vadd.f32 %v3626_v18, %v3230_v38  ;;  %v4580_v32 = vadd.f32 %v12086_v49, %v4579_v14  ;;  %5287 = vmatmul.f32.gmra.mxu0 %v10909_v47  ;;  %v4712_v39 = vsub.f32 %v12272_v19, %v14535_v29  ;;  %v2805_v38 = vadd.f32 %v10880_v12, %v2232_v54 }
 0x60f   : > { %v4021_v15 = vsel %vm330_vm0, %v9342_v2, 0  ;;  %v15168_v14 = vand.u32 4294901760, %v10927_v22 }
 0x610   : > { %9343 = vtanh.f32 %v3627_v45  ;;  %v4713_v23 = vand.u32 4294901760, %v4712_v39  ;;  %v12286_v34 = vand.u32 4294901760, %v4021_v15  ;;  %v12288_v60 = vadd.f32 %v5120_v0, %v4580_v32  ;;  %v15169_v32 = vld [vmem:[#allocation138_spill] sm:$0xff] }
 0x611   : > { %v2237_v0 = vadd.f32 %v10918_v56, %v1753_v8  ;;  %v1304_v12 = vadd.f32 %v12016_v62, %v15169_v32 }
 0x612   : > { %15164 = vst [vmem:[#allocation129_spill] sm:$0xff] %v12286_v34  ;;  %v3630_v26 = vpop.f32.mrf.mxu1  ;;  %4714 = vmatmul.f32.gmra.mxu2 %v4713_v23  ;;  %5191 = vmatmul.f32.gmra.mxu3 %v12286_v34  ;;  %v12294_v47 = vsub.f32 %v4021_v15, %v12286_v34 }
 0x613   : > { %15165 = vst [vmem:[#allocation132_spill] sm:$0xff] %v12288_v60  ;;  %v3233_v18 = vpop.f32.mrf.mxu0 }
 0x614   : > { %15167 = vst [vmem:[#allocation131_spill] sm:$0xff] %v12294_v47  ;;  %v3234_v50 = vadd.f32 %v3233_v18, %v2805_v38  ;;  %v14534_v2 = vand.u32 4294901760, %v12294_v47 }
 0x615   : > { %5787 = vmatmul.f32.gmra.mxu1 %v15168_v14  ;;  %v4587_v45 = vpop.f32.mrf.mxu2  ;;  %v5128_v1 = vpop.f32.mrf.mxu3  ;;  %v15172_v14 = vld [vmem:[#allocation166_spill] sm:$0xff] }
 0x616   : > { %v9344_v7 = vpop.eup %9343  ;;  %v3631_v54 = vadd.f32 %v3630_v26, %v3234_v50  ;;  %v4588_v39 = vadd.f32 %v12086_v49, %v4587_v45  ;;  %5292 = vmatmul.f32.gmra.mxu0 %v10927_v22  ;;  %v4720_v15 = vsub.f32 %v12294_v47, %v14534_v2  ;;  %v2811_v32 = vadd.f32 %v15172_v14, %v2237_v0  ;;  %v15173_v26 = vld [vmem:[#allocation137_spill] sm:$0xff] }
 0x617   : > { %v4024_v23 = vsel %vm330_vm0, %v9344_v7, 0  ;;  %v1757_v50 = vadd.f32 %v15173_v26, %v1304_v12  ;;  %v15175_v7 = vld [vmem:[#allocation172_spill] sm:$0xff]  ;;  %v15178_v12 = vld [vmem:[#allocation171_spill] sm:$0xff] }
 0x618   : > { %9345 = vtanh.f32 %v3631_v54  ;;  %v4721_v38 = vand.u32 4294901760, %v4720_v15  ;;  %v12308_v56 = vand.u32 4294901760, %v4024_v23  ;;  %v12310_v8 = vadd.f32 %v5124_v48, %v4588_v39  ;;  %v15177_v48 = vld [vmem:[#allocation140_spill] sm:$0xff] }
 0x619   : > { %v15176_v54 = vand.u32 4294901760, %v15175_v7  ;;  %v1312_v39 = vadd.f32 %v12016_v62, %v15177_v48 }
 0x61a   : > { %15170 = vst [vmem:[#allocation163_spill] sm:$0xff] %v12308_v56  ;;  %v3634_v18 = vpop.f32.mrf.mxu1  ;;  %4722 = vmatmul.f32.gmra.mxu2 %v4721_v38  ;;  %5195 = vmatmul.f32.gmra.mxu3 %v12308_v56  ;;  %v12316_v22 = vsub.f32 %v4024_v23, %v12308_v56  ;;  %v2242_v38 = vadd.f32 %v15178_v12, %v1757_v50  ;;  %v15181_v56 = vld [vmem:[#allocation139_spill] sm:$0xff] }
 0x61b   : > { %15171 = vst [vmem:[#allocation134_spill] sm:$0xff] %v12310_v8  ;;  %v3237_v45 = vpop.f32.mrf.mxu0  ;;  %v1761_v40 = vadd.f32 %v15181_v56, %v1312_v39 }
 0x61c   : > { %15174 = vst [vmem:[#allocation133_spill] sm:$0xff] %v12316_v22  ;;  %v3238_v2 = vadd.f32 %v3237_v45, %v2811_v32  ;;  %v14542_v15 = vand.u32 4294901760, %v12316_v22 }
 0x61d   : > { %5793 = vmatmul.f32.gmra.mxu1 %v15176_v54  ;;  %v4595_v29 = vpop.f32.mrf.mxu2  ;;  %v5132_v0 = vpop.f32.mrf.mxu3 }
 0x61e   : > { %v9346_v14 = vpop.eup %9345  ;;  %v3635_v26 = vadd.f32 %v3634_v18, %v3238_v2  ;;  %v4596_v34 = vadd.f32 %v12086_v49, %v4595_v29  ;;  %5297 = vmatmul.f32.gmra.mxu0 %v15175_v7  ;;  %v4728_v23 = vsub.f32 %v12316_v22, %v14542_v15  ;;  %v15182_v2 = vld [vmem:[#allocation169_spill] sm:$0xff] }
 0x61f   : > { %v4027_v32 = vsel %vm330_vm0, %v9346_v14, 0  ;;  %v2817_v18 = vadd.f32 %v15182_v2, %v2242_v38  ;;  %v15184_v14 = vld [vmem:[#allocation175_spill] sm:$0xff]  ;;  %v1320_v38 = vadd.f32 %v12016_v62, %v15187_v25 }
 0x620   : > { %9347 = vtanh.f32 %v3635_v26  ;;  %v4729_v45 = vand.u32 4294901760, %v4728_v23  ;;  %v12330_v54 = vand.u32 4294901760, %v4027_v32  ;;  %v12332_v48 = vadd.f32 %v5128_v1, %v4596_v34  ;;  %v15186_v34 = vld [vmem:[#allocation176_spill] sm:$0xff] }
 0x621   : > { %v15185_v26 = vand.u32 4294901760, %v15184_v14  ;;  %v2247_v1 = vadd.f32 %v15186_v34, %v1761_v40 }
 0x622   : > { %15179 = vst [vmem:[#allocation136_spill] sm:$0xff] %v12330_v54  ;;  %v3638_v50 = vpop.f32.mrf.mxu1  ;;  %4730 = vmatmul.f32.gmra.mxu2 %v4729_v45  ;;  %5199 = vmatmul.f32.gmra.mxu3 %v12330_v54  ;;  %v12338_v29 = vsub.f32 %v4027_v32, %v12330_v54  ;;  %v15190_v54 = vld [vmem:[#allocation173_spill] sm:$0xff] }
 0x623   : > { %15180 = vst [vmem:[#allocation135_spill] sm:$0xff] %v12332_v48  ;;  %v3241_v7 = vpop.f32.mrf.mxu0  ;;  %v2823_v25 = vadd.f32 %v15190_v54, %v2247_v1 }
 0x624   : > { %15183 = vst [vmem:[#allocation138_spill] sm:$0xff] %v12338_v29  ;;  %v3242_v12 = vadd.f32 %v3241_v7, %v2817_v18  ;;  %v14547_v23 = vand.u32 4294901760, %v12338_v29 }
 0x625   : > { %5799 = vmatmul.f32.gmra.mxu1 %v15185_v26  ;;  %v4603_v15 = vpop.f32.mrf.mxu2  ;;  %v5136_v56 = vpop.f32.mrf.mxu3 }
 0x626   : > { %v9348_v39 = vpop.eup %9347  ;;  %v3639_v45 = vadd.f32 %v3638_v50, %v3242_v12  ;;  %v4604_v2 = vadd.f32 %v12086_v49, %v4603_v15  ;;  %5302 = vmatmul.f32.gmra.mxu0 %v15184_v14  ;;  %v4736_v32 = vsub.f32 %v12338_v29, %v14547_v23  ;;  %v15191_v50 = vld [vmem:[#allocation141_spill] sm:$0xff] }
 0x627   : > { %v4030_v18 = vsel %vm330_vm0, %v9348_v39, 0  ;;  %v1765_v12 = vadd.f32 %v15191_v50, %v1320_v38  ;;  %v15193_v39 = vld [vmem:[#allocation179_spill] sm:$0xff]  ;;  %v15196_v38 = vld [vmem:[#allocation180_spill] sm:$0xff] }
 0x628   : > { %9349 = vtanh.f32 %v3639_v45  ;;  %v4737_v7 = vand.u32 4294901760, %v4736_v32  ;;  %v12352_v40 = vand.u32 4294901760, %v4030_v18  ;;  %v12354_v26 = vadd.f32 %v5132_v0, %v4604_v2  ;;  %v15195_v0 = vld [vmem:[#allocation144_spill] sm:$0xff] }
 0x629   : > { %v15194_v45 = vand.u32 4294901760, %v15193_v39  ;;  %v1328_v2 = vadd.f32 %v12016_v62, %v15195_v0 }
 0x62a   : > { %15188 = vst [vmem:[#allocation166_spill] sm:$0xff] %v12352_v40  ;;  %v3642_v34 = vpop.f32.mrf.mxu1  ;;  %4738 = vmatmul.f32.gmra.mxu2 %v4737_v7  ;;  %5203 = vmatmul.f32.gmra.mxu3 %v12352_v40  ;;  %v12360_v15 = vsub.f32 %v4030_v18, %v12352_v40  ;;  %v2252_v7 = vadd.f32 %v15196_v38, %v1765_v12  ;;  %v15199_v40 = vld [vmem:[#allocation143_spill] sm:$0xff] }
 0x62b   : > { %15189 = vst [vmem:[#allocation137_spill] sm:$0xff] %v12354_v26  ;;  %v3245_v14 = vpop.f32.mrf.mxu0  ;;  %v1769_v10 = vadd.f32 %v15199_v40, %v1328_v2 }
 0x62c   : > { %15192 = vst [vmem:[#allocation172_spill] sm:$0xff] %v12360_v15  ;;  %v3246_v23 = vadd.f32 %v3245_v14, %v2823_v25  ;;  %v14556_v32 = vand.u32 4294901760, %v12360_v15 }
 0x62d   : > { %5805 = vmatmul.f32.gmra.mxu1 %v15194_v45  ;;  %v4611_v9 = vpop.f32.mrf.mxu2  ;;  %v5140_v54 = vpop.f32.mrf.mxu3 }
 0x62e   : > { %v9350_v1 = vpop.eup %9349  ;;  %v3643_v50 = vadd.f32 %v3642_v34, %v3246_v23  ;;  %v4612_v30 = vadd.f32 %v12086_v49, %v4611_v9  ;;  %5307 = vmatmul.f32.gmra.mxu0 %v15193_v39  ;;  %v4744_v18 = vsub.f32 %v12360_v15, %v14556_v32  ;;  %v15200_v23 = vld [vmem:[#allocation177_spill] sm:$0xff] }
 0x62f   : > { %v4033_v25 = vsel %vm330_vm0, %v9350_v1, 0  ;;  %v2829_v34 = vadd.f32 %v15200_v23, %v2252_v7  ;;  %v15202_v1 = vld [vmem:[#allocation183_spill] sm:$0xff]  ;;  %v1336_v7 = vadd.f32 %v12016_v62, %v15205_v57 }
 0x630   : > { %9351 = vtanh.f32 %v3643_v50  ;;  %v4745_v14 = vand.u32 4294901760, %v4744_v18  ;;  %v12374_v45 = vand.u32 4294901760, %v4033_v25  ;;  %v12376_v0 = vadd.f32 %v5136_v56, %v4612_v30  ;;  %v15204_v30 = vld [vmem:[#allocation5_spill] sm:$0xff] }
 0x631   : > { %v15203_v50 = vand.u32 4294901760, %v15202_v1  ;;  %v2257_v56 = vadd.f32 %v15204_v30, %v1769_v10 }
 0x632   : > { %15197 = vst [vmem:[#allocation140_spill] sm:$0xff] %v12374_v45  ;;  %v3646_v12 = vpop.f32.mrf.mxu1  ;;  %4746 = vmatmul.f32.gmra.mxu2 %v4745_v14  ;;  %5207 = vmatmul.f32.gmra.mxu3 %v12374_v45  ;;  %v12382_v9 = vsub.f32 %v4033_v25, %v12374_v45  ;;  %v15208_v45 = vld [vmem:[#allocation181_spill] sm:$0xff] }
 0x633   : > { %15198 = vst [vmem:[#allocation171_spill] sm:$0xff] %v12376_v0  ;;  %v3249_v39 = vpop.f32.mrf.mxu0  ;;  %v2835_v57 = vadd.f32 %v15208_v45, %v2257_v56 }
 0x634   : > { %15201 = vst [vmem:[#allocation139_spill] sm:$0xff] %v12382_v9  ;;  %v3250_v38 = vadd.f32 %v3249_v39, %v2829_v34  ;;  %v14561_v18 = vand.u32 4294901760, %v12382_v9 }
 0x635   : > { %5811 = vmatmul.f32.gmra.mxu1 %v15203_v50  ;;  %v4619_v32 = vpop.f32.mrf.mxu2  ;;  %v5144_v40 = vpop.f32.mrf.mxu3 }
 0x636   : > { %v9352_v2 = vpop.eup %9351  ;;  %v3647_v14 = vadd.f32 %v3646_v12, %v3250_v38  ;;  %v4620_v23 = vadd.f32 %v12086_v49, %v4619_v32  ;;  %5312 = vmatmul.f32.gmra.mxu0 %v15202_v1  ;;  %v4752_v25 = vsub.f32 %v12382_v9, %v14561_v18  ;;  %v15209_v12 = vld [vmem:[#allocation145_spill] sm:$0xff] }
 0x637   : > { %v4036_v34 = vsel %vm330_vm0, %v9352_v2, 0  ;;  %v1773_v38 = vadd.f32 %v15209_v12, %v1336_v7  ;;  %v15211_v2 = vld [vmem:[#allocation185_spill] sm:$0xff]  ;;  %v15214_v7 = vld [vmem:[#allocation3_spill] sm:$0xff] }
 0x638   : > { %9353 = vtanh.f32 %v3647_v14  ;;  %v4753_v39 = vand.u32 4294901760, %v4752_v25  ;;  %v12396_v10 = vand.u32 4294901760, %v4036_v34  ;;  %v12398_v50 = vadd.f32 %v5140_v54, %v4620_v23  ;;  %v15213_v54 = vld [vmem:[#allocation148_spill] sm:$0xff] }
 0x639   : > { %v15212_v14 = vand.u32 4294901760, %v15211_v2  ;;  %v1344_v23 = vadd.f32 %v12016_v62, %v15213_v54 }
 0x63a   : > { %15206 = vst [vmem:[#allocation169_spill] sm:$0xff] %v12396_v10  ;;  %v3650_v30 = vpop.f32.mrf.mxu1  ;;  %4754 = vmatmul.f32.gmra.mxu2 %v4753_v39  ;;  %5211 = vmatmul.f32.gmra.mxu3 %v12396_v10  ;;  %v12404_v32 = vsub.f32 %v4036_v34, %v12396_v10  ;;  %v2262_v39 = vadd.f32 %v15214_v7, %v1773_v38  ;;  %v15217_v10 = vld [vmem:[#allocation147_spill] sm:$0xff] }
 0x63b   : > { %15207 = vst [vmem:[#allocation175_spill] sm:$0xff] %v12398_v50  ;;  %v3253_v1 = vpop.f32.mrf.mxu0  ;;  %v1777_v20 = vadd.f32 %v15217_v10, %v1344_v23 }
 0x63c   : > { %15210 = vst [vmem:[#allocation176_spill] sm:$0xff] %v12404_v32  ;;  %v3254_v18 = vadd.f32 %v3253_v1, %v2835_v57  ;;  %v14570_v25 = vand.u32 4294901760, %v12404_v32 }
 0x63d   : > { %5817 = vmatmul.f32.gmra.mxu1 %v15212_v14  ;;  %v4627_v16 = vpop.f32.mrf.mxu2  ;;  %v5148_v45 = vpop.f32.mrf.mxu3 }
 0x63e   : > { %v9354_v56 = vpop.eup %9353  ;;  %v3651_v12 = vadd.f32 %v3650_v30, %v3254_v18  ;;  %v4628_v58 = vadd.f32 %v12086_v49, %v4627_v16  ;;  %5317 = vmatmul.f32.gmra.mxu0 %v15211_v2  ;;  %v4760_v34 = vsub.f32 %v12404_v32, %v14570_v25  ;;  %v15218_v18 = vld [vmem:[#allocation184_spill] sm:$0xff] }
 0x63f   : > { %v4039_v57 = vsel %vm330_vm0, %v9354_v56, 0  ;;  %v2841_v30 = vadd.f32 %v15218_v18, %v2262_v39  ;;  %v15220_v56 = vld [vmem:[#allocation186_spill] sm:$0xff]  ;;  %v1352_v39 = vadd.f32 %v12016_v62, %v15223_v63 }
 0x640   : > { %9355 = vtanh.f32 %v3651_v12  ;;  %v4761_v1 = vand.u32 4294901760, %v4760_v34  ;;  %v12418_v14 = vand.u32 4294901760, %v4039_v57  ;;  %v12420_v54 = vadd.f32 %v5144_v40, %v4628_v58  ;;  %v15222_v58 = vld [vmem:[#allocation188_spill] sm:$0xff] }
 0x641   : > { %v15221_v12 = vand.u32 4294901760, %v15220_v56  ;;  %v2267_v40 = vadd.f32 %v15222_v58, %v1777_v20 }
 0x642   : > { %15215 = vst [vmem:[#allocation142_spill] sm:$0xff] %v12418_v14  ;;  %v3654_v38 = vpop.f32.mrf.mxu1  ;;  %4762 = vmatmul.f32.gmra.mxu2 %v4761_v1  ;;  %5215 = vmatmul.f32.gmra.mxu3 %v12418_v14  ;;  %v12426_v16 = vsub.f32 %v4039_v57, %v12418_v14  ;;  %v15226_v14 = vld [vmem:[#allocation187_spill] sm:$0xff] }
 0x643   : > { %15216 = vst [vmem:[#allocation173_spill] sm:$0xff] %v12420_v54  ;;  %v3257_v2 = vpop.f32.mrf.mxu0  ;;  %v2847_v63 = vadd.f32 %v15226_v14, %v2267_v40 }
 0x644   : > { %15219 = vst [vmem:[#allocation141_spill] sm:$0xff] %v12426_v16  ;;  %v3258_v7 = vadd.f32 %v3257_v2, %v2841_v30  ;;  %v14575_v34 = vand.u32 4294901760, %v12426_v16 }
 0x645   : > { %5823 = vmatmul.f32.gmra.mxu1 %v15221_v12  ;;  %v4635_v25 = vpop.f32.mrf.mxu2  ;;  %v5152_v10 = vpop.f32.mrf.mxu3 }
 0x646   : > { %v9356_v23 = vpop.eup %9355  ;;  %v3655_v1 = vadd.f32 %v3654_v38, %v3258_v7  ;;  %v4636_v18 = vadd.f32 %v12086_v49, %v4635_v25  ;;  %5322 = vmatmul.f32.gmra.mxu0 %v15220_v56  ;;  %v4768_v57 = vsub.f32 %v12426_v16, %v14575_v34  ;;  %v15227_v38 = vld [vmem:[#allocation149_spill] sm:$0xff] }
 0x647   : > { %v4042_v30 = vsel %vm330_vm0, %v9356_v23, 0  ;;  %v1781_v7 = vadd.f32 %v15227_v38, %v1352_v39  ;;  %v15229_v23 = vld [vmem:[#allocation4_spill] sm:$0xff]  ;;  %v15232_v39 = vld [vmem:[#allocation13_spill] sm:$0xff] }
 0x648   : > { %9357 = vtanh.f32 %v3655_v1  ;;  %v4769_v2 = vand.u32 4294901760, %v4768_v57  ;;  %v12440_v20 = vand.u32 4294901760, %v4042_v30  ;;  %v12442_v12 = vadd.f32 %v5148_v45, %v4636_v18  ;;  %v15231_v45 = vld [vmem:[#allocation152_spill] sm:$0xff] }
 0x649   : > { %v15230_v1 = vand.u32 4294901760, %v15229_v23  ;;  %v1360_v18 = vadd.f32 %v12016_v62, %v15231_v45 }
 0x64a   : > { %15224 = vst [vmem:[#allocation179_spill] sm:$0xff] %v12440_v20  ;;  %v3658_v58 = vpop.f32.mrf.mxu1  ;;  %4770 = vmatmul.f32.gmra.mxu2 %v4769_v2  ;;  %5219 = vmatmul.f32.gmra.mxu3 %v12440_v20  ;;  %v12448_v25 = vsub.f32 %v4042_v30, %v12440_v20  ;;  %v2272_v2 = vadd.f32 %v15232_v39, %v1781_v7  ;;  %v15235_v20 = vld [vmem:[#allocation151_spill] sm:$0xff] }
 0x64b   : > { %15225 = vst [vmem:[#allocation144_spill] sm:$0xff] %v12442_v12  ;;  %v3261_v56 = vpop.f32.mrf.mxu0  ;;  %v1785_v41 = vadd.f32 %v15235_v20, %v1360_v18 }
 0x64c   : > { %15228 = vst [vmem:[#allocation180_spill] sm:$0xff] %v12448_v25  ;;  %v3262_v34 = vadd.f32 %v3261_v56, %v2847_v63  ;;  %v14584_v57 = vand.u32 4294901760, %v12448_v25 }
 0x64d   : > { %5829 = vmatmul.f32.gmra.mxu1 %v15230_v1  ;;  %v4643_v31 = vpop.f32.mrf.mxu2  ;;  %v5156_v14 = vpop.f32.mrf.mxu3 }
 0x64e   : > { %v9358_v40 = vpop.eup %9357  ;;  %v3659_v38 = vadd.f32 %v3658_v58, %v3262_v34  ;;  %v4644_v16 = vadd.f32 %v12086_v49, %v4643_v31  ;;  %5327 = vmatmul.f32.gmra.mxu0 %v15229_v23  ;;  %v4776_v30 = vsub.f32 %v12448_v25, %v14584_v57  ;;  %v15236_v34 = vld [vmem:[#allocation11_spill] sm:$0xff]  ;;  %v15241_v25 = vld [vmem:[#allocation154_spill] sm:$0xff] }
 0x64f   : > { %v4045_v63 = vsel %vm330_vm0, %v9358_v40, 0  ;;  %v2853_v58 = vadd.f32 %v15236_v34, %v2272_v2  ;;  %v15238_v40 = vld [vmem:[#allocation189_spill] sm:$0xff]  ;;  %v1368_v2 = vadd.f32 %v12016_v62, %v15241_v25 }
 0x650   : > { %9359 = vtanh.f32 %v3659_v38  ;;  %v4777_v56 = vand.u32 4294901760, %v4776_v30  ;;  %v12462_v1 = vand.u32 4294901760, %v4045_v63  ;;  %v12464_v45 = vadd.f32 %v5152_v10, %v4644_v16  ;;  %v15240_v16 = vld [vmem:[#allocation15_spill] sm:$0xff]  ;;  %v15245_v25 = vld [vmem:[#allocation153_spill] sm:$0xff] }
 0x651   : > { %v15239_v38 = vand.u32 4294901760, %v15238_v40  ;;  %v2277_v10 = vadd.f32 %v15240_v16, %v1785_v41 }
 0x652   : > { %15233 = vst [vmem:[#allocation143_spill] sm:$0xff] %v12462_v1  ;;  %v3662_v7 = vpop.f32.mrf.mxu1  ;;  %4778 = vmatmul.f32.gmra.mxu2 %v4777_v56  ;;  %5223 = vmatmul.f32.gmra.mxu3 %v12462_v1  ;;  %v12470_v31 = vsub.f32 %v4045_v63, %v12462_v1  ;;  %v15244_v1 = vld [vmem:[#allocation8_spill] sm:$0xff] }
 0x653   : > { %15234 = vst [vmem:[#allocation177_spill] sm:$0xff] %v12464_v45  ;;  %v3265_v23 = vpop.f32.mrf.mxu0  ;;  %v2859_v62 = vadd.f32 %v15244_v1, %v2277_v10  ;;  %v15249_v1 = vld [vmem:[#allocation157_spill] sm:$0xff] }
 0x654   : > { %15237 = vst [vmem:[#allocation183_spill] sm:$0xff] %v12470_v31  ;;  %v3266_v39 = vadd.f32 %v3265_v23, %v2853_v58  ;;  %v14589_v30 = vand.u32 4294901760, %v12470_v31 }
 0x655   : > { %5835 = vmatmul.f32.gmra.mxu1 %v15239_v38  ;;  %v4651_v57 = vpop.f32.mrf.mxu2  ;;  %v5160_v20 = vpop.f32.mrf.mxu3 }
 0x656   : > { %v9360_v18 = vpop.eup %9359  ;;  %v3663_v56 = vadd.f32 %v3662_v7, %v3266_v39  ;;  %v4652_v34 = vadd.f32 %v12086_v49, %v4651_v57  ;;  %5332 = vmatmul.f32.gmra.mxu0 %v15238_v40  ;;  %v4784_v63 = vsub.f32 %v12470_v31, %v14589_v30  ;;  %v1789_v7 = vadd.f32 %v15245_v25, %v1368_v2  ;;  %v15250_v25 = vld [vmem:[#allocation12_spill] sm:$0xff] }
 0x657   : > { %v4048_v58 = vsel %vm330_vm0, %v9360_v18, 0  ;;  %v15247_v18 = vld [vmem:[#allocation191_spill] sm:$0xff]  ;;  %v15253_v31 = vld [vmem:[#allocation156_spill] sm:$0xff] }
 0x658   : > { %9361 = vtanh.f32 %v3663_v56  ;;  %v4785_v23 = vand.u32 4294901760, %v4784_v63  ;;  %v12484_v41 = vand.u32 4294901760, %v4048_v58  ;;  %v12486_v38 = vadd.f32 %v5156_v14, %v4652_v34  ;;  %v9752_v14 = vld [vmem:[%s14059_s2] ss:$0 sm:$0xff] }
 0x659   : > { %v15248_v56 = vand.u32 4294901760, %v15247_v18  ;;  %v1376_v10 = vadd.f32 %v9752_v14, %v15249_v1  ;;  %v2282_v30 = vadd.f32 %v15250_v25, %v1789_v7 }
 0x65a   : > { %15242 = vst [vmem:[#allocation5_spill] sm:$0xff] %v12484_v41  ;;  %v3666_v16 = vpop.f32.mrf.mxu1  ;;  %4786 = vmatmul.f32.gmra.mxu2 %v4785_v23  ;;  %5227 = vmatmul.f32.gmra.mxu3 %v12484_v41  ;;  %v12492_v57 = vsub.f32 %v4048_v58, %v12484_v41 }
 0x65b   : > { %15243 = vst [vmem:[#allocation146_spill] sm:$0xff] %v12486_v38  ;;  %v3269_v39 = vpop.f32.mrf.mxu0  ;;  %v1793_v45 = vadd.f32 %v15253_v31, %v1376_v10 }
 0x65c   : > { %15246 = vst [vmem:[#allocation181_spill] sm:$0xff] %v12492_v57  ;;  %v3270_v40 = vadd.f32 %v3269_v39, %v2859_v62  ;;  %v14594_v63 = vand.u32 4294901760, %v12492_v57 }
 0x65d   : > { %5841 = vmatmul.f32.gmra.mxu1 %v15248_v56  ;;  %v4659_v2 = vpop.f32.mrf.mxu2  ;;  %v5164_v34 = vpop.f32.mrf.mxu3 }
 0x65e   : > { %v9362_v23 = vpop.eup %9361  ;;  %v3667_v58 = vadd.f32 %v3666_v16, %v3270_v40  ;;  %v4660_v41 = vadd.f32 %v12086_v49, %v4659_v2  ;;  %5337 = vmatmul.f32.gmra.mxu0 %v15247_v18  ;;  %v4792_v62 = vsub.f32 %v12492_v57, %v14594_v63  ;;  %v15254_v16 = vld [vmem:[#allocation192_spill] sm:$0xff] }
 0x65f   : > { %v4051_v39 = vsel %vm330_vm0, %v9362_v23, 0  ;;  %v2865_v40 = vadd.f32 %v15254_v16, %v2282_v30  ;;  %v15256_v23 = vld [vmem:[#allocation193_spill] sm:$0xff] }
 0x660   : > { %9363 = vtanh.f32 %v3667_v58  ;;  %v4793_v56 = vand.u32 4294901760, %v4792_v62  ;;  %v12508_v38 = vand.u32 4294901760, %v4051_v39  ;;  %v12510_v1 = vadd.f32 %v5160_v20, %v4660_v41  ;;  %v15258_v20 = vld [vmem:[#allocation196_spill] sm:$0xff] }
 0x661   : > { %v15257_v58 = vand.u32 4294901760, %v15256_v23  ;;  %v2287_v41 = vadd.f32 %v15258_v20, %v1793_v45 }
 0x662   : > { %15251 = vst [vmem:[#allocation145_spill] sm:$0xff] %v12508_v38  ;;  %v3670_v7 = vpop.f32.mrf.mxu1  ;;  %4794 = vmatmul.f32.gmra.mxu2 %v4793_v56  ;;  %5231 = vmatmul.f32.gmra.mxu3 %v12508_v38  ;;  %v12516_v18 = vsub.f32 %v4051_v39, %v12508_v38  ;;  %v15262_v38 = vld [vmem:[#allocation195_spill] sm:$0xff] }
 0x663   : > { %15252 = vst [vmem:[#allocation185_spill] sm:$0xff] %v12510_v1  ;;  %v3273_v2 = vpop.f32.mrf.mxu0  ;;  %v15259_v1 = vld [vmem:[#allocation161_spill] sm:$0xff] }
 0x664   : > { %15255 = vst [vmem:[#allocation148_spill] sm:$0xff] %v12516_v18  ;;  %v3274_v25 = vadd.f32 %v3273_v2, %v2865_v40  ;;  %v14597_v62 = vand.u32 4294901760, %v12516_v18  ;;  %v1384_v30 = vadd.f32 %v9752_v14, %v15259_v1  ;;  %v2871_v14 = vadd.f32 %v15262_v38, %v2287_v41  ;;  %v15263_v1 = vld [vmem:[#allocation160_spill] sm:$0xff] }
 0x665   : > { %5847 = vmatmul.f32.gmra.mxu1 %v15257_v58  ;;  %v4667_v63 = vpop.f32.mrf.mxu2  ;;  %v5168_v31 = vpop.f32.mrf.mxu3 }
 0x666   : > { %v9364_v10 = vpop.eup %9363  ;;  %v3671_v56 = vadd.f32 %v3670_v7, %v3274_v25  ;;  %v4668_v16 = vadd.f32 %v12086_v49, %v4667_v63  ;;  %5342 = vmatmul.f32.gmra.mxu0 %v15256_v23  ;;  %v4800_v39 = vsub.f32 %v12516_v18, %v14597_v62  ;;  %v1797_v7 = vadd.f32 %v15263_v1, %v1384_v30 }
 0x667   : > { %v4054_v40 = vsel %vm330_vm0, %v9364_v10, 0  ;;  %v15265_v10 = vld [vmem:[#allocation194_spill] sm:$0xff] }
 0x668   : > { %9365 = vtanh.f32 %v3671_v56  ;;  %v4801_v2 = vand.u32 4294901760, %v4800_v39  ;;  %v12529_v58 = vand.u32 4294901760, %v4054_v40  ;;  %v12531_v45 = vadd.f32 %v5164_v34, %v4668_v16 }
 0x669   : > { %v15266_v56 = vand.u32 4294901760, %v15265_v10 }
 0x66a   : > { %15260 = vst [vmem:[#allocation3_spill] sm:$0xff] %v12529_v58  ;;  %v3674_v20 = vpop.f32.mrf.mxu1  ;;  %4802 = vmatmul.f32.gmra.mxu2 %v4801_v2  ;;  %5235 = vmatmul.f32.gmra.mxu3 %v12529_v58  ;;  %v12537_v63 = vsub.f32 %v4054_v40, %v12529_v58  ;;  %v15270_v58 = vld [vmem:[#allocation21_spill] sm:$0xff] }
 0x66b   : > { %15261 = vst [vmem:[#allocation147_spill] sm:$0xff] %v12531_v45  ;;  %v3277_v25 = vpop.f32.mrf.mxu0  ;;  %v15267_v45 = vld [vmem:[#allocation23_spill] sm:$0xff] }
 0x66c   : > { %15264 = vst [vmem:[#allocation184_spill] sm:$0xff] %v12537_v63  ;;  %v3278_v23 = vadd.f32 %v3277_v25, %v2871_v14  ;;  %v14600_v39 = vand.u32 4294901760, %v12537_v63  ;;  %v2292_v38 = vadd.f32 %v15267_v45, %v1797_v7 }
 0x66d   : > { %5853 = vmatmul.f32.gmra.mxu1 %v15266_v56  ;;  %v4675_v34 = vpop.f32.mrf.mxu2  ;;  %v5172_v16 = vpop.f32.mrf.mxu3 }
 0x66e   : > { %v9366_v62 = vpop.eup %9365  ;;  %v3675_v41 = vadd.f32 %v3674_v20, %v3278_v23  ;;  %v4676_v30 = vadd.f32 %v12086_v49, %v4675_v34  ;;  %5347 = vmatmul.f32.gmra.mxu0 %v15265_v10  ;;  %v4808_v40 = vsub.f32 %v12537_v63, %v14600_v39  ;;  %v2877_v45 = vadd.f32 %v15270_v58, %v2292_v38  ;;  %v15272_v23 = vld [vmem:[#allocation14_spill] sm:$0xff]  ;;  %v15278_v39 = vld [vmem:[#allocation197_spill] sm:$0xff] }
 0x66f   : > { %v4057_v2 = vsel %vm330_vm0, %v9366_v62, 0  ;;  %v15273_v10 = vand.u32 4294901760, %v15272_v23  ;;  %v12564_v58 = vld [vmem:[%s14061_s4] ss:$0 sm:$0xff] }
 0x670   : > { %9367 = vtanh.f32 %v3675_v41  ;;  %v4809_v14 = vand.u32 4294901760, %v4808_v40  ;;  %v12549_v1 = vand.u32 4294901760, %v4057_v2  ;;  %v12551_v25 = vadd.f32 %v5168_v31, %v4676_v30 }
 0x672   : > { %15268 = vst [vmem:[#allocation186_spill] sm:$0xff] %v12549_v1  ;;  %v3678_v56 = vpop.f32.mrf.mxu1  ;;  %4810 = vmatmul.f32.gmra.mxu2 %v4809_v14  ;;  %5239 = vmatmul.f32.gmra.mxu3 %v12549_v1  ;;  %v12556_v49 = vsub.f32 %v4057_v2, %v12549_v1 }
 0x673   : > { %15269 = vst [vmem:[#allocation188_spill] sm:$0xff] %v12551_v25  ;;  %v3281_v20 = vpop.f32.mrf.mxu0 }
 0x674   : > { %15271 = vst [vmem:[#allocation150_spill] sm:$0xff] %v12556_v49  ;;  %v3282_v7 = vadd.f32 %v3281_v20, %v2877_v45  ;;  %v14601_v62 = vand.u32 4294901760, %v12556_v49 }
 0x675   : > { %5859 = vmatmul.f32.gmra.mxu1 %v15273_v10  ;;  %v4683_v34 = vpop.f32.mrf.mxu2  ;;  %v5176_v41 = vpop.f32.mrf.mxu3  ;;  %v15277_v10 = vld [vmem:[#allocation20_spill] sm:$0xff] }
 0x676   : > { %v9368_v31 = vpop.eup %9367  ;;  %v3679_v30 = vadd.f32 %v3678_v56, %v3282_v7  ;;  %v4684_v38 = vadd.f32 %v12564_v58, %v4683_v34  ;;  %5352 = vmatmul.f32.gmra.mxu0 %v15272_v23  ;;  %v4816_v40 = vsub.f32 %v12556_v49, %v14601_v62  ;;  %v15279_v62 = vand.u32 4294901760, %v15278_v39  ;;  %v15289_v49 = vld [vmem:[#allocation199_spill] sm:$0xff] }
 0x677   : > { %v4060_v2 = vsel %vm330_vm0, %v9368_v31, 0 }
 0x678   : > { %9369 = vtanh.f32 %v3679_v30  ;;  %v4817_v14 = vand.u32 4294901760, %v4816_v40  ;;  %v12572_v45 = vand.u32 4294901760, %v4060_v2  ;;  %v12574_v56 = vadd.f32 %v5172_v16, %v4684_v38 }
 0x67a   : > { %15274 = vst [vmem:[#allocation187_spill] sm:$0xff] %v12572_v45  ;;  %v5770_v20 = vpop.f32.mrf.mxu1  ;;  %4818 = vmatmul.f32.gmra.mxu2 %v4817_v14  ;;  %5243 = vmatmul.f32.gmra.mxu3 %v12572_v45  ;;  %v12578_v7 = vsub.f32 %v4060_v2, %v12572_v45 }
 0x67b   : > { %15275 = vst [vmem:[#allocation149_spill] sm:$0xff] %v12574_v56  ;;  %v5278_v23 = vpop.f32.mrf.mxu0  ;;  %v15283_v56 = vld [vmem:[#allocation22_spill] sm:$0xff] }
 0x67c   : > { %15276 = vst [vmem:[#allocation4_spill] sm:$0xff] %v12578_v7  ;;  %v5279_v34 = vadd.f32 %v5278_v23, %v15277_v10  ;;  %v14606_v31 = vand.u32 4294901760, %v12578_v7 }
 0x67d   : > { %5865 = vmatmul.f32.gmra.mxu1 %v15279_v62  ;;  %v4691_v30 = vpop.f32.mrf.mxu2  ;;  %v5180_v40 = vpop.f32.mrf.mxu3 }
 0x67e   : > { %v9370_v1 = vpop.eup %9369  ;;  %v4692_v16 = vadd.f32 %v12564_v58, %v4691_v30  ;;  %5357 = vmatmul.f32.gmra.mxu0 %v15278_v39  ;;  %v4824_v38 = vsub.f32 %v12578_v7, %v14606_v31  ;;  %v12589_v2 = vadd.f32 %v5770_v20, %v5279_v34  ;;  %v15284_v31 = vld [vmem:[#allocation198_spill] sm:$0xff] }
 0x67f   : > { %v4063_v14 = vsel %vm330_vm0, %v9370_v1, 0  ;;  %v15285_v20 = vand.u32 4294901760, %v15284_v31 }
 0x680   : > { %v4825_v23 = vand.u32 4294901760, %v4824_v38  ;;  %v12592_v10 = vand.u32 4294901760, %v4063_v14  ;;  %v12594_v62 = vadd.f32 %v5176_v41, %v4692_v16 }
 0x682   : > { %15280 = vst [vmem:[#allocation152_spill] sm:$0xff] %v12592_v10  ;;  %v5776_v45 = vpop.f32.mrf.mxu1  ;;  %4826 = vmatmul.f32.gmra.mxu2 %v4825_v23  ;;  %5247 = vmatmul.f32.gmra.mxu3 %v12592_v10  ;;  %v12598_v30 = vsub.f32 %v4063_v14, %v12592_v10 }
 0x683   : > { %15281 = vst [vmem:[#allocation13_spill] sm:$0xff] %v12594_v62  ;;  %v5283_v39 = vpop.f32.mrf.mxu0  ;;  %v15288_v62 = vld [vmem:[#allocation24_spill] sm:$0xff] }
 0x684   : > { %15282 = vst [vmem:[#allocation151_spill] sm:$0xff] %v12598_v30  ;;  %v5284_v25 = vadd.f32 %v5283_v39, %v15283_v56  ;;  %v14617_v1 = vand.u32 4294901760, %v12598_v30  ;;  %v15287_v39 = vld [vmem:[#allocation164_spill] sm:$0xff] }
 0x685   : > { %5871 = vmatmul.f32.gmra.mxu1 %v15285_v20  ;;  %v4699_v34 = vpop.f32.mrf.mxu2  ;;  %v5184_v38 = vpop.f32.mrf.mxu3 }
 0x686   : > { %v4700_v41 = vadd.f32 %v12564_v58, %v4699_v34  ;;  %5362 = vmatmul.f32.gmra.mxu0 %v15284_v31  ;;  %v4832_v16 = vsub.f32 %v12598_v30, %v14617_v1  ;;  %v12609_v14 = vadd.f32 %v5776_v45, %v5284_v25  ;;  %v15290_v34 = vand.u32 4294901760, %v15289_v49 }
 0x688   : > { %v4833_v23 = vand.u32 4294901760, %v4832_v16  ;;  %v12611_v10 = vadd.f32 %v5180_v40, %v4700_v41  ;;  %v15292_v41 = vld [vmem:[#allocation165_spill] sm:$0xff] }
 0x68a   : > { %15286 = vst [vmem:[#allocation11_spill] sm:$0xff] %v12611_v10  ;;  %v5782_v56 = vpop.f32.mrf.mxu1  ;;  %4834 = vmatmul.f32.gmra.mxu2 %v4833_v23  ;;  %6757 = vmatmul.f32.vlgmr.msra.gmra.mxu3 %v15287_v39 }
 0x68b   : > { %v5288_v20 = vpop.f32.mrf.mxu0 }
 0x68c   : > { %v5289_v7 = vadd.f32 %v5288_v20, %v15288_v62  ;;  %v15293_v62 = vld [vmem:[#allocation26_spill] sm:$0xff]  ;;  %v15294_v20 = vld [vmem:[#allocation200_spill] sm:$0xff] }
 0x68d   : > { %5877 = vmatmul.f32.gmra.mxu1 %v15290_v34  ;;  %v4707_v31 = vpop.f32.mrf.mxu2  ;;  %v5188_v63 = vpop.f32.mrf.mxu3  ;;  %v15295_v34 = vand.u32 4294901760, %v15294_v20 }
 0x68e   : > { %v4708_v18 = vadd.f32 %v12564_v58, %v4707_v31  ;;  %5367 = vmatmul.f32.gmra.mxu0 %v15289_v49  ;;  %v12619_v25 = vadd.f32 %v5782_v56, %v5289_v7 }
 0x690   : > { %v12621_v45 = vadd.f32 %v5184_v38, %v4708_v18  ;;  %v15297_v38 = vld [vmem:[#allocation167_spill] sm:$0xff] }
 0x692   : > { %15291 = vst [vmem:[#allocation189_spill] sm:$0xff] %v12621_v45  ;;  %v5788_v40 = vpop.f32.mrf.mxu1  ;;  %6360 = vmatmul.f32.vlgmr.msra.gmra.mxu2 %v15287_v39  ;;  %6761 = vmatmul.f32.gmra.mxu3 %v15292_v41  ;;  %v15298_v39 = vld [vmem:[#allocation28_spill] sm:$0xff] }
 0x693   : > { %v5293_v16 = vpop.f32.mrf.mxu0 }
 0x694   : > { %v5294_v23 = vadd.f32 %v5293_v16, %v15293_v62  ;;  %v15299_v62 = vld [vmem:[#allocation201_spill] sm:$0xff] }
 0x695   : > { %5883 = vmatmul.f32.gmra.mxu1 %v15295_v34  ;;  %v4715_v1 = vpop.f32.mrf.mxu2  ;;  %v5192_v10 = vpop.f32.mrf.mxu3  ;;  %v15300_v34 = vand.u32 4294901760, %v15299_v62 }
 0x696   : > { %v4716_v31 = vadd.f32 %v12564_v58, %v4715_v1  ;;  %5372 = vmatmul.f32.gmra.mxu0 %v15294_v20  ;;  %v12630_v49 = vadd.f32 %v5788_v40, %v5294_v23 }
 0x698   : > { %v12632_v18 = vadd.f32 %v5188_v63, %v4716_v31  ;;  %v15303_v31 = vld [vmem:[#allocation30_spill] sm:$0xff] }
 0x69a   : > { %15296 = vst [vmem:[#allocation15_spill] sm:$0xff] %v12632_v18  ;;  %v5794_v7 = vpop.f32.mrf.mxu1  ;;  %6364 = vmatmul.f32.gmra.mxu2 %v15292_v41  ;;  %6765 = vmatmul.f32.gmra.mxu3 %v15297_v38  ;;  %v15302_v41 = vld [vmem:[#allocation168_spill] sm:$0xff] }
 0x69b   : > { %v5298_v56 = vpop.f32.mrf.mxu0 }
 0x69c   : > { %v5299_v16 = vadd.f32 %v5298_v56, %v15298_v39  ;;  %v15304_v39 = vld [vmem:[#allocation202_spill] sm:$0xff] }
 0x69d   : > { %5889 = vmatmul.f32.gmra.mxu1 %v15300_v34  ;;  %v4723_v45 = vpop.f32.mrf.mxu2  ;;  %v5196_v30 = vpop.f32.mrf.mxu3  ;;  %v15305_v34 = vand.u32 4294901760, %v15304_v39 }
 0x69e   : > { %v4724_v1 = vadd.f32 %v12564_v58, %v4723_v45  ;;  %5377 = vmatmul.f32.gmra.mxu0 %v15299_v62  ;;  %v12641_v40 = vadd.f32 %v5794_v7, %v5299_v16 }
 0x6a0   : > { %v12643_v63 = vadd.f32 %v5192_v10, %v4724_v1  ;;  %v15308_v1 = vld [vmem:[#allocation32_spill] sm:$0xff] }
 0x6a2   : > { %15301 = vst [vmem:[#allocation154_spill] sm:$0xff] %v12643_v63  ;;  %v5800_v23 = vpop.f32.mrf.mxu1  ;;  %6368 = vmatmul.f32.gmra.mxu2 %v15297_v38  ;;  %6769 = vmatmul.f32.gmra.mxu3 %v15302_v41  ;;  %v15307_v38 = vld [vmem:[#allocation170_spill] sm:$0xff] }
 0x6a3   : > { %v5303_v20 = vpop.f32.mrf.mxu0 }
 0x6a4   : > { %v5304_v56 = vadd.f32 %v5303_v20, %v15303_v31  ;;  %v15309_v31 = vld [vmem:[#allocation203_spill] sm:$0xff] }
 0x6a5   : > { %5895 = vmatmul.f32.gmra.mxu1 %v15305_v34  ;;  %v4731_v18 = vpop.f32.mrf.mxu2  ;;  %v5200_v57 = vpop.f32.mrf.mxu3  ;;  %v15310_v34 = vand.u32 4294901760, %v15309_v31 }
 0x6a6   : > { %v4732_v45 = vadd.f32 %v12564_v58, %v4731_v18  ;;  %5382 = vmatmul.f32.gmra.mxu0 %v15304_v39  ;;  %v12652_v7 = vadd.f32 %v5800_v23, %v5304_v56 }
 0x6a8   : > { %v12654_v10 = vadd.f32 %v5196_v30, %v4732_v45  ;;  %v15313_v45 = vld [vmem:[#allocation34_spill] sm:$0xff] }
 0x6aa   : > { %15306 = vst [vmem:[#allocation8_spill] sm:$0xff] %v12654_v10  ;;  %v5806_v16 = vpop.f32.mrf.mxu1  ;;  %6372 = vmatmul.f32.gmra.mxu2 %v15302_v41  ;;  %6773 = vmatmul.f32.gmra.mxu3 %v15307_v38  ;;  %v15312_v41 = vld [vmem:[#allocation174_spill] sm:$0xff] }
 0x6ab   : > { %v5308_v62 = vpop.f32.mrf.mxu0 }
 0x6ac   : > { %v5309_v20 = vadd.f32 %v5308_v62, %v15308_v1  ;;  %v15314_v1 = vld [vmem:[#allocation204_spill] sm:$0xff] }
 0x6ad   : > { %5901 = vmatmul.f32.gmra.mxu1 %v15310_v34  ;;  %v4739_v63 = vpop.f32.mrf.mxu2  ;;  %v5204_v12 = vpop.f32.mrf.mxu3  ;;  %v15315_v34 = vand.u32 4294901760, %v15314_v1 }
 0x6ae   : > { %v4740_v18 = vadd.f32 %v12564_v58, %v4739_v63  ;;  %5387 = vmatmul.f32.gmra.mxu0 %v15309_v31  ;;  %v12663_v23 = vadd.f32 %v5806_v16, %v5309_v20 }
 0x6b0   : > { %v12665_v30 = vadd.f32 %v5200_v57, %v4740_v18  ;;  %v15318_v18 = vld [vmem:[#allocation36_spill] sm:$0xff] }
 0x6b2   : > { %15311 = vst [vmem:[#allocation153_spill] sm:$0xff] %v12665_v30  ;;  %v5812_v56 = vpop.f32.mrf.mxu1  ;;  %6376 = vmatmul.f32.gmra.mxu2 %v15307_v38  ;;  %6777 = vmatmul.f32.gmra.mxu3 %v15312_v41  ;;  %v15317_v38 = vld [vmem:[#allocation178_spill] sm:$0xff] }
 0x6b3   : > { %v5313_v39 = vpop.f32.mrf.mxu0 }
 0x6b4   : > { %v5314_v62 = vadd.f32 %v5313_v39, %v15313_v45  ;;  %v15319_v45 = vld [vmem:[#allocation205_spill] sm:$0xff] }
 0x6b5   : > { %5907 = vmatmul.f32.gmra.mxu1 %v15315_v34  ;;  %v4747_v10 = vpop.f32.mrf.mxu2  ;;  %v5208_v32 = vpop.f32.mrf.mxu3  ;;  %v15320_v34 = vand.u32 4294901760, %v15319_v45 }
 0x6b6   : > { %v4748_v63 = vadd.f32 %v12564_v58, %v4747_v10  ;;  %5392 = vmatmul.f32.gmra.mxu0 %v15314_v1  ;;  %v12674_v16 = vadd.f32 %v5812_v56, %v5314_v62 }
 0x6b8   : > { %v12676_v57 = vadd.f32 %v5204_v12, %v4748_v63  ;;  %v15323_v63 = vld [vmem:[#allocation38_spill] sm:$0xff] }
 0x6ba   : > { %15316 = vst [vmem:[#allocation191_spill] sm:$0xff] %v12676_v57  ;;  %v5818_v20 = vpop.f32.mrf.mxu1  ;;  %6380 = vmatmul.f32.gmra.mxu2 %v15312_v41  ;;  %6781 = vmatmul.f32.gmra.mxu3 %v15317_v38  ;;  %v15322_v41 = vld [vmem:[#allocation182_spill] sm:$0xff] }
 0x6bb   : > { %v5318_v31 = vpop.f32.mrf.mxu0 }
 0x6bc   : > { %v5319_v39 = vadd.f32 %v5318_v31, %v15318_v18  ;;  %v15324_v18 = vld [vmem:[#allocation206_spill] sm:$0xff] }
 0x6bd   : > { %5913 = vmatmul.f32.gmra.mxu1 %v15320_v34  ;;  %v4755_v30 = vpop.f32.mrf.mxu2  ;;  %v5212_v54 = vpop.f32.mrf.mxu3  ;;  %v15325_v34 = vand.u32 4294901760, %v15324_v18 }
 0x6be   : > { %v4756_v10 = vadd.f32 %v12564_v58, %v4755_v30  ;;  %5397 = vmatmul.f32.gmra.mxu0 %v15319_v45  ;;  %v12685_v56 = vadd.f32 %v5818_v20, %v5319_v39 }
 0x6c0   : > { %v12687_v12 = vadd.f32 %v5208_v32, %v4756_v10  ;;  %v15328_v10 = vld [vmem:[#allocation40_spill] sm:$0xff] }
 0x6c2   : > { %15321 = vst [vmem:[#allocation157_spill] sm:$0xff] %v12687_v12  ;;  %v5824_v62 = vpop.f32.mrf.mxu1  ;;  %6384 = vmatmul.f32.gmra.mxu2 %v15317_v38  ;;  %6785 = vmatmul.f32.gmra.mxu3 %v15322_v41  ;;  %v15327_v38 = vld [vmem:[#allocation2_spill] sm:$0xff] }
 0x6c3   : > { %v5323_v1 = vpop.f32.mrf.mxu0 }
 0x6c4   : > { %v5324_v31 = vadd.f32 %v5323_v1, %v15323_v63  ;;  %v15329_v63 = vld [vmem:[#allocation207_spill] sm:$0xff] }
 0x6c5   : > { %5919 = vmatmul.f32.gmra.mxu1 %v15325_v34  ;;  %v4763_v57 = vpop.f32.mrf.mxu2  ;;  %v5216_v9 = vpop.f32.mrf.mxu3  ;;  %v15330_v34 = vand.u32 4294901760, %v15329_v63 }
 0x6c6   : > { %v4764_v30 = vadd.f32 %v12564_v58, %v4763_v57  ;;  %5402 = vmatmul.f32.gmra.mxu0 %v15324_v18  ;;  %v12696_v20 = vadd.f32 %v5824_v62, %v5324_v31 }
 0x6c8   : > { %v12698_v32 = vadd.f32 %v5212_v54, %v4764_v30  ;;  %v15333_v30 = vld [vmem:[#allocation42_spill] sm:$0xff] }
 0x6ca   : > { %15326 = vst [vmem:[#allocation12_spill] sm:$0xff] %v12698_v32  ;;  %v5830_v39 = vpop.f32.mrf.mxu1  ;;  %6388 = vmatmul.f32.gmra.mxu2 %v15322_v41  ;;  %6789 = vmatmul.f32.gmra.mxu3 %v15327_v38  ;;  %v15332_v41 = vld [vmem:[#allocation7_spill] sm:$0xff] }
 0x6cb   : > { %v5328_v45 = vpop.f32.mrf.mxu0 }
 0x6cc   : > { %v5329_v1 = vadd.f32 %v5328_v45, %v15328_v10  ;;  %v15334_v10 = vld [vmem:[#allocation208_spill] sm:$0xff] }
 0x6cd   : > { %5925 = vmatmul.f32.gmra.mxu1 %v15330_v34  ;;  %v4771_v12 = vpop.f32.mrf.mxu2  ;;  %v5220_v50 = vpop.f32.mrf.mxu3  ;;  %v15335_v34 = vand.u32 4294901760, %v15334_v10 }
 0x6ce   : > { %v4772_v57 = vadd.f32 %v12564_v58, %v4771_v12  ;;  %5407 = vmatmul.f32.gmra.mxu0 %v15329_v63  ;;  %v12707_v62 = vadd.f32 %v5830_v39, %v5329_v1 }
 0x6d0   : > { %v12709_v54 = vadd.f32 %v5216_v9, %v4772_v57  ;;  %v15338_v57 = vld [vmem:[#allocation44_spill] sm:$0xff] }
 0x6d2   : > { %15331 = vst [vmem:[#allocation156_spill] sm:$0xff] %v12709_v54  ;;  %v5836_v31 = vpop.f32.mrf.mxu1  ;;  %6392 = vmatmul.f32.gmra.mxu2 %v15327_v38  ;;  %6793 = vmatmul.f32.gmra.mxu3 %v15332_v41  ;;  %v15337_v38 = vld [vmem:[#allocation9_spill] sm:$0xff] }
 0x6d3   : > { %v5333_v18 = vpop.f32.mrf.mxu0 }
 0x6d4   : > { %v5334_v45 = vadd.f32 %v5333_v18, %v15333_v30  ;;  %v15339_v30 = vld [vmem:[#allocation209_spill] sm:$0xff] }
 0x6d5   : > { %5931 = vmatmul.f32.gmra.mxu1 %v15335_v34  ;;  %v4779_v32 = vpop.f32.mrf.mxu2  ;;  %v5224_v15 = vpop.f32.mrf.mxu3  ;;  %v15340_v34 = vand.u32 4294901760, %v15339_v30 }
 0x6d6   : > { %v4780_v12 = vadd.f32 %v12564_v58, %v4779_v32  ;;  %5412 = vmatmul.f32.gmra.mxu0 %v15334_v10  ;;  %v12718_v39 = vadd.f32 %v5836_v31, %v5334_v45 }
 0x6d8   : > { %v12720_v9 = vadd.f32 %v5220_v50, %v4780_v12  ;;  %v15343_v12 = vld [vmem:[#allocation46_spill] sm:$0xff] }
 0x6da   : > { %15336 = vst [vmem:[#allocation192_spill] sm:$0xff] %v12720_v9  ;;  %v5842_v1 = vpop.f32.mrf.mxu1  ;;  %6396 = vmatmul.f32.gmra.mxu2 %v15332_v41  ;;  %6797 = vmatmul.f32.gmra.mxu3 %v15337_v38  ;;  %v15342_v41 = vld [vmem:[#allocation6_spill] sm:$0xff] }
 0x6db   : > { %v5338_v63 = vpop.f32.mrf.mxu0 }
 0x6dc   : > { %v5339_v18 = vadd.f32 %v5338_v63, %v15338_v57  ;;  %v15344_v57 = vld [vmem:[#allocation210_spill] sm:$0xff] }
 0x6dd   : > { %5937 = vmatmul.f32.gmra.mxu1 %v15340_v34  ;;  %v4787_v54 = vpop.f32.mrf.mxu2  ;;  %v5228_v0 = vpop.f32.mrf.mxu3  ;;  %v15345_v34 = vand.u32 4294901760, %v15344_v57 }
 0x6de   : > { %v4788_v32 = vadd.f32 %v12564_v58, %v4787_v54  ;;  %5417 = vmatmul.f32.gmra.mxu0 %v15339_v30  ;;  %v12729_v31 = vadd.f32 %v5842_v1, %v5339_v18 }
 0x6e0   : > { %v12731_v50 = vadd.f32 %v5224_v15, %v4788_v32  ;;  %v15348_v32 = vld [vmem:[#allocation48_spill] sm:$0xff] }
 0x6e2   : > { %15341 = vst [vmem:[#allocation193_spill] sm:$0xff] %v12731_v50  ;;  %v5848_v45 = vpop.f32.mrf.mxu1  ;;  %6400 = vmatmul.f32.gmra.mxu2 %v15337_v38  ;;  %6801 = vmatmul.f32.gmra.mxu3 %v15342_v41  ;;  %v15347_v38 = vld [vmem:[#allocation190_spill] sm:$0xff] }
 0x6e3   : > { %v5343_v10 = vpop.f32.mrf.mxu0 }
 0x6e4   : > { %v5344_v63 = vadd.f32 %v5343_v10, %v15343_v12  ;;  %v15349_v12 = vld [vmem:[#allocation211_spill] sm:$0xff] }
 0x6e5   : > { %5943 = vmatmul.f32.gmra.mxu1 %v15345_v34  ;;  %v4795_v9 = vpop.f32.mrf.mxu2  ;;  %v5232_v29 = vpop.f32.mrf.mxu3  ;;  %v15350_v34 = vand.u32 4294901760, %v15349_v12 }
 0x6e6   : > { %v4796_v54 = vadd.f32 %v12564_v58, %v4795_v9  ;;  %5422 = vmatmul.f32.gmra.mxu0 %v15344_v57  ;;  %v12740_v1 = vadd.f32 %v5848_v45, %v5344_v63 }
 0x6e8   : > { %v12742_v15 = vadd.f32 %v5228_v0, %v4796_v54  ;;  %v15353_v54 = vld [vmem:[#allocation50_spill] sm:$0xff] }
 0x6ea   : > { %15346 = vst [vmem:[#allocation196_spill] sm:$0xff] %v12742_v15  ;;  %v5854_v18 = vpop.f32.mrf.mxu1  ;;  %6404 = vmatmul.f32.gmra.mxu2 %v15342_v41  ;;  %6805 = vmatmul.f32.gmra.mxu3 %v15347_v38  ;;  %v15352_v41 = vld [vmem:[#allocation10_spill] sm:$0xff] }
 0x6eb   : > { %v5348_v30 = vpop.f32.mrf.mxu0 }
 0x6ec   : > { %v5349_v10 = vadd.f32 %v5348_v30, %v15348_v32  ;;  %v15354_v32 = vld [vmem:[#allocation212_spill] sm:$0xff] }
 0x6ed   : > { %5949 = vmatmul.f32.gmra.mxu1 %v15350_v34  ;;  %v4803_v50 = vpop.f32.mrf.mxu2  ;;  %v5236_v26 = vpop.f32.mrf.mxu3  ;;  %v15355_v34 = vand.u32 4294901760, %v15354_v32 }
 0x6ee   : > { %v4804_v9 = vadd.f32 %v12564_v58, %v4803_v50  ;;  %5427 = vmatmul.f32.gmra.mxu0 %v15349_v12  ;;  %v12751_v45 = vadd.f32 %v5854_v18, %v5349_v10 }
 0x6f0   : > { %v12753_v0 = vadd.f32 %v5232_v29, %v4804_v9  ;;  %v15358_v9 = vld [vmem:[#allocation52_spill] sm:$0xff] }
 0x6f2   : > { %15351 = vst [vmem:[#allocation161_spill] sm:$0xff] %v12753_v0  ;;  %v5860_v63 = vpop.f32.mrf.mxu1  ;;  %6408 = vmatmul.f32.gmra.mxu2 %v15347_v38  ;;  %6809 = vmatmul.f32.gmra.mxu3 %v15352_v41  ;;  %v15357_v38 = vld [vmem:[#allocation17_spill] sm:$0xff] }
 0x6f3   : > { %v5353_v57 = vpop.f32.mrf.mxu0 }
 0x6f4   : > { %v5354_v30 = vadd.f32 %v5353_v57, %v15353_v54  ;;  %v15359_v54 = vld [vmem:[#allocation213_spill] sm:$0xff] }
 0x6f5   : > { %5955 = vmatmul.f32.gmra.mxu1 %v15355_v34  ;;  %v4811_v15 = vpop.f32.mrf.mxu2  ;;  %v5240_v22 = vpop.f32.mrf.mxu3  ;;  %v15360_v34 = vand.u32 4294901760, %v15359_v54 }
 0x6f6   : > { %v4812_v50 = vadd.f32 %v12564_v58, %v4811_v15  ;;  %5432 = vmatmul.f32.gmra.mxu0 %v15354_v32  ;;  %v12762_v18 = vadd.f32 %v5860_v63, %v5354_v30 }
 0x6f8   : > { %v12764_v29 = vadd.f32 %v5236_v26, %v4812_v50  ;;  %v15363_v50 = vld [vmem:[#allocation54_spill] sm:$0xff] }
 0x6fa   : > { %15356 = vst [vmem:[#allocation195_spill] sm:$0xff] %v12764_v29  ;;  %v5866_v10 = vpop.f32.mrf.mxu1  ;;  %6412 = vmatmul.f32.gmra.mxu2 %v15352_v41  ;;  %6813 = vmatmul.f32.gmra.mxu3 %v15357_v38  ;;  %v15362_v41 = vld [vmem:[#allocation19_spill] sm:$0xff] }
 0x6fb   : > { %v5358_v12 = vpop.f32.mrf.mxu0 }
 0x6fc   : > { %v5359_v57 = vadd.f32 %v5358_v12, %v15358_v9  ;;  %v15364_v9 = vld [vmem:[#allocation214_spill] sm:$0xff] }
 0x6fd   : > { %5961 = vmatmul.f32.gmra.mxu1 %v15360_v34  ;;  %v4819_v0 = vpop.f32.mrf.mxu2  ;;  %v5244_v48 = vpop.f32.mrf.mxu3  ;;  %v15365_v34 = vand.u32 4294901760, %v15364_v9 }
 0x6fe   : > { %v4820_v15 = vadd.f32 %v12564_v58, %v4819_v0  ;;  %5437 = vmatmul.f32.gmra.mxu0 %v15359_v54  ;;  %v12773_v63 = vadd.f32 %v5866_v10, %v5359_v57 }
 0x700   : > { %v12775_v26 = vadd.f32 %v5240_v22, %v4820_v15  ;;  %v15368_v15 = vld [vmem:[#allocation56_spill] sm:$0xff] }
 0x702   : > { %15361 = vst [vmem:[#allocation160_spill] sm:$0xff] %v12775_v26  ;;  %v5872_v30 = vpop.f32.mrf.mxu1  ;;  %6416 = vmatmul.f32.gmra.mxu2 %v15357_v38  ;;  %6817 = vmatmul.f32.gmra.mxu3 %v15362_v41  ;;  %v15367_v38 = vld [vmem:[#allocation16_spill] sm:$0xff] }
 0x703   : > { %v5363_v32 = vpop.f32.mrf.mxu0 }
 0x704   : > { %v5364_v12 = vadd.f32 %v5363_v32, %v15363_v50  ;;  %v15369_v50 = vld [vmem:[#allocation215_spill] sm:$0xff] }
 0x705   : > { %5967 = vmatmul.f32.gmra.mxu1 %v15365_v34  ;;  %v4827_v29 = vpop.f32.mrf.mxu2  ;;  %v5248_v47 = vpop.f32.mrf.mxu3  ;;  %v15370_v34 = vand.u32 4294901760, %v15369_v50 }
 0x706   : > { %v4828_v0 = vadd.f32 %v12564_v58, %v4827_v29  ;;  %5442 = vmatmul.f32.gmra.mxu0 %v15364_v9  ;;  %v12784_v10 = vadd.f32 %v5872_v30, %v5364_v12 }
 0x708   : > { %v12786_v22 = vadd.f32 %v5244_v48, %v4828_v0  ;;  %v15373_v0 = vld [vmem:[#allocation58_spill] sm:$0xff] }
 0x70a   : > { %15366 = vst [vmem:[#allocation194_spill] sm:$0xff] %v12786_v22  ;;  %v5878_v57 = vpop.f32.mrf.mxu1  ;;  %6420 = vmatmul.f32.gmra.mxu2 %v15362_v41  ;;  %6821 = vmatmul.f32.gmra.mxu3 %v15367_v38  ;;  %v15372_v41 = vld [vmem:[#allocation18_spill] sm:$0xff] }
 0x70b   : > { %v5368_v54 = vpop.f32.mrf.mxu0 }
 0x70c   : > { %v5369_v32 = vadd.f32 %v5368_v54, %v15368_v15  ;;  %v15374_v15 = vld [vmem:[#allocation216_spill] sm:$0xff] }
 0x70d   : > { %5973 = vmatmul.f32.gmra.mxu1 %v15370_v34  ;;  %v4835_v26 = vpop.f32.mrf.mxu2  ;;  %v6758_v8 = vpop.f32.mrf.mxu3  ;;  %v15375_v34 = vand.u32 4294901760, %v15374_v15 }
 0x70e   : > { %v4836_v29 = vadd.f32 %v12564_v58, %v4835_v26  ;;  %5447 = vmatmul.f32.gmra.mxu0 %v15369_v50  ;;  %v12795_v30 = vadd.f32 %v5878_v57, %v5369_v32 }
 0x710   : > { %v12797_v48 = vadd.f32 %v5248_v47, %v4836_v29  ;;  %v15377_v29 = vld [vmem:[#allocation60_spill] sm:$0xff] }
 0x712   : > { %15371 = vst [vmem:[#allocation23_spill] sm:$0xff] %v12797_v48  ;;  %v5884_v12 = vpop.f32.mrf.mxu1  ;;  %6424 = vmatmul.f32.gmra.mxu2 %v15367_v38  ;;  %6825 = vmatmul.f32.gmra.mxu3 %v15372_v41  ;;  %v15376_v38 = vld [vmem:[#allocation25_spill] sm:$0xff] }
 0x713   : > { %v5373_v9 = vpop.f32.mrf.mxu0 }
 0x714   : > { %v5374_v54 = vadd.f32 %v5373_v9, %v15373_v0  ;;  %v15378_v0 = vld [vmem:[#allocation217_spill] sm:$0xff] }
 0x715   : > { %5979 = vmatmul.f32.gmra.mxu1 %v15375_v34  ;;  %v6361_v22 = vpop.f32.mrf.mxu2  ;;  %v6762_v19 = vpop.f32.mrf.mxu3  ;;  %v15379_v34 = vand.u32 4294901760, %v15378_v0 }
 0x716   : > { %v6362_v58 = vadd.f32 %v6361_v22, %v12589_v2  ;;  %5452 = vmatmul.f32.gmra.mxu0 %v15374_v15  ;;  %v12806_v26 = vadd.f32 %v5884_v12, %v5374_v54 }
 0x718   : > { %v6759_v47 = vadd.f32 %v6758_v8, %v6362_v58  ;;  %v15380_v58 = vld [vmem:[#allocation27_spill] sm:$0xff] }
 0x71a   : > { %v5890_v57 = vpop.f32.mrf.mxu1  ;;  %v9077_v32 = vmul.f32 -1.442695, %v6759_v47  ;;  %6428 = vmatmul.f32.gmra.mxu2 %v15372_v41  ;;  %6829 = vmatmul.f32.gmra.mxu3 %v15376_v38 }
 0x71b   : > { %v5378_v50 = vpop.f32.mrf.mxu0 }
 0x71c   : > { %9371 = vpow2.f32 %v9077_v32  ;;  %v5379_v9 = vadd.f32 %v5378_v50, %v15377_v29  ;;  %v15381_v50 = vld [vmem:[#allocation62_spill] sm:$0xff] }
 0x71d   : > { %5985 = vmatmul.f32.gmra.mxu1 %v15379_v34  ;;  %v6365_v48 = vpop.f32.mrf.mxu2  ;;  %v6766_v2 = vpop.f32.mrf.mxu3  ;;  %v15382_v34 = vld [vmem:[#allocation218_spill] sm:$0xff] }
 0x71e   : > { %v6366_v22 = vadd.f32 %v6365_v48, %v12609_v14  ;;  %5457 = vmatmul.f32.gmra.mxu0 %v15378_v0  ;;  %v12815_v8 = vadd.f32 %v5890_v57, %v5379_v9  ;;  %v15383_v60 = vand.u32 4294901760, %v15382_v34 }
 0x720   : > { %v6763_v12 = vadd.f32 %v6762_v19, %v6366_v22 }
 0x722   : > { %v5896_v54 = vpop.f32.mrf.mxu1  ;;  %v9372_v41 = vpop.eup %9371  ;;  %v9078_v15 = vmul.f32 -1.442695, %v6763_v12  ;;  %6432 = vmatmul.f32.gmra.mxu2 %v15376_v38  ;;  %6833 = vmatmul.f32.gmra.mxu3 %v15380_v58  ;;  %v15384_v12 = vld [vmem:[#allocation29_spill] sm:$0xff] }
 0x723   : > { %v7415_v47 = vadd.f32 1.0, %v9372_v41  ;;  %v5383_v32 = vpop.f32.mrf.mxu0 }
 0x724   : > { %9373 = vpow2.f32 %v9078_v15  ;;  %v5384_v29 = vadd.f32 %v5383_v32, %v15381_v50  ;;  %v15385_v50 = vld [vmem:[#allocation64_spill] sm:$0xff] }
 0x725   : > { %5991 = vmatmul.f32.gmra.mxu1 %v15383_v60  ;;  %9375 = vrcp.f32 %v7415_v47  ;;  %v6369_v14 = vpop.f32.mrf.mxu2  ;;  %v6770_v48 = vpop.f32.mrf.mxu3  ;;  %vm7514_vm2 = vweird.f32 %v7415_v47 }
 0x726   : > { %v6370_v19 = vadd.f32 %v6369_v14, %v12619_v25  ;;  %5462 = vmatmul.f32.gmra.mxu0 %v15382_v34  ;;  %v12824_v57 = vadd.f32 %v5896_v54, %v5384_v29  ;;  %v15386_v14 = vld [vmem:[#allocation219_spill] sm:$0xff] }
 0x727   : > { %v15387_v34 = vand.u32 4294901760, %v15386_v14 }
 0x728   : > { %v6767_v38 = vadd.f32 %v6766_v2, %v6370_v19 }
 0x72a   : > { %v5902_v9 = vpop.f32.mrf.mxu1  ;;  %v9374_v0 = vpop.eup %9373  ;;  %v9079_v22 = vmul.f32 -1.442695, %v6767_v38  ;;  %6436 = vmatmul.f32.gmra.mxu2 %v15380_v58  ;;  %6837 = vmatmul.f32.gmra.mxu3 %v15384_v12  ;;  %v7520_v38 = vand.u32 2147483648, %v7415_v47 }
 0x72b   : > { %v9376_v41 = vpop.eup %9375  ;;  %v12828_v15 = vadd.f32 1.0, %v9374_v0  ;;  %v5388_v60 = vpop.f32.mrf.mxu0 }
 0x72c   : > { %v7510_v32 = vmul.f32 %v9376_v41, %v7415_v47  ;;  %9377 = vpow2.f32 %v9079_v22  ;;  %v5389_v25 = vadd.f32 %v5388_v60, %v15385_v50  ;;  %vm7515_vm1 = vweird.f32 %v9376_v41 }
 0x72d   : > { %5997 = vmatmul.f32.gmra.mxu1 %v15387_v34  ;;  %9379 = vrcp.f32 %v12828_v15  ;;  %v6373_v2 = vpop.f32.mrf.mxu2  ;;  %v6774_v54 = vpop.f32.mrf.mxu3  ;;  %v7518_v22 = vand.u32 2147483647, %v7415_v47  ;;  %vm7516_vm3 = vmor %vm7514_vm2, %vm7515_vm1  ;;  %vm7529_vm7 = vweird.f32 %v12828_v15 }
 0x72e   : > { %v7511_v29 = vsub.f32 1.0, %v7510_v32  ;;  %v6374_v58 = vadd.f32 %v6373_v2, %v12630_v49  ;;  %5467 = vmatmul.f32.gmra.mxu0 %v15386_v14  ;;  %v12836_v19 = vadd.f32 %v5902_v9, %v5389_v25  ;;  %v15388_v32 = vld [vmem:[#allocation31_spill] sm:$0xff]  ;;  %v7521_v9 = vor.u32 1.1754944e-38, %v7520_v38  ;;  %v15389_v14 = vld [vmem:[#allocation220_spill] sm:$0xff] }
 0x72f   : > { %vm7519_vm5 = vcmp.eq.f32.partialorder %v7518_v22, 8.507059e+37  ;;  %v15390_v2 = vand.u32 4294901760, %v15389_v14 }
 0x730   : > { %v7512_v0 = vmul.f32 %v9376_v41, %v7511_v29  ;;  %v6771_v60 = vadd.f32 %v6770_v48, %v6374_v58 }
 0x732   : > { %v5908_v50 = vpop.f32.mrf.mxu1  ;;  %v9378_v35 = vpop.eup %9377  ;;  %v7513_v34 = vadd.f32 %v9376_v41, %v7512_v0  ;;  %v9080_v17 = vmul.f32 -1.442695, %v6771_v60  ;;  %6440 = vmatmul.f32.gmra.mxu2 %v15384_v12  ;;  %6841 = vmatmul.f32.gmra.mxu3 %v15388_v32  ;;  %v15391_v60 = vld [vmem:[#allocation66_spill] sm:$0xff] }
 0x733   : > { %v9380_v49 = vpop.eup %9379  ;;  %v12847_v48 = vadd.f32 1.0, %v9378_v35  ;;  %v5393_v25 = vpop.f32.mrf.mxu0 }
 0x734   : > { %v7517_v47 = vsel %vm7516_vm3, %v9376_v41, %v7513_v34  ;;  %v7525_v12 = vmul.f32 %v9380_v49, %v12828_v15  ;;  %9381 = vpow2.f32 %v9080_v17  ;;  %v5394_v35 = vadd.f32 %v5393_v25, %v15391_v60 }
 0x735   : > { %6003 = vmatmul.f32.gmra.mxu1 %v15390_v2  ;;  %v7522_v29 = vsel %vm7519_vm5, %v7521_v9, %v7517_v47  ;;  %9383 = vrcp.f32 %v12847_v48  ;;  %v6377_v58 = vpop.f32.mrf.mxu2  ;;  %v6778_v0 = vpop.f32.mrf.mxu3  ;;  %v7533_v41 = vand.u32 2147483647, %v12828_v15  ;;  %v7535_v17 = vand.u32 2147483648, %v12828_v15 }
 0x736   : > { %8920 = vst.msk [vmem:[%s12845_s14] sm:$0xff] %vm8919_vm4, %v7522_v29  ;;  %v7526_v38 = vsub.f32 1.0, %v7525_v12  ;;  %v6378_v28 = vadd.f32 %v6377_v58, %v12641_v40  ;;  %5472 = vmatmul.f32.gmra.mxu0 %v15389_v14  ;;  %vm7530_vm6 = vweird.f32 %v9380_v49  ;;  %v12860_v9 = vadd.f32 %v5908_v50, %v5394_v35  ;;  %v15392_v40 = vld [vmem:[#allocation33_spill] sm:$0xff] }
 0x737   : > { %vm7531_vm8 = vmor %vm7529_vm7, %vm7530_vm6  ;;  %v7536_v14 = vor.u32 1.1754944e-38, %v7535_v17  ;;  %vm7534_vm9 = vcmp.eq.f32.partialorder %v7533_v41, 8.507059e+37  ;;  %v15393_v50 = vld [vmem:[#allocation221_spill] sm:$0xff]  ;;  %v15395_v17 = vld [vmem:[#allocation68_spill] sm:$0xff]  ;;  %vm7544_vm11 = vweird.f32 %v12847_v48 }
 0x738   : > { %v7527_v22 = vmul.f32 %v9380_v49, %v7526_v38  ;;  %v6775_v34 = vadd.f32 %v6774_v54, %v6378_v28  ;;  %v15394_v38 = vand.u32 4294901760, %v15393_v50 }
 0x73a   : > { %v5914_v47 = vpop.f32.mrf.mxu1  ;;  %v9382_v2 = vpop.eup %9381  ;;  %v7528_v33 = vadd.f32 %v9380_v49, %v7527_v22  ;;  %v9081_v12 = vmul.f32 -1.442695, %v6775_v34  ;;  %6444 = vmatmul.f32.gmra.mxu2 %v15388_v32  ;;  %6845 = vmatmul.f32.gmra.mxu3 %v15392_v40 }
 0x73b   : > { %v9384_v25 = vpop.eup %9383  ;;  %v12865_v29 = vadd.f32 1.0, %v9382_v2  ;;  %v5398_v58 = vpop.f32.mrf.mxu0 }
 0x73c   : > { %v7532_v28 = vsel %vm7531_vm8, %v9380_v49, %v7528_v33  ;;  %v7540_v54 = vmul.f32 %v9384_v25, %v12847_v48  ;;  %9385 = vpow2.f32 %v9081_v12  ;;  %v5399_v22 = vadd.f32 %v5398_v58, %v15395_v17 }
 0x73d   : > { %6009 = vmatmul.f32.gmra.mxu1 %v15394_v38  ;;  %v7537_v15 = vsel %vm7534_vm9, %v7536_v14, %v7532_v28  ;;  %9387 = vrcp.f32 %v12865_v29  ;;  %v6381_v32 = vpop.f32.mrf.mxu2  ;;  %v6782_v60 = vpop.f32.mrf.mxu3  ;;  %v7548_v33 = vand.u32 2147483647, %v12847_v48  ;;  %v7550_v49 = vand.u32 2147483648, %v12847_v48 }
 0x73e   : > { %8921 = vst.msk [vmem:[%s12845_s14 + $0x8] sm:$0xff] %vm8919_vm4, %v7537_v15  ;;  %v7541_v35 = vsub.f32 1.0, %v7540_v54  ;;  %v6382_v34 = vadd.f32 %v6381_v32, %v12652_v7  ;;  %5477 = vmatmul.f32.gmra.mxu0 %v15393_v50  ;;  %vm7545_vm10 = vweird.f32 %v9384_v25  ;;  %v12878_v12 = vadd.f32 %v5914_v47, %v5399_v22  ;;  %v15396_v7 = vld [vmem:[#allocation35_spill] sm:$0xff] }
 0x73f   : > { %vm7546_vm12 = vmor %vm7544_vm11, %vm7545_vm10  ;;  %v7551_v50 = vor.u32 1.1754944e-38, %v7550_v49  ;;  %vm7549_vm13 = vcmp.eq.f32.partialorder %v7548_v33, 8.507059e+37  ;;  %v15399_v49 = vld [vmem:[#allocation70_spill] sm:$0xff]  ;;  %v7565_v33 = vand.u32 2147483648, %v12865_v29  ;;  %vm7559_vm15 = vweird.f32 %v12865_v29 }
 0x740   : > { %v7542_v41 = vmul.f32 %v9384_v25, %v7541_v35  ;;  %v6779_v2 = vadd.f32 %v6778_v0, %v6382_v34  ;;  %v15397_v35 = vld [vmem:[#allocation222_spill] sm:$0xff] }
 0x741   : > { %v15398_v17 = vand.u32 4294901760, %v15397_v35 }
 0x742   : > { %v5920_v14 = vpop.f32.mrf.mxu1  ;;  %v9386_v28 = vpop.eup %9385  ;;  %v7543_v38 = vadd.f32 %v9384_v25, %v7542_v41  ;;  %v9082_v54 = vmul.f32 -1.442695, %v6779_v2  ;;  %6448 = vmatmul.f32.gmra.mxu2 %v15392_v40  ;;  %6849 = vmatmul.f32.gmra.mxu3 %v15396_v7 }
 0x743   : > { %v9388_v58 = vpop.eup %9387  ;;  %v12883_v15 = vadd.f32 1.0, %v9386_v28  ;;  %v5403_v32 = vpop.f32.mrf.mxu0 }
 0x744   : > { %v7547_v0 = vsel %vm7546_vm12, %v9384_v25, %v7543_v38  ;;  %v7555_v47 = vmul.f32 %v9388_v58, %v12865_v29  ;;  %9389 = vpow2.f32 %v9082_v54  ;;  %v5404_v41 = vadd.f32 %v5403_v32, %v15399_v49 }
 0x745   : > { %6015 = vmatmul.f32.gmra.mxu1 %v15398_v17  ;;  %v7552_v48 = vsel %vm7549_vm13, %v7551_v50, %v7547_v0  ;;  %9391 = vrcp.f32 %v12883_v15  ;;  %v6385_v40 = vpop.f32.mrf.mxu2  ;;  %v6786_v22 = vpop.f32.mrf.mxu3  ;;  %v7563_v25 = vand.u32 2147483647, %v12865_v29  ;;  %vm7560_vm14 = vweird.f32 %v9388_v58 }
 0x746   : > { %8922 = vst.msk [vmem:[%s12845_s14 + $0x10] sm:$0xff] %vm8919_vm4, %v7552_v48  ;;  %v7556_v34 = vsub.f32 1.0, %v7555_v47  ;;  %v6386_v2 = vadd.f32 %v6385_v40, %v12663_v23  ;;  %5482 = vmatmul.f32.gmra.mxu0 %v15397_v35  ;;  %v12896_v54 = vadd.f32 %v5920_v14, %v5404_v41  ;;  %v15400_v23 = vld [vmem:[#allocation37_spill] sm:$0xff]  ;;  %vm7561_vm0 = vmor %vm7559_vm15, %vm7560_vm14  ;;  %v7566_v35 = vor.u32 1.1754944e-38, %v7565_v33  ;;  %v15403_v33 = vld [vmem:[#allocation72_spill] sm:$0xff] }
 0x747   : > { %vm7564_vm1 = vcmp.eq.f32.partialorder %v7563_v25, 8.507059e+37  ;;  %v7580_v25 = vand.u32 2147483648, %v12883_v15  ;;  %vm7574_vm3 = vweird.f32 %v12883_v15 }
 0x748   : > { %v7557_v28 = vmul.f32 %v9388_v58, %v7556_v34  ;;  %v6783_v38 = vadd.f32 %v6782_v60, %v6386_v2  ;;  %v15401_v34 = vld [vmem:[#allocation223_spill] sm:$0xff] }
 0x749   : > { %v15402_v49 = vand.u32 4294901760, %v15401_v34 }
 0x74a   : > { %v5926_v50 = vpop.f32.mrf.mxu1  ;;  %v9390_v0 = vpop.eup %9389  ;;  %v7558_v17 = vadd.f32 %v9388_v58, %v7557_v28  ;;  %v9083_v47 = vmul.f32 -1.442695, %v6783_v38  ;;  %6452 = vmatmul.f32.gmra.mxu2 %v15396_v7  ;;  %6853 = vmatmul.f32.gmra.mxu3 %v15400_v23 }
 0x74b   : > { %v9392_v32 = vpop.eup %9391  ;;  %v12901_v48 = vadd.f32 1.0, %v9390_v0  ;;  %v5408_v40 = vpop.f32.mrf.mxu0 }
 0x74c   : > { %v7562_v60 = vsel %vm7561_vm0, %v9388_v58, %v7558_v17  ;;  %v7570_v14 = vmul.f32 %v9392_v32, %v12883_v15  ;;  %9393 = vpow2.f32 %v9083_v47  ;;  %v5409_v28 = vadd.f32 %v5408_v40, %v15403_v33 }
 0x74d   : > { %6021 = vmatmul.f32.gmra.mxu1 %v15402_v49  ;;  %v7567_v29 = vsel %vm7564_vm1, %v7566_v35, %v7562_v60  ;;  %9395 = vrcp.f32 %v12901_v48  ;;  %v6389_v7 = vpop.f32.mrf.mxu2  ;;  %v6790_v41 = vpop.f32.mrf.mxu3  ;;  %v7578_v58 = vand.u32 2147483647, %v12883_v15  ;;  %vm7575_vm2 = vweird.f32 %v9392_v32 }
 0x74e   : > { %8923 = vst.msk [vmem:[%s12845_s14 + $0x18] sm:$0xff] %vm8919_vm4, %v7567_v29  ;;  %v7571_v2 = vsub.f32 1.0, %v7570_v14  ;;  %v6390_v38 = vadd.f32 %v6389_v7, %v12674_v16  ;;  %5487 = vmatmul.f32.gmra.mxu0 %v15401_v34  ;;  %v12914_v47 = vadd.f32 %v5926_v50, %v5409_v28  ;;  %v15404_v16 = vld [vmem:[#allocation39_spill] sm:$0xff]  ;;  %vm7576_vm5 = vmor %vm7574_vm3, %vm7575_vm2  ;;  %v7581_v34 = vor.u32 1.1754944e-38, %v7580_v25  ;;  %v15407_v25 = vld [vmem:[#allocation74_spill] sm:$0xff] }
 0x74f   : > { %vm7579_vm6 = vcmp.eq.f32.partialorder %v7578_v58, 8.507059e+37  ;;  %v7595_v58 = vand.u32 2147483648, %v12901_v48  ;;  %vm7589_vm8 = vweird.f32 %v12901_v48 }
 0x750   : > { %v7572_v0 = vmul.f32 %v9392_v32, %v7571_v2  ;;  %v6787_v17 = vadd.f32 %v6786_v22, %v6390_v38  ;;  %v15405_v2 = vld [vmem:[#allocation224_spill] sm:$0xff] }
 0x751   : > { %v15406_v33 = vand.u32 4294901760, %v15405_v2 }
 0x752   : > { %v5932_v35 = vpop.f32.mrf.mxu1  ;;  %v9394_v60 = vpop.eup %9393  ;;  %v7573_v49 = vadd.f32 %v9392_v32, %v7572_v0  ;;  %v9084_v14 = vmul.f32 -1.442695, %v6787_v17  ;;  %6456 = vmatmul.f32.gmra.mxu2 %v15400_v23  ;;  %6857 = vmatmul.f32.gmra.mxu3 %v15404_v16 }
 0x753   : > { %v9396_v40 = vpop.eup %9395  ;;  %v12919_v29 = vadd.f32 1.0, %v9394_v60  ;;  %v5413_v7 = vpop.f32.mrf.mxu0 }
 0x754   : > { %v7577_v22 = vsel %vm7576_vm5, %v9392_v32, %v7573_v49  ;;  %v7585_v50 = vmul.f32 %v9396_v40, %v12901_v48  ;;  %9397 = vpow2.f32 %v9084_v14  ;;  %v5414_v0 = vadd.f32 %v5413_v7, %v15407_v25 }
 0x755   : > { %6027 = vmatmul.f32.gmra.mxu1 %v15406_v33  ;;  %v7582_v15 = vsel %vm7579_vm6, %v7581_v34, %v7577_v22  ;;  %9399 = vrcp.f32 %v12919_v29  ;;  %v6393_v23 = vpop.f32.mrf.mxu2  ;;  %v6794_v28 = vpop.f32.mrf.mxu3  ;;  %v7593_v32 = vand.u32 2147483647, %v12901_v48  ;;  %vm7590_vm7 = vweird.f32 %v9396_v40 }
 0x756   : > { %8924 = vst.msk [vmem:[%s12845_s14 + $0x20] sm:$0xff] %vm8919_vm4, %v7582_v15  ;;  %v7586_v38 = vsub.f32 1.0, %v7585_v50  ;;  %v6394_v17 = vadd.f32 %v6393_v23, %v12685_v56  ;;  %5492 = vmatmul.f32.gmra.mxu0 %v15405_v2  ;;  %v12932_v14 = vadd.f32 %v5932_v35, %v5414_v0  ;;  %v15408_v56 = vld [vmem:[#allocation41_spill] sm:$0xff]  ;;  %vm7591_vm9 = vmor %vm7589_vm8, %vm7590_vm7  ;;  %v7596_v2 = vor.u32 1.1754944e-38, %v7595_v58  ;;  %v15411_v58 = vld [vmem:[#allocation76_spill] sm:$0xff] }
 0x757   : > { %vm7594_vm10 = vcmp.eq.f32.partialorder %v7593_v32, 8.507059e+37  ;;  %v7610_v32 = vand.u32 2147483648, %v12919_v29  ;;  %vm7604_vm12 = vweird.f32 %v12919_v29 }
 0x758   : > { %v7587_v60 = vmul.f32 %v9396_v40, %v7586_v38  ;;  %v6791_v49 = vadd.f32 %v6790_v41, %v6394_v17  ;;  %v15409_v38 = vld [vmem:[#allocation225_spill] sm:$0xff] }
 0x759   : > { %v15410_v25 = vand.u32 4294901760, %v15409_v38 }
 0x75a   : > { %v5938_v34 = vpop.f32.mrf.mxu1  ;;  %v9398_v22 = vpop.eup %9397  ;;  %v7588_v33 = vadd.f32 %v9396_v40, %v7587_v60  ;;  %v9085_v50 = vmul.f32 -1.442695, %v6791_v49  ;;  %6460 = vmatmul.f32.gmra.mxu2 %v15404_v16  ;;  %6861 = vmatmul.f32.gmra.mxu3 %v15408_v56 }
 0x75b   : > { %v9400_v7 = vpop.eup %9399  ;;  %v12937_v15 = vadd.f32 1.0, %v9398_v22  ;;  %v5418_v23 = vpop.f32.mrf.mxu0 }
 0x75c   : > { %v7592_v41 = vsel %vm7591_vm9, %v9396_v40, %v7588_v33  ;;  %v7600_v35 = vmul.f32 %v9400_v7, %v12919_v29  ;;  %9401 = vpow2.f32 %v9085_v50  ;;  %v5419_v60 = vadd.f32 %v5418_v23, %v15411_v58 }
 0x75d   : > { %6033 = vmatmul.f32.gmra.mxu1 %v15410_v25  ;;  %v7597_v48 = vsel %vm7594_vm10, %v7596_v2, %v7592_v41  ;;  %9403 = vrcp.f32 %v12937_v15  ;;  %v6397_v16 = vpop.f32.mrf.mxu2  ;;  %v6798_v0 = vpop.f32.mrf.mxu3  ;;  %v7608_v40 = vand.u32 2147483647, %v12919_v29  ;;  %vm7605_vm11 = vweird.f32 %v9400_v7 }
 0x75e   : > { %8925 = vst.msk [vmem:[%s12845_s14 + $0x28] sm:$0xff] %vm8919_vm4, %v7597_v48  ;;  %v7601_v17 = vsub.f32 1.0, %v7600_v35  ;;  %v6398_v49 = vadd.f32 %v6397_v16, %v12696_v20  ;;  %5497 = vmatmul.f32.gmra.mxu0 %v15409_v38  ;;  %v12950_v50 = vadd.f32 %v5938_v34, %v5419_v60  ;;  %v15412_v20 = vld [vmem:[#allocation43_spill] sm:$0xff]  ;;  %vm7606_vm13 = vmor %vm7604_vm12, %vm7605_vm11  ;;  %v7611_v38 = vor.u32 1.1754944e-38, %v7610_v32  ;;  %v15415_v32 = vld [vmem:[#allocation78_spill] sm:$0xff] }
 0x75f   : > { %vm7609_vm14 = vcmp.eq.f32.partialorder %v7608_v40, 8.507059e+37  ;;  %v7625_v40 = vand.u32 2147483648, %v12937_v15  ;;  %vm7619_vm0 = vweird.f32 %v12937_v15 }
 0x760   : > { %v7602_v22 = vmul.f32 %v9400_v7, %v7601_v17  ;;  %v6795_v33 = vadd.f32 %v6794_v28, %v6398_v49  ;;  %v15413_v17 = vld [vmem:[#allocation226_spill] sm:$0xff] }
 0x761   : > { %v15414_v58 = vand.u32 4294901760, %v15413_v17 }
 0x762   : > { %v5944_v2 = vpop.f32.mrf.mxu1  ;;  %v9402_v41 = vpop.eup %9401  ;;  %v7603_v25 = vadd.f32 %v9400_v7, %v7602_v22  ;;  %v9086_v35 = vmul.f32 -1.442695, %v6795_v33  ;;  %6464 = vmatmul.f32.gmra.mxu2 %v15408_v56  ;;  %6865 = vmatmul.f32.gmra.mxu3 %v15412_v20 }
 0x763   : > { %v9404_v23 = vpop.eup %9403  ;;  %v12955_v48 = vadd.f32 1.0, %v9402_v41  ;;  %v5423_v16 = vpop.f32.mrf.mxu0 }
 0x764   : > { %v7607_v28 = vsel %vm7606_vm13, %v9400_v7, %v7603_v25  ;;  %v7615_v34 = vmul.f32 %v9404_v23, %v12937_v15  ;;  %9405 = vpow2.f32 %v9086_v35  ;;  %v5424_v22 = vadd.f32 %v5423_v16, %v15415_v32 }
 0x765   : > { %6039 = vmatmul.f32.gmra.mxu1 %v15414_v58  ;;  %v7612_v29 = vsel %vm7609_vm14, %v7611_v38, %v7607_v28  ;;  %9407 = vrcp.f32 %v12955_v48  ;;  %v6401_v56 = vpop.f32.mrf.mxu2  ;;  %v6802_v60 = vpop.f32.mrf.mxu3  ;;  %v7623_v7 = vand.u32 2147483647, %v12937_v15  ;;  %vm7620_vm15 = vweird.f32 %v9404_v23 }
 0x766   : > { %8926 = vst.msk [vmem:[%s12845_s14 + $0x30] sm:$0xff] %vm8919_vm4, %v7612_v29  ;;  %v7616_v49 = vsub.f32 1.0, %v7615_v34  ;;  %v6402_v33 = vadd.f32 %v6401_v56, %v12707_v62  ;;  %5502 = vmatmul.f32.gmra.mxu0 %v15413_v17  ;;  %v12968_v35 = vadd.f32 %v5944_v2, %v5424_v22  ;;  %v15416_v62 = vld [vmem:[#allocation45_spill] sm:$0xff]  ;;  %vm7621_vm1 = vmor %vm7619_vm0, %vm7620_vm15  ;;  %v7626_v17 = vor.u32 1.1754944e-38, %v7625_v40  ;;  %v15419_v40 = vld [vmem:[#allocation80_spill] sm:$0xff] }
 0x767   : > { %vm7624_vm2 = vcmp.eq.f32.partialorder %v7623_v7, 8.507059e+37  ;;  %v7640_v7 = vand.u32 2147483648, %v12955_v48  ;;  %vm7634_vm5 = vweird.f32 %v12955_v48 }
 0x768   : > { %v7617_v41 = vmul.f32 %v9404_v23, %v7616_v49  ;;  %v6799_v25 = vadd.f32 %v6798_v0, %v6402_v33  ;;  %v15417_v49 = vld [vmem:[#allocation227_spill] sm:$0xff] }
 0x769   : > { %v15418_v32 = vand.u32 4294901760, %v15417_v49 }
 0x76a   : > { %v5950_v38 = vpop.f32.mrf.mxu1  ;;  %v9406_v28 = vpop.eup %9405  ;;  %v7618_v58 = vadd.f32 %v9404_v23, %v7617_v41  ;;  %v9087_v34 = vmul.f32 -1.442695, %v6799_v25  ;;  %6468 = vmatmul.f32.gmra.mxu2 %v15412_v20  ;;  %6869 = vmatmul.f32.gmra.mxu3 %v15416_v62 }
 0x76b   : > { %v9408_v16 = vpop.eup %9407  ;;  %v12973_v29 = vadd.f32 1.0, %v9406_v28  ;;  %v5428_v56 = vpop.f32.mrf.mxu0 }
 0x76c   : > { %v7622_v0 = vsel %vm7621_vm1, %v9404_v23, %v7618_v58  ;;  %v7630_v2 = vmul.f32 %v9408_v16, %v12955_v48  ;;  %9409 = vpow2.f32 %v9087_v34  ;;  %v5429_v41 = vadd.f32 %v5428_v56, %v15419_v40 }
 0x76d   : > { %6045 = vmatmul.f32.gmra.mxu1 %v15418_v32  ;;  %v7627_v15 = vsel %vm7624_vm2, %v7626_v17, %v7622_v0  ;;  %9411 = vrcp.f32 %v12973_v29  ;;  %v6405_v20 = vpop.f32.mrf.mxu2  ;;  %v6806_v22 = vpop.f32.mrf.mxu3  ;;  %v7638_v23 = vand.u32 2147483647, %v12955_v48  ;;  %vm7635_vm3 = vweird.f32 %v9408_v16 }
 0x76e   : > { %8927 = vst.msk [vmem:[%s12845_s14 + $0x38] sm:$0xff] %vm8919_vm4, %v7627_v15  ;;  %v7631_v33 = vsub.f32 1.0, %v7630_v2  ;;  %v6406_v25 = vadd.f32 %v6405_v20, %v12718_v39  ;;  %5507 = vmatmul.f32.gmra.mxu0 %v15417_v49  ;;  %v12986_v34 = vadd.f32 %v5950_v38, %v5429_v41  ;;  %v15420_v39 = vld [vmem:[#allocation47_spill] sm:$0xff]  ;;  %vm7636_vm6 = vmor %vm7634_vm5, %vm7635_vm3  ;;  %v7641_v49 = vor.u32 1.1754944e-38, %v7640_v7  ;;  %v15423_v7 = vld [vmem:[#allocation82_spill] sm:$0xff] }
 0x76f   : > { %vm7639_vm7 = vcmp.eq.f32.partialorder %v7638_v23, 8.507059e+37  ;;  %v7655_v23 = vand.u32 2147483648, %v12973_v29  ;;  %vm7649_vm9 = vweird.f32 %v12973_v29 }
 0x770   : > { %v7632_v28 = vmul.f32 %v9408_v16, %v7631_v33  ;;  %v6803_v58 = vadd.f32 %v6802_v60, %v6406_v25  ;;  %v15421_v33 = vld [vmem:[#allocation228_spill] sm:$0xff] }
 0x771   : > { %v15422_v40 = vand.u32 4294901760, %v15421_v33 }
 0x772   : > { %v5956_v17 = vpop.f32.mrf.mxu1  ;;  %v9410_v0 = vpop.eup %9409  ;;  %v7633_v32 = vadd.f32 %v9408_v16, %v7632_v28  ;;  %v9088_v2 = vmul.f32 -1.442695, %v6803_v58  ;;  %6472 = vmatmul.f32.gmra.mxu2 %v15416_v62  ;;  %6873 = vmatmul.f32.gmra.mxu3 %v15420_v39 }
 0x773   : > { %v9412_v56 = vpop.eup %9411  ;;  %v12991_v15 = vadd.f32 1.0, %v9410_v0  ;;  %v5433_v20 = vpop.f32.mrf.mxu0 }
 0x774   : > { %v7637_v60 = vsel %vm7636_vm6, %v9408_v16, %v7633_v32  ;;  %v7645_v38 = vmul.f32 %v9412_v56, %v12973_v29  ;;  %9413 = vpow2.f32 %v9088_v2  ;;  %v5434_v28 = vadd.f32 %v5433_v20, %v15423_v7 }
 0x775   : > { %6051 = vmatmul.f32.gmra.mxu1 %v15422_v40  ;;  %v7642_v48 = vsel %vm7639_vm7, %v7641_v49, %v7637_v60  ;;  %9415 = vrcp.f32 %v12991_v15  ;;  %v6409_v62 = vpop.f32.mrf.mxu2  ;;  %v6810_v41 = vpop.f32.mrf.mxu3  ;;  %v7653_v16 = vand.u32 2147483647, %v12973_v29  ;;  %vm7650_vm8 = vweird.f32 %v9412_v56 }
 0x776   : > { %8928 = vst.msk [vmem:[%s12845_s14 + $0x40] sm:$0xff] %vm8919_vm4, %v7642_v48  ;;  %v7646_v25 = vsub.f32 1.0, %v7645_v38  ;;  %v6410_v58 = vadd.f32 %v6409_v62, %v12729_v31  ;;  %5512 = vmatmul.f32.gmra.mxu0 %v15421_v33  ;;  %v13004_v2 = vadd.f32 %v5956_v17, %v5434_v28  ;;  %v15424_v31 = vld [vmem:[#allocation49_spill] sm:$0xff]  ;;  %vm7651_vm10 = vmor %vm7649_vm9, %vm7650_vm8  ;;  %v7656_v33 = vor.u32 1.1754944e-38, %v7655_v23  ;;  %v15427_v23 = vld [vmem:[#allocation84_spill] sm:$0xff] }
 0x777   : > { %vm7654_vm11 = vcmp.eq.f32.partialorder %v7653_v16, 8.507059e+37  ;;  %v7670_v16 = vand.u32 2147483648, %v12991_v15  ;;  %vm7664_vm13 = vweird.f32 %v12991_v15 }
 0x778   : > { %v7647_v0 = vmul.f32 %v9412_v56, %v7646_v25  ;;  %v6807_v32 = vadd.f32 %v6806_v22, %v6410_v58  ;;  %v15425_v25 = vld [vmem:[#allocation229_spill] sm:$0xff] }
 0x779   : > { %v15426_v7 = vand.u32 4294901760, %v15425_v25 }
 0x77a   : > { %v5962_v49 = vpop.f32.mrf.mxu1  ;;  %v9414_v60 = vpop.eup %9413  ;;  %v7648_v40 = vadd.f32 %v9412_v56, %v7647_v0  ;;  %v9089_v38 = vmul.f32 -1.442695, %v6807_v32  ;;  %6476 = vmatmul.f32.gmra.mxu2 %v15420_v39  ;;  %6877 = vmatmul.f32.gmra.mxu3 %v15424_v31 }
 0x77b   : > { %v9416_v20 = vpop.eup %9415  ;;  %v13009_v48 = vadd.f32 1.0, %v9414_v60  ;;  %v5438_v62 = vpop.f32.mrf.mxu0 }
 0x77c   : > { %v7652_v22 = vsel %vm7651_vm10, %v9412_v56, %v7648_v40  ;;  %v7660_v17 = vmul.f32 %v9416_v20, %v12991_v15  ;;  %9417 = vpow2.f32 %v9089_v38  ;;  %v5439_v0 = vadd.f32 %v5438_v62, %v15427_v23 }
 0x77d   : > { %6057 = vmatmul.f32.gmra.mxu1 %v15426_v7  ;;  %v7657_v29 = vsel %vm7654_vm11, %v7656_v33, %v7652_v22  ;;  %9419 = vrcp.f32 %v13009_v48  ;;  %v6413_v39 = vpop.f32.mrf.mxu2  ;;  %v6814_v28 = vpop.f32.mrf.mxu3  ;;  %v7668_v56 = vand.u32 2147483647, %v12991_v15  ;;  %vm7665_vm12 = vweird.f32 %v9416_v20 }
 0x77e   : > { %8929 = vst.msk [vmem:[%s12845_s14 + $0x48] sm:$0xff] %vm8919_vm4, %v7657_v29  ;;  %v7661_v58 = vsub.f32 1.0, %v7660_v17  ;;  %v6414_v32 = vadd.f32 %v6413_v39, %v12740_v1  ;;  %5517 = vmatmul.f32.gmra.mxu0 %v15425_v25  ;;  %v13022_v38 = vadd.f32 %v5962_v49, %v5439_v0  ;;  %v15428_v1 = vld [vmem:[#allocation51_spill] sm:$0xff]  ;;  %vm7666_vm14 = vmor %vm7664_vm13, %vm7665_vm12  ;;  %v7671_v25 = vor.u32 1.1754944e-38, %v7670_v16  ;;  %v15431_v16 = vld [vmem:[#allocation86_spill] sm:$0xff] }
 0x77f   : > { %vm7669_vm15 = vcmp.eq.f32.partialorder %v7668_v56, 8.507059e+37  ;;  %v7685_v56 = vand.u32 2147483648, %v13009_v48  ;;  %vm7679_vm1 = vweird.f32 %v13009_v48 }
 0x780   : > { %v7662_v60 = vmul.f32 %v9416_v20, %v7661_v58  ;;  %v6811_v40 = vadd.f32 %v6810_v41, %v6414_v32  ;;  %v15429_v58 = vld [vmem:[#allocation230_spill] sm:$0xff] }
 0x781   : > { %v15430_v23 = vand.u32 4294901760, %v15429_v58 }
 0x782   : > { %v5968_v33 = vpop.f32.mrf.mxu1  ;;  %v9418_v22 = vpop.eup %9417  ;;  %v7663_v7 = vadd.f32 %v9416_v20, %v7662_v60  ;;  %v9090_v17 = vmul.f32 -1.442695, %v6811_v40  ;;  %6480 = vmatmul.f32.gmra.mxu2 %v15424_v31  ;;  %6881 = vmatmul.f32.gmra.mxu3 %v15428_v1 }
 0x783   : > { %v9420_v62 = vpop.eup %9419  ;;  %v13027_v29 = vadd.f32 1.0, %v9418_v22  ;;  %v5443_v39 = vpop.f32.mrf.mxu0 }
 0x784   : > { %v7667_v41 = vsel %vm7666_vm14, %v9416_v20, %v7663_v7  ;;  %v7675_v49 = vmul.f32 %v9420_v62, %v13009_v48  ;;  %9421 = vpow2.f32 %v9090_v17  ;;  %v5444_v60 = vadd.f32 %v5443_v39, %v15431_v16 }
 0x785   : > { %6063 = vmatmul.f32.gmra.mxu1 %v15430_v23  ;;  %v7672_v15 = vsel %vm7669_vm15, %v7671_v25, %v7667_v41  ;;  %9423 = vrcp.f32 %v13027_v29  ;;  %v6417_v31 = vpop.f32.mrf.mxu2  ;;  %v6818_v0 = vpop.f32.mrf.mxu3  ;;  %v7683_v20 = vand.u32 2147483647, %v13009_v48  ;;  %vm7680_vm0 = vweird.f32 %v9420_v62 }
 0x786   : > { %8930 = vst.msk [vmem:[%s12845_s14 + $0x50] sm:$0xff] %vm8919_vm4, %v7672_v15  ;;  %v7676_v32 = vsub.f32 1.0, %v7675_v49  ;;  %v6418_v40 = vadd.f32 %v6417_v31, %v12751_v45  ;;  %5522 = vmatmul.f32.gmra.mxu0 %v15429_v58  ;;  %v13040_v17 = vadd.f32 %v5968_v33, %v5444_v60  ;;  %v15432_v45 = vld [vmem:[#allocation53_spill] sm:$0xff]  ;;  %vm7681_vm2 = vmor %vm7679_vm1, %vm7680_vm0  ;;  %v7686_v58 = vor.u32 1.1754944e-38, %v7685_v56  ;;  %v15435_v56 = vld [vmem:[#allocation88_spill] sm:$0xff] }
 0x787   : > { %vm7684_vm3 = vcmp.eq.f32.partialorder %v7683_v20, 8.507059e+37  ;;  %v7700_v20 = vand.u32 2147483648, %v13027_v29  ;;  %vm7694_vm6 = vweird.f32 %v13027_v29 }
 0x788   : > { %v7677_v22 = vmul.f32 %v9420_v62, %v7676_v32  ;;  %v6815_v7 = vadd.f32 %v6814_v28, %v6418_v40  ;;  %v15433_v32 = vld [vmem:[#allocation231_spill] sm:$0xff] }
 0x789   : > { %v15434_v16 = vand.u32 4294901760, %v15433_v32 }
 0x78a   : > { %v5974_v25 = vpop.f32.mrf.mxu1  ;;  %v9422_v41 = vpop.eup %9421  ;;  %v7678_v23 = vadd.f32 %v9420_v62, %v7677_v22  ;;  %v9091_v49 = vmul.f32 -1.442695, %v6815_v7  ;;  %6484 = vmatmul.f32.gmra.mxu2 %v15428_v1  ;;  %6885 = vmatmul.f32.gmra.mxu3 %v15432_v45 }
 0x78b   : > { %v9424_v39 = vpop.eup %9423  ;;  %v13045_v15 = vadd.f32 1.0, %v9422_v41  ;;  %v5448_v31 = vpop.f32.mrf.mxu0 }
 0x78c   : > { %v7682_v28 = vsel %vm7681_vm2, %v9420_v62, %v7678_v23  ;;  %v7690_v33 = vmul.f32 %v9424_v39, %v13027_v29  ;;  %9425 = vpow2.f32 %v9091_v49  ;;  %v5449_v22 = vadd.f32 %v5448_v31, %v15435_v56 }
 0x78d   : > { %6069 = vmatmul.f32.gmra.mxu1 %v15434_v16  ;;  %v7687_v48 = vsel %vm7684_vm3, %v7686_v58, %v7682_v28  ;;  %9427 = vrcp.f32 %v13045_v15  ;;  %v6421_v1 = vpop.f32.mrf.mxu2  ;;  %v6822_v60 = vpop.f32.mrf.mxu3  ;;  %v7698_v62 = vand.u32 2147483647, %v13027_v29  ;;  %vm7695_vm5 = vweird.f32 %v9424_v39 }
 0x78e   : > { %8931 = vst.msk [vmem:[%s12845_s14 + $0x58] sm:$0xff] %vm8919_vm4, %v7687_v48  ;;  %v7691_v40 = vsub.f32 1.0, %v7690_v33  ;;  %v6422_v7 = vadd.f32 %v6421_v1, %v12762_v18  ;;  %5527 = vmatmul.f32.gmra.mxu0 %v15433_v32  ;;  %v13058_v49 = vadd.f32 %v5974_v25, %v5449_v22  ;;  %v15436_v18 = vld [vmem:[#allocation55_spill] sm:$0xff]  ;;  %vm7696_vm7 = vmor %vm7694_vm6, %vm7695_vm5  ;;  %v7701_v32 = vor.u32 1.1754944e-38, %v7700_v20  ;;  %v15439_v20 = vld [vmem:[#allocation90_spill] sm:$0xff] }
 0x78f   : > { %vm7699_vm8 = vcmp.eq.f32.partialorder %v7698_v62, 8.507059e+37  ;;  %v7715_v62 = vand.u32 2147483648, %v13045_v15  ;;  %vm7709_vm10 = vweird.f32 %v13045_v15 }
 0x790   : > { %v7692_v41 = vmul.f32 %v9424_v39, %v7691_v40  ;;  %v6819_v23 = vadd.f32 %v6818_v0, %v6422_v7  ;;  %v15437_v40 = vld [vmem:[#allocation232_spill] sm:$0xff] }
 0x791   : > { %v15438_v56 = vand.u32 4294901760, %v15437_v40 }
 0x792   : > { %v5980_v58 = vpop.f32.mrf.mxu1  ;;  %v9426_v28 = vpop.eup %9425  ;;  %v7693_v16 = vadd.f32 %v9424_v39, %v7692_v41  ;;  %v9092_v33 = vmul.f32 -1.442695, %v6819_v23  ;;  %6488 = vmatmul.f32.gmra.mxu2 %v15432_v45  ;;  %6889 = vmatmul.f32.gmra.mxu3 %v15436_v18 }
 0x793   : > { %v9428_v31 = vpop.eup %9427  ;;  %v13063_v48 = vadd.f32 1.0, %v9426_v28  ;;  %v5453_v1 = vpop.f32.mrf.mxu0 }
 0x794   : > { %v7697_v0 = vsel %vm7696_vm7, %v9424_v39, %v7693_v16  ;;  %v7705_v25 = vmul.f32 %v9428_v31, %v13045_v15  ;;  %9429 = vpow2.f32 %v9092_v33  ;;  %v5454_v41 = vadd.f32 %v5453_v1, %v15439_v20 }
 0x795   : > { %6075 = vmatmul.f32.gmra.mxu1 %v15438_v56  ;;  %v7702_v29 = vsel %vm7699_vm8, %v7701_v32, %v7697_v0  ;;  %9431 = vrcp.f32 %v13063_v48  ;;  %v6425_v45 = vpop.f32.mrf.mxu2  ;;  %v6826_v22 = vpop.f32.mrf.mxu3  ;;  %v7713_v39 = vand.u32 2147483647, %v13045_v15  ;;  %vm7710_vm9 = vweird.f32 %v9428_v31 }
 0x796   : > { %8932 = vst.msk [vmem:[%s12845_s14 + $0x60] sm:$0xff] %vm8919_vm4, %v7702_v29  ;;  %v7706_v7 = vsub.f32 1.0, %v7705_v25  ;;  %v6426_v23 = vadd.f32 %v6425_v45, %v12773_v63  ;;  %5532 = vmatmul.f32.gmra.mxu0 %v15437_v40  ;;  %v13076_v33 = vadd.f32 %v5980_v58, %v5454_v41  ;;  %v15440_v63 = vld [vmem:[#allocation57_spill] sm:$0xff]  ;;  %vm7711_vm11 = vmor %vm7709_vm10, %vm7710_vm9  ;;  %v7716_v40 = vor.u32 1.1754944e-38, %v7715_v62  ;;  %v15443_v62 = vld [vmem:[#allocation92_spill] sm:$0xff] }
 0x797   : > { %vm7714_vm12 = vcmp.eq.f32.partialorder %v7713_v39, 8.507059e+37  ;;  %v7730_v39 = vand.u32 2147483648, %v13063_v48  ;;  %vm7724_vm14 = vweird.f32 %v13063_v48 }
 0x798   : > { %v7707_v28 = vmul.f32 %v9428_v31, %v7706_v7  ;;  %v6823_v16 = vadd.f32 %v6822_v60, %v6426_v23  ;;  %v15441_v7 = vld [vmem:[#allocation233_spill] sm:$0xff] }
 0x799   : > { %v15442_v20 = vand.u32 4294901760, %v15441_v7 }
 0x79a   : > { %v5986_v32 = vpop.f32.mrf.mxu1  ;;  %v9430_v0 = vpop.eup %9429  ;;  %v7708_v56 = vadd.f32 %v9428_v31, %v7707_v28  ;;  %v9093_v25 = vmul.f32 -1.442695, %v6823_v16  ;;  %6492 = vmatmul.f32.gmra.mxu2 %v15436_v18  ;;  %6893 = vmatmul.f32.gmra.mxu3 %v15440_v63 }
 0x79b   : > { %v9432_v1 = vpop.eup %9431  ;;  %v13081_v29 = vadd.f32 1.0, %v9430_v0  ;;  %v5458_v45 = vpop.f32.mrf.mxu0 }
 0x79c   : > { %v7712_v60 = vsel %vm7711_vm11, %v9428_v31, %v7708_v56  ;;  %v7720_v58 = vmul.f32 %v9432_v1, %v13063_v48  ;;  %9433 = vpow2.f32 %v9093_v25  ;;  %v5459_v28 = vadd.f32 %v5458_v45, %v15443_v62 }
 0x79d   : > { %6081 = vmatmul.f32.gmra.mxu1 %v15442_v20  ;;  %v7717_v15 = vsel %vm7714_vm12, %v7716_v40, %v7712_v60  ;;  %9435 = vrcp.f32 %v13081_v29  ;;  %v6429_v18 = vpop.f32.mrf.mxu2  ;;  %v6830_v41 = vpop.f32.mrf.mxu3  ;;  %v7728_v31 = vand.u32 2147483647, %v13063_v48  ;;  %vm7725_vm13 = vweird.f32 %v9432_v1 }
 0x79e   : > { %8933 = vst.msk [vmem:[%s12845_s14 + $0x68] sm:$0xff] %vm8919_vm4, %v7717_v15  ;;  %v7721_v23 = vsub.f32 1.0, %v7720_v58  ;;  %v6430_v16 = vadd.f32 %v6429_v18, %v12784_v10  ;;  %5537 = vmatmul.f32.gmra.mxu0 %v15441_v7  ;;  %v13094_v25 = vadd.f32 %v5986_v32, %v5459_v28  ;;  %v15444_v10 = vld [vmem:[#allocation59_spill] sm:$0xff]  ;;  %vm7726_vm15 = vmor %vm7724_vm14, %vm7725_vm13  ;;  %v7731_v7 = vor.u32 1.1754944e-38, %v7730_v39  ;;  %v15447_v39 = vld [vmem:[#allocation94_spill] sm:$0xff] }
 0x79f   : > { %vm7729_vm0 = vcmp.eq.f32.partialorder %v7728_v31, 8.507059e+37  ;;  %v7745_v31 = vand.u32 2147483648, %v13081_v29  ;;  %vm7739_vm2 = vweird.f32 %v13081_v29 }
 0x7a0   : > { %v7722_v0 = vmul.f32 %v9432_v1, %v7721_v23  ;;  %v6827_v56 = vadd.f32 %v6826_v22, %v6430_v16  ;;  %v15445_v23 = vld [vmem:[#allocation234_spill] sm:$0xff] }
 0x7a1   : > { %v15446_v62 = vand.u32 4294901760, %v15445_v23 }
 0x7a2   : > { %v5992_v40 = vpop.f32.mrf.mxu1  ;;  %v9434_v60 = vpop.eup %9433  ;;  %v7723_v20 = vadd.f32 %v9432_v1, %v7722_v0  ;;  %v9094_v58 = vmul.f32 -1.442695, %v6827_v56  ;;  %6496 = vmatmul.f32.gmra.mxu2 %v15440_v63  ;;  %6897 = vmatmul.f32.gmra.mxu3 %v15444_v10 }
 0x7a3   : > { %v9436_v45 = vpop.eup %9435  ;;  %v13099_v15 = vadd.f32 1.0, %v9434_v60  ;;  %v5463_v18 = vpop.f32.mrf.mxu0 }
 0x7a4   : > { %v7727_v22 = vsel %vm7726_vm15, %v9432_v1, %v7723_v20  ;;  %v7735_v32 = vmul.f32 %v9436_v45, %v13081_v29  ;;  %9437 = vpow2.f32 %v9094_v58  ;;  %v5464_v0 = vadd.f32 %v5463_v18, %v15447_v39 }
 0x7a5   : > { %6087 = vmatmul.f32.gmra.mxu1 %v15446_v62  ;;  %v7732_v48 = vsel %vm7729_vm0, %v7731_v7, %v7727_v22  ;;  %9439 = vrcp.f32 %v13099_v15  ;;  %v6433_v63 = vpop.f32.mrf.mxu2  ;;  %v6834_v28 = vpop.f32.mrf.mxu3  ;;  %v7743_v1 = vand.u32 2147483647, %v13081_v29  ;;  %vm7740_vm1 = vweird.f32 %v9436_v45 }
 0x7a6   : > { %8934 = vst.msk [vmem:[%s12845_s14 + $0x70] sm:$0xff] %vm8919_vm4, %v7732_v48  ;;  %v7736_v16 = vsub.f32 1.0, %v7735_v32  ;;  %v6434_v56 = vadd.f32 %v6433_v63, %v12795_v30  ;;  %5542 = vmatmul.f32.gmra.mxu0 %v15445_v23  ;;  %v13112_v58 = vadd.f32 %v5992_v40, %v5464_v0  ;;  %v15448_v30 = vld [vmem:[#allocation61_spill] sm:$0xff]  ;;  %vm7741_vm3 = vmor %vm7739_vm2, %vm7740_vm1  ;;  %v7746_v23 = vor.u32 1.1754944e-38, %v7745_v31  ;;  %v15451_v31 = vld [vmem:[#allocation96_spill] sm:$0xff] }
 0x7a7   : > { %vm7744_vm5 = vcmp.eq.f32.partialorder %v7743_v1, 8.507059e+37  ;;  %v7760_v1 = vand.u32 2147483648, %v13099_v15  ;;  %vm7754_vm7 = vweird.f32 %v13099_v15 }
 0x7a8   : > { %v7737_v60 = vmul.f32 %v9436_v45, %v7736_v16  ;;  %v6831_v20 = vadd.f32 %v6830_v41, %v6434_v56  ;;  %v15449_v16 = vld [vmem:[#allocation235_spill] sm:$0xff] }
 0x7a9   : > { %v15450_v39 = vand.u32 4294901760, %v15449_v16 }
 0x7aa   : > { %v5998_v7 = vpop.f32.mrf.mxu1  ;;  %v9438_v22 = vpop.eup %9437  ;;  %v7738_v62 = vadd.f32 %v9436_v45, %v7737_v60  ;;  %v9095_v32 = vmul.f32 -1.442695, %v6831_v20  ;;  %6500 = vmatmul.f32.gmra.mxu2 %v15444_v10  ;;  %6901 = vmatmul.f32.gmra.mxu3 %v15448_v30 }
 0x7ab   : > { %v9440_v18 = vpop.eup %9439  ;;  %v13117_v48 = vadd.f32 1.0, %v9438_v22  ;;  %v5468_v63 = vpop.f32.mrf.mxu0 }
 0x7ac   : > { %v7742_v41 = vsel %vm7741_vm3, %v9436_v45, %v7738_v62  ;;  %v7750_v40 = vmul.f32 %v9440_v18, %v13099_v15  ;;  %9441 = vpow2.f32 %v9095_v32  ;;  %v5469_v60 = vadd.f32 %v5468_v63, %v15451_v31 }
 0x7ad   : > { %6093 = vmatmul.f32.gmra.mxu1 %v15450_v39  ;;  %v7747_v29 = vsel %vm7744_vm5, %v7746_v23, %v7742_v41  ;;  %9443 = vrcp.f32 %v13117_v48  ;;  %v6437_v10 = vpop.f32.mrf.mxu2  ;;  %v6838_v0 = vpop.f32.mrf.mxu3  ;;  %v7758_v45 = vand.u32 2147483647, %v13099_v15  ;;  %vm7755_vm6 = vweird.f32 %v9440_v18 }
 0x7ae   : > { %8935 = vst.msk [vmem:[%s12845_s14 + $0x78] sm:$0xff] %vm8919_vm4, %v7747_v29  ;;  %v7751_v56 = vsub.f32 1.0, %v7750_v40  ;;  %v6438_v20 = vadd.f32 %v6437_v10, %v12806_v26  ;;  %5547 = vmatmul.f32.gmra.mxu0 %v15449_v16  ;;  %v13130_v32 = vadd.f32 %v5998_v7, %v5469_v60  ;;  %v15452_v26 = vld [vmem:[#allocation63_spill] sm:$0xff]  ;;  %vm7756_vm8 = vmor %vm7754_vm7, %vm7755_vm6  ;;  %v7761_v16 = vor.u32 1.1754944e-38, %v7760_v1  ;;  %v15455_v1 = vld [vmem:[#allocation98_spill] sm:$0xff] }
 0x7af   : > { %vm7759_vm9 = vcmp.eq.f32.partialorder %v7758_v45, 8.507059e+37  ;;  %v7775_v45 = vand.u32 2147483648, %v13117_v48  ;;  %vm7769_vm11 = vweird.f32 %v13117_v48 }
 0x7b0   : > { %v7752_v22 = vmul.f32 %v9440_v18, %v7751_v56  ;;  %v6835_v62 = vadd.f32 %v6834_v28, %v6438_v20  ;;  %v15453_v56 = vld [vmem:[#allocation236_spill] sm:$0xff] }
 0x7b1   : > { %v15454_v31 = vand.u32 4294901760, %v15453_v56 }
 0x7b2   : > { %v6004_v23 = vpop.f32.mrf.mxu1  ;;  %v9442_v41 = vpop.eup %9441  ;;  %v7753_v39 = vadd.f32 %v9440_v18, %v7752_v22  ;;  %v9096_v40 = vmul.f32 -1.442695, %v6835_v62  ;;  %6504 = vmatmul.f32.gmra.mxu2 %v15448_v30  ;;  %6905 = vmatmul.f32.gmra.mxu3 %v15452_v26 }
 0x7b3   : > { %v9444_v63 = vpop.eup %9443  ;;  %v13135_v29 = vadd.f32 1.0, %v9442_v41  ;;  %v5473_v10 = vpop.f32.mrf.mxu0 }
 0x7b4   : > { %v7757_v28 = vsel %vm7756_vm8, %v9440_v18, %v7753_v39  ;;  %v7765_v7 = vmul.f32 %v9444_v63, %v13117_v48  ;;  %9445 = vpow2.f32 %v9096_v40  ;;  %v5474_v22 = vadd.f32 %v5473_v10, %v15455_v1 }
 0x7b5   : > { %6099 = vmatmul.f32.gmra.mxu1 %v15454_v31  ;;  %v7762_v15 = vsel %vm7759_vm9, %v7761_v16, %v7757_v28  ;;  %9447 = vrcp.f32 %v13135_v29  ;;  %v6441_v30 = vpop.f32.mrf.mxu2  ;;  %v6842_v60 = vpop.f32.mrf.mxu3  ;;  %v7773_v18 = vand.u32 2147483647, %v13117_v48  ;;  %vm7770_vm10 = vweird.f32 %v9444_v63 }
 0x7b6   : > { %8936 = vst.msk [vmem:[%s12845_s14 + $0x80] sm:$0xff] %vm8919_vm4, %v7762_v15  ;;  %v7766_v20 = vsub.f32 1.0, %v7765_v7  ;;  %v6442_v62 = vadd.f32 %v6441_v30, %v12815_v8  ;;  %5552 = vmatmul.f32.gmra.mxu0 %v15453_v56  ;;  %v13148_v40 = vadd.f32 %v6004_v23, %v5474_v22  ;;  %v15456_v8 = vld [vmem:[#allocation65_spill] sm:$0xff]  ;;  %vm7771_vm12 = vmor %vm7769_vm11, %vm7770_vm10  ;;  %v7776_v56 = vor.u32 1.1754944e-38, %v7775_v45  ;;  %v15459_v45 = vld [vmem:[#allocation100_spill] sm:$0xff] }
 0x7b7   : > { %vm7774_vm13 = vcmp.eq.f32.partialorder %v7773_v18, 8.507059e+37  ;;  %v7790_v18 = vand.u32 2147483648, %v13135_v29  ;;  %vm7784_vm15 = vweird.f32 %v13135_v29 }
 0x7b8   : > { %v7767_v41 = vmul.f32 %v9444_v63, %v7766_v20  ;;  %v6839_v39 = vadd.f32 %v6838_v0, %v6442_v62  ;;  %v15457_v20 = vld [vmem:[#allocation237_spill] sm:$0xff] }
 0x7b9   : > { %v15458_v1 = vand.u32 4294901760, %v15457_v20 }
 0x7ba   : > { %v6010_v16 = vpop.f32.mrf.mxu1  ;;  %v9446_v28 = vpop.eup %9445  ;;  %v7768_v31 = vadd.f32 %v9444_v63, %v7767_v41  ;;  %v9097_v7 = vmul.f32 -1.442695, %v6839_v39  ;;  %6508 = vmatmul.f32.gmra.mxu2 %v15452_v26  ;;  %6909 = vmatmul.f32.gmra.mxu3 %v15456_v8 }
 0x7bb   : > { %v9448_v10 = vpop.eup %9447  ;;  %v13153_v15 = vadd.f32 1.0, %v9446_v28  ;;  %v5478_v30 = vpop.f32.mrf.mxu0 }
 0x7bc   : > { %v7772_v0 = vsel %vm7771_vm12, %v9444_v63, %v7768_v31  ;;  %v7780_v23 = vmul.f32 %v9448_v10, %v13135_v29  ;;  %9449 = vpow2.f32 %v9097_v7  ;;  %v5479_v41 = vadd.f32 %v5478_v30, %v15459_v45 }
 0x7bd   : > { %6105 = vmatmul.f32.gmra.mxu1 %v15458_v1  ;;  %v7777_v48 = vsel %vm7774_vm13, %v7776_v56, %v7772_v0  ;;  %9451 = vrcp.f32 %v13153_v15  ;;  %v6445_v26 = vpop.f32.mrf.mxu2  ;;  %v6846_v22 = vpop.f32.mrf.mxu3  ;;  %v7788_v63 = vand.u32 2147483647, %v13135_v29  ;;  %vm7785_vm14 = vweird.f32 %v9448_v10 }
 0x7be   : > { %8937 = vst.msk [vmem:[%s12845_s14 + $0x88] sm:$0xff] %vm8919_vm4, %v7777_v48  ;;  %v7781_v62 = vsub.f32 1.0, %v7780_v23  ;;  %v6446_v39 = vadd.f32 %v6445_v26, %v12824_v57  ;;  %5557 = vmatmul.f32.gmra.mxu0 %v15457_v20  ;;  %v13166_v7 = vadd.f32 %v6010_v16, %v5479_v41  ;;  %v15460_v57 = vld [vmem:[#allocation67_spill] sm:$0xff]  ;;  %vm7786_vm0 = vmor %vm7784_vm15, %vm7785_vm14  ;;  %v7791_v20 = vor.u32 1.1754944e-38, %v7790_v18  ;;  %v15463_v18 = vld [vmem:[#allocation102_spill] sm:$0xff] }
 0x7bf   : > { %vm7789_vm1 = vcmp.eq.f32.partialorder %v7788_v63, 8.507059e+37  ;;  %v7805_v63 = vand.u32 2147483648, %v13153_v15  ;;  %vm7799_vm3 = vweird.f32 %v13153_v15 }
 0x7c0   : > { %v7782_v28 = vmul.f32 %v9448_v10, %v7781_v62  ;;  %v6843_v31 = vadd.f32 %v6842_v60, %v6446_v39  ;;  %v15461_v62 = vld [vmem:[#allocation238_spill] sm:$0xff] }
 0x7c1   : > { %v15462_v45 = vand.u32 4294901760, %v15461_v62 }
 0x7c2   : > { %v6016_v56 = vpop.f32.mrf.mxu1  ;;  %v9450_v0 = vpop.eup %9449  ;;  %v7783_v1 = vadd.f32 %v9448_v10, %v7782_v28  ;;  %v9098_v23 = vmul.f32 -1.442695, %v6843_v31  ;;  %6512 = vmatmul.f32.gmra.mxu2 %v15456_v8  ;;  %6913 = vmatmul.f32.gmra.mxu3 %v15460_v57 }
 0x7c3   : > { %v9452_v30 = vpop.eup %9451  ;;  %v13171_v48 = vadd.f32 1.0, %v9450_v0  ;;  %v5483_v26 = vpop.f32.mrf.mxu0 }
 0x7c4   : > { %v7787_v60 = vsel %vm7786_vm0, %v9448_v10, %v7783_v1  ;;  %v7795_v16 = vmul.f32 %v9452_v30, %v13153_v15  ;;  %9453 = vpow2.f32 %v9098_v23  ;;  %v5484_v28 = vadd.f32 %v5483_v26, %v15463_v18 }
 0x7c5   : > { %6111 = vmatmul.f32.gmra.mxu1 %v15462_v45  ;;  %v7792_v29 = vsel %vm7789_vm1, %v7791_v20, %v7787_v60  ;;  %9455 = vrcp.f32 %v13171_v48  ;;  %v6449_v8 = vpop.f32.mrf.mxu2  ;;  %v6850_v41 = vpop.f32.mrf.mxu3  ;;  %v7803_v10 = vand.u32 2147483647, %v13153_v15  ;;  %vm7800_vm2 = vweird.f32 %v9452_v30 }
 0x7c6   : > { %8938 = vst.msk [vmem:[%s12845_s14 + $0x90] sm:$0xff] %vm8919_vm4, %v7792_v29  ;;  %v7796_v39 = vsub.f32 1.0, %v7795_v16  ;;  %v6450_v31 = vadd.f32 %v6449_v8, %v12836_v19  ;;  %5562 = vmatmul.f32.gmra.mxu0 %v15461_v62  ;;  %v13184_v23 = vadd.f32 %v6016_v56, %v5484_v28  ;;  %v15464_v19 = vld [vmem:[#allocation69_spill] sm:$0xff]  ;;  %vm7801_vm5 = vmor %vm7799_vm3, %vm7800_vm2  ;;  %v7806_v62 = vor.u32 1.1754944e-38, %v7805_v63  ;;  %v15467_v63 = vld [vmem:[#allocation104_spill] sm:$0xff] }
 0x7c7   : > { %vm7804_vm6 = vcmp.eq.f32.partialorder %v7803_v10, 8.507059e+37  ;;  %v7820_v10 = vand.u32 2147483648, %v13171_v48  ;;  %vm7814_vm8 = vweird.f32 %v13171_v48 }
 0x7c8   : > { %v7797_v0 = vmul.f32 %v9452_v30, %v7796_v39  ;;  %v6847_v1 = vadd.f32 %v6846_v22, %v6450_v31  ;;  %v15465_v39 = vld [vmem:[#allocation239_spill] sm:$0xff] }
 0x7c9   : > { %v15466_v18 = vand.u32 4294901760, %v15465_v39 }
 0x7ca   : > { %v6022_v20 = vpop.f32.mrf.mxu1  ;;  %v9454_v60 = vpop.eup %9453  ;;  %v7798_v45 = vadd.f32 %v9452_v30, %v7797_v0  ;;  %v9099_v16 = vmul.f32 -1.442695, %v6847_v1  ;;  %6516 = vmatmul.f32.gmra.mxu2 %v15460_v57  ;;  %6917 = vmatmul.f32.gmra.mxu3 %v15464_v19 }
 0x7cb   : > { %v9456_v26 = vpop.eup %9455  ;;  %v13189_v29 = vadd.f32 1.0, %v9454_v60  ;;  %v5488_v8 = vpop.f32.mrf.mxu0 }
 0x7cc   : > { %v7802_v22 = vsel %vm7801_vm5, %v9452_v30, %v7798_v45  ;;  %v7810_v56 = vmul.f32 %v9456_v26, %v13171_v48  ;;  %9457 = vpow2.f32 %v9099_v16  ;;  %v5489_v0 = vadd.f32 %v5488_v8, %v15467_v63 }
 0x7cd   : > { %6117 = vmatmul.f32.gmra.mxu1 %v15466_v18  ;;  %v7807_v15 = vsel %vm7804_vm6, %v7806_v62, %v7802_v22  ;;  %9459 = vrcp.f32 %v13189_v29  ;;  %v6453_v57 = vpop.f32.mrf.mxu2  ;;  %v6854_v28 = vpop.f32.mrf.mxu3  ;;  %v7818_v30 = vand.u32 2147483647, %v13171_v48  ;;  %vm7815_vm7 = vweird.f32 %v9456_v26 }
 0x7ce   : > { %8939 = vst.msk [vmem:[%s12845_s14 + $0x98] sm:$0xff] %vm8919_vm4, %v7807_v15  ;;  %v7811_v31 = vsub.f32 1.0, %v7810_v56  ;;  %v6454_v1 = vadd.f32 %v6453_v57, %v12860_v9  ;;  %5567 = vmatmul.f32.gmra.mxu0 %v15465_v39  ;;  %v13202_v16 = vadd.f32 %v6022_v20, %v5489_v0  ;;  %v15468_v9 = vld [vmem:[#allocation71_spill] sm:$0xff]  ;;  %vm7816_vm9 = vmor %vm7814_vm8, %vm7815_vm7  ;;  %v7821_v39 = vor.u32 1.1754944e-38, %v7820_v10  ;;  %v15471_v10 = vld [vmem:[#allocation106_spill] sm:$0xff] }
 0x7cf   : > { %vm7819_vm10 = vcmp.eq.f32.partialorder %v7818_v30, 8.507059e+37  ;;  %v7835_v30 = vand.u32 2147483648, %v13189_v29  ;;  %vm7829_vm12 = vweird.f32 %v13189_v29 }
 0x7d0   : > { %v7812_v60 = vmul.f32 %v9456_v26, %v7811_v31  ;;  %v6851_v45 = vadd.f32 %v6850_v41, %v6454_v1  ;;  %v15469_v31 = vld [vmem:[#allocation240_spill] sm:$0xff] }
 0x7d1   : > { %v15470_v63 = vand.u32 4294901760, %v15469_v31 }
 0x7d2   : > { %v6028_v62 = vpop.f32.mrf.mxu1  ;;  %v9458_v22 = vpop.eup %9457  ;;  %v7813_v18 = vadd.f32 %v9456_v26, %v7812_v60  ;;  %v9100_v56 = vmul.f32 -1.442695, %v6851_v45  ;;  %6520 = vmatmul.f32.gmra.mxu2 %v15464_v19  ;;  %6921 = vmatmul.f32.gmra.mxu3 %v15468_v9 }
 0x7d3   : > { %v9460_v8 = vpop.eup %9459  ;;  %v13207_v15 = vadd.f32 1.0, %v9458_v22  ;;  %v5493_v57 = vpop.f32.mrf.mxu0 }
 0x7d4   : > { %v7817_v41 = vsel %vm7816_vm9, %v9456_v26, %v7813_v18  ;;  %v7825_v20 = vmul.f32 %v9460_v8, %v13189_v29  ;;  %9461 = vpow2.f32 %v9100_v56  ;;  %v5494_v60 = vadd.f32 %v5493_v57, %v15471_v10 }
 0x7d5   : > { %6123 = vmatmul.f32.gmra.mxu1 %v15470_v63  ;;  %v7822_v48 = vsel %vm7819_vm10, %v7821_v39, %v7817_v41  ;;  %9463 = vrcp.f32 %v13207_v15  ;;  %v6457_v19 = vpop.f32.mrf.mxu2  ;;  %v6858_v0 = vpop.f32.mrf.mxu3  ;;  %v7833_v26 = vand.u32 2147483647, %v13189_v29  ;;  %vm7830_vm11 = vweird.f32 %v9460_v8 }
 0x7d6   : > { %8940 = vst.msk [vmem:[%s12845_s14 + $0xa0] sm:$0xff] %vm8919_vm4, %v7822_v48  ;;  %v7826_v1 = vsub.f32 1.0, %v7825_v20  ;;  %v6458_v45 = vadd.f32 %v6457_v19, %v12878_v12  ;;  %5572 = vmatmul.f32.gmra.mxu0 %v15469_v31  ;;  %v13220_v56 = vadd.f32 %v6028_v62, %v5494_v60  ;;  %v15472_v12 = vld [vmem:[#allocation73_spill] sm:$0xff]  ;;  %vm7831_vm13 = vmor %vm7829_vm12, %vm7830_vm11  ;;  %v7836_v31 = vor.u32 1.1754944e-38, %v7835_v30  ;;  %v15475_v30 = vld [vmem:[#allocation108_spill] sm:$0xff] }
 0x7d7   : > { %vm7834_vm14 = vcmp.eq.f32.partialorder %v7833_v26, 8.507059e+37  ;;  %v7850_v26 = vand.u32 2147483648, %v13207_v15  ;;  %vm7844_vm0 = vweird.f32 %v13207_v15 }
 0x7d8   : > { %v7827_v22 = vmul.f32 %v9460_v8, %v7826_v1  ;;  %v6855_v18 = vadd.f32 %v6854_v28, %v6458_v45  ;;  %v15473_v1 = vld [vmem:[#allocation241_spill] sm:$0xff] }
 0x7d9   : > { %v15474_v10 = vand.u32 4294901760, %v15473_v1 }
 0x7da   : > { %v6034_v39 = vpop.f32.mrf.mxu1  ;;  %v9462_v41 = vpop.eup %9461  ;;  %v7828_v63 = vadd.f32 %v9460_v8, %v7827_v22  ;;  %v9101_v20 = vmul.f32 -1.442695, %v6855_v18  ;;  %6524 = vmatmul.f32.gmra.mxu2 %v15468_v9  ;;  %6925 = vmatmul.f32.gmra.mxu3 %v15472_v12 }
 0x7db   : > { %v9464_v57 = vpop.eup %9463  ;;  %v13225_v48 = vadd.f32 1.0, %v9462_v41  ;;  %v5498_v19 = vpop.f32.mrf.mxu0 }
 0x7dc   : > { %v7832_v28 = vsel %vm7831_vm13, %v9460_v8, %v7828_v63  ;;  %v7840_v62 = vmul.f32 %v9464_v57, %v13207_v15  ;;  %9465 = vpow2.f32 %v9101_v20  ;;  %v5499_v22 = vadd.f32 %v5498_v19, %v15475_v30 }
 0x7dd   : > { %6129 = vmatmul.f32.gmra.mxu1 %v15474_v10  ;;  %v7837_v29 = vsel %vm7834_vm14, %v7836_v31, %v7832_v28  ;;  %9467 = vrcp.f32 %v13225_v48  ;;  %v6461_v9 = vpop.f32.mrf.mxu2  ;;  %v6862_v60 = vpop.f32.mrf.mxu3  ;;  %v7848_v8 = vand.u32 2147483647, %v13207_v15  ;;  %vm7845_vm15 = vweird.f32 %v9464_v57 }
 0x7de   : > { %8941 = vst.msk [vmem:[%s12845_s14 + $0xa8] sm:$0xff] %vm8919_vm4, %v7837_v29  ;;  %v7841_v45 = vsub.f32 1.0, %v7840_v62  ;;  %v6462_v18 = vadd.f32 %v6461_v9, %v12896_v54  ;;  %5577 = vmatmul.f32.gmra.mxu0 %v15473_v1  ;;  %v13238_v20 = vadd.f32 %v6034_v39, %v5499_v22  ;;  %v15476_v54 = vld [vmem:[#allocation75_spill] sm:$0xff]  ;;  %vm7846_vm1 = vmor %vm7844_vm0, %vm7845_vm15  ;;  %v7851_v1 = vor.u32 1.1754944e-38, %v7850_v26  ;;  %v15479_v26 = vld [vmem:[#allocation110_spill] sm:$0xff] }
 0x7df   : > { %vm7849_vm2 = vcmp.eq.f32.partialorder %v7848_v8, 8.507059e+37  ;;  %v7865_v8 = vand.u32 2147483648, %v13225_v48  ;;  %vm7859_vm5 = vweird.f32 %v13225_v48 }
 0x7e0   : > { %v7842_v41 = vmul.f32 %v9464_v57, %v7841_v45  ;;  %v6859_v63 = vadd.f32 %v6858_v0, %v6462_v18  ;;  %v15477_v45 = vld [vmem:[#allocation242_spill] sm:$0xff] }
 0x7e1   : > { %v15478_v30 = vand.u32 4294901760, %v15477_v45 }
 0x7e2   : > { %v6040_v31 = vpop.f32.mrf.mxu1  ;;  %v9466_v28 = vpop.eup %9465  ;;  %v7843_v10 = vadd.f32 %v9464_v57, %v7842_v41  ;;  %v9102_v62 = vmul.f32 -1.442695, %v6859_v63  ;;  %6528 = vmatmul.f32.gmra.mxu2 %v15472_v12  ;;  %6929 = vmatmul.f32.gmra.mxu3 %v15476_v54 }
 0x7e3   : > { %v9468_v19 = vpop.eup %9467  ;;  %v13243_v29 = vadd.f32 1.0, %v9466_v28  ;;  %v5503_v9 = vpop.f32.mrf.mxu0 }
 0x7e4   : > { %v7847_v0 = vsel %vm7846_vm1, %v9464_v57, %v7843_v10  ;;  %v7855_v39 = vmul.f32 %v9468_v19, %v13225_v48  ;;  %9469 = vpow2.f32 %v9102_v62  ;;  %v5504_v41 = vadd.f32 %v5503_v9, %v15479_v26 }
 0x7e5   : > { %6135 = vmatmul.f32.gmra.mxu1 %v15478_v30  ;;  %v7852_v15 = vsel %vm7849_vm2, %v7851_v1, %v7847_v0  ;;  %9471 = vrcp.f32 %v13243_v29  ;;  %v6465_v12 = vpop.f32.mrf.mxu2  ;;  %v6866_v22 = vpop.f32.mrf.mxu3  ;;  %v7863_v57 = vand.u32 2147483647, %v13225_v48  ;;  %vm7860_vm3 = vweird.f32 %v9468_v19 }
 0x7e6   : > { %8942 = vst.msk [vmem:[%s12845_s14 + $0xb0] sm:$0xff] %vm8919_vm4, %v7852_v15  ;;  %v7856_v18 = vsub.f32 1.0, %v7855_v39  ;;  %v6466_v63 = vadd.f32 %v6465_v12, %v12914_v47  ;;  %5582 = vmatmul.f32.gmra.mxu0 %v15477_v45  ;;  %v13256_v62 = vadd.f32 %v6040_v31, %v5504_v41  ;;  %v15480_v47 = vld [vmem:[#allocation77_spill] sm:$0xff]  ;;  %vm7861_vm6 = vmor %vm7859_vm5, %vm7860_vm3  ;;  %v7866_v45 = vor.u32 1.1754944e-38, %v7865_v8 }
 0x7e7   : > { %vm7864_vm7 = vcmp.eq.f32.partialorder %v7863_v57, 8.507059e+37  ;;  %v7880_v57 = vand.u32 2147483648, %v13243_v29  ;;  %vm7874_vm9 = vweird.f32 %v13243_v29 }
 0x7e8   : > { %v7857_v28 = vmul.f32 %v9468_v19, %v7856_v18  ;;  %v6863_v10 = vadd.f32 %v6862_v60, %v6466_v63  ;;  %v15481_v18 = vld [vmem:[#allocation243_spill] sm:$0xff] }
 0x7e9   : > { %v15482_v26 = vand.u32 4294901760, %v15481_v18 }
 0x7ea   : > { %v6046_v1 = vpop.f32.mrf.mxu1  ;;  %v9470_v0 = vpop.eup %9469  ;;  %v7858_v30 = vadd.f32 %v9468_v19, %v7857_v28  ;;  %v9103_v39 = vmul.f32 -1.442695, %v6863_v10  ;;  %6532 = vmatmul.f32.gmra.mxu2 %v15476_v54  ;;  %6933 = vmatmul.f32.gmra.mxu3 %v15480_v47 }
 0x7eb   : > { %v9472_v9 = vpop.eup %9471  ;;  %v13261_v15 = vadd.f32 1.0, %v9470_v0  ;;  %v5508_v12 = vpop.f32.mrf.mxu0 }
 0x7ec   : > { %v7862_v60 = vsel %vm7861_vm6, %v9468_v19, %v7858_v30  ;;  %v7870_v31 = vmul.f32 %v9472_v9, %v13243_v29  ;;  %9473 = vpow2.f32 %v9103_v39  ;;  %v5509_v8 = vadd.f32 %v5508_v12, %v11970_v4  ;;  %v15483_v4 = vld [vmem:[#allocation79_spill] sm:$0xff] }
 0x7ed   : > { %6141 = vmatmul.f32.gmra.mxu1 %v15482_v26  ;;  %v7867_v48 = vsel %vm7864_vm7, %v7866_v45, %v7862_v60  ;;  %9475 = vrcp.f32 %v13261_v15  ;;  %v6469_v54 = vpop.f32.mrf.mxu2  ;;  %v6870_v41 = vpop.f32.mrf.mxu3  ;;  %v7878_v19 = vand.u32 2147483647, %v13243_v29  ;;  %vm7875_vm8 = vweird.f32 %v9472_v9 }
 0x7ee   : > { %8943 = vst.msk [vmem:[%s12845_s14 + $0xb8] sm:$0xff] %vm8919_vm4, %v7867_v48  ;;  %v7871_v63 = vsub.f32 1.0, %v7870_v31  ;;  %v6470_v28 = vadd.f32 %v6469_v54, %v12932_v14  ;;  %5587 = vmatmul.f32.gmra.mxu0 %v15481_v18  ;;  %v13274_v30 = vadd.f32 %v6046_v1, %v5509_v8  ;;  %vm7876_vm10 = vmor %vm7874_vm9, %vm7875_vm8  ;;  %v7881_v12 = vor.u32 1.1754944e-38, %v7880_v57  ;;  %v15484_v48 = vld [vmem:[#allocation244_spill] sm:$0xff] }
 0x7ef   : > { %vm7879_vm11 = vcmp.eq.f32.partialorder %v7878_v19, 8.507059e+37  ;;  %v15485_v54 = vand.u32 4294901760, %v15484_v48  ;;  %v7895_v19 = vand.u32 2147483648, %v13261_v15  ;;  %vm7889_vm13 = vweird.f32 %v13261_v15 }
 0x7f0   : > { %v7872_v10 = vmul.f32 %v9472_v9, %v7871_v63  ;;  %v6867_v0 = vadd.f32 %v6866_v22, %v6470_v28  ;;  %v15486_v28 = vld [vmem:[#allocation114_spill] sm:$0xff] }
 0x7f2   : > { %v6052_v39 = vpop.f32.mrf.mxu1  ;;  %v9474_v45 = vpop.eup %9473  ;;  %v7873_v60 = vadd.f32 %v9472_v9, %v7872_v10  ;;  %v9104_v31 = vmul.f32 -1.442695, %v6867_v0  ;;  %6536 = vmatmul.f32.gmra.mxu2 %v15480_v47  ;;  %6937 = vmatmul.f32.gmra.mxu3 %v15483_v4 }
 0x7f3   : > { %v9476_v14 = vpop.eup %9475  ;;  %v13279_v18 = vadd.f32 1.0, %v9474_v45  ;;  %v5513_v26 = vpop.f32.mrf.mxu0 }
 0x7f4   : > { %v7877_v22 = vsel %vm7876_vm10, %v9472_v9, %v7873_v60  ;;  %v7885_v1 = vmul.f32 %v9476_v14, %v13261_v15  ;;  %9477 = vpow2.f32 %v9104_v31  ;;  %v5514_v57 = vadd.f32 %v5513_v26, %v15486_v28 }
 0x7f5   : > { %6147 = vmatmul.f32.gmra.mxu1 %v15485_v54  ;;  %v7882_v29 = vsel %vm7879_vm11, %v7881_v12, %v7877_v22  ;;  %9479 = vrcp.f32 %v13279_v18  ;;  %v6473_v47 = vpop.f32.mrf.mxu2  ;;  %v6874_v63 = vpop.f32.mrf.mxu3  ;;  %v7893_v9 = vand.u32 2147483647, %v13261_v15  ;;  %vm7890_vm12 = vweird.f32 %v9476_v14 }
 0x7f6   : > { %8944 = vst.msk [vmem:[%s12845_s14 + $0xc0] sm:$0xff] %vm8919_vm4, %v7882_v29  ;;  %v7886_v8 = vsub.f32 1.0, %v7885_v1  ;;  %v6474_v10 = vadd.f32 %v6473_v47, %v12950_v50  ;;  %5592 = vmatmul.f32.gmra.mxu0 %v15484_v48  ;;  %v13292_v60 = vadd.f32 %v6052_v39, %v5514_v57  ;;  %v15487_v50 = vld [vmem:[#allocation81_spill] sm:$0xff]  ;;  %vm7891_vm14 = vmor %vm7889_vm13, %vm7890_vm12  ;;  %v7896_v48 = vor.u32 1.1754944e-38, %v7895_v19  ;;  %v15488_v47 = vld [vmem:[#allocation112_spill] sm:$0xff] }
 0x7f7   : > { %vm7894_vm15 = vcmp.eq.f32.partialorder %v7893_v9, 8.507059e+37  ;;  %v7910_v9 = vand.u32 2147483648, %v13279_v18  ;;  %vm7904_vm1 = vweird.f32 %v13279_v18 }
 0x7f8   : > { %v7887_v0 = vmul.f32 %v9476_v14, %v7886_v8  ;;  %v6871_v45 = vadd.f32 %v6870_v41, %v6474_v10  ;;  %v15489_v8 = vand.u32 4294901760, %v15488_v47  ;;  %v15490_v10 = vld [vmem:[#allocation246_spill] sm:$0xff] }
 0x7fa   : > { %v6058_v31 = vpop.f32.mrf.mxu1  ;;  %v9478_v12 = vpop.eup %9477  ;;  %v7888_v22 = vadd.f32 %v9476_v14, %v7887_v0  ;;  %v9105_v1 = vmul.f32 -1.442695, %v6871_v45  ;;  %6540 = vmatmul.f32.gmra.mxu2 %v15483_v4  ;;  %6941 = vmatmul.f32.gmra.mxu3 %v15487_v50 }
 0x7fb   : > { %v9480_v26 = vpop.eup %9479  ;;  %v13297_v54 = vadd.f32 1.0, %v9478_v12  ;;  %v5518_v29 = vpop.f32.mrf.mxu0 }
 0x7fc   : > { %v7892_v41 = vsel %vm7891_vm14, %v9476_v14, %v7888_v22  ;;  %v7900_v39 = vmul.f32 %v9480_v26, %v13279_v18  ;;  %9481 = vpow2.f32 %v9105_v1  ;;  %v5519_v19 = vadd.f32 %v5518_v29, %v15490_v10 }
 0x7fd   : > { %6153 = vmatmul.f32.gmra.mxu1 %v15489_v8  ;;  %v7897_v15 = vsel %vm7894_vm15, %v7896_v48, %v7892_v41  ;;  %9483 = vrcp.f32 %v13297_v54  ;;  %v6477_v4 = vpop.f32.mrf.mxu2  ;;  %v6878_v28 = vpop.f32.mrf.mxu3  ;;  %v7908_v14 = vand.u32 2147483647, %v13279_v18  ;;  %vm7905_vm0 = vweird.f32 %v9480_v26 }
 0x7fe   : > { %8945 = vst.msk [vmem:[%s12845_s14 + $0xc8] sm:$0xff] %vm8919_vm4, %v7897_v15  ;;  %v7901_v57 = vsub.f32 1.0, %v7900_v39  ;;  %v6478_v0 = vadd.f32 %v6477_v4, %v12968_v35  ;;  %5597 = vmatmul.f32.gmra.mxu0 %v15488_v47  ;;  %v13310_v22 = vadd.f32 %v6058_v31, %v5519_v19  ;;  %v15491_v35 = vld [vmem:[#allocation83_spill] sm:$0xff]  ;;  %vm7906_vm2 = vmor %vm7904_vm1, %vm7905_vm0  ;;  %v7911_v47 = vor.u32 1.1754944e-38, %v7910_v9  ;;  %v15492_v4 = vld [vmem:[#allocation245_spill] sm:$0xff] }
 0x7ff   : > { %vm7909_vm3 = vcmp.eq.f32.partialorder %v7908_v14, 8.507059e+37  ;;  %v7925_v14 = vand.u32 2147483648, %v13297_v54  ;;  %vm7919_vm6 = vweird.f32 %v13297_v54 }
 0x800   : > { %v7902_v45 = vmul.f32 %v9480_v26, %v7901_v57  ;;  %v6875_v12 = vadd.f32 %v6874_v63, %v6478_v0  ;;  %v15493_v57 = vand.u32 4294901760, %v15492_v4 }
 0x802   : > { %v6064_v1 = vpop.f32.mrf.mxu1  ;;  %v9482_v48 = vpop.eup %9481  ;;  %v7903_v41 = vadd.f32 %v9480_v26, %v7902_v45  ;;  %v9106_v39 = vmul.f32 -1.442695, %v6875_v12  ;;  %6544 = vmatmul.f32.gmra.mxu2 %v15487_v50  ;;  %6945 = vmatmul.f32.gmra.mxu3 %v15491_v35 }
 0x803   : > { %v9484_v29 = vpop.eup %9483  ;;  %v13315_v8 = vadd.f32 1.0, %v9482_v48  ;;  %v5523_v15 = vpop.f32.mrf.mxu0 }
 0x804   : > { %v7907_v63 = vsel %vm7906_vm2, %v9480_v26, %v7903_v41  ;;  %v7915_v31 = vmul.f32 %v9484_v29, %v13297_v54  ;;  %9485 = vpow2.f32 %v9106_v39  ;;  %v5524_v0 = vadd.f32 %v5523_v15, %v12028_v36  ;;  %v15494_v36 = vld [vmem:[#allocation85_spill] sm:$0xff] }
 0x805   : > { %6159 = vmatmul.f32.gmra.mxu1 %v15493_v57  ;;  %v7912_v18 = vsel %vm7909_vm3, %v7911_v47, %v7907_v63  ;;  %9487 = vrcp.f32 %v13315_v8  ;;  %v6481_v50 = vpop.f32.mrf.mxu2  ;;  %v6882_v10 = vpop.f32.mrf.mxu3  ;;  %v7923_v26 = vand.u32 2147483647, %v13297_v54  ;;  %vm7920_vm5 = vweird.f32 %v9484_v29 }
 0x806   : > { %8946 = vst.msk [vmem:[%s12845_s14 + $0xd0] sm:$0xff] %vm8919_vm4, %v7912_v18  ;;  %v7916_v19 = vsub.f32 1.0, %v7915_v31  ;;  %v6482_v9 = vadd.f32 %v6481_v50, %v12986_v34  ;;  %5602 = vmatmul.f32.gmra.mxu0 %v15492_v4  ;;  %v13328_v48 = vadd.f32 %v6064_v1, %v5524_v0  ;;  %vm7921_vm7 = vmor %vm7919_vm6, %vm7920_vm5  ;;  %v7926_v15 = vor.u32 1.1754944e-38, %v7925_v14 }
 0x807   : > { %vm7924_vm8 = vcmp.eq.f32.partialorder %v7923_v26, 8.507059e+37  ;;  %v15495_v57 = vand.u32 4294901760, %v12008_v51  ;;  %vm7934_vm10 = vweird.f32 %v13315_v8 }
 0x808   : > { %v7917_v45 = vmul.f32 %v9484_v29, %v7916_v19  ;;  %v6879_v12 = vadd.f32 %v6878_v28, %v6482_v9  ;;  %v7940_v9 = vand.u32 2147483648, %v13315_v8 }
 0x80a   : > { %v6070_v41 = vpop.f32.mrf.mxu1  ;;  %v9486_v39 = vpop.eup %9485  ;;  %v7918_v47 = vadd.f32 %v9484_v29, %v7917_v45  ;;  %v9107_v63 = vmul.f32 -1.442695, %v6879_v12  ;;  %6548 = vmatmul.f32.gmra.mxu2 %v15491_v35  ;;  %6949 = vmatmul.f32.gmra.mxu3 %v15494_v36 }
 0x80b   : > { %v9488_v34 = vpop.eup %9487  ;;  %v13333_v31 = vadd.f32 1.0, %v9486_v39  ;;  %v5528_v4 = vpop.f32.mrf.mxu0 }
 0x80c   : > { %v7922_v28 = vsel %vm7921_vm7, %v9484_v29, %v7918_v47  ;;  %v7930_v1 = vmul.f32 %v9488_v34, %v13315_v8  ;;  %9489 = vpow2.f32 %v9107_v63  ;;  %v5529_v19 = vadd.f32 %v5528_v4, %v12049_v55  ;;  %v15496_v55 = vld [vmem:[#allocation87_spill] sm:$0xff] }
 0x80d   : > { %6165 = vmatmul.f32.gmra.mxu1 %v15495_v57  ;;  %v7927_v54 = vsel %vm7924_vm8, %v7926_v15, %v7922_v28  ;;  %9491 = vrcp.f32 %v13333_v31  ;;  %v6485_v35 = vpop.f32.mrf.mxu2  ;;  %v6886_v18 = vpop.f32.mrf.mxu3  ;;  %v7938_v29 = vand.u32 2147483647, %v13315_v8  ;;  %vm7935_vm9 = vweird.f32 %v9488_v34 }
 0x80e   : > { %8947 = vst.msk [vmem:[%s12845_s14 + $0xd8] sm:$0xff] %vm8919_vm4, %v7927_v54  ;;  %v7931_v50 = vsub.f32 1.0, %v7930_v1  ;;  %v6486_v0 = vadd.f32 %v6485_v35, %v13004_v2  ;;  %5607 = vmatmul.f32.gmra.mxu0 %v12008_v51  ;;  %v13346_v45 = vadd.f32 %v6070_v41, %v5529_v19  ;;  %vm7936_vm11 = vmor %vm7934_vm10, %vm7935_vm9  ;;  %v7941_v2 = vor.u32 1.1754944e-38, %v7940_v9 }
 0x80f   : > { %vm7939_vm12 = vcmp.eq.f32.partialorder %v7938_v29, 8.507059e+37  ;;  %v15497_v28 = vand.u32 4294901760, %v12033_v27  ;;  %vm7949_vm14 = vweird.f32 %v13333_v31 }
 0x810   : > { %v7932_v26 = vmul.f32 %v9488_v34, %v7931_v50  ;;  %v6883_v14 = vadd.f32 %v6882_v10, %v6486_v0  ;;  %v7955_v50 = vand.u32 2147483648, %v13333_v31 }
 0x812   : > { %v6076_v12 = vpop.f32.mrf.mxu1  ;;  %v9490_v39 = vpop.eup %9489  ;;  %v7933_v47 = vadd.f32 %v9488_v34, %v7932_v26  ;;  %v9108_v63 = vmul.f32 -1.442695, %v6883_v14  ;;  %6552 = vmatmul.f32.gmra.mxu2 %v15494_v36  ;;  %6953 = vmatmul.f32.gmra.mxu3 %v15496_v55 }
 0x813   : > { %v9492_v51 = vpop.eup %9491  ;;  %v13351_v15 = vadd.f32 1.0, %v9490_v39  ;;  %v5533_v4 = vpop.f32.mrf.mxu0 }
 0x814   : > { %v7937_v10 = vsel %vm7936_vm11, %v9488_v34, %v7933_v47  ;;  %v7945_v41 = vmul.f32 %v9492_v51, %v13333_v31  ;;  %9493 = vpow2.f32 %v9108_v63  ;;  %v5534_v54 = vadd.f32 %v5533_v4, %v12070_v13  ;;  %v15498_v13 = vld [vmem:[#allocation89_spill] sm:$0xff] }
 0x815   : > { %6171 = vmatmul.f32.gmra.mxu1 %v15497_v28  ;;  %v7942_v8 = vsel %vm7939_vm12, %v7941_v2, %v7937_v10  ;;  %9495 = vrcp.f32 %v13351_v15  ;;  %v6489_v36 = vpop.f32.mrf.mxu2  ;;  %v6890_v1 = vpop.f32.mrf.mxu3  ;;  %v7953_v34 = vand.u32 2147483647, %v13333_v31  ;;  %vm7950_vm13 = vweird.f32 %v9492_v51 }
 0x816   : > { %8948 = vst.msk [vmem:[%s12845_s14 + $0xe0] sm:$0xff] %vm8919_vm4, %v7942_v8  ;;  %v7946_v57 = vsub.f32 1.0, %v7945_v41  ;;  %v6490_v35 = vadd.f32 %v6489_v36, %v13022_v38  ;;  %5612 = vmatmul.f32.gmra.mxu0 %v12033_v27  ;;  %v13364_v29 = vadd.f32 %v6076_v12, %v5534_v54  ;;  %vm7951_vm15 = vmor %vm7949_vm14, %vm7950_vm13  ;;  %v7956_v38 = vor.u32 1.1754944e-38, %v7955_v50 }
 0x817   : > { %vm7954_vm0 = vcmp.eq.f32.partialorder %v7953_v34, 8.507059e+37  ;;  %v15499_v2 = vand.u32 4294901760, %v12055_v21  ;;  %v7970_v8 = vand.u32 2147483648, %v13351_v15  ;;  %vm7964_vm2 = vweird.f32 %v13351_v15 }
 0x818   : > { %v7947_v19 = vmul.f32 %v9492_v51, %v7946_v57  ;;  %v6887_v0 = vadd.f32 %v6886_v18, %v6490_v35 }
 0x81a   : > { %v6082_v9 = vpop.f32.mrf.mxu1  ;;  %v9494_v26 = vpop.eup %9493  ;;  %v7948_v14 = vadd.f32 %v9492_v51, %v7947_v19  ;;  %v9109_v39 = vmul.f32 -1.442695, %v6887_v0  ;;  %6556 = vmatmul.f32.gmra.mxu2 %v15496_v55  ;;  %6957 = vmatmul.f32.gmra.mxu3 %v15498_v13 }
 0x81b   : > { %v9496_v27 = vpop.eup %9495  ;;  %v13369_v47 = vadd.f32 1.0, %v9494_v26  ;;  %v5538_v63 = vpop.f32.mrf.mxu0 }
 0x81c   : > { %v7952_v18 = vsel %vm7951_vm15, %v9492_v51, %v7948_v14  ;;  %v7960_v12 = vmul.f32 %v9496_v27, %v13351_v15  ;;  %9497 = vpow2.f32 %v9109_v39  ;;  %v5539_v41 = vadd.f32 %v5538_v63, %v12096_v46  ;;  %v15500_v46 = vld [vmem:[#allocation91_spill] sm:$0xff] }
 0x81d   : > { %6177 = vmatmul.f32.gmra.mxu1 %v15499_v2  ;;  %v7957_v31 = vsel %vm7954_vm0, %v7956_v38, %v7952_v18  ;;  %9499 = vrcp.f32 %v13369_v47  ;;  %v6493_v55 = vpop.f32.mrf.mxu2  ;;  %v6894_v4 = vpop.f32.mrf.mxu3  ;;  %v7968_v51 = vand.u32 2147483647, %v13351_v15  ;;  %vm7965_vm1 = vweird.f32 %v9496_v27 }
 0x81e   : > { %8949 = vst.msk [vmem:[%s12845_s14 + $0xe8] sm:$0xff] %vm8919_vm4, %v7957_v31  ;;  %v7961_v10 = vsub.f32 1.0, %v7960_v12  ;;  %v6494_v28 = vadd.f32 %v6493_v55, %v13040_v17  ;;  %5617 = vmatmul.f32.gmra.mxu0 %v12055_v21  ;;  %v13382_v54 = vadd.f32 %v6082_v9, %v5539_v41  ;;  %vm7966_vm3 = vmor %vm7964_vm2, %vm7965_vm1  ;;  %v7971_v17 = vor.u32 1.1754944e-38, %v7970_v8 }
 0x81f   : > { %vm7969_vm5 = vcmp.eq.f32.partialorder %v7968_v51, 8.507059e+37  ;;  %v15501_v14 = vand.u32 4294901760, %v12076_v11  ;;  %v7985_v12 = vand.u32 2147483648, %v13369_v47  ;;  %vm7979_vm7 = vweird.f32 %v13369_v47 }
 0x820   : > { %v7962_v36 = vmul.f32 %v9496_v27, %v7961_v10  ;;  %v6891_v57 = vadd.f32 %v6890_v1, %v6494_v28 }
 0x822   : > { %v6088_v35 = vpop.f32.mrf.mxu1  ;;  %v9498_v34 = vpop.eup %9497  ;;  %v7963_v50 = vadd.f32 %v9496_v27, %v7962_v36  ;;  %v9110_v19 = vmul.f32 -1.442695, %v6891_v57  ;;  %6560 = vmatmul.f32.gmra.mxu2 %v15498_v13  ;;  %6961 = vmatmul.f32.gmra.mxu3 %v15500_v46 }
 0x823   : > { %v9500_v21 = vpop.eup %9499  ;;  %v13387_v0 = vadd.f32 1.0, %v9498_v34  ;;  %v5543_v26 = vpop.f32.mrf.mxu0 }
 0x824   : > { %v7967_v1 = vsel %vm7966_vm3, %v9496_v27, %v7963_v50  ;;  %v7975_v9 = vmul.f32 %v9500_v21, %v13369_v47  ;;  %9501 = vpow2.f32 %v9110_v19  ;;  %v5544_v63 = vadd.f32 %v5543_v26, %v12117_v43  ;;  %v15502_v43 = vld [vmem:[#allocation93_spill] sm:$0xff] }
 0x825   : > { %6183 = vmatmul.f32.gmra.mxu1 %v15501_v14  ;;  %v7972_v15 = vsel %vm7969_vm5, %v7971_v17, %v7967_v1  ;;  %9503 = vrcp.f32 %v13387_v0  ;;  %v6497_v39 = vpop.f32.mrf.mxu2  ;;  %v6898_v13 = vpop.f32.mrf.mxu3  ;;  %v7983_v27 = vand.u32 2147483647, %v13369_v47  ;;  %vm7980_vm6 = vweird.f32 %v9500_v21 }
 0x826   : > { %8950 = vst.msk [vmem:[%s12845_s14 + $0xf0] sm:$0xff] %vm8919_vm4, %v7972_v15  ;;  %v7976_v38 = vsub.f32 1.0, %v7975_v9  ;;  %v6498_v18 = vadd.f32 %v6497_v39, %v13058_v49  ;;  %5622 = vmatmul.f32.gmra.mxu0 %v12076_v11  ;;  %v13400_v55 = vadd.f32 %v6088_v35, %v5544_v63  ;;  %vm7981_vm8 = vmor %vm7979_vm7, %vm7980_vm6  ;;  %v7986_v49 = vor.u32 1.1754944e-38, %v7985_v12 }
 0x827   : > { %vm7984_vm9 = vcmp.eq.f32.partialorder %v7983_v27, 8.507059e+37  ;;  %v15503_v35 = vand.u32 4294901760, %v12102_v42  ;;  %v8000_v26 = vand.u32 2147483648, %v13387_v0  ;;  %vm7994_vm11 = vweird.f32 %v13387_v0 }
 0x828   : > { %v7977_v2 = vmul.f32 %v9500_v21, %v7976_v38  ;;  %v6895_v31 = vadd.f32 %v6894_v4, %v6498_v18 }
 0x82a   : > { %v6094_v10 = vpop.f32.mrf.mxu1  ;;  %v9502_v41 = vpop.eup %9501  ;;  %v7978_v28 = vadd.f32 %v9500_v21, %v7977_v2  ;;  %v9111_v51 = vmul.f32 -1.442695, %v6895_v31  ;;  %6564 = vmatmul.f32.gmra.mxu2 %v15500_v46  ;;  %6965 = vmatmul.f32.gmra.mxu3 %v15502_v43  ;;  %v15505_v2 = vand.u32 4294901760, %v12123_v52 }
 0x82b   : > { %v9504_v11 = vpop.eup %9503  ;;  %v13405_v8 = vadd.f32 1.0, %v9502_v41  ;;  %v5548_v36 = vpop.f32.mrf.mxu0 }
 0x82c   : > { %v7982_v4 = vsel %vm7981_vm8, %v9500_v21, %v7978_v28  ;;  %v7990_v57 = vmul.f32 %v9504_v11, %v13387_v0  ;;  %9505 = vpow2.f32 %v9111_v51  ;;  %v5549_v46 = vadd.f32 %v5548_v36, %v12138_v3  ;;  %v15504_v3 = vld [vmem:[#allocation95_spill] sm:$0xff] }
 0x82d   : > { %6189 = vmatmul.f32.gmra.mxu1 %v15503_v35  ;;  %v7987_v47 = vsel %vm7984_vm9, %v7986_v49, %v7982_v4  ;;  %9507 = vrcp.f32 %v13405_v8  ;;  %v6501_v34 = vpop.f32.mrf.mxu2  ;;  %v6902_v50 = vpop.f32.mrf.mxu3  ;;  %v7998_v21 = vand.u32 2147483647, %v13387_v0  ;;  %vm7995_vm10 = vweird.f32 %v9504_v11 }
 0x82e   : > { %8951 = vst.msk [vmem:[%s12845_s14 + $0xf8] sm:$0xff] %vm8919_vm4, %v7987_v47  ;;  %v7991_v19 = vsub.f32 1.0, %v7990_v57  ;;  %v6502_v17 = vadd.f32 %v6501_v34, %v13076_v33  ;;  %5627 = vmatmul.f32.gmra.mxu0 %v12102_v42  ;;  %v13418_v14 = vadd.f32 %v6094_v10, %v5549_v46  ;;  %vm7996_vm12 = vmor %vm7994_vm11, %vm7995_vm10  ;;  %v8001_v33 = vor.u32 1.1754944e-38, %v8000_v26 }
 0x82f   : > { %vm7999_vm13 = vcmp.eq.f32.partialorder %v7998_v21, 8.507059e+37  ;;  %vm8009_vm15 = vweird.f32 %v13405_v8  ;;  %v15507_v21 = vand.u32 4294901760, %v12144_v59 }
 0x830   : > { %v7992_v1 = vmul.f32 %v9504_v11, %v7991_v19  ;;  %v6899_v9 = vadd.f32 %v6898_v13, %v6502_v17 }
 0x832   : > { %v6100_v15 = vpop.f32.mrf.mxu1  ;;  %v9506_v39 = vpop.eup %9505  ;;  %v7993_v38 = vadd.f32 %v9504_v11, %v7992_v1  ;;  %v9112_v63 = vmul.f32 -1.442695, %v6899_v9  ;;  %6568 = vmatmul.f32.gmra.mxu2 %v15502_v43  ;;  %6969 = vmatmul.f32.gmra.mxu3 %v15504_v3  ;;  %v8013_v43 = vand.u32 2147483647, %v13405_v8 }
 0x833   : > { %v9508_v42 = vpop.eup %9507  ;;  %v13423_v18 = vadd.f32 1.0, %v9506_v39  ;;  %v5553_v27 = vpop.f32.mrf.mxu0 }
 0x834   : > { %v7997_v13 = vsel %vm7996_vm12, %v9504_v11, %v7993_v38  ;;  %v8005_v12 = vmul.f32 %v9508_v42, %v13405_v8  ;;  %9509 = vpow2.f32 %v9112_v63  ;;  %v5554_v28 = vadd.f32 %v5553_v27, %v12159_v53  ;;  %v15506_v53 = vld [vmem:[#allocation97_spill] sm:$0xff] }
 0x835   : > { %6195 = vmatmul.f32.gmra.mxu1 %v15505_v2  ;;  %v8002_v0 = vsel %vm7999_vm13, %v8001_v33, %v7997_v13  ;;  %9511 = vrcp.f32 %v13423_v18  ;;  %v6505_v31 = vpop.f32.mrf.mxu2  ;;  %v6906_v10 = vpop.f32.mrf.mxu3  ;;  %v8015_v11 = vand.u32 2147483648, %v13405_v8  ;;  %vm8010_vm14 = vweird.f32 %v9508_v42 }
 0x836   : > { %8952 = vst.msk [vmem:[%s12845_s14 + $0x100] sm:$0xff] %vm8919_vm4, %v8002_v0  ;;  %v8006_v41 = vsub.f32 1.0, %v8005_v12  ;;  %v6506_v51 = vadd.f32 %v6505_v31, %v13094_v25  ;;  %5632 = vmatmul.f32.gmra.mxu0 %v12123_v52  ;;  %v13436_v4 = vadd.f32 %v6100_v15, %v5554_v28  ;;  %vm8011_vm0 = vmor %vm8009_vm15, %vm8010_vm14  ;;  %vm8014_vm1 = vcmp.eq.f32.partialorder %v8013_v43, 8.507059e+37 }
 0x837   : > { %v8016_v25 = vor.u32 1.1754944e-38, %v8015_v11  ;;  %v8028_v38 = vand.u32 2147483647, %v13423_v18  ;;  %v8030_v63 = vand.u32 2147483648, %v13423_v18  ;;  %vm8024_vm3 = vweird.f32 %v13423_v18 }
 0x838   : > { %v8007_v49 = vmul.f32 %v9508_v42, %v8006_v41  ;;  %v6903_v36 = vadd.f32 %v6902_v50, %v6506_v51  ;;  %v15509_v28 = vand.u32 4294901760, %v12165_v44 }
 0x839   : > { %vm8029_vm6 = vcmp.eq.f32.partialorder %v8028_v38, 8.507059e+37 }
 0x83a   : > { %v6106_v57 = vpop.f32.mrf.mxu1  ;;  %v9510_v35 = vpop.eup %9509  ;;  %v8008_v47 = vadd.f32 %v9508_v42, %v8007_v49  ;;  %v9113_v34 = vmul.f32 -1.442695, %v6903_v36  ;;  %6572 = vmatmul.f32.gmra.mxu2 %v15504_v3  ;;  %6973 = vmatmul.f32.gmra.mxu3 %v15506_v53 }
 0x83b   : > { %v9512_v52 = vpop.eup %9511  ;;  %v13441_v19 = vadd.f32 1.0, %v9510_v35  ;;  %v5558_v46 = vpop.f32.mrf.mxu0 }
 0x83c   : > { %v8012_v50 = vsel %vm8011_vm0, %v9508_v42, %v8008_v47  ;;  %v8020_v17 = vmul.f32 %v9512_v52, %v13423_v18  ;;  %9513 = vpow2.f32 %v9113_v34  ;;  %v5559_v15 = vadd.f32 %v5558_v46, %v12180_v37  ;;  %v15508_v37 = vld [vmem:[#allocation99_spill] sm:$0xff] }
 0x83d   : > { %6201 = vmatmul.f32.gmra.mxu1 %v15507_v21  ;;  %v8017_v8 = vsel %vm8014_vm1, %v8016_v25, %v8012_v50  ;;  %9515 = vrcp.f32 %v13441_v19  ;;  %v6509_v26 = vpop.f32.mrf.mxu2  ;;  %v6910_v1 = vpop.f32.mrf.mxu3  ;;  %vm8025_vm2 = vweird.f32 %v9512_v52  ;;  %v8045_v35 = vand.u32 2147483648, %v13441_v19 }
 0x83e   : > { %8953 = vst.msk [vmem:[%s12845_s14 + $0x108] sm:$0xff] %vm8919_vm4, %v8017_v8  ;;  %v8021_v9 = vsub.f32 1.0, %v8020_v17  ;;  %v6510_v39 = vadd.f32 %v6509_v26, %v13112_v58  ;;  %5637 = vmatmul.f32.gmra.mxu0 %v12144_v59  ;;  %v13454_v33 = vadd.f32 %v6106_v57, %v5559_v15  ;;  %vm8026_vm5 = vmor %vm8024_vm3, %vm8025_vm2  ;;  %v8031_v58 = vor.u32 1.1754944e-38, %v8030_v63 }
 0x83f   : > { %v8043_v57 = vand.u32 2147483647, %v13441_v19  ;;  %vm8039_vm8 = vweird.f32 %v13441_v19 }
 0x840   : > { %v8022_v3 = vmul.f32 %v9512_v52, %v8021_v9  ;;  %v6907_v42 = vadd.f32 %v6906_v10, %v6510_v39 }
 0x841   : > { %vm8044_vm10 = vcmp.eq.f32.partialorder %v8043_v57, 8.507059e+37 }
 0x842   : > { %v6112_v27 = vpop.f32.mrf.mxu1  ;;  %v9514_v13 = vpop.eup %9513  ;;  %v8023_v12 = vadd.f32 %v9512_v52, %v8022_v3  ;;  %v9114_v2 = vmul.f32 -1.442695, %v6907_v42  ;;  %6576 = vmatmul.f32.gmra.mxu2 %v15506_v53  ;;  %6977 = vmatmul.f32.gmra.mxu3 %v15508_v37 }
 0x843   : > { %v9516_v59 = vpop.eup %9515  ;;  %v13459_v0 = vadd.f32 1.0, %v9514_v13  ;;  %v5563_v31 = vpop.f32.mrf.mxu0 }
 0x844   : > { %v8027_v10 = vsel %vm8026_vm5, %v9512_v52, %v8023_v12  ;;  %v8035_v41 = vmul.f32 %v9516_v59, %v13441_v19  ;;  %9517 = vpow2.f32 %v9114_v2  ;;  %v5564_v49 = vadd.f32 %v5563_v31, %v12201_v5  ;;  %v15510_v5 = vld [vmem:[#allocation101_spill] sm:$0xff] }
 0x845   : > { %6207 = vmatmul.f32.gmra.mxu1 %v15509_v28  ;;  %v8032_v18 = vsel %vm8029_vm6, %v8031_v58, %v8027_v10  ;;  %9519 = vrcp.f32 %v13459_v0  ;;  %v6513_v51 = vpop.f32.mrf.mxu2  ;;  %v6914_v43 = vpop.f32.mrf.mxu3  ;;  %vm8040_vm7 = vweird.f32 %v9516_v59  ;;  %v8058_v3 = vand.u32 2147483647, %v13459_v0 }
 0x846   : > { %8954 = vst.msk [vmem:[%s12845_s14 + $0x110] sm:$0xff] %vm8919_vm4, %v8032_v18  ;;  %v8036_v11 = vsub.f32 1.0, %v8035_v41  ;;  %v6514_v36 = vadd.f32 %v6513_v51, %v13130_v32  ;;  %5642 = vmatmul.f32.gmra.mxu0 %v12165_v44  ;;  %v13472_v53 = vadd.f32 %v6112_v27, %v5564_v49  ;;  %vm8041_vm9 = vmor %vm8039_vm8, %vm8040_vm7  ;;  %v8046_v32 = vor.u32 1.1754944e-38, %v8045_v35  ;;  %v15514_v49 = vld [vmem:[#allocation155_spill] sm:$0xff] }
 0x847   : > { %v8060_v42 = vand.u32 2147483648, %v13459_v0  ;;  %vm8054_vm12 = vweird.f32 %v13459_v0  ;;  %vm8059_vm14 = vcmp.eq.f32.partialorder %v8058_v3, 8.507059e+37  ;;  %v15513_v18 = vand.u32 4294901760, %v12207_v24 }
 0x848   : > { %v8037_v47 = vmul.f32 %v9516_v59, %v8036_v11  ;;  %v6911_v34 = vadd.f32 %v6910_v1, %v6514_v36  ;;  %v15511_v1 = vand.u32 4294901760, %v12186_v61 }
 0x84a   : > { %v6118_v52 = vpop.f32.mrf.mxu1  ;;  %v9518_v25 = vpop.eup %9517  ;;  %v8038_v46 = vadd.f32 %v9516_v59, %v8037_v47  ;;  %v9115_v50 = vmul.f32 -1.442695, %v6911_v34  ;;  %6580 = vmatmul.f32.gmra.mxu2 %v15508_v37  ;;  %6981 = vmatmul.f32.gmra.mxu3 %v15510_v5 }
 0x84b   : > { %v9520_v44 = vpop.eup %9519  ;;  %v13477_v17 = vadd.f32 1.0, %v9518_v25  ;;  %v5568_v21 = vpop.f32.mrf.mxu0 }
 0x84c   : > { %v8042_v8 = vsel %vm8041_vm9, %v9516_v59, %v8038_v46  ;;  %v8050_v26 = vmul.f32 %v9520_v44, %v13459_v0  ;;  %9521 = vpow2.f32 %v9115_v50  ;;  %v5569_v38 = vadd.f32 %v5568_v21, %v12222_v6  ;;  %v15512_v6 = vld [vmem:[#allocation103_spill] sm:$0xff] }
 0x84d   : > { %6213 = vmatmul.f32.gmra.mxu1 %v15511_v1  ;;  %v8047_v19 = vsel %vm8044_vm10, %v8046_v32, %v8042_v8  ;;  %9523 = vrcp.f32 %v13477_v17  ;;  %v6517_v9 = vpop.f32.mrf.mxu2  ;;  %v6918_v15 = vpop.f32.mrf.mxu3  ;;  %vm8055_vm11 = vweird.f32 %v9520_v44  ;;  %v8073_v35 = vand.u32 2147483647, %v13477_v17 }
 0x84e   : > { %8955 = vst.msk [vmem:[%s12845_s14 + $0x118] sm:$0xff] %vm8919_vm4, %v8047_v19  ;;  %v8051_v39 = vsub.f32 1.0, %v8050_v26  ;;  %v6518_v63 = vadd.f32 %v6517_v9, %v13148_v40  ;;  %5647 = vmatmul.f32.gmra.mxu0 %v12186_v61  ;;  %v13490_v12 = vadd.f32 %v6118_v52, %v5569_v38  ;;  %vm8056_vm13 = vmor %vm8054_vm12, %vm8055_vm11  ;;  %v8061_v40 = vor.u32 1.1754944e-38, %v8060_v42  ;;  %v15516_v19 = vld [vmem:[#allocation158_spill] sm:$0xff] }
 0x84f   : > { %v8075_v47 = vand.u32 2147483648, %v13477_v17  ;;  %vm8069_vm0 = vweird.f32 %v13477_v17  ;;  %vm8074_vm2 = vcmp.eq.f32.partialorder %v8073_v35, 8.507059e+37  ;;  %v15517_v9 = vand.u32 4294901760, %v15516_v19  ;;  %v15522_v35 = vld [vmem:[#allocation132_spill] sm:$0xff] }
 0x850   : > { %v8052_v27 = vmul.f32 %v9520_v44, %v8051_v39  ;;  %v6915_v13 = vadd.f32 %v6914_v43, %v6518_v63  ;;  %v15518_v63 = vld [vmem:[#allocation130_spill] sm:$0xff] }
 0x851   : > { %v8076_v32 = vor.u32 1.1754944e-38, %v8075_v47 }
 0x852   : > { %v6124_v2 = vpop.f32.mrf.mxu1  ;;  %v9522_v37 = vpop.eup %9521  ;;  %v8053_v59 = vadd.f32 %v9520_v44, %v8052_v27  ;;  %v9116_v58 = vmul.f32 -1.442695, %v6915_v13  ;;  %6584 = vmatmul.f32.gmra.mxu2 %v15510_v5  ;;  %6985 = vmatmul.f32.gmra.mxu3 %v15512_v6 }
 0x853   : > { %v9524_v61 = vpop.eup %9523  ;;  %v13495_v31 = vadd.f32 1.0, %v9522_v37  ;;  %v5573_v10 = vpop.f32.mrf.mxu0 }
 0x854   : > { %v8057_v41 = vsel %vm8056_vm13, %v9520_v44, %v8053_v59  ;;  %v8065_v28 = vmul.f32 %v9524_v61, %v13477_v17  ;;  %9525 = vpow2.f32 %v9116_v58  ;;  %v5574_v36 = vadd.f32 %v5573_v10, %v15514_v49 }
 0x855   : > { %6219 = vmatmul.f32.gmra.mxu1 %v15513_v18  ;;  %v8062_v0 = vsel %vm8059_vm14, %v8061_v40, %v8057_v41  ;;  %9527 = vrcp.f32 %v13495_v31  ;;  %v6521_v51 = vpop.f32.mrf.mxu2  ;;  %v6922_v43 = vpop.f32.mrf.mxu3  ;;  %vm8070_vm15 = vweird.f32 %v9524_v61  ;;  %v8088_v27 = vand.u32 2147483647, %v13495_v31 }
 0x856   : > { %8956 = vst.msk [vmem:[%s12845_s14 + $0x120] sm:$0xff] %vm8919_vm4, %v8062_v0  ;;  %v8066_v11 = vsub.f32 1.0, %v8065_v28  ;;  %v6522_v57 = vadd.f32 %v6521_v51, %v13166_v7  ;;  %5652 = vmatmul.f32.gmra.mxu0 %v12207_v24  ;;  %v13508_v25 = vadd.f32 %v6124_v2, %v5574_v36  ;;  %v15515_v7 = vld [vmem:[#allocation105_spill] sm:$0xff]  ;;  %vm8071_vm1 = vmor %vm8069_vm0, %vm8070_vm15  ;;  %v8090_v13 = vand.u32 2147483648, %v13495_v31 }
 0x857   : > { %vm8084_vm5 = vweird.f32 %v13495_v31  ;;  %vm8089_vm7 = vcmp.eq.f32.partialorder %v8088_v27, 8.507059e+37  ;;  %v15526_v27 = vld [vmem:[#allocation134_spill] sm:$0xff] }
 0x858   : > { %v8067_v34 = vmul.f32 %v9524_v61, %v8066_v11  ;;  %v6919_v52 = vadd.f32 %v6918_v15, %v6522_v57  ;;  %v8091_v41 = vor.u32 1.1754944e-38, %v8090_v13 }
 0x85a   : > { %v6130_v46 = vpop.f32.mrf.mxu1  ;;  %v9526_v50 = vpop.eup %9525  ;;  %v8068_v5 = vadd.f32 %v9524_v61, %v8067_v34  ;;  %v9117_v44 = vmul.f32 -1.442695, %v6919_v52  ;;  %6588 = vmatmul.f32.gmra.mxu2 %v15512_v6  ;;  %6989 = vmatmul.f32.gmra.mxu3 %v15515_v7 }
 0x85b   : > { %v9528_v24 = vpop.eup %9527  ;;  %v13513_v21 = vadd.f32 1.0, %v9526_v50  ;;  %v5578_v8 = vpop.f32.mrf.mxu0 }
 0x85c   : > { %v8072_v26 = vsel %vm8071_vm1, %v9524_v61, %v8068_v5  ;;  %v8080_v1 = vmul.f32 %v9528_v24, %v13495_v31  ;;  %9529 = vpow2.f32 %v9117_v44  ;;  %v5579_v3 = vadd.f32 %v5578_v8, %v15518_v63 }
 0x85d   : > { %6225 = vmatmul.f32.gmra.mxu1 %v15517_v9  ;;  %v8077_v17 = vsel %vm8074_vm2, %v8076_v32, %v8072_v26  ;;  %9531 = vrcp.f32 %v13513_v21  ;;  %v6525_v15 = vpop.f32.mrf.mxu2  ;;  %v6926_v39 = vpop.f32.mrf.mxu3  ;;  %vm8085_vm3 = vweird.f32 %v9528_v24  ;;  %v8103_v52 = vand.u32 2147483647, %v13513_v21 }
 0x85e   : > { %8957 = vst.msk [vmem:[%s12845_s14 + $0x128] sm:$0xff] %vm8919_vm4, %v8077_v17  ;;  %v8081_v38 = vsub.f32 1.0, %v8080_v1  ;;  %v6526_v42 = vadd.f32 %v6525_v15, %v13184_v23  ;;  %5657 = vmatmul.f32.gmra.mxu0 %v15516_v19  ;;  %v13526_v59 = vadd.f32 %v6130_v46, %v5579_v3  ;;  %v15519_v23 = vld [vmem:[#allocation107_spill] sm:$0xff]  ;;  %vm8086_vm6 = vmor %vm8084_vm5, %vm8085_vm3  ;;  %v8105_v46 = vand.u32 2147483648, %v13513_v21 }
 0x85f   : > { %vm8099_vm9 = vweird.f32 %v13513_v21  ;;  %vm8104_vm11 = vcmp.eq.f32.partialorder %v8103_v52, 8.507059e+37  ;;  %v15530_v52 = vld [vmem:[#allocation135_spill] sm:$0xff] }
 0x860   : > { %v8082_v2 = vmul.f32 %v9528_v24, %v8081_v38  ;;  %v6923_v37 = vadd.f32 %v6922_v43, %v6526_v42  ;;  %v15520_v43 = vld [vmem:[#allocation127_spill] sm:$0xff]  ;;  %v8106_v1 = vor.u32 1.1754944e-38, %v8105_v46 }
 0x861   : > { %v15521_v11 = vand.u32 4294901760, %v15520_v43 }
 0x862   : > { %v6136_v58 = vpop.f32.mrf.mxu1  ;;  %v9530_v6 = vpop.eup %9529  ;;  %v8083_v61 = vadd.f32 %v9528_v24, %v8082_v2  ;;  %v9118_v40 = vmul.f32 -1.442695, %v6923_v37  ;;  %6592 = vmatmul.f32.gmra.mxu2 %v15515_v7  ;;  %6993 = vmatmul.f32.gmra.mxu3 %v15519_v23 }
 0x863   : > { %v9532_v10 = vpop.eup %9531  ;;  %v13531_v28 = vadd.f32 1.0, %v9530_v6  ;;  %v5583_v18 = vpop.f32.mrf.mxu0 }
 0x864   : > { %v8087_v0 = vsel %vm8086_vm6, %v9528_v24, %v8083_v61  ;;  %v8095_v51 = vmul.f32 %v9532_v10, %v13513_v21  ;;  %9533 = vpow2.f32 %v9118_v40  ;;  %v5584_v47 = vadd.f32 %v5583_v18, %v15522_v35 }
 0x865   : > { %6231 = vmatmul.f32.gmra.mxu1 %v15521_v11  ;;  %v8092_v31 = vsel %vm8089_vm7, %v8091_v41, %v8087_v0  ;;  %9535 = vrcp.f32 %v13531_v28  ;;  %v6529_v49 = vpop.f32.mrf.mxu2  ;;  %v6930_v36 = vpop.f32.mrf.mxu3  ;;  %vm8100_vm8 = vweird.f32 %v9532_v10  ;;  %v8118_v37 = vand.u32 2147483647, %v13531_v28 }
 0x866   : > { %8958 = vst.msk [vmem:[%s12845_s14 + $0x130] sm:$0xff] %vm8919_vm4, %v8092_v31  ;;  %v8096_v57 = vsub.f32 1.0, %v8095_v51  ;;  %v6530_v34 = vadd.f32 %v6529_v49, %v13202_v16  ;;  %5662 = vmatmul.f32.gmra.mxu0 %v15520_v43  ;;  %v13544_v44 = vadd.f32 %v6136_v58, %v5584_v47  ;;  %v15523_v16 = vld [vmem:[#allocation109_spill] sm:$0xff]  ;;  %vm8101_vm10 = vmor %vm8099_vm9, %vm8100_vm8  ;;  %v8120_v58 = vand.u32 2147483648, %v13531_v28 }
 0x867   : > { %vm8114_vm13 = vweird.f32 %v13531_v28  ;;  %vm8119_vm15 = vcmp.eq.f32.partialorder %v8118_v37, 8.507059e+37  ;;  %v15534_v37 = vld [vmem:[#allocation137_spill] sm:$0xff] }
 0x868   : > { %v8097_v50 = vmul.f32 %v9532_v10, %v8096_v57  ;;  %v6927_v5 = vadd.f32 %v6926_v39, %v6530_v34  ;;  %v15524_v39 = vld [vmem:[#allocation159_spill] sm:$0xff]  ;;  %v8121_v51 = vor.u32 1.1754944e-38, %v8120_v58 }
 0x869   : > { %v15525_v38 = vand.u32 4294901760, %v15524_v39 }
 0x86a   : > { %v6142_v7 = vpop.f32.mrf.mxu1  ;;  %v9534_v24 = vpop.eup %9533  ;;  %v8098_v32 = vadd.f32 %v9532_v10, %v8097_v50  ;;  %v9119_v8 = vmul.f32 -1.442695, %v6927_v5  ;;  %6596 = vmatmul.f32.gmra.mxu2 %v15519_v23  ;;  %6997 = vmatmul.f32.gmra.mxu3 %v15523_v16 }
 0x86b   : > { %v9536_v26 = vpop.eup %9535  ;;  %v13549_v19 = vadd.f32 1.0, %v9534_v24  ;;  %v5588_v9 = vpop.f32.mrf.mxu0 }
 0x86c   : > { %v8102_v17 = vsel %vm8101_vm10, %v9532_v10, %v8098_v32  ;;  %v8110_v15 = vmul.f32 %v9536_v26, %v13531_v28  ;;  %9537 = vpow2.f32 %v9119_v8  ;;  %v5589_v13 = vadd.f32 %v5588_v9, %v15526_v27 }
 0x86d   : > { %6237 = vmatmul.f32.gmra.mxu1 %v15525_v38  ;;  %v8107_v21 = vsel %vm8104_vm11, %v8106_v1, %v8102_v17  ;;  %9539 = vrcp.f32 %v13549_v19  ;;  %v6533_v63 = vpop.f32.mrf.mxu2  ;;  %v6934_v3 = vpop.f32.mrf.mxu3  ;;  %vm8115_vm12 = vweird.f32 %v9536_v26  ;;  %v8133_v5 = vand.u32 2147483647, %v13549_v19 }
 0x86e   : > { %8959 = vst.msk [vmem:[%s12845_s14 + $0x138] sm:$0xff] %vm8919_vm4, %v8107_v21  ;;  %v8111_v42 = vsub.f32 1.0, %v8110_v15  ;;  %v6534_v2 = vadd.f32 %v6533_v63, %v13220_v56  ;;  %5667 = vmatmul.f32.gmra.mxu0 %v15524_v39  ;;  %v13562_v40 = vadd.f32 %v6142_v7, %v5589_v13  ;;  %v15527_v56 = vld [vmem:[#allocation111_spill] sm:$0xff]  ;;  %vm8116_vm14 = vmor %vm8114_vm13, %vm8115_vm12  ;;  %v8135_v7 = vand.u32 2147483648, %v13549_v19 }
 0x86f   : > { %vm8129_vm1 = vweird.f32 %v13549_v19  ;;  %vm8134_vm3 = vcmp.eq.f32.partialorder %v8133_v5, 8.507059e+37  ;;  %v15538_v5 = vld [vmem:[#allocation171_spill] sm:$0xff] }
 0x870   : > { %v8112_v6 = vmul.f32 %v9536_v26, %v8111_v42  ;;  %v6931_v61 = vadd.f32 %v6930_v36, %v6534_v2  ;;  %v15528_v36 = vld [vmem:[#allocation131_spill] sm:$0xff]  ;;  %v8136_v15 = vor.u32 1.1754944e-38, %v8135_v7 }
 0x871   : > { %v15529_v57 = vand.u32 4294901760, %v15528_v36 }
 0x872   : > { %v6148_v23 = vpop.f32.mrf.mxu1  ;;  %v9538_v10 = vpop.eup %9537  ;;  %v8113_v41 = vadd.f32 %v9536_v26, %v8112_v6  ;;  %v9120_v18 = vmul.f32 -1.442695, %v6931_v61  ;;  %6600 = vmatmul.f32.gmra.mxu2 %v15523_v16  ;;  %7001 = vmatmul.f32.gmra.mxu3 %v15527_v56 }
 0x873   : > { %v9540_v0 = vpop.eup %9539  ;;  %v13567_v43 = vadd.f32 1.0, %v9538_v10  ;;  %v5593_v11 = vpop.f32.mrf.mxu0 }
 0x874   : > { %v8117_v31 = vsel %vm8116_vm14, %v9536_v26, %v8113_v41  ;;  %v8125_v49 = vmul.f32 %v9540_v0, %v13549_v19  ;;  %9541 = vpow2.f32 %v9120_v18  ;;  %v5594_v46 = vadd.f32 %v5593_v11, %v15530_v52 }
 0x875   : > { %6243 = vmatmul.f32.gmra.mxu1 %v15529_v57  ;;  %v8122_v28 = vsel %vm8119_vm15, %v8121_v51, %v8117_v31  ;;  %9543 = vrcp.f32 %v13567_v43  ;;  %v6537_v35 = vpop.f32.mrf.mxu2  ;;  %v6938_v47 = vpop.f32.mrf.mxu3  ;;  %vm8130_vm0 = vweird.f32 %v9540_v0  ;;  %v8148_v61 = vand.u32 2147483647, %v13567_v43 }
 0x876   : > { %8960 = vst.msk [vmem:[%s12845_s14 + $0x140] sm:$0xff] %vm8919_vm4, %v8122_v28  ;;  %v8126_v34 = vsub.f32 1.0, %v8125_v49  ;;  %v6538_v50 = vadd.f32 %v6537_v35, %v13238_v20  ;;  %5672 = vmatmul.f32.gmra.mxu0 %v15528_v36  ;;  %v13580_v8 = vadd.f32 %v6148_v23, %v5594_v46  ;;  %v15531_v20 = vld [vmem:[#allocation113_spill] sm:$0xff]  ;;  %vm8131_vm2 = vmor %vm8129_vm1, %vm8130_vm0  ;;  %v8150_v23 = vand.u32 2147483648, %v13567_v43 }
 0x877   : > { %vm8144_vm6 = vweird.f32 %v13567_v43  ;;  %vm8149_vm8 = vcmp.eq.f32.partialorder %v8148_v61, 8.507059e+37  ;;  %v15542_v61 = vld [vmem:[#allocation175_spill] sm:$0xff] }
 0x878   : > { %v8127_v24 = vmul.f32 %v9540_v0, %v8126_v34  ;;  %v6935_v32 = vadd.f32 %v6934_v3, %v6538_v50  ;;  %v15532_v3 = vld [vmem:[#allocation133_spill] sm:$0xff]  ;;  %v8151_v49 = vor.u32 1.1754944e-38, %v8150_v23 }
 0x879   : > { %v15533_v42 = vand.u32 4294901760, %v15532_v3 }
 0x87a   : > { %v6154_v16 = vpop.f32.mrf.mxu1  ;;  %v9542_v26 = vpop.eup %9541  ;;  %v8128_v1 = vadd.f32 %v9540_v0, %v8127_v24  ;;  %v9121_v9 = vmul.f32 -1.442695, %v6935_v32  ;;  %6604 = vmatmul.f32.gmra.mxu2 %v15527_v56  ;;  %7005 = vmatmul.f32.gmra.mxu3 %v15531_v20 }
 0x87b   : > { %v9544_v17 = vpop.eup %9543  ;;  %v13585_v39 = vadd.f32 1.0, %v9542_v26  ;;  %v5598_v38 = vpop.f32.mrf.mxu0 }
 0x87c   : > { %v8132_v21 = vsel %vm8131_vm2, %v9540_v0, %v8128_v1  ;;  %v8140_v63 = vmul.f32 %v9544_v17, %v13567_v43  ;;  %9545 = vpow2.f32 %v9121_v9  ;;  %v5599_v58 = vadd.f32 %v5598_v38, %v15534_v37 }
 0x87d   : > { %6249 = vmatmul.f32.gmra.mxu1 %v15533_v42  ;;  %v8137_v19 = vsel %vm8134_vm3, %v8136_v15, %v8132_v21  ;;  %9547 = vrcp.f32 %v13585_v39  ;;  %v6541_v27 = vpop.f32.mrf.mxu2  ;;  %v6942_v13 = vpop.f32.mrf.mxu3  ;;  %vm8145_vm5 = vweird.f32 %v9544_v17  ;;  %v8163_v32 = vand.u32 2147483647, %v13585_v39 }
 0x87e   : > { %8961 = vst.msk [vmem:[%s12845_s14 + $0x148] sm:$0xff] %vm8919_vm4, %v8137_v19  ;;  %v8141_v2 = vsub.f32 1.0, %v8140_v63  ;;  %v6542_v6 = vadd.f32 %v6541_v27, %v13256_v62  ;;  %5677 = vmatmul.f32.gmra.mxu0 %v15532_v3  ;;  %v13598_v18 = vadd.f32 %v6154_v16, %v5599_v58  ;;  %v15535_v62 = vld [vmem:[#allocation115_spill] sm:$0xff]  ;;  %vm8146_vm7 = vmor %vm8144_vm6, %vm8145_vm5  ;;  %v8165_v16 = vand.u32 2147483648, %v13585_v39 }
 0x87f   : > { %vm8159_vm10 = vweird.f32 %v13585_v39  ;;  %vm8164_vm12 = vcmp.eq.f32.partialorder %v8163_v32, 8.507059e+37  ;;  %v15546_v32 = vld [vmem:[#allocation173_spill] sm:$0xff] }
 0x880   : > { %v8142_v10 = vmul.f32 %v9544_v17, %v8141_v2  ;;  %v6939_v41 = vadd.f32 %v6938_v47, %v6542_v6  ;;  %v15536_v47 = vld [vmem:[#allocation138_spill] sm:$0xff]  ;;  %v8166_v63 = vor.u32 1.1754944e-38, %v8165_v16 }
 0x881   : > { %v15537_v34 = vand.u32 4294901760, %v15536_v47 }
 0x882   : > { %v6160_v56 = vpop.f32.mrf.mxu1  ;;  %v9546_v0 = vpop.eup %9545  ;;  %v8143_v51 = vadd.f32 %v9544_v17, %v8142_v10  ;;  %v9122_v11 = vmul.f32 -1.442695, %v6939_v41  ;;  %6608 = vmatmul.f32.gmra.mxu2 %v15531_v20  ;;  %7009 = vmatmul.f32.gmra.mxu3 %v15535_v62 }
 0x883   : > { %v9548_v31 = vpop.eup %9547  ;;  %v13603_v36 = vadd.f32 1.0, %v9546_v0  ;;  %v5603_v57 = vpop.f32.mrf.mxu0 }
 0x884   : > { %v8147_v28 = vsel %vm8146_vm7, %v9544_v17, %v8143_v51  ;;  %v8155_v35 = vmul.f32 %v9548_v31, %v13585_v39  ;;  %9549 = vpow2.f32 %v9122_v11  ;;  %v5604_v7 = vadd.f32 %v5603_v57, %v15538_v5 }
 0x885   : > { %6255 = vmatmul.f32.gmra.mxu1 %v15537_v34  ;;  %v8152_v43 = vsel %vm8149_vm8, %v8151_v49, %v8147_v28  ;;  %9551 = vrcp.f32 %v13603_v36  ;;  %v6545_v52 = vpop.f32.mrf.mxu2  ;;  %v6946_v46 = vpop.f32.mrf.mxu3  ;;  %vm8160_vm9 = vweird.f32 %v9548_v31  ;;  %v8178_v41 = vand.u32 2147483647, %v13603_v36 }
 0x886   : > { %8962 = vst.msk [vmem:[%s12845_s14 + $0x150] sm:$0xff] %vm8919_vm4, %v8152_v43  ;;  %v8156_v50 = vsub.f32 1.0, %v8155_v35  ;;  %v6546_v24 = vadd.f32 %v6545_v52, %v13274_v30  ;;  %5682 = vmatmul.f32.gmra.mxu0 %v15536_v47  ;;  %v13616_v9 = vadd.f32 %v6160_v56, %v5604_v7  ;;  %v15539_v30 = vld [vmem:[#allocation117_spill] sm:$0xff]  ;;  %vm8161_vm11 = vmor %vm8159_vm10, %vm8160_vm9  ;;  %v8180_v56 = vand.u32 2147483648, %v13603_v36 }
 0x887   : > { %vm8174_vm14 = vweird.f32 %v13603_v36  ;;  %vm8179_vm0 = vcmp.eq.f32.partialorder %v8178_v41, 8.507059e+37  ;;  %v15550_v41 = vld [vmem:[#allocation144_spill] sm:$0xff] }
 0x888   : > { %v8157_v26 = vmul.f32 %v9548_v31, %v8156_v50  ;;  %v6943_v1 = vadd.f32 %v6942_v13, %v6546_v24  ;;  %v15540_v13 = vld [vmem:[#allocation172_spill] sm:$0xff]  ;;  %v8181_v35 = vor.u32 1.1754944e-38, %v8180_v56 }
 0x889   : > { %v15541_v2 = vand.u32 4294901760, %v15540_v13 }
 0x88a   : > { %v6166_v20 = vpop.f32.mrf.mxu1  ;;  %v9550_v17 = vpop.eup %9549  ;;  %v8158_v15 = vadd.f32 %v9548_v31, %v8157_v26  ;;  %v9123_v38 = vmul.f32 -1.442695, %v6943_v1  ;;  %6612 = vmatmul.f32.gmra.mxu2 %v15535_v62  ;;  %7013 = vmatmul.f32.gmra.mxu3 %v15539_v30 }
 0x88b   : > { %v9552_v21 = vpop.eup %9551  ;;  %v13621_v3 = vadd.f32 1.0, %v9550_v17  ;;  %v5608_v42 = vpop.f32.mrf.mxu0 }
 0x88c   : > { %v8162_v19 = vsel %vm8161_vm11, %v9548_v31, %v8158_v15  ;;  %v8170_v27 = vmul.f32 %v9552_v21, %v13603_v36  ;;  %9553 = vpow2.f32 %v9123_v38  ;;  %v5609_v23 = vadd.f32 %v5608_v42, %v15542_v61  ;;  %v15547_v42 = vld [vmem:[#allocation116_spill] sm:$0xff] }
 0x88d   : > { %6261 = vmatmul.f32.gmra.mxu1 %v15541_v2  ;;  %v8167_v39 = vsel %vm8164_vm12, %v8166_v63, %v8162_v19  ;;  %9555 = vrcp.f32 %v13621_v3  ;;  %v6549_v37 = vpop.f32.mrf.mxu2  ;;  %v6950_v58 = vpop.f32.mrf.mxu3  ;;  %vm8175_vm13 = vweird.f32 %v9552_v21  ;;  %v8193_v1 = vand.u32 2147483647, %v13621_v3 }
 0x88e   : > { %8963 = vst.msk [vmem:[%s12845_s14 + $0x158] sm:$0xff] %vm8919_vm4, %v8167_v39  ;;  %v8171_v6 = vsub.f32 1.0, %v8170_v27  ;;  %v6550_v10 = vadd.f32 %v6549_v37, %v13292_v60  ;;  %5687 = vmatmul.f32.gmra.mxu0 %v15540_v13  ;;  %v13634_v11 = vadd.f32 %v6166_v20, %v5609_v23  ;;  %v15543_v60 = vld [vmem:[#allocation119_spill] sm:$0xff]  ;;  %vm8176_vm15 = vmor %vm8174_vm14, %vm8175_vm13  ;;  %v8195_v20 = vand.u32 2147483648, %v13621_v3 }
 0x88f   : > { %vm8189_vm2 = vweird.f32 %v13621_v3  ;;  %vm8194_vm5 = vcmp.eq.f32.partialorder %v8193_v1, 8.507059e+37 }
 0x890   : > { %v8172_v0 = vmul.f32 %v9552_v21, %v8171_v6  ;;  %v6947_v51 = vadd.f32 %v6946_v46, %v6550_v10  ;;  %v15544_v46 = vld [vmem:[#allocation139_spill] sm:$0xff]  ;;  %v8196_v19 = vor.u32 1.1754944e-38, %v8195_v20 }
 0x891   : > { %v15545_v36 = vand.u32 4294901760, %v15544_v46 }
 0x892   : > { %v9554_v62 = vpop.eup %9553  ;;  %v8173_v31 = vadd.f32 %v9552_v21, %v8172_v0  ;;  %v9124_v49 = vmul.f32 -1.442695, %v6947_v51  ;;  %v6172_v57 = vpop.f32.mrf.mxu1  ;;  %6616 = vmatmul.f32.gmra.mxu2 %v15539_v30  ;;  %7017 = vmatmul.f32.gmra.mxu3 %v15543_v60 }
 0x893   : > { %v9556_v28 = vpop.eup %9555  ;;  %v13639_v47 = vadd.f32 1.0, %v9554_v62  ;;  %v5613_v34 = vpop.f32.mrf.mxu0 }
 0x894   : > { %v8177_v43 = vsel %vm8176_vm15, %v9552_v21, %v8173_v31  ;;  %v8185_v52 = vmul.f32 %v9556_v28, %v13621_v3  ;;  %9557 = vpow2.f32 %v9124_v49  ;;  %v5614_v16 = vadd.f32 %v5613_v34, %v15546_v32  ;;  %v15551_v34 = vld [vmem:[#allocation118_spill] sm:$0xff] }
 0x895   : > { %6267 = vmatmul.f32.gmra.mxu1 %v15545_v36  ;;  %v8182_v50 = vsel %vm8179_vm0, %v8181_v35, %v8177_v43  ;;  %9559 = vrcp.f32 %v13639_v47  ;;  %v6553_v5 = vpop.f32.mrf.mxu2  ;;  %v6954_v7 = vpop.f32.mrf.mxu3  ;;  %vm8190_vm1 = vweird.f32 %v9556_v28  ;;  %v8208_v51 = vand.u32 2147483647, %v13639_v47 }
 0x896   : > { %8964 = vst.msk [vmem:[%s12845_s14 + $0x160] sm:$0xff] %vm8919_vm4, %v8182_v50  ;;  %v8186_v24 = vsub.f32 1.0, %v8185_v52  ;;  %v6554_v26 = vadd.f32 %v6553_v5, %v13310_v22  ;;  %5692 = vmatmul.f32.gmra.mxu0 %v15544_v46  ;;  %v13652_v38 = vadd.f32 %v6172_v57, %v5614_v16  ;;  %vm8191_vm3 = vmor %vm8189_vm2, %vm8190_vm1  ;;  %v8210_v62 = vand.u32 2147483648, %v13639_v47  ;;  %v15552_v5 = vld [vmem:[#allocation141_spill] sm:$0xff] }
 0x897   : > { %vm8204_vm7 = vweird.f32 %v13639_v47  ;;  %vm8209_vm9 = vcmp.eq.f32.partialorder %v8208_v51, 8.507059e+37 }
 0x898   : > { %v8187_v17 = vmul.f32 %v9556_v28, %v8186_v24  ;;  %v6951_v15 = vadd.f32 %v6950_v58, %v6554_v26  ;;  %v15548_v58 = vld [vmem:[#allocation176_spill] sm:$0xff]  ;;  %v8211_v43 = vor.u32 1.1754944e-38, %v8210_v62  ;;  %v15554_v26 = vld [vmem:[#allocation177_spill] sm:$0xff] }
 0x899   : > { %v15549_v3 = vand.u32 4294901760, %v15548_v58 }
 0x89a   : > { %v9558_v30 = vpop.eup %9557  ;;  %v8188_v21 = vadd.f32 %v9556_v28, %v8187_v17  ;;  %v9125_v63 = vmul.f32 -1.442695, %v6951_v15  ;;  %6620 = vmatmul.f32.gmra.mxu2 %v15543_v60  ;;  %7021 = vmatmul.f32.gmra.mxu3 %v15547_v42  ;;  %v6178_v37 = vpop.f32.mrf.mxu1 }
 0x89b   : > { %v9560_v22 = vpop.eup %9559  ;;  %v13657_v27 = vadd.f32 1.0, %v9558_v30  ;;  %v5618_v13 = vpop.f32.mrf.mxu0 }
 0x89c   : > { %v8192_v2 = vsel %vm8191_vm3, %v9556_v28, %v8188_v21  ;;  %v8200_v39 = vmul.f32 %v9560_v22, %v13639_v47  ;;  %9561 = vpow2.f32 %v9125_v63  ;;  %v5619_v56 = vadd.f32 %v5618_v13, %v15550_v41 }
 0x89d   : > { %6273 = vmatmul.f32.gmra.mxu1 %v15549_v3  ;;  %v8197_v6 = vsel %vm8194_vm5, %v8196_v19, %v8192_v2  ;;  %9563 = vrcp.f32 %v13657_v27  ;;  %v6557_v61 = vpop.f32.mrf.mxu2  ;;  %v6958_v23 = vpop.f32.mrf.mxu3  ;;  %vm8205_vm6 = vweird.f32 %v9560_v22  ;;  %v8223_v17 = vand.u32 2147483647, %v13657_v27 }
 0x89e   : > { %8965 = vst.msk [vmem:[%s12845_s14 + $0x168] sm:$0xff] %vm8919_vm4, %v8197_v6  ;;  %v8201_v10 = vsub.f32 1.0, %v8200_v39  ;;  %v6558_v0 = vadd.f32 %v6557_v61, %v13328_v48  ;;  %5697 = vmatmul.f32.gmra.mxu0 %v15548_v58  ;;  %v13670_v57 = vadd.f32 %v6178_v37, %v5619_v56  ;;  %vm8206_vm8 = vmor %vm8204_vm7, %vm8205_vm6  ;;  %v8225_v15 = vand.u32 2147483648, %v13657_v27  ;;  %v15556_v6 = vld [vmem:[#allocation180_spill] sm:$0xff] }
 0x89f   : > { %vm8219_vm11 = vweird.f32 %v13657_v27  ;;  %vm8224_vm13 = vcmp.eq.f32.partialorder %v8223_v17, 8.507059e+37  ;;  %v15557_v61 = vand.u32 4294901760, %v15556_v6 }
 0x8a0   : > { %v8202_v31 = vmul.f32 %v9560_v22, %v8201_v10  ;;  %v6955_v49 = vadd.f32 %v6954_v7, %v6558_v0  ;;  %v15553_v7 = vand.u32 4294901760, %v15552_v5  ;;  %v8226_v39 = vor.u32 1.1754944e-38, %v8225_v15 }
 0x8a2   : > { %v9562_v60 = vpop.eup %9561  ;;  %v8203_v28 = vadd.f32 %v9560_v22, %v8202_v31  ;;  %v9126_v35 = vmul.f32 -1.442695, %v6955_v49  ;;  %6624 = vmatmul.f32.gmra.mxu2 %v15547_v42  ;;  %7025 = vmatmul.f32.gmra.mxu3 %v15551_v34  ;;  %v6184_v30 = vpop.f32.mrf.mxu1 }
 0x8a3   : > { %v9564_v48 = vpop.eup %9563  ;;  %v13675_v52 = vadd.f32 1.0, %v9562_v60  ;;  %v5623_v46 = vpop.f32.mrf.mxu0 }
 0x8a4   : > { %v8207_v36 = vsel %vm8206_vm8, %v9560_v22, %v8203_v28  ;;  %v8215_v50 = vmul.f32 %v9564_v48, %v13657_v27  ;;  %9565 = vpow2.f32 %v9126_v35  ;;  %v5624_v1 = vadd.f32 %v5623_v46, %v15554_v26  ;;  %v15558_v35 = vld [vmem:[#allocation120_spill] sm:$0xff] }
 0x8a5   : > { %6279 = vmatmul.f32.gmra.mxu1 %v15553_v7  ;;  %v8212_v47 = vsel %vm8209_vm9, %v8211_v43, %v8207_v36  ;;  %9567 = vrcp.f32 %v13675_v52  ;;  %v6561_v24 = vpop.f32.mrf.mxu2  ;;  %v6962_v32 = vpop.f32.mrf.mxu3  ;;  %vm8220_vm10 = vweird.f32 %v9564_v48  ;;  %v8240_v0 = vand.u32 2147483648, %v13675_v52  ;;  %v15559_v36 = vld [vmem:[#allocation183_spill] sm:$0xff] }
 0x8a6   : > { %8966 = vst.msk [vmem:[%s12845_s14 + $0x170] sm:$0xff] %vm8919_vm4, %v8212_v47  ;;  %v8216_v16 = vsub.f32 1.0, %v8215_v50  ;;  %v6562_v20 = vadd.f32 %v6561_v24, %v13346_v45  ;;  %5702 = vmatmul.f32.gmra.mxu0 %v15552_v5  ;;  %v13688_v42 = vadd.f32 %v6184_v30, %v5624_v1  ;;  %v15555_v45 = vld [vmem:[#allocation247_spill] sm:$0xff]  ;;  %vm8221_vm12 = vmor %vm8219_vm11, %vm8220_vm10  ;;  %v8238_v62 = vand.u32 2147483647, %v13675_v52  ;;  %v15561_v30 = vld [vmem:[#allocation248_spill] sm:$0xff] }
 0x8a7   : > { %vm8234_vm15 = vweird.f32 %v13675_v52  ;;  %v15560_v50 = vand.u32 4294901760, %v15559_v36 }
 0x8a8   : > { %v8217_v21 = vmul.f32 %v9564_v48, %v8216_v16  ;;  %v6959_v63 = vadd.f32 %v6958_v23, %v6562_v20  ;;  %vm8239_vm1 = vcmp.eq.f32.partialorder %v8238_v62, 8.507059e+37 }
 0x8aa   : > { %v9566_v22 = vpop.eup %9565  ;;  %v8218_v19 = vadd.f32 %v9564_v48, %v8217_v21  ;;  %v9127_v13 = vmul.f32 -1.442695, %v6959_v63  ;;  %6628 = vmatmul.f32.gmra.mxu2 %v15551_v34  ;;  %7029 = vmatmul.f32.gmra.mxu3 %v15555_v45  ;;  %v8241_v34 = vor.u32 1.1754944e-38, %v8240_v0  ;;  %v15564_v0 = vld [vmem:[#allocation121_spill] sm:$0xff] }
 0x8ab   : > { %v9568_v2 = vpop.eup %9567  ;;  %v7464_v37 = vadd.f32 1.0, %v9566_v22 }
 0x8ac   : > { %v8222_v58 = vsel %vm8221_vm12, %v9564_v48, %v8218_v19  ;;  %v8230_v3 = vmul.f32 %v9568_v2, %v13675_v52  ;;  %9569 = vpow2.f32 %v9127_v13  ;;  %vm8235_vm14 = vweird.f32 %v9568_v2  ;;  %v15562_v13 = vld [vmem:[#allocation181_spill] sm:$0xff] }
 0x8ad   : > { %6285 = vmatmul.f32.gmra.mxu1 %v15557_v61  ;;  %v8227_v23 = vsel %vm8224_vm13, %v8226_v39, %v8222_v58  ;;  %9571 = vrcp.f32 %v7464_v37  ;;  %v6565_v27 = vpop.f32.mrf.mxu2  ;;  %v6966_v10 = vpop.f32.mrf.mxu3  ;;  %vm8236_vm0 = vmor %vm8234_vm15, %vm8235_vm14  ;;  %v8253_v26 = vand.u32 2147483647, %v7464_v37  ;;  %vm8249_vm3 = vweird.f32 %v7464_v37 }
 0x8ae   : > { %8967 = vst.msk [vmem:[%s12845_s14 + $0x178] sm:$0xff] %vm8919_vm4, %v8227_v23  ;;  %v8231_v41 = vsub.f32 1.0, %v8230_v3  ;;  %v6566_v56 = vadd.f32 %v6565_v27, %v13364_v29  ;;  %5707 = vmatmul.f32.gmra.mxu0 %v15556_v6 }
 0x8af   : > { %vm8254_vm6 = vcmp.eq.f32.partialorder %v8253_v26, 8.507059e+37 }
 0x8b0   : > { %v8232_v51 = vmul.f32 %v9568_v2, %v8231_v41  ;;  %v6963_v31 = vadd.f32 %v6962_v32, %v6566_v56  ;;  %v8255_v32 = vand.u32 2147483648, %v7464_v37 }
 0x8b2   : > { %v9570_v49 = vpop.eup %9569  ;;  %v8233_v60 = vadd.f32 %v9568_v2, %v8232_v51  ;;  %v9128_v28 = vmul.f32 -1.442695, %v6963_v31  ;;  %6632 = vmatmul.f32.gmra.mxu2 %v15555_v45  ;;  %7033 = vmatmul.f32.gmra.mxu3 %v15558_v35  ;;  %v8256_v63 = vor.u32 1.1754944e-38, %v8255_v32  ;;  %v15563_v45 = vand.u32 4294901760, %v15562_v13 }
 0x8b3   : > { %v9572_v29 = vpop.eup %9571  ;;  %v7465_v48 = vadd.f32 1.0, %v9570_v49 }
 0x8b4   : > { %v8237_v43 = vsel %vm8236_vm0, %v9568_v2, %v8233_v60  ;;  %v8245_v46 = vmul.f32 %v9572_v29, %v7464_v37  ;;  %9573 = vpow2.f32 %v9128_v28  ;;  %vm8250_vm2 = vweird.f32 %v9572_v29  ;;  %v15565_v60 = vld [vmem:[#allocation148_spill] sm:$0xff] }
 0x8b5   : > { %6291 = vmatmul.f32.gmra.mxu1 %v15560_v50  ;;  %v8242_v5 = vsel %vm8239_vm1, %v8241_v34, %v8237_v43  ;;  %9575 = vrcp.f32 %v7465_v48  ;;  %v6569_v52 = vpop.f32.mrf.mxu2  ;;  %v6970_v7 = vpop.f32.mrf.mxu3  ;;  %vm8251_vm5 = vmor %vm8249_vm3, %vm8250_vm2  ;;  %v8270_v6 = vand.u32 2147483648, %v7465_v48  ;;  %v8268_v23 = vand.u32 2147483647, %v7465_v48 }
 0x8b6   : > { %8968 = vst.msk [vmem:[%s12845_s14 + $0x180] sm:$0xff] %vm8919_vm4, %v8242_v5  ;;  %v8246_v47 = vsub.f32 1.0, %v8245_v46  ;;  %v6570_v24 = vadd.f32 %v6569_v52, %v13382_v54  ;;  %5712 = vmatmul.f32.gmra.mxu0 %v15559_v36  ;;  %vm8264_vm8 = vweird.f32 %v7465_v48  ;;  %v15566_v28 = vand.u32 4294901760, %v15565_v60 }
 0x8b7   : > { %v8271_v62 = vor.u32 1.1754944e-38, %v8270_v6  ;;  %vm8269_vm10 = vcmp.eq.f32.partialorder %v8268_v23, 8.507059e+37 }
 0x8b8   : > { %v8247_v16 = vmul.f32 %v9572_v29, %v8246_v47  ;;  %v6967_v1 = vadd.f32 %v6966_v10, %v6570_v24  ;;  %v15567_v24 = vld [vmem:[#allocation125_spill] sm:$0xff] }
 0x8ba   : > { %v9574_v20 = vpop.eup %9573  ;;  %v8248_v17 = vadd.f32 %v9572_v29, %v8247_v16  ;;  %v9129_v15 = vmul.f32 -1.442695, %v6967_v1  ;;  %6636 = vmatmul.f32.gmra.mxu2 %v15558_v35  ;;  %7037 = vmatmul.f32.gmra.mxu3 %v15561_v30 }
 0x8bb   : > { %v9576_v21 = vpop.eup %9575  ;;  %v7466_v54 = vadd.f32 1.0, %v9574_v20  ;;  %v15568_v20 = vld [vmem:[#allocation184_spill] sm:$0xff] }
 0x8bc   : > { %v8252_v22 = vsel %vm8251_vm5, %v9572_v29, %v8248_v17  ;;  %v8260_v19 = vmul.f32 %v9576_v21, %v7465_v48  ;;  %9577 = vpow2.f32 %v9129_v15  ;;  %vm8265_vm7 = vweird.f32 %v9576_v21 }
 0x8bd   : > { %6297 = vmatmul.f32.gmra.mxu1 %v15563_v45  ;;  %v8257_v2 = vsel %vm8254_vm6, %v8256_v63, %v8252_v22  ;;  %9579 = vrcp.f32 %v7466_v54  ;;  %v6573_v39 = vpop.f32.mrf.mxu2  ;;  %v6974_v37 = vpop.f32.mrf.mxu3  ;;  %vm8266_vm9 = vmor %vm8264_vm8, %vm8265_vm7  ;;  %v8285_v46 = vand.u32 2147483648, %v7466_v54  ;;  %v8283_v50 = vand.u32 2147483647, %v7466_v54 }
 0x8be   : > { %8969 = vst.msk [vmem:[%s12845_s14 + $0x188] sm:$0xff] %vm8919_vm4, %v8257_v2  ;;  %v8261_v58 = vsub.f32 1.0, %v8260_v19  ;;  %v6574_v3 = vadd.f32 %v6573_v39, %v13400_v55  ;;  %5717 = vmatmul.f32.gmra.mxu0 %v15562_v13  ;;  %vm8279_vm12 = vweird.f32 %v7466_v54  ;;  %v15569_v17 = vand.u32 4294901760, %v15568_v20 }
 0x8bf   : > { %v8286_v16 = vor.u32 1.1754944e-38, %v8285_v46  ;;  %vm8284_vm14 = vcmp.eq.f32.partialorder %v8283_v50, 8.507059e+37  ;;  %v15574_v50 = vld [vmem:[#allocation4_spill] sm:$0xff] }
 0x8c0   : > { %v8262_v61 = vmul.f32 %v9576_v21, %v8261_v58  ;;  %v6971_v27 = vadd.f32 %v6970_v7, %v6574_v3  ;;  %v15570_v58 = vld [vmem:[#allocation122_spill] sm:$0xff] }
 0x8c2   : > { %v9578_v10 = vpop.eup %9577  ;;  %v8263_v41 = vadd.f32 %v9576_v21, %v8262_v61  ;;  %v9130_v56 = vmul.f32 -1.442695, %v6971_v27  ;;  %6640 = vmatmul.f32.gmra.mxu2 %v15561_v30  ;;  %7041 = vmatmul.f32.gmra.mxu3 %v15564_v0  ;;  %v15571_v27 = vld [vmem:[#allocation150_spill] sm:$0xff] }
 0x8c3   : > { %v9580_v51 = vpop.eup %9579  ;;  %v7467_v55 = vadd.f32 1.0, %v9578_v10  ;;  %v15572_v10 = vand.u32 4294901760, %v15571_v27 }
 0x8c4   : > { %v8267_v31 = vsel %vm8266_vm9, %v9576_v21, %v8263_v41  ;;  %v8275_v49 = vmul.f32 %v9580_v51, %v7466_v54  ;;  %9581 = vpow2.f32 %v9130_v56  ;;  %vm8280_vm11 = vweird.f32 %v9580_v51 }
 0x8c5   : > { %6303 = vmatmul.f32.gmra.mxu1 %v15566_v28  ;;  %v8272_v35 = vsel %vm8269_vm10, %v8271_v62, %v8267_v31  ;;  %9583 = vrcp.f32 %v7467_v55  ;;  %v6577_v29 = vpop.f32.mrf.mxu2  ;;  %v6978_v34 = vpop.f32.mrf.mxu3  ;;  %vm8281_vm13 = vmor %vm8279_vm12, %vm8280_vm11  ;;  %v8300_v22 = vand.u32 2147483648, %v7467_v55  ;;  %v8298_v13 = vand.u32 2147483647, %v7467_v55 }
 0x8c6   : > { %8970 = vst.msk [vmem:[%s12845_s14 + $0x190] sm:$0xff] %vm8919_vm4, %v8272_v35  ;;  %v8276_v48 = vsub.f32 1.0, %v8275_v49  ;;  %v6578_v43 = vadd.f32 %v6577_v29, %v13418_v14  ;;  %5722 = vmatmul.f32.gmra.mxu0 %v15565_v60  ;;  %vm8294_vm0 = vweird.f32 %v7467_v55 }
 0x8c7   : > { %v8301_v6 = vor.u32 1.1754944e-38, %v8300_v22  ;;  %vm8299_vm2 = vcmp.eq.f32.partialorder %v8298_v13, 8.507059e+37 }
 0x8c8   : > { %v8277_v36 = vmul.f32 %v9580_v51, %v8276_v48  ;;  %v6975_v5 = vadd.f32 %v6974_v37, %v6578_v43 }
 0x8ca   : > { %v9582_v52 = vpop.eup %9581  ;;  %v8278_v7 = vadd.f32 %v9580_v51, %v8277_v36  ;;  %v9131_v47 = vmul.f32 -1.442695, %v6975_v5  ;;  %6644 = vmatmul.f32.gmra.mxu2 %v15564_v0  ;;  %7045 = vmatmul.f32.gmra.mxu3 %v15567_v24  ;;  %v15575_v5 = vand.u32 4294901760, %v15574_v50 }
 0x8cb   : > { %v9584_v32 = vpop.eup %9583  ;;  %v7468_v14 = vadd.f32 1.0, %v9582_v52 }
 0x8cc   : > { %v8282_v26 = vsel %vm8281_vm13, %v9580_v51, %v8278_v7  ;;  %v8290_v1 = vmul.f32 %v9584_v32, %v7467_v55  ;;  %9585 = vpow2.f32 %v9131_v47  ;;  %vm8295_vm15 = vweird.f32 %v9584_v32 }
 0x8cd   : > { %6309 = vmatmul.f32.gmra.mxu1 %v15569_v17  ;;  %v8287_v15 = vsel %vm8284_vm14, %v8286_v16, %v8282_v26  ;;  %9587 = vrcp.f32 %v7468_v14  ;;  %v6581_v30 = vpop.f32.mrf.mxu2  ;;  %v6982_v21 = vpop.f32.mrf.mxu3  ;;  %vm8296_vm1 = vmor %vm8294_vm0, %vm8295_vm15  ;;  %v8315_v55 = vand.u32 2147483648, %v7468_v14  ;;  %v8313_v49 = vand.u32 2147483647, %v7468_v14 }
 0x8ce   : > { %8971 = vst.msk [vmem:[%s12845_s14 + $0x198] sm:$0xff] %vm8919_vm4, %v8287_v15  ;;  %v8291_v63 = vsub.f32 1.0, %v8290_v1  ;;  %v6582_v54 = vadd.f32 %v6581_v30, %v13436_v4  ;;  %5727 = vmatmul.f32.gmra.mxu0 %v15568_v20  ;;  %vm8309_vm5 = vweird.f32 %v7468_v14  ;;  %v15576_v30 = vld [vmem:[#allocation123_spill] sm:$0xff] }
 0x8cf   : > { %v8316_v43 = vor.u32 1.1754944e-38, %v8315_v55  ;;  %vm8314_vm7 = vcmp.eq.f32.partialorder %v8313_v49, 8.507059e+37 }
 0x8d0   : > { %v8292_v19 = vmul.f32 %v9584_v32, %v8291_v63  ;;  %v6979_v45 = vadd.f32 %v6978_v34, %v6582_v54  ;;  %v15573_v34 = vld [vmem:[#allocation126_spill] sm:$0xff] }
 0x8d2   : > { %v9586_v2 = vpop.eup %9585  ;;  %v8293_v39 = vadd.f32 %v9584_v32, %v8292_v19  ;;  %v9132_v37 = vmul.f32 -1.442695, %v6979_v45  ;;  %6648 = vmatmul.f32.gmra.mxu2 %v15567_v24  ;;  %7049 = vmatmul.f32.gmra.mxu3 %v15570_v58  ;;  %v15577_v19 = vld [vmem:[#allocation151_spill] sm:$0xff] }
 0x8d3   : > { %v9588_v3 = vpop.eup %9587  ;;  %v7469_v4 = vadd.f32 1.0, %v9586_v2  ;;  %v15578_v13 = vand.u32 4294901760, %v15577_v19 }
 0x8d4   : > { %v8297_v61 = vsel %vm8296_vm1, %v9584_v32, %v8293_v39  ;;  %v8305_v23 = vmul.f32 %v9588_v3, %v7468_v14  ;;  %9589 = vpow2.f32 %v9132_v37  ;;  %vm8310_vm3 = vweird.f32 %v9588_v3 }
 0x8d5   : > { %6315 = vmatmul.f32.gmra.mxu1 %v15572_v10  ;;  %v8302_v41 = vsel %vm8299_vm2, %v8301_v6, %v8297_v61  ;;  %9591 = vrcp.f32 %v7469_v4  ;;  %v6585_v56 = vpop.f32.mrf.mxu2  ;;  %v6986_v0 = vpop.f32.mrf.mxu3  ;;  %vm8311_vm6 = vmor %vm8309_vm5, %vm8310_vm3  ;;  %v8330_v16 = vand.u32 2147483648, %v7469_v4  ;;  %v8328_v26 = vand.u32 2147483647, %v7469_v4 }
 0x8d6   : > { %8972 = vst.msk [vmem:[%s12845_s14 + $0x1a0] sm:$0xff] %vm8919_vm4, %v8302_v41  ;;  %v8306_v51 = vsub.f32 1.0, %v8305_v23  ;;  %v6586_v62 = vadd.f32 %v6585_v56, %v13454_v33  ;;  %5732 = vmatmul.f32.gmra.mxu0 %v15571_v27  ;;  %vm8324_vm9 = vweird.f32 %v7469_v4  ;;  %v15579_v41 = vld [vmem:[#allocation124_spill] sm:$0xff] }
 0x8d7   : > { %v8331_v63 = vor.u32 1.1754944e-38, %v8330_v16  ;;  %vm8329_vm11 = vcmp.eq.f32.partialorder %v8328_v26, 8.507059e+37 }
 0x8d8   : > { %v8307_v31 = vmul.f32 %v9588_v3, %v8306_v51  ;;  %v6983_v60 = vadd.f32 %v6982_v21, %v6586_v62 }
 0x8da   : > { %v9590_v28 = vpop.eup %9589  ;;  %v8308_v35 = vadd.f32 %v9588_v3, %v8307_v31  ;;  %v9133_v29 = vmul.f32 -1.442695, %v6983_v60  ;;  %6652 = vmatmul.f32.gmra.mxu2 %v15570_v58  ;;  %7053 = vmatmul.f32.gmra.mxu3 %v15573_v34 }
 0x8db   : > { %v9592_v48 = vpop.eup %9591  ;;  %v7470_v33 = vadd.f32 1.0, %v9590_v28 }
 0x8dc   : > { %v8312_v46 = vsel %vm8311_vm6, %v9588_v3, %v8308_v35  ;;  %v8320_v36 = vmul.f32 %v9592_v48, %v7469_v4  ;;  %9593 = vpow2.f32 %v9133_v29  ;;  %vm8325_vm8 = vweird.f32 %v9592_v48 }
 0x8dd   : > { %6321 = vmatmul.f32.gmra.mxu1 %v15575_v5  ;;  %v8317_v52 = vsel %vm8314_vm7, %v8316_v43, %v8312_v46  ;;  %9595 = vrcp.f32 %v7470_v33  ;;  %v6589_v7 = vpop.f32.mrf.mxu2  ;;  %v6990_v47 = vpop.f32.mrf.mxu3  ;;  %vm8326_vm10 = vmor %vm8324_vm9, %vm8325_vm8  ;;  %v8345_v3 = vand.u32 2147483648, %v7470_v33  ;;  %v8343_v4 = vand.u32 2147483647, %v7470_v33 }
 0x8de   : > { %8973 = vst.msk [vmem:[%s12845_s14 + $0x1a8] sm:$0xff] %vm8919_vm4, %v8317_v52  ;;  %v8321_v24 = vsub.f32 1.0, %v8320_v36  ;;  %v6590_v32 = vadd.f32 %v6589_v7, %v13472_v53  ;;  %5737 = vmatmul.f32.gmra.mxu0 %v15574_v50  ;;  %vm8339_vm13 = vweird.f32 %v7470_v33  ;;  %v15580_v36 = vld [vmem:[#allocation128_spill] sm:$0xff] }
 0x8df   : > { %vm8344_vm15 = vcmp.eq.f32.partialorder %v8343_v4, 8.507059e+37 }
 0x8e0   : > { %v8322_v14 = vmul.f32 %v9592_v48, %v8321_v24  ;;  %v6987_v1 = vadd.f32 %v6986_v0, %v6590_v32  ;;  %v8346_v0 = vor.u32 1.1754944e-38, %v8345_v3 }
 0x8e2   : > { %v9594_v20 = vpop.eup %9593  ;;  %v8323_v17 = vadd.f32 %v9592_v48, %v8322_v14  ;;  %v9134_v15 = vmul.f32 -1.442695, %v6987_v1  ;;  %6656 = vmatmul.f32.gmra.mxu2 %v15573_v34  ;;  %7057 = vmatmul.f32.gmra.mxu3 %v15576_v30 }
 0x8e3   : > { %v9596_v21 = vpop.eup %9595  ;;  %v7471_v53 = vadd.f32 1.0, %v9594_v20 }
 0x8e4   : > { %v8327_v54 = vsel %vm8326_vm10, %v9592_v48, %v8323_v17  ;;  %v8335_v22 = vmul.f32 %v9596_v21, %v7470_v33  ;;  %9597 = vpow2.f32 %v9134_v15  ;;  %vm8340_vm12 = vweird.f32 %v9596_v21 }
 0x8e5   : > { %6327 = vmatmul.f32.gmra.mxu1 %v15578_v13  ;;  %v8332_v45 = vsel %vm8329_vm11, %v8331_v63, %v8327_v54  ;;  %9599 = vrcp.f32 %v7471_v53  ;;  %v6593_v2 = vpop.f32.mrf.mxu2  ;;  %v6994_v39 = vpop.f32.mrf.mxu3  ;;  %vm8341_vm14 = vmor %vm8339_vm13, %vm8340_vm12  ;;  %v8360_v35 = vand.u32 2147483648, %v7471_v53  ;;  %v8358_v34 = vand.u32 2147483647, %v7471_v53  ;;  %v15581_v63 = vld [vmem:[#allocation162_spill] sm:$0xff] }
 0x8e6   : > { %8974 = vst.msk [vmem:[%s12845_s14 + $0x1b0] sm:$0xff] %vm8919_vm4, %v8332_v45  ;;  %v8336_v37 = vsub.f32 1.0, %v8335_v22  ;;  %v6594_v58 = vadd.f32 %v6593_v2, %v13490_v12  ;;  %5742 = vmatmul.f32.gmra.mxu0 %v15577_v19  ;;  %vm8354_vm1 = vweird.f32 %v7471_v53 }
 0x8e7   : > { %v8361_v5 = vor.u32 1.1754944e-38, %v8360_v35  ;;  %vm8359_vm3 = vcmp.eq.f32.partialorder %v8358_v34, 8.507059e+37 }
 0x8e8   : > { %v8337_v6 = vmul.f32 %v9596_v21, %v8336_v37  ;;  %v6991_v61 = vadd.f32 %v6990_v47, %v6594_v58 }
 0x8ea   : > { %v9598_v23 = vpop.eup %9597  ;;  %v8338_v27 = vadd.f32 %v9596_v21, %v8337_v6  ;;  %v9135_v10 = vmul.f32 -1.442695, %v6991_v61  ;;  %6660 = vmatmul.f32.gmra.mxu2 %v15576_v30  ;;  %7061 = vmatmul.f32.gmra.mxu3 %v15579_v41 }
 0x8eb   : > { %v9600_v56 = vpop.eup %9599  ;;  %v7472_v12 = vadd.f32 1.0, %v9598_v23 }
 0x8ec   : > { %v8342_v51 = vsel %vm8341_vm14, %v9596_v21, %v8338_v27  ;;  %v8350_v62 = vmul.f32 %v9600_v56, %v7471_v53  ;;  %9601 = vpow2.f32 %v9135_v10  ;;  %vm8355_vm0 = vweird.f32 %v9600_v56  ;;  %v15582_v10 = vld [vmem:[#allocation129_spill] sm:$0xff] }
 0x8ed   : > { %v8347_v55 = vsel %vm8344_vm15, %v8346_v0, %v8342_v51  ;;  %9603 = vrcp.f32 %v7472_v12  ;;  %v6597_v31 = vpop.f32.mrf.mxu2  ;;  %v6998_v49 = vpop.f32.mrf.mxu3  ;;  %vm8356_vm2 = vmor %vm8354_vm1, %vm8355_vm0  ;;  %v8375_v26 = vand.u32 2147483648, %v7472_v12  ;;  %v8373_v20 = vand.u32 2147483647, %v7472_v12 }
 0x8ee   : > { %8975 = vst.msk [vmem:[%s12845_s14 + $0x1b8] sm:$0xff] %vm8919_vm4, %v8347_v55  ;;  %v8351_v60 = vsub.f32 1.0, %v8350_v62  ;;  %v6598_v28 = vadd.f32 %v6597_v31, %v13508_v25  ;;  %vm8369_vm6 = vweird.f32 %v7472_v12 }
 0x8ef   : > { %v8376_v54 = vor.u32 1.1754944e-38, %v8375_v26  ;;  %vm8374_vm8 = vcmp.eq.f32.partialorder %v8373_v20, 8.507059e+37 }
 0x8f0   : > { %v8352_v29 = vmul.f32 %v9600_v56, %v8351_v60  ;;  %v6995_v48 = vadd.f32 %v6994_v39, %v6598_v28 }
 0x8f2   : > { %v9602_v43 = vpop.eup %9601  ;;  %v8353_v33 = vadd.f32 %v9600_v56, %v8352_v29  ;;  %v9136_v46 = vmul.f32 -1.442695, %v6995_v48  ;;  %6664 = vmatmul.f32.gmra.mxu2 %v15579_v41  ;;  %7065 = vmatmul.f32.gmra.mxu3 %v15580_v36 }
 0x8f3   : > { %v9604_v50 = vpop.eup %9603  ;;  %v7473_v52 = vadd.f32 1.0, %v9602_v43 }
 0x8f4   : > { %v8357_v7 = vsel %vm8356_vm2, %v9600_v56, %v8353_v33  ;;  %v8365_v25 = vmul.f32 %v9604_v50, %v7472_v12  ;;  %9605 = vpow2.f32 %v9136_v46  ;;  %vm8370_vm5 = vweird.f32 %v9604_v50  ;;  %v15583_v33 = vld [vmem:[#allocation163_spill] sm:$0xff] }
 0x8f5   : > { %v8362_v47 = vsel %vm8359_vm3, %v8361_v5, %v8357_v7  ;;  %9607 = vrcp.f32 %v7473_v52  ;;  %v6601_v24 = vpop.f32.mrf.mxu2  ;;  %v7002_v32 = vpop.f32.mrf.mxu3  ;;  %vm8371_vm7 = vmor %vm8369_vm6, %vm8370_vm5  ;;  %v8390_v58 = vand.u32 2147483648, %v7473_v52  ;;  %v8388_v6 = vand.u32 2147483647, %v7473_v52 }
 0x8f6   : > { %8976 = vst.msk [vmem:[%s12845_s14 + $0x1c0] sm:$0xff] %vm8919_vm4, %v8362_v47  ;;  %v8366_v16 = vsub.f32 1.0, %v8365_v25  ;;  %v6602_v14 = vadd.f32 %v6601_v24, %v13526_v59  ;;  %vm8384_vm10 = vweird.f32 %v7473_v52  ;;  %v13781_v47 = vpop.f32.mrf.mxu0 }
 0x8f7   : > { %v8391_v56 = vor.u32 1.1754944e-38, %v8390_v58  ;;  %vm8389_vm12 = vcmp.eq.f32.partialorder %v8388_v6, 8.507059e+37 }
 0x8f8   : > { %v8367_v1 = vmul.f32 %v9604_v50, %v8366_v16  ;;  %v6999_v17 = vadd.f32 %v6998_v49, %v6602_v14 }
 0x8fa   : > { %v9606_v15 = vpop.eup %9605  ;;  %v8368_v30 = vadd.f32 %v9604_v50, %v8367_v1  ;;  %v9137_v21 = vmul.f32 -1.442695, %v6999_v17  ;;  %6668 = vmatmul.f32.gmra.mxu2 %v15580_v36  ;;  %7069 = vmatmul.f32.gmra.mxu3 %v15581_v63 }
 0x8fb   : > { %v9608_v53 = vpop.eup %9607  ;;  %v7474_v22 = vadd.f32 1.0, %v9606_v15 }
 0x8fc   : > { %v8372_v19 = vsel %vm8371_vm7, %v9604_v50, %v8368_v30  ;;  %v8380_v59 = vmul.f32 %v9608_v53, %v7473_v52  ;;  %9609 = vpow2.f32 %v9137_v21  ;;  %vm8385_vm9 = vweird.f32 %v9608_v53  ;;  %v15584_v30 = vld [vmem:[#allocation136_spill] sm:$0xff] }
 0x8fd   : > { %v8377_v13 = vsel %vm8374_vm8, %v8376_v54, %v8372_v19  ;;  %9611 = vrcp.f32 %v7474_v22  ;;  %v6605_v45 = vpop.f32.mrf.mxu2  ;;  %v7006_v2 = vpop.f32.mrf.mxu3  ;;  %vm8386_vm11 = vmor %vm8384_vm10, %vm8385_vm9  ;;  %v8405_v60 = vand.u32 2147483648, %v7474_v22  ;;  %v8403_v35 = vand.u32 2147483647, %v7474_v22 }
 0x8fe   : > { %8977 = vst.msk [vmem:[%s12845_s14 + $0x1c8] sm:$0xff] %vm8919_vm4, %v8377_v13  ;;  %v8381_v39 = vsub.f32 1.0, %v8380_v59  ;;  %v6606_v37 = vadd.f32 %v6605_v45, %v13544_v44  ;;  %vm8399_vm14 = vweird.f32 %v7474_v22  ;;  %v13788_v54 = vpop.f32.mrf.mxu1 }
 0x8ff   : > { %v8406_v36 = vor.u32 1.1754944e-38, %v8405_v60  ;;  %vm8404_vm0 = vcmp.eq.f32.partialorder %v8403_v35, 8.507059e+37 }
 0x900   : > { %v8382_v3 = vmul.f32 %v9608_v53, %v8381_v39  ;;  %v7003_v4 = vadd.f32 %v7002_v32, %v6606_v37  ;;  %v13793_v37 = vpop.f32.mrf.mxu0 }
 0x902   : > { %v9610_v61 = vpop.eup %9609  ;;  %v8383_v23 = vadd.f32 %v9608_v53, %v8382_v3  ;;  %v9138_v27 = vmul.f32 -1.442695, %v7003_v4  ;;  %6672 = vmatmul.f32.gmra.mxu2 %v15581_v63  ;;  %7073 = vmatmul.f32.gmra.mxu3 %v15582_v10 }
 0x903   : > { %v9612_v41 = vpop.eup %9611  ;;  %v7475_v0 = vadd.f32 1.0, %v9610_v61 }
 0x904   : > { %v8387_v12 = vsel %vm8386_vm11, %v9608_v53, %v8383_v23  ;;  %v8395_v44 = vmul.f32 %v9612_v41, %v7474_v22  ;;  %9613 = vpow2.f32 %v9138_v27  ;;  %vm8400_vm13 = vweird.f32 %v9612_v41  ;;  %v15585_v27 = vld [vmem:[#allocation166_spill] sm:$0xff] }
 0x905   : > { %v8392_v51 = vsel %vm8389_vm12, %v8391_v56, %v8387_v12  ;;  %9615 = vrcp.f32 %v7475_v0  ;;  %v6609_v62 = vpop.f32.mrf.mxu2  ;;  %v7010_v55 = vpop.f32.mrf.mxu3  ;;  %vm8401_vm15 = vmor %vm8399_vm14, %vm8400_vm13  ;;  %v8420_v16 = vand.u32 2147483648, %v7475_v0  ;;  %v8418_v26 = vand.u32 2147483647, %v7475_v0 }
 0x906   : > { %8978 = vst.msk [vmem:[%s12845_s14 + $0x1d0] sm:$0xff] %vm8919_vm4, %v8392_v51  ;;  %v8396_v31 = vsub.f32 1.0, %v8395_v44  ;;  %v6610_v49 = vadd.f32 %v6609_v62, %v13562_v40  ;;  %vm8414_vm2 = vweird.f32 %v7475_v0  ;;  %v13797_v62 = vpop.f32.mrf.mxu1 }
 0x907   : > { %v8421_v63 = vor.u32 1.1754944e-38, %v8420_v16  ;;  %vm8419_vm5 = vcmp.eq.f32.partialorder %v8418_v26, 8.507059e+37 }
 0x908   : > { %v8397_v28 = vmul.f32 %v9612_v41, %v8396_v31  ;;  %v7007_v29 = vadd.f32 %v7006_v2, %v6610_v49 }
 0x90a   : > { %v9614_v34 = vpop.eup %9613  ;;  %v8398_v48 = vadd.f32 %v9612_v41, %v8397_v28  ;;  %v9139_v43 = vmul.f32 -1.442695, %v7007_v29  ;;  %6676 = vmatmul.f32.gmra.mxu2 %v15582_v10  ;;  %7077 = vmatmul.f32.gmra.mxu3 %v15583_v33 }
 0x90b   : > { %v9616_v46 = vpop.eup %9615  ;;  %v7476_v50 = vadd.f32 1.0, %v9614_v34  ;;  %v13802_v34 = vpop.f32.mrf.mxu0 }
 0x90c   : > { %v8402_v5 = vsel %vm8401_vm15, %v9612_v41, %v8398_v48  ;;  %v8410_v40 = vmul.f32 %v9616_v46, %v7475_v0  ;;  %9617 = vpow2.f32 %v9139_v43  ;;  %vm8415_vm1 = vweird.f32 %v9616_v46 }
 0x90d   : > { %v8407_v52 = vsel %vm8404_vm0, %v8406_v36, %v8402_v5  ;;  %9619 = vrcp.f32 %v7476_v50  ;;  %v6613_v7 = vpop.f32.mrf.mxu2  ;;  %v7014_v25 = vpop.f32.mrf.mxu3  ;;  %vm8416_vm3 = vmor %vm8414_vm2, %vm8415_vm1  ;;  %v8435_v39 = vand.u32 2147483648, %v7476_v50  ;;  %v8433_v3 = vand.u32 2147483647, %v7476_v50 }
 0x90e   : > { %8979 = vst.msk [vmem:[%s12845_s14 + $0x1d8] sm:$0xff] %vm8919_vm4, %v8407_v52  ;;  %v8411_v24 = vsub.f32 1.0, %v8410_v40  ;;  %v6614_v32 = vadd.f32 %v6613_v7, %v13580_v8  ;;  %vm8429_vm7 = vweird.f32 %v7476_v50  ;;  %v13809_v16 = vpop.f32.mrf.mxu1 }
 0x90f   : > { %v8436_v41 = vor.u32 1.1754944e-38, %v8435_v39  ;;  %vm8434_vm9 = vcmp.eq.f32.partialorder %v8433_v3, 8.507059e+37 }
 0x910   : > { %v8412_v14 = vmul.f32 %v9616_v46, %v8411_v24  ;;  %v7011_v1 = vadd.f32 %v7010_v55, %v6614_v32 }
 0x912   : > { %v9618_v20 = vpop.eup %9617  ;;  %v8413_v17 = vadd.f32 %v9616_v46, %v8412_v14  ;;  %v9140_v15 = vmul.f32 -1.442695, %v7011_v1  ;;  %6680 = vmatmul.f32.gmra.mxu2 %v15583_v33  ;;  %7081 = vmatmul.f32.gmra.mxu3 %v15584_v30  ;;  %v15586_v33 = vld [vmem:[#allocation140_spill] sm:$0xff] }
 0x913   : > { %v9620_v21 = vpop.eup %9619  ;;  %v7477_v53 = vadd.f32 1.0, %v9618_v20 }
 0x914   : > { %v8417_v8 = vsel %vm8416_vm3, %v9616_v46, %v8413_v17  ;;  %v8425_v22 = vmul.f32 %v9620_v21, %v7476_v50  ;;  %9621 = vpow2.f32 %v9140_v15  ;;  %vm8430_vm6 = vweird.f32 %v9620_v21 }
 0x915   : > { %v8422_v19 = vsel %vm8419_vm5, %v8421_v63, %v8417_v8  ;;  %9623 = vrcp.f32 %v7477_v53  ;;  %v6617_v59 = vpop.f32.mrf.mxu2  ;;  %v7018_v13 = vpop.f32.mrf.mxu3  ;;  %vm8431_vm8 = vmor %vm8429_vm7, %vm8430_vm6  ;;  %v8450_v49 = vand.u32 2147483648, %v7477_v53  ;;  %v8448_v28 = vand.u32 2147483647, %v7477_v53 }
 0x916   : > { %8980 = vst.msk [vmem:[%s12845_s14 + $0x1e0] sm:$0xff] %vm8919_vm4, %v8422_v19  ;;  %v8426_v45 = vsub.f32 1.0, %v8425_v22  ;;  %v6618_v2 = vadd.f32 %v6617_v59, %v13598_v18  ;;  %vm8444_vm11 = vweird.f32 %v7477_v53 }
 0x917   : > { %v8451_v36 = vor.u32 1.1754944e-38, %v8450_v49  ;;  %vm8449_vm13 = vcmp.eq.f32.partialorder %v8448_v28, 8.507059e+37 }
 0x918   : > { %v8427_v58 = vmul.f32 %v9620_v21, %v8426_v45  ;;  %v7015_v6 = vadd.f32 %v7014_v25, %v6618_v2 }
 0x91a   : > { %v9622_v4 = vpop.eup %9621  ;;  %v8428_v61 = vadd.f32 %v9620_v21, %v8427_v58  ;;  %v9141_v23 = vmul.f32 -1.442695, %v7015_v6  ;;  %6684 = vmatmul.f32.gmra.mxu2 %v15584_v30  ;;  %7085 = vmatmul.f32.gmra.mxu3 %v15585_v27  ;;  %v15587_v30 = vld [vmem:[#allocation169_spill] sm:$0xff] }
 0x91b   : > { %v9624_v10 = vpop.eup %9623  ;;  %v7478_v18 = vadd.f32 1.0, %v9622_v4 }
 0x91c   : > { %v8432_v56 = vsel %vm8431_vm8, %v9620_v21, %v8428_v61  ;;  %v8440_v0 = vmul.f32 %v9624_v10, %v7477_v53  ;;  %9625 = vpow2.f32 %v9141_v23  ;;  %vm8445_vm10 = vweird.f32 %v9624_v10  ;;  %v13813_v53 = vpop.f32.mrf.mxu0  ;;  %v13818_v61 = vpop.f32.mrf.mxu1 }
 0x91d   : > { %v8437_v12 = vsel %vm8434_vm9, %v8436_v41, %v8432_v56  ;;  %9627 = vrcp.f32 %v7478_v18  ;;  %v6621_v44 = vpop.f32.mrf.mxu2  ;;  %v7022_v51 = vpop.f32.mrf.mxu3  ;;  %vm8446_vm12 = vmor %vm8444_vm11, %vm8445_vm10  ;;  %v8465_v32 = vand.u32 2147483648, %v7478_v18  ;;  %v8463_v26 = vand.u32 2147483647, %v7478_v18 }
 0x91e   : > { %8981 = vst.msk [vmem:[%s12845_s14 + $0x1e8] sm:$0xff] %vm8919_vm4, %v8437_v12  ;;  %v8441_v55 = vsub.f32 1.0, %v8440_v0  ;;  %v6622_v31 = vadd.f32 %v6621_v44, %v13616_v9  ;;  %vm8459_vm15 = vweird.f32 %v7478_v18 }
 0x91f   : > { %v8466_v63 = vor.u32 1.1754944e-38, %v8465_v32  ;;  %vm8464_vm1 = vcmp.eq.f32.partialorder %v8463_v26, 8.507059e+37 }
 0x920   : > { %v8442_v60 = vmul.f32 %v9624_v10, %v8441_v55  ;;  %v7019_v35 = vadd.f32 %v7018_v13, %v6622_v31 }
 0x922   : > { %v9626_v29 = vpop.eup %9625  ;;  %v8443_v48 = vadd.f32 %v9624_v10, %v8442_v60  ;;  %v9142_v43 = vmul.f32 -1.442695, %v7019_v35  ;;  %6688 = vmatmul.f32.gmra.mxu2 %v15585_v27  ;;  %7089 = vmatmul.f32.gmra.mxu3 %v15586_v33 }
 0x923   : > { %v9628_v46 = vpop.eup %9627  ;;  %v7479_v9 = vadd.f32 1.0, %v9626_v29 }
 0x924   : > { %v8447_v50 = vsel %vm8446_vm12, %v9624_v10, %v8443_v48  ;;  %v8455_v5 = vmul.f32 %v9628_v46, %v7478_v18  ;;  %9629 = vpow2.f32 %v9142_v43  ;;  %vm8460_vm14 = vweird.f32 %v9628_v46  ;;  %v15588_v10 = vld [vmem:[#allocation142_spill] sm:$0xff]  ;;  %v13822_v55 = vpop.f32.mrf.mxu0 }
 0x925   : > { %v8452_v40 = vsel %vm8449_vm13, %v8451_v36, %v8447_v50  ;;  %9631 = vrcp.f32 %v7479_v9  ;;  %v6625_v52 = vpop.f32.mrf.mxu2  ;;  %v7026_v7 = vpop.f32.mrf.mxu3  ;;  %vm8461_vm0 = vmor %vm8459_vm15, %vm8460_vm14  ;;  %v8480_v39 = vand.u32 2147483648, %v7479_v9  ;;  %v8478_v3 = vand.u32 2147483647, %v7479_v9 }
 0x926   : > { %8982 = vst.msk [vmem:[%s12845_s14 + $0x1f0] sm:$0xff] %vm8919_vm4, %v8452_v40  ;;  %v8456_v25 = vsub.f32 1.0, %v8455_v5  ;;  %v6626_v24 = vadd.f32 %v6625_v52, %v13634_v11  ;;  %vm8474_vm3 = vweird.f32 %v7479_v9 }
 0x927   : > { %v8481_v18 = vor.u32 1.1754944e-38, %v8480_v39  ;;  %vm8479_vm6 = vcmp.eq.f32.partialorder %v8478_v3, 8.507059e+37 }
 0x928   : > { %v8457_v14 = vmul.f32 %v9628_v46, %v8456_v25  ;;  %v7023_v1 = vadd.f32 %v7022_v51, %v6626_v24 }
 0x92a   : > { %v9630_v20 = vpop.eup %9629  ;;  %v8458_v17 = vadd.f32 %v9628_v46, %v8457_v14  ;;  %v9143_v15 = vmul.f32 -1.442695, %v7023_v1  ;;  %6692 = vmatmul.f32.gmra.mxu2 %v15586_v33  ;;  %7093 = vmatmul.f32.gmra.mxu3 %v15587_v30  ;;  %v15590_v14 = vld [vmem:[#allocation146_spill] sm:$0xff] }
 0x92b   : > { %v9632_v21 = vpop.eup %9631  ;;  %v7480_v11 = vadd.f32 1.0, %v9630_v20  ;;  %v5629_v26 = vadd.f32 %v13781_v47, %v15590_v14 }
 0x92c   : > { %v8462_v8 = vsel %vm8461_vm0, %v9628_v46, %v8458_v17  ;;  %v8470_v22 = vmul.f32 %v9632_v21, %v7479_v9  ;;  %9633 = vpow2.f32 %v9143_v15  ;;  %vm8475_vm2 = vweird.f32 %v9632_v21  ;;  %v15589_v46 = vld [vmem:[#allocation179_spill] sm:$0xff]  ;;  %v13839_v20 = vpop.f32.mrf.mxu0 }
 0x92d   : > { %v8467_v19 = vsel %vm8464_vm1, %v8466_v63, %v8462_v8  ;;  %9635 = vrcp.f32 %v7480_v11  ;;  %v6629_v59 = vpop.f32.mrf.mxu2  ;;  %v7030_v13 = vpop.f32.mrf.mxu3  ;;  %vm8476_vm5 = vmor %vm8474_vm3, %vm8475_vm2  ;;  %v8495_v60 = vand.u32 2147483648, %v7480_v11  ;;  %v8493_v35 = vand.u32 2147483647, %v7480_v11  ;;  %v15591_v8 = vld [vmem:[#allocation143_spill] sm:$0xff] }
 0x92e   : > { %8983 = vst.msk [vmem:[%s12845_s14 + $0x1f8] sm:$0xff] %vm8919_vm4, %v8467_v19  ;;  %v8471_v45 = vsub.f32 1.0, %v8470_v22  ;;  %v6630_v2 = vadd.f32 %v6629_v59, %v13652_v38  ;;  %vm8489_vm8 = vweird.f32 %v7480_v11  ;;  %v6191_v19 = vadd.f32 %v13788_v54, %v5629_v26 }
 0x92f   : > { %v8496_v9 = vor.u32 1.1754944e-38, %v8495_v60  ;;  %vm8494_vm10 = vcmp.eq.f32.partialorder %v8493_v35, 8.507059e+37 }
 0x930   : > { %v8472_v58 = vmul.f32 %v9632_v21, %v8471_v45  ;;  %v7027_v6 = vadd.f32 %v7026_v7, %v6630_v2 }
 0x932   : > { %v9634_v4 = vpop.eup %9633  ;;  %v8473_v23 = vadd.f32 %v9632_v21, %v8472_v58  ;;  %v9144_v27 = vmul.f32 -1.442695, %v7027_v6  ;;  %6696 = vmatmul.f32.gmra.mxu2 %v15587_v30  ;;  %7097 = vmatmul.f32.gmra.mxu3 %v15588_v10 }
 0x933   : > { %v9636_v41 = vpop.eup %9635  ;;  %v7481_v38 = vadd.f32 1.0, %v9634_v4  ;;  %v15592_v4 = vld [vmem:[#allocation185_spill] sm:$0xff] }
 0x934   : > { %v8477_v56 = vsel %vm8476_vm5, %v9632_v21, %v8473_v23  ;;  %v8485_v0 = vmul.f32 %v9636_v41, %v7480_v11  ;;  %9637 = vpow2.f32 %v9144_v27  ;;  %vm8490_vm7 = vweird.f32 %v9636_v41 }
 0x935   : > { %v8482_v12 = vsel %vm8479_vm6, %v8481_v18, %v8477_v56  ;;  %9639 = vrcp.f32 %v7481_v38  ;;  %v6633_v44 = vpop.f32.mrf.mxu2  ;;  %v7034_v51 = vpop.f32.mrf.mxu3  ;;  %vm8491_vm9 = vmor %vm8489_vm8, %vm8490_vm7  ;;  %v8510_v1 = vand.u32 2147483648, %v7481_v38  ;;  %v8508_v15 = vand.u32 2147483647, %v7481_v38 }
 0x936   : > { %8984 = vst.msk [vmem:[%s12845_s14 + $0x200] sm:$0xff] %vm8919_vm4, %v8482_v12  ;;  %v8486_v31 = vsub.f32 1.0, %v8485_v0  ;;  %v6634_v49 = vadd.f32 %v6633_v44, %v13670_v57  ;;  %v13831_v57 = vpop.f32.mrf.mxu1  ;;  %vm8504_vm12 = vweird.f32 %v7481_v38  ;;  %v5634_v23 = vadd.f32 %v13793_v37, %v15592_v4  ;;  %v15593_v12 = vld [vmem:[#allocation5_spill] sm:$0xff] }
 0x937   : > { %v8511_v22 = vor.u32 1.1754944e-38, %v8510_v1  ;;  %vm8509_vm14 = vcmp.eq.f32.partialorder %v8508_v15, 8.507059e+37 }
 0x938   : > { %v8487_v28 = vmul.f32 %v9636_v41, %v8486_v31  ;;  %v7031_v29 = vadd.f32 %v7030_v13, %v6634_v49  ;;  %v6197_v31 = vadd.f32 %v13797_v62, %v5634_v23 }
 0x93a   : > { %v9638_v48 = vpop.eup %9637  ;;  %v8488_v43 = vadd.f32 %v9636_v41, %v8487_v28  ;;  %v9145_v33 = vmul.f32 -1.442695, %v7031_v29  ;;  %6700 = vmatmul.f32.gmra.mxu2 %v15588_v10  ;;  %7101 = vmatmul.f32.gmra.mxu3 %v15589_v46 }
 0x93b   : > { %v9640_v36 = vpop.eup %9639  ;;  %v13829_v50 = vadd.f32 1.0, %v9638_v48 }
 0x93c   : > { %v8492_v5 = vsel %vm8491_vm9, %v9636_v41, %v8488_v43  ;;  %v8500_v40 = vmul.f32 %v9640_v36, %v7481_v38  ;;  %9641 = vpow2.f32 %v9145_v33  ;;  %vm8505_vm11 = vweird.f32 %v9640_v36  ;;  %v13856_v38 = vpop.f32.mrf.mxu0  ;;  %v15594_v33 = vld [vmem:[#allocation147_spill] sm:$0xff] }
 0x93d   : > { %v8497_v52 = vsel %vm8494_vm10, %v8496_v9, %v8492_v5  ;;  %9643 = vrcp.f32 %v13829_v50  ;;  %v6637_v7 = vpop.f32.mrf.mxu2  ;;  %v7038_v25 = vpop.f32.mrf.mxu3  ;;  %vm8506_vm13 = vmor %vm8504_vm12, %vm8505_vm11  ;;  %v8525_v54 = vand.u32 2147483648, %v13829_v50  ;;  %v8523_v10 = vand.u32 2147483647, %v13829_v50 }
 0x93e   : > { %8985 = vst.msk [vmem:[%s12845_s14 + $0x208] sm:$0xff] %vm8919_vm4, %v8497_v52  ;;  %v8501_v24 = vsub.f32 1.0, %v8500_v40  ;;  %v6638_v32 = vadd.f32 %v6637_v7, %v13688_v42  ;;  %v13848_v58 = vpop.f32.mrf.mxu1  ;;  %vm8519_vm0 = vweird.f32 %v13829_v50 }
 0x93f   : > { %v8526_v44 = vor.u32 1.1754944e-38, %v8525_v54  ;;  %vm8524_vm2 = vcmp.eq.f32.partialorder %v8523_v10, 8.507059e+37 }
 0x940   : > { %v8502_v17 = vmul.f32 %v9640_v36, %v8501_v24  ;;  %v7035_v30 = vadd.f32 %v7034_v51, %v6638_v32 }
 0x942   : > { %v9642_v21 = vpop.eup %9641  ;;  %v8503_v63 = vadd.f32 %v9640_v36, %v8502_v17  ;;  %v9146_v11 = vmul.f32 -1.442695, %v7035_v30  ;;  %6704 = vmatmul.f32.gmra.mxu2 %v15589_v46  ;;  %7105 = vmatmul.f32.gmra.mxu3 %v15591_v8  ;;  %v5639_v46 = vadd.f32 %v13802_v34, %v15594_v33 }
 0x943   : > { %v9644_v42 = vpop.eup %9643  ;;  %v13843_v47 = vadd.f32 1.0, %v9642_v21 }
 0x944   : > { %v8507_v59 = vsel %vm8506_vm13, %v9640_v36, %v8503_v63  ;;  %v8515_v13 = vmul.f32 %v9644_v42, %v13829_v50  ;;  %9645 = vpow2.f32 %v9146_v11  ;;  %vm8520_vm15 = vweird.f32 %v9644_v42  ;;  %v13880_v26 = vpop.f32.mrf.mxu0 }
 0x945   : > { %v8512_v45 = vsel %vm8509_vm14, %v8511_v22, %v8507_v59  ;;  %9647 = vrcp.f32 %v13843_v47  ;;  %v6641_v2 = vpop.f32.mrf.mxu2  ;;  %v7042_v39 = vpop.f32.mrf.mxu3  ;;  %vm8521_vm1 = vmor %vm8519_vm0, %vm8520_vm15  ;;  %v8540_v36 = vand.u32 2147483648, %v13843_v47  ;;  %v8538_v50 = vand.u32 2147483647, %v13843_v47 }
 0x946   : > { %8986 = vst.msk [vmem:[%s12845_s14 + $0x210] sm:$0xff] %vm8919_vm4, %v8512_v45  ;;  %v8516_v3 = vsub.f32 1.0, %v8515_v13  ;;  %v6642_v6 = vadd.f32 %v6641_v2, %v6191_v19  ;;  %v13871_v62 = vpop.f32.mrf.mxu1  ;;  %vm8534_vm5 = vweird.f32 %v13843_v47  ;;  %v6203_v14 = vadd.f32 %v13809_v16, %v5639_v46 }
 0x947   : > { %v8541_v24 = vor.u32 1.1754944e-38, %v8540_v36  ;;  %vm8539_vm7 = vcmp.eq.f32.partialorder %v8538_v50, 8.507059e+37 }
 0x948   : > { %v8517_v27 = vmul.f32 %v9644_v42, %v8516_v3  ;;  %v7039_v41 = vadd.f32 %v7038_v25, %v6642_v6  ;;  %v15595_v25 = vld [vmem:[#allocation145_spill] sm:$0xff] }
 0x94a   : > { %v9646_v18 = vpop.eup %9645  ;;  %v8518_v56 = vadd.f32 %v9644_v42, %v8517_v27  ;;  %v9147_v0 = vmul.f32 -1.442695, %v7039_v41  ;;  %6708 = vmatmul.f32.gmra.mxu2 %v15591_v8  ;;  %7109 = vmatmul.f32.gmra.mxu3 %v15593_v12  ;;  %v15596_v8 = vld [vmem:[#allocation188_spill] sm:$0xff] }
 0x94b   : > { %v9648_v37 = vpop.eup %9647  ;;  %v13861_v51 = vadd.f32 1.0, %v9646_v18 }
 0x94c   : > { %v8522_v49 = vsel %vm8521_vm1, %v9644_v42, %v8518_v56  ;;  %v8530_v60 = vmul.f32 %v9648_v37, %v13843_v47  ;;  %9649 = vpow2.f32 %v9147_v0  ;;  %vm8535_vm3 = vweird.f32 %v9648_v37  ;;  %v13900_v18 = vpop.f32.mrf.mxu0 }
 0x94d   : > { %v8527_v28 = vsel %vm8524_vm2, %v8526_v44, %v8522_v49  ;;  %9651 = vrcp.f32 %v13861_v51  ;;  %v6645_v35 = vpop.f32.mrf.mxu2  ;;  %v7046_v29 = vpop.f32.mrf.mxu3  ;;  %vm8536_vm6 = vmor %vm8534_vm5, %vm8535_vm3  ;;  %v5644_v42 = vadd.f32 %v13813_v53, %v15596_v8  ;;  %v8555_v16 = vand.u32 2147483648, %v13861_v51 }
 0x94e   : > { %8987 = vst.msk [vmem:[%s12845_s14 + $0x218] sm:$0xff] %vm8919_vm4, %v8527_v28  ;;  %v8531_v48 = vsub.f32 1.0, %v8530_v60  ;;  %v6646_v43 = vadd.f32 %v6645_v35, %v6197_v31  ;;  %v8553_v47 = vand.u32 2147483647, %v13861_v51  ;;  %v13890_v13 = vpop.f32.mrf.mxu1  ;;  %vm8549_vm9 = vweird.f32 %v13861_v51  ;;  %v15599_v35 = vld [vmem:[#allocation186_spill] sm:$0xff] }
 0x94f   : > { %v8556_v3 = vor.u32 1.1754944e-38, %v8555_v16  ;;  %v6209_v4 = vadd.f32 %v13818_v61, %v5644_v42 }
 0x950   : > { %v8532_v9 = vmul.f32 %v9648_v37, %v8531_v48  ;;  %v7043_v5 = vadd.f32 %v7042_v39, %v6646_v43  ;;  %v15597_v39 = vld [vmem:[#allocation3_spill] sm:$0xff]  ;;  %vm8554_vm11 = vcmp.eq.f32.partialorder %v8553_v47, 8.507059e+37 }
 0x952   : > { %v9650_v40 = vpop.eup %9649  ;;  %v8533_v52 = vadd.f32 %v9648_v37, %v8532_v9  ;;  %v9148_v7 = vmul.f32 -1.442695, %v7043_v5  ;;  %6712 = vmatmul.f32.gmra.mxu2 %v15593_v12  ;;  %7113 = vmatmul.f32.gmra.mxu3 %v15595_v25  ;;  %v15598_v12 = vld [vmem:[#allocation149_spill] sm:$0xff] }
 0x953   : > { %v9652_v34 = vpop.eup %9651  ;;  %v13877_v32 = vadd.f32 1.0, %v9650_v40 }
 0x954   : > { %v8537_v1 = vsel %vm8536_vm6, %v9648_v37, %v8533_v52  ;;  %v8545_v17 = vmul.f32 %v9652_v34, %v13861_v51  ;;  %9653 = vpow2.f32 %v9148_v7  ;;  %vm8550_vm8 = vweird.f32 %v9652_v34  ;;  %v15600_v7 = vld [vmem:[#allocation13_spill] sm:$0xff] }
 0x955   : > { %v8542_v15 = vsel %vm8539_vm7, %v8541_v24, %v8537_v1  ;;  %9655 = vrcp.f32 %v13877_v32  ;;  %v6649_v30 = vpop.f32.mrf.mxu2  ;;  %v7050_v21 = vpop.f32.mrf.mxu3  ;;  %vm8551_vm10 = vmor %vm8549_vm9, %vm8550_vm8  ;;  %v5649_v37 = vadd.f32 %v13822_v55, %v15598_v12  ;;  %v8570_v61 = vand.u32 2147483648, %v13877_v32 }
 0x956   : > { %8988 = vst.msk [vmem:[%s12845_s14 + $0x220] sm:$0xff] %vm8919_vm4, %v8542_v15  ;;  %v8546_v63 = vsub.f32 1.0, %v8545_v17  ;;  %v6650_v11 = vadd.f32 %v6649_v30, %v6203_v14  ;;  %v8568_v51 = vand.u32 2147483647, %v13877_v32  ;;  %vm8564_vm13 = vweird.f32 %v13877_v32  ;;  %v13914_v33 = vpop.f32.mrf.mxu1  ;;  %v15601_v30 = vld [vmem:[#allocation187_spill] sm:$0xff] }
 0x957   : > { %v8571_v55 = vor.u32 1.1754944e-38, %v8570_v61  ;;  %v6215_v43 = vadd.f32 %v13831_v57, %v5649_v37 }
 0x958   : > { %v8547_v22 = vmul.f32 %v9652_v34, %v8546_v63  ;;  %v7047_v19 = vadd.f32 %v7046_v29, %v6650_v11  ;;  %vm8569_vm15 = vcmp.eq.f32.partialorder %v8568_v51, 8.507059e+37 }
 0x95a   : > { %v9654_v59 = vpop.eup %9653  ;;  %v8548_v45 = vadd.f32 %v9652_v34, %v8547_v22  ;;  %v9149_v2 = vmul.f32 -1.442695, %v7047_v19  ;;  %6716 = vmatmul.f32.gmra.mxu2 %v15595_v25  ;;  %7117 = vmatmul.f32.gmra.mxu3 %v15597_v39  ;;  %v5654_v25 = vadd.f32 %v13839_v20, %v15600_v7 }
 0x95b   : > { %v9656_v53 = vpop.eup %9655  ;;  %v13895_v6 = vadd.f32 1.0, %v9654_v59 }
 0x95c   : > { %v8552_v23 = vsel %vm8551_vm10, %v9652_v34, %v8548_v45  ;;  %v8560_v54 = vmul.f32 %v9656_v53, %v13877_v32  ;;  %9657 = vpow2.f32 %v9149_v2  ;;  %vm8565_vm12 = vweird.f32 %v9656_v53  ;;  %v13923_v34 = vpop.f32.mrf.mxu0  ;;  %v15602_v2 = vld [vmem:[#allocation11_spill] sm:$0xff] }
 0x95d   : > { %v8557_v27 = vsel %vm8554_vm11, %v8556_v3, %v8552_v23  ;;  %9659 = vrcp.f32 %v13895_v6  ;;  %v6653_v10 = vpop.f32.mrf.mxu2  ;;  %v7054_v41 = vpop.f32.mrf.mxu3  ;;  %vm8566_vm14 = vmor %vm8564_vm13, %vm8565_vm12  ;;  %v8585_v57 = vand.u32 2147483648, %v13895_v6  ;;  %v8583_v32 = vand.u32 2147483647, %v13895_v6 }
 0x95e   : > { %8989 = vst.msk [vmem:[%s12845_s14 + $0x228] sm:$0xff] %vm8919_vm4, %v8557_v27  ;;  %v8561_v56 = vsub.f32 1.0, %v8560_v54  ;;  %v6654_v0 = vadd.f32 %v6653_v10, %v6209_v4  ;;  %vm8579_vm1 = vweird.f32 %v13895_v6  ;;  %v6221_v11 = vadd.f32 %v13848_v58, %v5654_v25  ;;  %v13934_v19 = vpop.f32.mrf.mxu1  ;;  %v15603_v10 = vld [vmem:[#allocation152_spill] sm:$0xff] }
 0x95f   : > { %vm8584_vm3 = vcmp.eq.f32.partialorder %v8583_v32, 8.507059e+37 }
 0x960   : > { %v8562_v44 = vmul.f32 %v9656_v53, %v8561_v56  ;;  %v7051_v31 = vadd.f32 %v7050_v21, %v6654_v0  ;;  %v8586_v21 = vor.u32 1.1754944e-38, %v8585_v57 }
 0x962   : > { %v9658_v49 = vpop.eup %9657  ;;  %v8563_v60 = vadd.f32 %v9656_v53, %v8562_v44  ;;  %v9150_v28 = vmul.f32 -1.442695, %v7051_v31  ;;  %6720 = vmatmul.f32.gmra.mxu2 %v15597_v39  ;;  %7121 = vmatmul.f32.gmra.mxu3 %v15599_v35  ;;  %v5659_v39 = vadd.f32 %v13856_v38, %v15602_v2 }
 0x963   : > { %v9660_v29 = vpop.eup %9659  ;;  %v13911_v48 = vadd.f32 1.0, %v9658_v49 }
 0x964   : > { %v8567_v46 = vsel %vm8566_vm14, %v9656_v53, %v8563_v60  ;;  %v8575_v36 = vmul.f32 %v9660_v29, %v13895_v6  ;;  %9661 = vpow2.f32 %v9150_v28  ;;  %vm8580_vm0 = vweird.f32 %v9660_v29  ;;  %v13942_v23 = vpop.f32.mrf.mxu0  ;;  %v15604_v60 = vld [vmem:[#allocation189_spill] sm:$0xff] }
 0x965   : > { %v8572_v9 = vsel %vm8569_vm15, %v8571_v55, %v8567_v46  ;;  %9663 = vrcp.f32 %v13911_v48  ;;  %v6657_v50 = vpop.f32.mrf.mxu2  ;;  %v7058_v5 = vpop.f32.mrf.mxu3  ;;  %vm8581_vm2 = vmor %vm8579_vm1, %vm8580_vm0  ;;  %v8600_v58 = vand.u32 2147483648, %v13911_v48  ;;  %v8598_v3 = vand.u32 2147483647, %v13911_v48 }
 0x966   : > { %8990 = vst.msk [vmem:[%s12845_s14 + $0x230] sm:$0xff] %vm8919_vm4, %v8572_v9  ;;  %v8576_v40 = vsub.f32 1.0, %v8575_v36  ;;  %v6658_v52 = vadd.f32 %v6657_v50, %v6215_v43  ;;  %vm8594_vm6 = vweird.f32 %v13911_v48  ;;  %v6227_v0 = vadd.f32 %v13871_v62, %v5659_v39 }
 0x967   : > { %vm8599_vm8 = vcmp.eq.f32.partialorder %v8598_v3, 8.507059e+37  ;;  %v5664_v28 = vadd.f32 %v13880_v26, %v15604_v60 }
 0x968   : > { %v8577_v24 = vmul.f32 %v9660_v29, %v8576_v40  ;;  %v7055_v14 = vadd.f32 %v7054_v41, %v6658_v52  ;;  %v8601_v41 = vor.u32 1.1754944e-38, %v8600_v58 }
 0x96a   : > { %v9662_v1 = vpop.eup %9661  ;;  %v8578_v17 = vadd.f32 %v9660_v29, %v8577_v24  ;;  %v9151_v15 = vmul.f32 -1.442695, %v7055_v14  ;;  %6724 = vmatmul.f32.gmra.mxu2 %v15599_v35  ;;  %7125 = vmatmul.f32.gmra.mxu3 %v15601_v30 }
 0x96b   : > { %v9664_v20 = vpop.eup %9663  ;;  %v13929_v63 = vadd.f32 1.0, %v9662_v1  ;;  %v15605_v1 = vld [vmem:[#allocation15_spill] sm:$0xff] }
 0x96c   : > { %v8582_v8 = vsel %vm8581_vm2, %v9660_v29, %v8578_v17  ;;  %v8590_v42 = vmul.f32 %v9664_v20, %v13911_v48  ;;  %9665 = vpow2.f32 %v9151_v15  ;;  %vm8595_vm5 = vweird.f32 %v9664_v20  ;;  %v13954_v29 = vpop.f32.mrf.mxu1  ;;  %v13960_v40 = vpop.f32.mrf.mxu0 }
 0x96d   : > { %v8587_v16 = vsel %vm8584_vm3, %v8586_v21, %v8582_v8  ;;  %9667 = vrcp.f32 %v13929_v63  ;;  %v6661_v22 = vpop.f32.mrf.mxu2  ;;  %v7062_v47 = vpop.f32.mrf.mxu3  ;;  %vm8596_vm7 = vmor %vm8594_vm6, %vm8595_vm5  ;;  %v8615_v35 = vand.u32 2147483648, %v13929_v63  ;;  %v8613_v55 = vand.u32 2147483647, %v13929_v63 }
 0x96e   : > { %8991 = vst.msk [vmem:[%s12845_s14 + $0x238] sm:$0xff] %vm8919_vm4, %v8587_v16  ;;  %v8591_v59 = vsub.f32 1.0, %v8590_v42  ;;  %v6662_v45 = vadd.f32 %v6661_v22, %v6221_v11  ;;  %vm8609_vm10 = vweird.f32 %v13929_v63  ;;  %v5669_v17 = vadd.f32 %v13900_v18, %v15605_v1 }
 0x96f   : > { %v8616_v26 = vor.u32 1.1754944e-38, %v8615_v35  ;;  %vm8614_vm12 = vcmp.eq.f32.partialorder %v8613_v55, 8.507059e+37 }
 0x970   : > { %v8592_v53 = vmul.f32 %v9664_v20, %v8591_v59  ;;  %v7059_v6 = vadd.f32 %v7058_v5, %v6662_v45  ;;  %v6233_v5 = vadd.f32 %v13890_v13, %v5664_v28 }
 0x972   : > { %v9666_v4 = vpop.eup %9665  ;;  %v8593_v54 = vadd.f32 %v9664_v20, %v8592_v53  ;;  %v9152_v27 = vmul.f32 -1.442695, %v7059_v6  ;;  %6728 = vmatmul.f32.gmra.mxu2 %v15601_v30  ;;  %7129 = vmatmul.f32.gmra.mxu3 %v15603_v10  ;;  %v15606_v6 = vld [vmem:[#allocation154_spill] sm:$0xff] }
 0x973   : > { %v9668_v38 = vpop.eup %9667  ;;  %v7489_v56 = vadd.f32 1.0, %v9666_v4  ;;  %v5674_v4 = vadd.f32 %v13923_v34, %v15606_v6 }
 0x974   : > { %v8597_v12 = vsel %vm8596_vm7, %v9664_v20, %v8593_v54  ;;  %v8605_v37 = vmul.f32 %v9668_v38, %v13929_v63  ;;  %9669 = vpow2.f32 %v9152_v27  ;;  %vm8610_vm9 = vweird.f32 %v9668_v38  ;;  %v13966_v63 = vpop.f32.mrf.mxu1  ;;  %v13969_v58 = vpop.f32.mrf.mxu0 }
 0x975   : > { %v8602_v61 = vsel %vm8599_vm8, %v8601_v41, %v8597_v12  ;;  %9671 = vrcp.f32 %v7489_v56  ;;  %v6665_v44 = vpop.f32.mrf.mxu2  ;;  %v7066_v51 = vpop.f32.mrf.mxu3  ;;  %vm8611_vm11 = vmor %vm8609_vm10, %vm8610_vm9  ;;  %v8630_v15 = vand.u32 2147483648, %v7489_v56  ;;  %v8628_v13 = vand.u32 2147483647, %v7489_v56 }
 0x976   : > { %8992 = vst.msk [vmem:[%s12845_s14 + $0x240] sm:$0xff] %vm8919_vm4, %v8602_v61  ;;  %v8606_v31 = vsub.f32 1.0, %v8605_v37  ;;  %v6666_v49 = vadd.f32 %v6665_v44, %v6227_v0  ;;  %vm8624_vm14 = vweird.f32 %v7489_v56  ;;  %v6245_v61 = vadd.f32 %v13934_v19, %v5674_v4 }
 0x977   : > { %v8631_v16 = vor.u32 1.1754944e-38, %v8630_v15  ;;  %vm8629_vm0 = vcmp.eq.f32.partialorder %v8628_v13, 8.507059e+37 }
 0x978   : > { %v8607_v62 = vmul.f32 %v9668_v38, %v8606_v31  ;;  %v7063_v48 = vadd.f32 %v7062_v47, %v6666_v49  ;;  %v6239_v47 = vadd.f32 %v13914_v33, %v5669_v17 }
 0x97a   : > { %v9670_v43 = vpop.eup %9669  ;;  %v8608_v46 = vadd.f32 %v9668_v38, %v8607_v62  ;;  %v9153_v36 = vmul.f32 -1.442695, %v7063_v48  ;;  %6732 = vmatmul.f32.gmra.mxu2 %v15603_v10  ;;  %v15607_v62 = vld [vmem:[#allocation8_spill] sm:$0xff] }
 0x97b   : > { %v9672_v9 = vpop.eup %9671  ;;  %v7490_v50 = vadd.f32 1.0, %v9670_v43  ;;  %v5679_v55 = vadd.f32 %v13942_v23, %v15607_v62 }
 0x97c   : > { %v8612_v52 = vsel %vm8611_vm11, %v9668_v38, %v8608_v46  ;;  %v8620_v7 = vmul.f32 %v9672_v9, %v7489_v56  ;;  %9673 = vpow2.f32 %v9153_v36  ;;  %vm8625_vm13 = vweird.f32 %v9672_v9  ;;  %v13976_v44 = vpop.f32.mrf.mxu1  ;;  %v13982_v43 = vpop.f32.mrf.mxu0 }
 0x97d   : > { %v8617_v25 = vsel %vm8614_vm12, %v8616_v26, %v8612_v52  ;;  %9675 = vrcp.f32 %v7490_v50  ;;  %v6669_v57 = vpop.f32.mrf.mxu2  ;;  %v7070_v24 = vpop.f32.mrf.mxu3  ;;  %vm8626_vm15 = vmor %vm8624_vm14, %vm8625_vm13  ;;  %v8645_v54 = vand.u32 2147483648, %v7490_v50  ;;  %v8643_v33 = vand.u32 2147483647, %v7490_v50 }
 0x97e   : > { %8993 = vst.msk [vmem:[%s12845_s14 + $0x248] sm:$0xff] %vm8919_vm4, %v8617_v25  ;;  %v8621_v32 = vsub.f32 1.0, %v8620_v7  ;;  %v6670_v14 = vadd.f32 %v6669_v57, %v6233_v5  ;;  %vm8639_vm2 = vweird.f32 %v7490_v50  ;;  %v6251_v25 = vadd.f32 %v13954_v29, %v5679_v55 }
 0x97f   : > { %v8646_v12 = vor.u32 1.1754944e-38, %v8645_v54  ;;  %vm8644_vm5 = vcmp.eq.f32.partialorder %v8643_v33, 8.507059e+37  ;;  %v15609_v54 = vld [vmem:[#allocation191_spill] sm:$0xff] }
 0x980   : > { %v8622_v30 = vmul.f32 %v9672_v9, %v8621_v32  ;;  %v7067_v20 = vadd.f32 %v7066_v51, %v6670_v14 }
 0x982   : > { %v9674_v21 = vpop.eup %9673  ;;  %v8623_v11 = vadd.f32 %v9672_v9, %v8622_v30  ;;  %v9154_v8 = vmul.f32 -1.442695, %v7067_v20  ;;  %v15608_v30 = vld [vmem:[#allocation153_spill] sm:$0xff] }
 0x983   : > { %v9676_v42 = vpop.eup %9675  ;;  %v7491_v22 = vadd.f32 1.0, %v9674_v21  ;;  %v5684_v13 = vadd.f32 %v13960_v40, %v15608_v30 }
 0x984   : > { %v8627_v59 = vsel %vm8626_vm15, %v9672_v9, %v8623_v11  ;;  %v8635_v18 = vmul.f32 %v9676_v42, %v7490_v50  ;;  %9677 = vpow2.f32 %v9154_v8  ;;  %vm8640_vm1 = vweird.f32 %v9676_v42  ;;  %v13985_v1 = vpop.f32.mrf.mxu1 }
 0x985   : > { %v8632_v45 = vsel %vm8629_vm0, %v8631_v16, %v8627_v59  ;;  %9679 = vrcp.f32 %v7491_v22  ;;  %v6673_v2 = vpop.f32.mrf.mxu2  ;;  %v7074_v39 = vpop.f32.mrf.mxu3  ;;  %vm8641_vm3 = vmor %vm8639_vm2, %vm8640_vm1  ;;  %v8660_v48 = vand.u32 2147483648, %v7491_v22  ;;  %v8658_v46 = vand.u32 2147483647, %v7491_v22 }
 0x986   : > { %8994 = vst.msk [vmem:[%s12845_s14 + $0x250] sm:$0xff] %vm8919_vm4, %v8632_v45  ;;  %v8636_v53 = vsub.f32 1.0, %v8635_v18  ;;  %v6674_v3 = vadd.f32 %v6673_v2, %v6239_v47  ;;  %vm8654_vm7 = vweird.f32 %v7491_v22  ;;  %v6257_v45 = vadd.f32 %v13966_v63, %v5684_v13 }
 0x987   : > { %v8661_v52 = vor.u32 1.1754944e-38, %v8660_v48  ;;  %vm8659_vm9 = vcmp.eq.f32.partialorder %v8658_v46, 8.507059e+37  ;;  %v15610_v48 = vld [vmem:[#allocation157_spill] sm:$0xff] }
 0x988   : > { %v8637_v27 = vmul.f32 %v9676_v42, %v8636_v53  ;;  %v7071_v10 = vadd.f32 %v7070_v24, %v6674_v3 }
 0x98a   : > { %v9678_v38 = vpop.eup %9677  ;;  %v8638_v41 = vadd.f32 %v9676_v42, %v8637_v27  ;;  %v9155_v56 = vmul.f32 -1.442695, %v7071_v10  ;;  %v5689_v27 = vadd.f32 %v13969_v58, %v15609_v54 }
 0x98b   : > { %v9680_v0 = vpop.eup %9679  ;;  %v7492_v37 = vadd.f32 1.0, %v9678_v38 }
 0x98c   : > { %v8642_v51 = vsel %vm8641_vm3, %v9676_v42, %v8638_v41  ;;  %v8650_v34 = vmul.f32 %v9680_v0, %v7491_v22  ;;  %9681 = vpow2.f32 %v9155_v56  ;;  %vm8655_vm6 = vweird.f32 %v9680_v0  ;;  %v13991_v42 = vpop.f32.mrf.mxu0  ;;  %v13998_v10 = vpop.f32.mrf.mxu1 }
 0x98d   : > { %v8647_v31 = vsel %vm8644_vm5, %v8646_v12, %v8642_v51  ;;  %9683 = vrcp.f32 %v7492_v37  ;;  %v6677_v49 = vpop.f32.mrf.mxu2  ;;  %v7078_v60 = vpop.f32.mrf.mxu3  ;;  %vm8656_vm8 = vmor %vm8654_vm7, %vm8655_vm6  ;;  %v8675_v20 = vand.u32 2147483648, %v7492_v37  ;;  %v8673_v29 = vand.u32 2147483647, %v7492_v37 }
 0x98e   : > { %8995 = vst.msk [vmem:[%s12845_s14 + $0x258] sm:$0xff] %vm8919_vm4, %v8647_v31  ;;  %v8651_v28 = vsub.f32 1.0, %v8650_v34  ;;  %v6678_v35 = vadd.f32 %v6677_v49, %v6245_v61  ;;  %vm8669_vm11 = vweird.f32 %v7492_v37  ;;  %v6263_v34 = vadd.f32 %v13976_v44, %v5689_v27  ;;  %v15612_v27 = vld [vmem:[#allocation156_spill] sm:$0xff] }
 0x98f   : > { %v8676_v59 = vor.u32 1.1754944e-38, %v8675_v20  ;;  %vm8674_vm13 = vcmp.eq.f32.partialorder %v8673_v29, 8.507059e+37  ;;  %v15611_v20 = vld [vmem:[#allocation12_spill] sm:$0xff] }
 0x990   : > { %v8652_v19 = vmul.f32 %v9680_v0, %v8651_v28  ;;  %v7075_v36 = vadd.f32 %v7074_v39, %v6678_v35 }
 0x992   : > { %v9682_v9 = vpop.eup %9681  ;;  %v8653_v26 = vadd.f32 %v9680_v0, %v8652_v19  ;;  %v9156_v50 = vmul.f32 -1.442695, %v7075_v36  ;;  %v5694_v19 = vadd.f32 %v13982_v43, %v15610_v48 }
 0x993   : > { %v9684_v5 = vpop.eup %9683  ;;  %v7493_v7 = vadd.f32 1.0, %v9682_v9 }
 0x994   : > { %v8657_v57 = vsel %vm8656_vm8, %v9680_v0, %v8653_v26  ;;  %v8665_v23 = vmul.f32 %v9684_v5, %v7492_v37  ;;  %9685 = vpow2.f32 %v9156_v50  ;;  %vm8670_vm10 = vweird.f32 %v9684_v5  ;;  %v14001_v31 = vpop.f32.mrf.mxu0  ;;  %v14007_v50 = vpop.f32.mrf.mxu1 }
 0x995   : > { %v8662_v24 = vsel %vm8659_vm9, %v8661_v52, %v8657_v57  ;;  %9687 = vrcp.f32 %v7493_v7  ;;  %v6681_v32 = vpop.f32.mrf.mxu2  ;;  %v7082_v14 = vpop.f32.mrf.mxu3  ;;  %vm8671_vm12 = vmor %vm8669_vm11, %vm8670_vm10  ;;  %v8690_v33 = vand.u32 2147483648, %v7493_v7  ;;  %v8688_v63 = vand.u32 2147483647, %v7493_v7 }
 0x996   : > { %8996 = vst.msk [vmem:[%s12845_s14 + $0x260] sm:$0xff] %vm8919_vm4, %v8662_v24  ;;  %v8666_v17 = vsub.f32 1.0, %v8665_v23  ;;  %v6682_v15 = vadd.f32 %v6681_v32, %v6251_v25  ;;  %vm8684_vm15 = vweird.f32 %v7493_v7  ;;  %v6269_v23 = vadd.f32 %v13985_v1, %v5694_v19  ;;  %v15613_v19 = vld [vmem:[#allocation192_spill] sm:$0xff] }
 0x997   : > { %v8691_v61 = vor.u32 1.1754944e-38, %v8690_v33  ;;  %vm8689_vm1 = vcmp.eq.f32.partialorder %v8688_v63, 8.507059e+37  ;;  %v5704_v33 = vadd.f32 %v14001_v31, %v15612_v27 }
 0x998   : > { %v8667_v21 = vmul.f32 %v9684_v5, %v8666_v17  ;;  %v7079_v11 = vadd.f32 %v7078_v60, %v6682_v15 }
 0x99a   : > { %v9686_v8 = vpop.eup %9685  ;;  %v8668_v16 = vadd.f32 %v9684_v5, %v8667_v21  ;;  %v9157_v22 = vmul.f32 -1.442695, %v7079_v11  ;;  %v5699_v21 = vadd.f32 %v13991_v42, %v15611_v20  ;;  %v15614_v20 = vld [vmem:[#allocation193_spill] sm:$0xff] }
 0x99b   : > { %v9688_v47 = vpop.eup %9687  ;;  %v7494_v18 = vadd.f32 1.0, %v9686_v8 }
 0x99c   : > { %v8672_v2 = vsel %vm8671_vm12, %v9684_v5, %v8668_v16  ;;  %v8680_v40 = vmul.f32 %v9688_v47, %v7493_v7  ;;  %9689 = vpow2.f32 %v9157_v22  ;;  %vm8685_vm14 = vweird.f32 %v9688_v47  ;;  %v5708_v15 = vpop.f32.mrf.mxu0 }
 0x99d   : > { %v8677_v39 = vsel %vm8674_vm13, %v8676_v59, %v8672_v2  ;;  %9691 = vrcp.f32 %v7494_v18  ;;  %v6685_v53 = vpop.f32.mrf.mxu2  ;;  %v7086_v3 = vpop.f32.mrf.mxu3  ;;  %vm8686_vm0 = vmor %vm8684_vm15, %vm8685_vm14  ;;  %v8705_v46 = vand.u32 2147483648, %v7494_v18  ;;  %v8703_v44 = vand.u32 2147483647, %v7494_v18 }
 0x99e   : > { %8997 = vst.msk [vmem:[%s12845_s14 + $0x268] sm:$0xff] %vm8919_vm4, %v8677_v39  ;;  %v8681_v6 = vsub.f32 1.0, %v8680_v40  ;;  %v6686_v4 = vadd.f32 %v6685_v53, %v6257_v45  ;;  %vm8699_vm3 = vweird.f32 %v7494_v18  ;;  %v6275_v2 = vadd.f32 %v13998_v10, %v5699_v21  ;;  %v6286_v40 = vpop.f32.mrf.mxu1 }
 0x99f   : > { %v8706_v25 = vor.u32 1.1754944e-38, %v8705_v46  ;;  %vm8704_vm6 = vcmp.eq.f32.partialorder %v8703_v44, 8.507059e+37  ;;  %v5709_v46 = vadd.f32 %v5708_v15, %v15613_v19  ;;  %v15616_v19 = vld [vmem:[#allocation161_spill] sm:$0xff] }
 0x9a0   : > { %v8682_v38 = vmul.f32 %v9688_v47, %v8681_v6  ;;  %v7083_v41 = vadd.f32 %v7082_v14, %v6686_v4 }
 0x9a2   : > { %v9690_v56 = vpop.eup %9689  ;;  %v8683_v0 = vadd.f32 %v9688_v47, %v8682_v38  ;;  %v9158_v12 = vmul.f32 -1.442695, %v7083_v41 }
 0x9a3   : > { %v9692_v37 = vpop.eup %9691  ;;  %v7495_v51 = vadd.f32 1.0, %v9690_v56 }
 0x9a4   : > { %v8687_v58 = vsel %vm8686_vm0, %v9688_v47, %v8683_v0  ;;  %v8695_v49 = vmul.f32 %v9692_v37, %v7494_v18  ;;  %9693 = vpow2.f32 %v9158_v12  ;;  %vm8700_vm2 = vweird.f32 %v9692_v37  ;;  %v5713_v63 = vpop.f32.mrf.mxu0 }
 0x9a5   : > { %v8692_v60 = vsel %vm8689_vm1, %v8691_v61, %v8687_v58  ;;  %9695 = vrcp.f32 %v7495_v51  ;;  %v6689_v28 = vpop.f32.mrf.mxu2  ;;  %v7090_v35 = vpop.f32.mrf.mxu3  ;;  %vm8701_vm5 = vmor %vm8699_vm3, %vm8700_vm2  ;;  %v8720_v29 = vand.u32 2147483648, %v7495_v51  ;;  %v8718_v1 = vand.u32 2147483647, %v7495_v51 }
 0x9a6   : > { %8998 = vst.msk [vmem:[%s12845_s14 + $0x270] sm:$0xff] %vm8919_vm4, %v8692_v60  ;;  %v8696_v62 = vsub.f32 1.0, %v8695_v49  ;;  %v6690_v55 = vadd.f32 %v6689_v28, %v6263_v34  ;;  %vm8714_vm8 = vweird.f32 %v7495_v51  ;;  %v6281_v58 = vadd.f32 %v14007_v50, %v5704_v33  ;;  %v15615_v33 = vld [vmem:[#allocation196_spill] sm:$0xff] }
 0x9a7   : > { %v8721_v18 = vor.u32 1.1754944e-38, %v8720_v29  ;;  %vm8719_vm10 = vcmp.eq.f32.partialorder %v8718_v1, 8.507059e+37  ;;  %v5714_v21 = vadd.f32 %v5713_v63, %v15614_v20  ;;  %v15617_v20 = vld [vmem:[#allocation195_spill] sm:$0xff] }
 0x9a8   : > { %v8697_v36 = vmul.f32 %v9692_v37, %v8696_v62  ;;  %v7087_v9 = vadd.f32 %v7086_v3, %v6690_v55  ;;  %v6292_v62 = vpop.f32.mrf.mxu1 }
 0x9aa   : > { %v9694_v26 = vpop.eup %9693  ;;  %v8698_v5 = vadd.f32 %v9692_v37, %v8697_v36  ;;  %v9159_v52 = vmul.f32 -1.442695, %v7087_v9 }
 0x9ab   : > { %v9696_v7 = vpop.eup %9695  ;;  %v7496_v57 = vadd.f32 1.0, %v9694_v26 }
 0x9ac   : > { %v8702_v24 = vsel %vm8701_vm5, %v9692_v37, %v8698_v5  ;;  %v8710_v43 = vmul.f32 %v9696_v7, %v7495_v51  ;;  %9697 = vpow2.f32 %v9159_v52  ;;  %vm8715_vm7 = vweird.f32 %v9696_v7  ;;  %v5718_v5 = vpop.f32.mrf.mxu0 }
 0x9ad   : > { %v8707_v32 = vsel %vm8704_vm6, %v8706_v25, %v8702_v24  ;;  %9699 = vrcp.f32 %v7496_v57  ;;  %v6693_v14 = vpop.f32.mrf.mxu2  ;;  %v7094_v17 = vpop.f32.mrf.mxu3  ;;  %vm8716_vm9 = vmor %vm8714_vm8, %vm8715_vm7  ;;  %v8735_v38 = vand.u32 2147483648, %v7496_v57  ;;  %v8733_v10 = vand.u32 2147483647, %v7496_v57 }
 0x9ae   : > { %8999 = vst.msk [vmem:[%s12845_s14 + $0x278] sm:$0xff] %vm8919_vm4, %v8707_v32  ;;  %v8711_v30 = vsub.f32 1.0, %v8710_v43  ;;  %v6694_v13 = vadd.f32 %v6693_v14, %v6269_v23  ;;  %vm8729_vm12 = vweird.f32 %v7496_v57  ;;  %v6287_v24 = vadd.f32 %v6286_v40, %v5709_v46 }
 0x9af   : > { %v8736_v51 = vor.u32 1.1754944e-38, %v8735_v38  ;;  %vm8734_vm14 = vcmp.eq.f32.partialorder %v8733_v10, 8.507059e+37  ;;  %v6293_v40 = vadd.f32 %v6292_v62, %v5714_v21  ;;  %v5719_v38 = vadd.f32 %v5718_v5, %v15615_v33  ;;  %v15618_v33 = vld [vmem:[#allocation160_spill] sm:$0xff] }
 0x9b0   : > { %v8712_v11 = vmul.f32 %v9696_v7, %v8711_v30  ;;  %v7091_v8 = vadd.f32 %v7090_v35, %v6694_v13 }
 0x9b2   : > { %v9698_v16 = vpop.eup %9697  ;;  %v8713_v22 = vadd.f32 %v9696_v7, %v8712_v11  ;;  %v9160_v47 = vmul.f32 -1.442695, %v7091_v8  ;;  %v6298_v11 = vpop.f32.mrf.mxu1 }
 0x9b3   : > { %v9700_v59 = vpop.eup %9699  ;;  %v7497_v45 = vadd.f32 1.0, %v9698_v16 }
 0x9b4   : > { %v8717_v39 = vsel %vm8716_vm9, %v9696_v7, %v8713_v22  ;;  %v8725_v42 = vmul.f32 %v9700_v59, %v7496_v57  ;;  %9701 = vpow2.f32 %v9160_v47  ;;  %vm8730_vm11 = vweird.f32 %v9700_v59 }
 0x9b5   : > { %v8722_v53 = vsel %vm8719_vm10, %v8721_v18, %v8717_v39  ;;  %9703 = vrcp.f32 %v7497_v45  ;;  %v6697_v3 = vpop.f32.mrf.mxu2  ;;  %v7098_v6 = vpop.f32.mrf.mxu3  ;;  %vm8731_vm13 = vmor %vm8729_vm12, %vm8730_vm11  ;;  %v8750_v36 = vand.u32 2147483648, %v7497_v45  ;;  %v8748_v9 = vand.u32 2147483647, %v7497_v45 }
 0x9b6   : > { %9000 = vst.msk [vmem:[%s12845_s14 + $0x280] sm:$0xff] %vm8919_vm4, %v8722_v53  ;;  %v8726_v4 = vsub.f32 1.0, %v8725_v42  ;;  %v6698_v54 = vadd.f32 %v6697_v3, %v6275_v2  ;;  %vm8744_vm0 = vweird.f32 %v7497_v45  ;;  %v5723_v39 = vpop.f32.mrf.mxu0 }
 0x9b7   : > { %v8751_v57 = vor.u32 1.1754944e-38, %v8750_v36  ;;  %vm8749_vm2 = vcmp.eq.f32.partialorder %v8748_v9, 8.507059e+37  ;;  %v5724_v46 = vadd.f32 %v5723_v39, %v15616_v19  ;;  %v15619_v19 = vld [vmem:[#allocation194_spill] sm:$0xff] }
 0x9b8   : > { %v8727_v41 = vmul.f32 %v9700_v59, %v8726_v4  ;;  %v7095_v56 = vadd.f32 %v7094_v17, %v6698_v54 }
 0x9ba   : > { %v9702_v0 = vpop.eup %9701  ;;  %v8728_v12 = vadd.f32 %v9700_v59, %v8727_v41  ;;  %v9161_v37 = vmul.f32 -1.442695, %v7095_v56 }
 0x9bb   : > { %v9704_v61 = vpop.eup %9703  ;;  %v7498_v34 = vadd.f32 1.0, %v9702_v0 }
 0x9bc   : > { %v8732_v49 = vsel %vm8731_vm13, %v9700_v59, %v8728_v12  ;;  %v8740_v31 = vmul.f32 %v9704_v61, %v7497_v45  ;;  %9705 = vpow2.f32 %v9161_v37  ;;  %vm8745_vm15 = vweird.f32 %v9704_v61  ;;  %v6304_v12 = vpop.f32.mrf.mxu1 }
 0x9bd   : > { %v8737_v60 = vsel %vm8734_vm14, %v8736_v51, %v8732_v49  ;;  %9707 = vrcp.f32 %v7498_v34  ;;  %v6701_v28 = vpop.f32.mrf.mxu2  ;;  %v7102_v35 = vpop.f32.mrf.mxu3  ;;  %vm8746_vm1 = vmor %vm8744_vm0, %vm8745_vm15  ;;  %v8765_v29 = vand.u32 2147483648, %v7498_v34  ;;  %v8763_v8 = vand.u32 2147483647, %v7498_v34 }
 0x9be   : > { %9001 = vst.msk [vmem:[%s12845_s14 + $0x288] sm:$0xff] %vm8919_vm4, %v8737_v60  ;;  %v8741_v55 = vsub.f32 1.0, %v8740_v31  ;;  %v6702_v48 = vadd.f32 %v6701_v28, %v6281_v58  ;;  %vm8759_vm5 = vweird.f32 %v7498_v34  ;;  %v6299_v49 = vadd.f32 %v6298_v11, %v5719_v38  ;;  %v5728_v62 = vpop.f32.mrf.mxu0 }
 0x9bf   : > { %v8766_v45 = vor.u32 1.1754944e-38, %v8765_v29  ;;  %vm8764_vm7 = vcmp.eq.f32.partialorder %v8763_v8, 8.507059e+37  ;;  %v5729_v21 = vadd.f32 %v5728_v62, %v15617_v20 }
 0x9c0   : > { %v8742_v44 = vmul.f32 %v9704_v61, %v8741_v55  ;;  %v7099_v26 = vadd.f32 %v7098_v6, %v6702_v48 }
 0x9c2   : > { %v9706_v50 = vpop.eup %9705  ;;  %v8743_v52 = vadd.f32 %v9704_v61, %v8742_v44  ;;  %v9162_v7 = vmul.f32 -1.442695, %v7099_v26 }
 0x9c3   : > { %v9708_v25 = vpop.eup %9707  ;;  %v7499_v23 = vadd.f32 1.0, %v9706_v50 }
 0x9c4   : > { %v8747_v43 = vsel %vm8746_vm1, %v9704_v61, %v8743_v52  ;;  %v8755_v32 = vmul.f32 %v9708_v25, %v7498_v34  ;;  %9709 = vpow2.f32 %v9162_v7  ;;  %vm8760_vm3 = vweird.f32 %v9708_v25 }
 0x9c5   : > { %v8752_v14 = vsel %vm8749_vm2, %v8751_v57, %v8747_v43  ;;  %9711 = vrcp.f32 %v7499_v23  ;;  %v6705_v17 = vpop.f32.mrf.mxu2  ;;  %v7106_v15 = vpop.f32.mrf.mxu3  ;;  %vm8761_vm6 = vmor %vm8759_vm5, %vm8760_vm3  ;;  %v8780_v63 = vand.u32 2147483648, %v7499_v23  ;;  %v8778_v10 = vand.u32 2147483647, %v7499_v23 }
 0x9c6   : > { %9002 = vst.msk [vmem:[%s12845_s14 + $0x290] sm:$0xff] %vm8919_vm4, %v8752_v14  ;;  %v8756_v30 = vsub.f32 1.0, %v8755_v32  ;;  %v6706_v13 = vadd.f32 %v6705_v17, %v6287_v24  ;;  %vm8774_vm9 = vweird.f32 %v7499_v23  ;;  %v6305_v24 = vadd.f32 %v6304_v12, %v5724_v46  ;;  %v6310_v43 = vpop.f32.mrf.mxu1  ;;  %v5733_v11 = vpop.f32.mrf.mxu0 }
 0x9c7   : > { %v8781_v34 = vor.u32 1.1754944e-38, %v8780_v63  ;;  %vm8779_vm11 = vcmp.eq.f32.partialorder %v8778_v10, 8.507059e+37  ;;  %v6311_v39 = vadd.f32 %v6310_v43, %v5729_v21  ;;  %v5734_v38 = vadd.f32 %v5733_v11, %v15618_v33  ;;  %v15620_v21 = vld [vmem:[#allocation23_spill] sm:$0xff] }
 0x9c8   : > { %v8757_v1 = vmul.f32 %v9708_v25, %v8756_v30  ;;  %v7103_v16 = vadd.f32 %v7102_v35, %v6706_v13 }
 0x9ca   : > { %v9710_v22 = vpop.eup %9709  ;;  %v8758_v47 = vadd.f32 %v9708_v25, %v8757_v1  ;;  %v9163_v59 = vmul.f32 -1.442695, %v7103_v16 }
 0x9cb   : > { %v9712_v18 = vpop.eup %9711  ;;  %v7500_v2 = vadd.f32 1.0, %v9710_v22 }
 0x9cc   : > { %v8762_v42 = vsel %vm8761_vm6, %v9708_v25, %v8758_v47  ;;  %v8770_v53 = vmul.f32 %v9712_v18, %v7499_v23  ;;  %9713 = vpow2.f32 %v9163_v59  ;;  %vm8775_vm8 = vweird.f32 %v9712_v18 }
 0x9cd   : > { %v8767_v3 = vsel %vm8764_vm7, %v8766_v45, %v8762_v42  ;;  %9715 = vrcp.f32 %v7500_v2  ;;  %v6709_v6 = vpop.f32.mrf.mxu2  ;;  %v7110_v4 = vpop.f32.mrf.mxu3  ;;  %vm8776_vm10 = vmor %vm8774_vm9, %vm8775_vm8  ;;  %v8795_v36 = vand.u32 2147483648, %v7500_v2  ;;  %v8793_v26 = vand.u32 2147483647, %v7500_v2 }
 0x9ce   : > { %9003 = vst.msk [vmem:[%s12845_s14 + $0x298] sm:$0xff] %vm8919_vm4, %v8767_v3  ;;  %v8771_v54 = vsub.f32 1.0, %v8770_v53  ;;  %v6710_v27 = vadd.f32 %v6709_v6, %v6293_v40  ;;  %vm8789_vm13 = vweird.f32 %v7500_v2  ;;  %v5738_v12 = vpop.f32.mrf.mxu0 }
 0x9cf   : > { %v8796_v57 = vor.u32 1.1754944e-38, %v8795_v36  ;;  %vm8794_vm15 = vcmp.eq.f32.partialorder %v8793_v26, 8.507059e+37  ;;  %v5739_v46 = vadd.f32 %v5738_v12, %v15619_v19 }
 0x9d0   : > { %v8772_v41 = vmul.f32 %v9712_v18, %v8771_v54  ;;  %v7107_v56 = vadd.f32 %v7106_v15, %v6710_v27 }
 0x9d2   : > { %v9714_v0 = vpop.eup %9713  ;;  %v8773_v37 = vadd.f32 %v9712_v18, %v8772_v41  ;;  %v9164_v61 = vmul.f32 -1.442695, %v7107_v56 }
 0x9d3   : > { %v9716_v51 = vpop.eup %9715  ;;  %v7501_v58 = vadd.f32 1.0, %v9714_v0 }
 0x9d4   : > { %v8777_v31 = vsel %vm8776_vm10, %v9712_v18, %v8773_v37  ;;  %v8785_v60 = vmul.f32 %v9716_v51, %v7500_v2  ;;  %9717 = vpow2.f32 %v9164_v61  ;;  %vm8790_vm12 = vweird.f32 %v9716_v51 }
 0x9d5   : > { %v8782_v28 = vsel %vm8779_vm11, %v8781_v34, %v8777_v31  ;;  %9719 = vrcp.f32 %v7501_v58  ;;  %v6713_v35 = vpop.f32.mrf.mxu2  ;;  %v7114_v44 = vpop.f32.mrf.mxu3  ;;  %vm8791_vm14 = vmor %vm8789_vm13, %vm8790_vm12  ;;  %v8810_v29 = vand.u32 2147483648, %v7501_v58  ;;  %v8808_v8 = vand.u32 2147483647, %v7501_v58 }
 0x9d6   : > { %9004 = vst.msk [vmem:[%s12845_s14 + $0x2a0] sm:$0xff] %vm8919_vm4, %v8782_v28  ;;  %v8786_v55 = vsub.f32 1.0, %v8785_v60  ;;  %v6714_v48 = vadd.f32 %v6713_v35, %v6299_v49  ;;  %vm8804_vm1 = vweird.f32 %v7501_v58  ;;  %v5743_v43 = vpop.f32.mrf.mxu0 }
 0x9d7   : > { %v8811_v2 = vor.u32 1.1754944e-38, %v8810_v29  ;;  %vm8809_vm3 = vcmp.eq.f32.partialorder %v8808_v8, 8.507059e+37  ;;  %v5744_v29 = vadd.f32 %v5743_v43, %v15620_v21 }
 0x9d8   : > { %v8787_v9 = vmul.f32 %v9716_v51, %v8786_v55  ;;  %v7111_v50 = vadd.f32 %v7110_v4, %v6714_v48  ;;  %v6316_v4 = vpop.f32.mrf.mxu1 }
 0x9d9   : > { %v6317_v31 = vadd.f32 %v6316_v4, %v5734_v38 }
 0x9da   : > { %v9718_v5 = vpop.eup %9717  ;;  %v8788_v52 = vadd.f32 %v9716_v51, %v8787_v9  ;;  %v9165_v7 = vmul.f32 -1.442695, %v7111_v50 }
 0x9db   : > { %v9720_v25 = vpop.eup %9719  ;;  %v7502_v23 = vadd.f32 1.0, %v9718_v5 }
 0x9dc   : > { %v8792_v32 = vsel %vm8791_vm14, %v9716_v51, %v8788_v52  ;;  %v8800_v14 = vmul.f32 %v9720_v25, %v7501_v58  ;;  %9721 = vpow2.f32 %v9165_v7  ;;  %vm8805_vm0 = vweird.f32 %v9720_v25 }
 0x9dd   : > { %v8797_v17 = vsel %vm8794_vm15, %v8796_v57, %v8792_v32  ;;  %9723 = vrcp.f32 %v7502_v23  ;;  %v6717_v15 = vpop.f32.mrf.mxu2  ;;  %v7118_v22 = vpop.f32.mrf.mxu3  ;;  %vm8806_vm2 = vmor %vm8804_vm1, %vm8805_vm0  ;;  %v8825_v63 = vand.u32 2147483648, %v7502_v23  ;;  %v8823_v10 = vand.u32 2147483647, %v7502_v23 }
 0x9de   : > { %9005 = vst.msk [vmem:[%s12845_s14 + $0x2a8] sm:$0xff] %vm8919_vm4, %v8797_v17  ;;  %v8801_v30 = vsub.f32 1.0, %v8800_v14  ;;  %v6718_v13 = vadd.f32 %v6717_v15, %v6305_v24  ;;  %vm8819_vm6 = vweird.f32 %v7502_v23 }
 0x9df   : > { %v8826_v34 = vor.u32 1.1754944e-38, %v8825_v63  ;;  %vm8824_vm8 = vcmp.eq.f32.partialorder %v8823_v10, 8.507059e+37 }
 0x9e0   : > { %v8802_v1 = vmul.f32 %v9720_v25, %v8801_v30  ;;  %v7115_v16 = vadd.f32 %v7114_v44, %v6718_v13  ;;  %v6322_v44 = vpop.f32.mrf.mxu1 }
 0x9e1   : > { %v6323_v24 = vadd.f32 %v6322_v44, %v5739_v46 }
 0x9e2   : > { %v9722_v47 = vpop.eup %9721  ;;  %v8803_v59 = vadd.f32 %v9720_v25, %v8802_v1  ;;  %v9166_v18 = vmul.f32 -1.442695, %v7115_v16 }
 0x9e3   : > { %v9724_v45 = vpop.eup %9723  ;;  %v7503_v40 = vadd.f32 1.0, %v9722_v47 }
 0x9e4   : > { %v8807_v42 = vsel %vm8806_vm2, %v9720_v25, %v8803_v59  ;;  %v8815_v53 = vmul.f32 %v9724_v45, %v7502_v23  ;;  %9725 = vpow2.f32 %v9166_v18  ;;  %vm8820_vm5 = vweird.f32 %v9724_v45 }
 0x9e5   : > { %v8812_v3 = vsel %vm8809_vm3, %v8811_v2, %v8807_v42  ;;  %9727 = vrcp.f32 %v7503_v40  ;;  %v6721_v6 = vpop.f32.mrf.mxu2  ;;  %vm8821_vm7 = vmor %vm8819_vm6, %vm8820_vm5  ;;  %v7122_v49 = vpop.f32.mrf.mxu3  ;;  %v8840_v36 = vand.u32 2147483648, %v7503_v40  ;;  %v8838_v26 = vand.u32 2147483647, %v7503_v40 }
 0x9e6   : > { %9006 = vst.msk [vmem:[%s12845_s14 + $0x2b0] sm:$0xff] %vm8919_vm4, %v8812_v3  ;;  %v8816_v54 = vsub.f32 1.0, %v8815_v53  ;;  %v6722_v27 = vadd.f32 %v6721_v6, %v6311_v39  ;;  %vm8834_vm10 = vweird.f32 %v7503_v40 }
 0x9e7   : > { %v8841_v57 = vor.u32 1.1754944e-38, %v8840_v36  ;;  %vm8839_vm12 = vcmp.eq.f32.partialorder %v8838_v26, 8.507059e+37 }
 0x9e8   : > { %v8817_v41 = vmul.f32 %v9724_v45, %v8816_v54  ;;  %v7119_v56 = vadd.f32 %v7118_v22, %v6722_v27  ;;  %v6328_v47 = vpop.f32.mrf.mxu1 }
 0x9e9   : > { %v6329_v39 = vadd.f32 %v6328_v47, %v5744_v29 }
 0x9ea   : > { %v9726_v0 = vpop.eup %9725  ;;  %v8818_v37 = vadd.f32 %v9724_v45, %v8817_v41  ;;  %v9167_v61 = vmul.f32 -1.442695, %v7119_v56 }
 0x9eb   : > { %v9728_v51 = vpop.eup %9727  ;;  %v7504_v58 = vadd.f32 1.0, %v9726_v0 }
 0x9ec   : > { %v8822_v60 = vsel %vm8821_vm7, %v9724_v45, %v8818_v37  ;;  %v8830_v28 = vmul.f32 %v9728_v51, %v7503_v40  ;;  %9729 = vpow2.f32 %v9167_v61  ;;  %vm8835_vm9 = vweird.f32 %v9728_v51 }
 0x9ed   : > { %v8827_v35 = vsel %vm8824_vm8, %v8826_v34, %v8822_v60  ;;  %9731 = vrcp.f32 %v7504_v58  ;;  %v6725_v62 = vpop.f32.mrf.mxu2  ;;  %vm8836_vm11 = vmor %vm8834_vm10, %vm8835_vm9  ;;  %v7126_v15 = vpop.f32.mrf.mxu3  ;;  %v8855_v11 = vand.u32 2147483648, %v7504_v58  ;;  %v8853_v8 = vand.u32 2147483647, %v7504_v58 }
 0x9ee   : > { %9007 = vst.msk [vmem:[%s12845_s14 + $0x2b8] sm:$0xff] %vm8919_vm4, %v8827_v35  ;;  %v8831_v55 = vsub.f32 1.0, %v8830_v28  ;;  %v6726_v48 = vadd.f32 %v6725_v62, %v6317_v31  ;;  %vm8849_vm14 = vweird.f32 %v7504_v58 }
 0x9ef   : > { %v8856_v2 = vor.u32 1.1754944e-38, %v8855_v11  ;;  %vm8854_vm0 = vcmp.eq.f32.partialorder %v8853_v8, 8.507059e+37 }
 0x9f0   : > { %v8832_v9 = vmul.f32 %v9728_v51, %v8831_v55  ;;  %v7123_v50 = vadd.f32 %v7122_v49, %v6726_v48 }
 0x9f2   : > { %v9730_v5 = vpop.eup %9729  ;;  %v8833_v52 = vadd.f32 %v9728_v51, %v8832_v9  ;;  %v9168_v7 = vmul.f32 -1.442695, %v7123_v50 }
 0x9f3   : > { %v9732_v25 = vpop.eup %9731  ;;  %v7505_v23 = vadd.f32 1.0, %v9730_v5 }
 0x9f4   : > { %v8837_v32 = vsel %vm8836_vm11, %v9728_v51, %v8833_v52  ;;  %v8845_v14 = vmul.f32 %v9732_v25, %v7504_v58  ;;  %9733 = vpow2.f32 %v9168_v7  ;;  %vm8850_vm13 = vweird.f32 %v9732_v25 }
 0x9f5   : > { %v8842_v17 = vsel %vm8839_vm12, %v8841_v57, %v8837_v32  ;;  %9735 = vrcp.f32 %v7505_v23  ;;  %v6729_v30 = vpop.f32.mrf.mxu2  ;;  %vm8851_vm15 = vmor %vm8849_vm14, %vm8850_vm13  ;;  %v8870_v27 = vand.u32 2147483648, %v7505_v23  ;;  %v7130_v33 = vpop.f32.mrf.mxu3  ;;  %v8868_v63 = vand.u32 2147483647, %v7505_v23 }
 0x9f6   : > { %9008 = vst.msk [vmem:[%s12845_s14 + $0x2c0] sm:$0xff] %vm8919_vm4, %v8842_v17  ;;  %v8846_v13 = vsub.f32 1.0, %v8845_v14  ;;  %v6730_v20 = vadd.f32 %v6729_v30, %v6323_v24  ;;  %vm8864_vm2 = vweird.f32 %v7505_v23 }
 0x9f7   : > { %v8871_v37 = vor.u32 1.1754944e-38, %v8870_v27  ;;  %vm8869_vm5 = vcmp.eq.f32.partialorder %v8868_v63, 8.507059e+37 }
 0x9f8   : > { %v8847_v1 = vmul.f32 %v9732_v25, %v8846_v13  ;;  %v7127_v16 = vadd.f32 %v7126_v15, %v6730_v20 }
 0x9fa   : > { %v9734_v22 = vpop.eup %9733  ;;  %v8848_v59 = vadd.f32 %v9732_v25, %v8847_v1  ;;  %v9169_v18 = vmul.f32 -1.442695, %v7127_v16 }
 0x9fb   : > { %v9736_v45 = vpop.eup %9735  ;;  %v7506_v40 = vadd.f32 1.0, %v9734_v22 }
 0x9fc   : > { %v8852_v42 = vsel %vm8851_vm15, %v9732_v25, %v8848_v59  ;;  %v8860_v53 = vmul.f32 %v9736_v45, %v7505_v23  ;;  %9737 = vpow2.f32 %v9169_v18  ;;  %vm8865_vm1 = vweird.f32 %v9736_v45 }
 0x9fd   : > { %v8857_v3 = vsel %vm8854_vm0, %v8856_v2, %v8852_v42  ;;  %9739 = vrcp.f32 %v7506_v40  ;;  %v6733_v6 = vpop.f32.mrf.mxu2  ;;  %vm8866_vm3 = vmor %vm8864_vm2, %vm8865_vm1  ;;  %v8885_v31 = vand.u32 2147483648, %v7506_v40  ;;  %v8883_v28 = vand.u32 2147483647, %v7506_v40 }
 0x9fe   : > { %9009 = vst.msk [vmem:[%s12845_s14 + $0x2c8] sm:$0xff] %vm8919_vm4, %v8857_v3  ;;  %v8861_v4 = vsub.f32 1.0, %v8860_v53  ;;  %v6734_v54 = vadd.f32 %v6733_v6, %v6329_v39  ;;  %vm8879_vm7 = vweird.f32 %v7506_v40 }
 0x9ff   : > { %v8886_v48 = vor.u32 1.1754944e-38, %v8885_v31  ;;  %vm8884_vm9 = vcmp.eq.f32.partialorder %v8883_v28, 8.507059e+37 }
 0xa00   : > { %v8862_v38 = vmul.f32 %v9736_v45, %v8861_v4  ;;  %v7131_v41 = vadd.f32 %v7130_v33, %v6734_v54 }
 0xa02   : > { %v9738_v10 = vpop.eup %9737  ;;  %v8863_v56 = vadd.f32 %v9736_v45, %v8862_v38  ;;  %v9170_v0 = vmul.f32 -1.442695, %v7131_v41 }
 0xa03   : > { %v9740_v12 = vpop.eup %9739  ;;  %v7507_v61 = vadd.f32 1.0, %v9738_v10 }
 0xa04   : > { %v8867_v51 = vsel %vm8866_vm3, %v9736_v45, %v8863_v56  ;;  %v8875_v34 = vmul.f32 %v9740_v12, %v7506_v40  ;;  %9741 = vpow2.f32 %v9170_v0  ;;  %vm8880_vm6 = vweird.f32 %v9740_v12 }
 0xa05   : > { %v8872_v58 = vsel %vm8869_vm5, %v8871_v37, %v8867_v51  ;;  %9743 = vrcp.f32 %v7507_v61  ;;  %vm8881_vm8 = vmor %vm8879_vm7, %vm8880_vm6  ;;  %v8900_v26 = vand.u32 2147483648, %v7507_v61  ;;  %v8898_v5 = vand.u32 2147483647, %v7507_v61 }
 0xa06   : > { %9010 = vst.msk [vmem:[%s12845_s14 + $0x2d0] sm:$0xff] %vm8919_vm4, %v8872_v58  ;;  %v8876_v49 = vsub.f32 1.0, %v8875_v34  ;;  %vm8894_vm11 = vweird.f32 %v7507_v61 }
 0xa07   : > { %v8901_v25 = vor.u32 1.1754944e-38, %v8900_v26  ;;  %vm8899_vm13 = vcmp.eq.f32.partialorder %v8898_v5, 8.507059e+37 }
 0xa08   : > { %v8877_v60 = vmul.f32 %v9740_v12, %v8876_v49 }
 0xa0a   : > { %v9742_v35 = vpop.eup %9741  ;;  %v8878_v62 = vadd.f32 %v9740_v12, %v8877_v60 }
 0xa0b   : > { %v9744_v55 = vpop.eup %9743  ;;  %v7508_v19 = vadd.f32 1.0, %v9742_v35 }
 0xa0c   : > { %v8882_v46 = vsel %vm8881_vm8, %v9740_v12, %v8878_v62  ;;  %v8890_v36 = vmul.f32 %v9744_v55, %v7507_v61  ;;  %vm8895_vm10 = vweird.f32 %v9744_v55 }
 0xa0d   : > { %v8887_v44 = vsel %vm8884_vm9, %v8886_v48, %v8882_v46  ;;  %9745 = vrcp.f32 %v7508_v19  ;;  %vm8896_vm12 = vmor %vm8894_vm11, %vm8895_vm10  ;;  %v8915_v32 = vand.u32 2147483648, %v7508_v19  ;;  %v8913_v17 = vand.u32 2147483647, %v7508_v19 }
 0xa0e   : > { %9011 = vst.msk [vmem:[%s12845_s14 + $0x2d8] sm:$0xff] %vm8919_vm4, %v8887_v44  ;;  %v8891_v9 = vsub.f32 1.0, %v8890_v36  ;;  %vm8909_vm15 = vweird.f32 %v7508_v19 }
 0xa0f   : > { %v8916_v30 = vor.u32 1.1754944e-38, %v8915_v32  ;;  %vm8914_vm1 = vcmp.eq.f32.partialorder %v8913_v17, 8.507059e+37 }
 0xa10   : > { %v8892_v50 = vmul.f32 %v9744_v55, %v8891_v9 }
 0xa12   : > { %v8893_v52 = vadd.f32 %v9744_v55, %v8892_v50 }
 0xa13   : > { %v9746_v7 = vpop.eup %9745 }
 0xa14   : > { %v8897_v57 = vsel %vm8896_vm12, %v9744_v55, %v8893_v52  ;;  %v8905_v23 = vmul.f32 %v9746_v7, %v7508_v19  ;;  %vm8910_vm14 = vweird.f32 %v9746_v7 }
 0xa15   : > { %v8902_v24 = vsel %vm8899_vm13, %v8901_v25, %v8897_v57  ;;  %vm8911_vm0 = vmor %vm8909_vm15, %vm8910_vm14 }
 0xa16   : > { %9012 = vst.msk [vmem:[%s12845_s14 + $0x2e0] sm:$0xff] %vm8919_vm4, %v8902_v24  ;;  %v8906_v43 = vsub.f32 1.0, %v8905_v23 }
 0xa18   : > { %v8907_v14 = vmul.f32 %v9746_v7, %v8906_v43 }
 0xa1a   : > { %v8908_v15 = vadd.f32 %v9746_v7, %v8907_v14 }
 0xa1c   : > { %v8912_v13 = vsel %vm8911_vm0, %v9746_v7, %v8908_v15 }
 0xa1d   : > { %v8917_v20 = vsel %vm8914_vm1, %v8916_v30, %v8912_v13 }
 0xa1e   : > { %9013 = vst.msk [vmem:[%s12845_s14 + $0x2e8] sm:$0xff] %vm8919_vm4, %v8917_v20 }
 0xa1f PF: > { %s15_s18 = sadd.s32 1, %s9760_s18  }
 0xa20   : > { %p12_p4 = scmp.ge.s32.totalorder %s15_s18, 4  }
 0xa22   :  { %14 = sbr.rel (!%p12_p4) target bundleno = 1 (0x1), region = 70 }

</bundles_post_ra>
